<compile_context>
chip_gen: v7x
topology: tpu7x:2x2x1
jax: 0.10.0
libtpu: 0.0.40
codegen_flags: <defaults>
</compile_context>

<pallas_src>
import functools
import math

import jax
import jax.numpy as jnp
import numpy as np
from jax.experimental import pallas as pl
from jax.experimental.pallas import tpu as pltpu

HIDDEN = 512
OUT = 6
FEAT = 4096           # per-backbone feature width
BATCH, SEQ = 4, 15    # hard-coded by desc.forward: view(4, 15, 8192)


def fc2_head_kernel(th_ref, rgb_ref, w1_ref, b1_ref, w2_ref, b2_ref, m_ref, o_ref):
    """Fully fused head, single invocation.

    [thermal | rgb] @ W1 + b1 -> ReLU -> @ W2 + b2 -> sigmoid -> per-group mean.

    The torch.cat(dim=1) is never materialized: the 8192-wide reduction is done
    as two 4096-wide partial matmuls against static halves of the resident W1
    block, accumulated in f32 on the MXU.
    """
    acc = jnp.dot(th_ref[...], w1_ref[0:FEAT, :],
                  preferred_element_type=jnp.float32)
    acc = acc + jnp.dot(rgb_ref[...], w1_ref[FEAT:2 * FEAT, :],
                        preferred_element_type=jnp.float32)
    # ReLU; Dropout(p=0.5) is identity in eval mode.
    h = jnp.maximum(acc + b1_ref[...], 0.0)
    # Linear(512 -> 6) + Sigmoid.
    y = jnp.dot(h, w2_ref[...], preferred_element_type=jnp.float32) + b2_ref[...]
    y = jax.nn.sigmoid(y)
    # torch.mean(img, 1) over the seq axis as a tiny (B, B*seq) @ (B*seq, 6) matmul;
    # m_ref rows hold 1/seq in their group's columns.  Then flatten -> (B, 6).
    o_ref[...] = jnp.dot(m_ref[...], y, preferred_element_type=jnp.float32)


@functools.lru_cache(maxsize=None)
def _mean_matrix(batch, seq):
    # Row b has 1/seq in columns [b*seq, (b+1)*seq).  Built host-side once.
    m = np.repeat(np.eye(batch, dtype=np.float32), seq, axis=1) / float(seq)
    return jnp.asarray(m)


def desc_head(thermal_features, rgb_features, w1, b1, w2, b2, *, seq=SEQ):
    """thermal/rgb: (B*seq, 4096).  w1: (8192, 512).  Returns (B, 6) f32."""
    n, feat = thermal_features.shape
    assert rgb_features.shape == (n, feat)
    assert w1.shape == (2 * feat, HIDDEN)
    assert n % seq == 0
    batch = n // seq

    # Big streams in bf16 (no-op casts if the caller already passes bf16,
    # which the backbones should guarantee).
    thermal_features = thermal_features.astype(jnp.bfloat16)
    rgb_features = rgb_features.astype(jnp.bfloat16)
    w1 = w1.astype(jnp.bfloat16)

    mean_mat = _mean_matrix(batch, seq)

    return pl.pallas_call(
        fc2_head_kernel,
        out_shape=jax.ShapeDtypeStruct((batch, OUT), jnp.float32),
        grid_spec=pltpu.PrefetchScalarGridSpec(
            num_scalar_prefetch=0,
            grid=(1,),  # single invocation: nothing left worth pipelining
            in_specs=[
                pl.BlockSpec((n, feat), lambda i: (0, 0)),            # thermal
                pl.BlockSpec((n, feat), lambda i: (0, 0)),            # rgb
                pl.BlockSpec((2 * feat, HIDDEN), lambda i: (0, 0)),   # W1 (full, 8 MiB bf16)
                pl.BlockSpec((1, HIDDEN), lambda i: (0, 0)),          # b1
                pl.BlockSpec((HIDDEN, OUT), lambda i: (0, 0)),        # W2
                pl.BlockSpec((1, OUT), lambda i: (0, 0)),             # b2
                pl.BlockSpec((batch, n), lambda i: (0, 0)),           # mean matrix
            ],
            out_specs=pl.BlockSpec((batch, OUT), lambda i: (0, 0)),
        ),
        compiler_params=pltpu.CompilerParams(
            dimension_semantics=("arbitrary",),
            vmem_limit_bytes=32 * 1024 * 1024,  # ~19 MiB live incl. default double buffers
        ),
    )(thermal_features, rgb_features, w1, b1, w2, b2, mean_mat)


def init_fc2_params(key):
    """Deterministic init matching init_weights(): xavier_normal_(gain=relu), bias=0.

    W1 is returned in bf16 (it is the dominant HBM stream of the kernel); the tiny
    b1 / W2 / b2 stay in f32.
    """
    k1, k2 = jax.random.split(key)
    gain = math.sqrt(2.0)  # calculate_gain('relu')
    # Linear(8192 -> 512): xavier std = gain * sqrt(2 / (fan_in + fan_out))
    std1 = gain * math.sqrt(2.0 / (2 * FEAT + HIDDEN))
    w1 = (std1 * jax.random.normal(k1, (2 * FEAT, HIDDEN), jnp.float32)).astype(jnp.bfloat16)
    b1 = jnp.zeros((1, HIDDEN), jnp.float32)
    # Linear(512 -> 6)
    std2 = gain * math.sqrt(2.0 / (HIDDEN + OUT))
    w2 = std2 * jax.random.normal(k2, (HIDDEN, OUT), jnp.float32)
    b2 = jnp.zeros((1, OUT), jnp.float32)
    return w1, b1, w2, b2


if __name__ == "__main__":
    key = jax.random.PRNGKey(0)
    k_therm, k_rgb, k_params = jax.random.split(key, 3)

    # Shapes implied by forward(): each backbone yields (4*15, 4096) features,
    # concatenated to (60, 8192) and viewed as (4, 15, 8192).
    N = BATCH * SEQ  # 60

    thermal_features = jax.random.normal(k_therm, (N, FEAT), jnp.float32).astype(jnp.bfloat16)
    rgb_features = jax.random.normal(k_rgb, (N, FEAT), jnp.float32).astype(jnp.bfloat16)

    w1, b1, w2, b2 = init_fc2_params(k_params)

    head = jax.jit(functools.partial(desc_head, seq=SEQ))
    out = head(thermal_features, rgb_features, w1, b1, w2, b2)
    out = jax.block_until_ready(out)
    assert out.shape == (BATCH, OUT)

    # Pure-JAX reference (same bf16-quantized values, f32 math) for sanity.
    th_f32 = thermal_features.astype(jnp.float32)
    rgb_f32 = rgb_features.astype(jnp.float32)
    w1_f32 = w1.astype(jnp.float32)
    combined = jnp.concatenate([th_f32, rgb_f32], axis=1)          # torch.cat(dim=1)
    lstm_input = combined.reshape(BATCH, SEQ, 2 * FEAT)            # view(4, 15, 8192)
    h = jnp.maximum(
        jnp.einsum("bsf,fh->bsh", lstm_input, w1_f32, precision="highest") + b1[0], 0.0
    )
    y = jax.nn.sigmoid(
        jnp.einsum("bsh,ho->bso", h, w2, precision="highest") + b2[0]
    )
    ref = jnp.mean(y, axis=1)  # torch.mean(img, 1, True) then flatten(start_dim=1)
    assert jnp.allclose(out, ref, atol=2e-3), float(jnp.max(jnp.abs(out - ref)))

    print("KERNEL_OK")
</pallas_src>

<mosaic_0001>
module attributes {stable_mosaic.version = 11 : i64} {
  func.func @fc2_head_kernel(%arg0: i32, %arg1: memref<60x4096xbf16, #tpu.memory_space<vmem>>, %arg2: memref<60x4096xbf16, #tpu.memory_space<vmem>>, %arg3: memref<8192x512xbf16, #tpu.memory_space<vmem>>, %arg4: memref<1x512xf32, #tpu.memory_space<vmem>>, %arg5: memref<512x6xf32, #tpu.memory_space<vmem>>, %arg6: memref<1x6xf32, #tpu.memory_space<vmem>>, %arg7: memref<4x60xf32, #tpu.memory_space<vmem>>, %arg8: memref<4x6xf32, #tpu.memory_space<vmem>>) attributes {dimension_semantics = [#tpu.dimension_semantics<arbitrary>], iteration_bounds = array<i64: 1>, scalar_prefetch = 0 : i64, scratch_operands = 0 : i64, tpu.core_type = #tpu.core_type<tc>, window_params = [{pipeline_mode = #tpu.pipeline_mode<synchronous>, transform_indices = @transform_0, window_bounds = array<i64: 60, 4096>}, {pipeline_mode = #tpu.pipeline_mode<synchronous>, transform_indices = @transform_1, window_bounds = array<i64: 60, 4096>}, {pipeline_mode = #tpu.pipeline_mode<synchronous>, transform_indices = @transform_2, window_bounds = array<i64: 8192, 512>}, {pipeline_mode = #tpu.pipeline_mode<synchronous>, transform_indices = @transform_3, window_bounds = array<i64: 1, 512>}, {pipeline_mode = #tpu.pipeline_mode<synchronous>, transform_indices = @transform_4, window_bounds = array<i64: 512, 6>}, {pipeline_mode = #tpu.pipeline_mode<synchronous>, transform_indices = @transform_5, window_bounds = array<i64: 1, 6>}, {pipeline_mode = #tpu.pipeline_mode<synchronous>, transform_indices = @transform_6, window_bounds = array<i64: 4, 60>}, {pipeline_mode = #tpu.pipeline_mode<synchronous>, transform_indices = @transform_7, window_bounds = array<i64: 4, 6>}]} {
    %c0 = arith.constant 0 : index
    %c0_0 = arith.constant 0 : index
    %0 = vector.load %arg1[%c0, %c0_0] : memref<60x4096xbf16, #tpu.memory_space<vmem>>, vector<60x4096xbf16>
    %c0_1 = arith.constant 0 : index
    %c0_2 = arith.constant 0 : index
    %1 = vector.load %arg3[%c0_1, %c0_2] : memref<8192x512xbf16, #tpu.memory_space<vmem>>, vector<4096x512xbf16>
    %cst = arith.constant dense<0.000000e+00> : vector<60x512xf32>
    %2 = tpu.matmul %0, %1, %cst {dimension_numbers = #tpu.dot_dimension_numbers<[1], [0], [0], [1], [0, 0, 1, 1], [], []>} : vector<60x4096xbf16>, vector<4096x512xbf16>, vector<60x512xf32> -> vector<60x512xf32>
    %c0_3 = arith.constant 0 : index
    %c0_4 = arith.constant 0 : index
    %3 = vector.load %arg2[%c0_3, %c0_4] : memref<60x4096xbf16, #tpu.memory_space<vmem>>, vector<60x4096xbf16>
    %c4096 = arith.constant 4096 : index
    %c0_5 = arith.constant 0 : index
    %4 = vector.load %arg3[%c4096, %c0_5] : memref<8192x512xbf16, #tpu.memory_space<vmem>>, vector<4096x512xbf16>
    %cst_6 = arith.constant dense<0.000000e+00> : vector<60x512xf32>
    %5 = tpu.matmul %3, %4, %cst_6 {dimension_numbers = #tpu.dot_dimension_numbers<[1], [0], [0], [1], [0, 0, 1, 1], [], []>} : vector<60x4096xbf16>, vector<4096x512xbf16>, vector<60x512xf32> -> vector<60x512xf32>
    %6 = arith.addf %2, %5 : vector<60x512xf32>
    %c0_7 = arith.constant 0 : index
    %c0_8 = arith.constant 0 : index
    %7 = vector.load %arg4[%c0_7, %c0_8] : memref<1x512xf32, #tpu.memory_space<vmem>>, vector<1x512xf32>
    %8 = vector.broadcast %7 : vector<1x512xf32> to vector<60x512xf32>
    %9 = arith.addf %6, %8 : vector<60x512xf32>
    %cst_9 = arith.constant 0.000000e+00 : f32
    %10 = vector.broadcast %cst_9 : f32 to vector<60x512xf32>
    %11 = arith.maximumf %9, %10 : vector<60x512xf32>
    %c0_10 = arith.constant 0 : index
    %c0_11 = arith.constant 0 : index
    %12 = vector.load %arg5[%c0_10, %c0_11] : memref<512x6xf32, #tpu.memory_space<vmem>>, vector<512x6xf32>
    %cst_12 = arith.constant dense<0.000000e+00> : vector<60x6xf32>
    %13 = tpu.matmul %11, %12, %cst_12 {dimension_numbers = #tpu.dot_dimension_numbers<[1], [0], [0], [1], [0, 0, 1, 1], [], []>} : vector<60x512xf32>, vector<512x6xf32>, vector<60x6xf32> -> vector<60x6xf32>
    %c0_13 = arith.constant 0 : index
    %c0_14 = arith.constant 0 : index
    %14 = vector.load %arg6[%c0_13, %c0_14] : memref<1x6xf32, #tpu.memory_space<vmem>>, vector<1x6xf32>
    %15 = vector.broadcast %14 : vector<1x6xf32> to vector<60x6xf32>
    %16 = arith.addf %13, %15 : vector<60x6xf32>
    %17 = arith.negf %16 : vector<60x6xf32>
    %18 = math.exp %17 : vector<60x6xf32>
    %cst_15 = arith.constant 1.000000e+00 : f32
    %19 = vector.broadcast %cst_15 : f32 to vector<60x6xf32>
    %20 = arith.addf %19, %18 : vector<60x6xf32>
    %21 = arith.divf %19, %20 : vector<60x6xf32>
    %c0_16 = arith.constant 0 : index
    %c0_17 = arith.constant 0 : index
    %22 = vector.load %arg7[%c0_16, %c0_17] : memref<4x60xf32, #tpu.memory_space<vmem>>, vector<4x60xf32>
    %cst_18 = arith.constant dense<0.000000e+00> : vector<4x6xf32>
    %23 = tpu.matmul %22, %21, %cst_18 {dimension_numbers = #tpu.dot_dimension_numbers<[1], [0], [0], [1], [0, 0, 1, 1], [], []>} : vector<4x60xf32>, vector<60x6xf32>, vector<4x6xf32> -> vector<4x6xf32>
    %c0_19 = arith.constant 0 : index
    %c0_20 = arith.constant 0 : index
    %24 = vector.load %arg8[%c0_19, %c0_20] : memref<4x6xf32, #tpu.memory_space<vmem>>, vector<4x6xf32>
    tpu.vector_store %arg8[%c0_19, %c0_20], %23 {strides = array<i32>} : memref<4x6xf32, #tpu.memory_space<vmem>>, vector<4x6xf32>,
    return
  }
  func.func @transform_0(%arg0: i32) -> (i32, i32) {
    %c0_i32 = arith.constant 0 : i32
    %c0_i32_0 = arith.constant 0 : i32
    %c0_i32_1 = arith.constant 0 : i32
    return %c0_i32, %c0_i32_0 : i32, i32
  }
  func.func @transform_1(%arg0: i32) -> (i32, i32) {
    %c0_i32 = arith.constant 0 : i32
    %c0_i32_0 = arith.constant 0 : i32
    %c0_i32_1 = arith.constant 0 : i32
    return %c0_i32, %c0_i32_0 : i32, i32
  }
  func.func @transform_2(%arg0: i32) -> (i32, i32) {
    %c0_i32 = arith.constant 0 : i32
    %c0_i32_0 = arith.constant 0 : i32
    %c0_i32_1 = arith.constant 0 : i32
    return %c0_i32, %c0_i32_0 : i32, i32
  }
  func.func @transform_3(%arg0: i32) -> (i32, i32) {
    %c0_i32 = arith.constant 0 : i32
    %c0_i32_0 = arith.constant 0 : i32
    %c0_i32_1 = arith.constant 0 : i32
    return %c0_i32, %c0_i32_0 : i32, i32
  }
  func.func @transform_4(%arg0: i32) -> (i32, i32) {
    %c0_i32 = arith.constant 0 : i32
    %c0_i32_0 = arith.constant 0 : i32
    %c0_i32_1 = arith.constant 0 : i32
    return %c0_i32, %c0_i32_0 : i32, i32
  }
  func.func @transform_5(%arg0: i32) -> (i32, i32) {
    %c0_i32 = arith.constant 0 : i32
    %c0_i32_0 = arith.constant 0 : i32
    %c0_i32_1 = arith.constant 0 : i32
    return %c0_i32, %c0_i32_0 : i32, i32
  }
  func.func @transform_6(%arg0: i32) -> (i32, i32) {
    %c0_i32 = arith.constant 0 : i32
    %c0_i32_0 = arith.constant 0 : i32
    %c0_i32_1 = arith.constant 0 : i32
    return %c0_i32, %c0_i32_0 : i32, i32
  }
  func.func @transform_7(%arg0: i32) -> (i32, i32) {
    %c0_i32 = arith.constant 0 : i32
    %c0_i32_0 = arith.constant 0 : i32
    %c0_i32_1 = arith.constant 0 : i32
    return %c0_i32, %c0_i32_0 : i32, i32
  }
}

</mosaic_0001>

<bundles_post_ra>
// kernel: desc_head.1
= control target key start
LH: loop header
LB: loop body
LE: loop exit
PB: predicated region body
PF: predicated region fallthrough
CT: control target
= control target key end

     0   :  { %12 = vsyncpa [#allocation3], 0  ;;  %s26566_s0 = inlined_call_operand.hbm [shape: bf16[60,4096], index: 0, kind: input, shape index: {}]   ;;  %s26567_s1 = inlined_call_operand.hbm [shape: bf16[60,4096], index: 1, kind: input, shape index: {}]   ;;  %s26568_s2 = inlined_call_operand.hbm [shape: bf16[8192,512], index: 2, kind: input, shape index: {}]   ;;  %s26569_s3 = inlined_call_operand.hbm [shape: f32[1,512], index: 3, kind: input, shape index: {}]   ;;  %s26570_s4 = inlined_call_operand.vmem [shape: f32[512,6], index: 4, kind: input, shape index: {}]   ;;  %s26571_s5 = inlined_call_operand.hbm [shape: f32[1,6], index: 5, kind: input, shape index: {}]   ;;  %s26572_s6 = inlined_call_operand.hbm [shape: f32[4,60], index: 6, kind: input, shape index: {}]   ;;  %s26573_s7 = inlined_call_operand.hbm [shape: f32[4,6], index: 7, kind: output, shape index: {}]  }
   0x1   :  { %13 = vsyncpa [#allocation6], 0 }
   0x2   :  { %14 = vsyncpa [#allocation9], 0 }
   0x3   :  { %15 = vsyncpa [#allocation12], 0 }
   0x4   :  { %16 = vsyncpa [#allocation4], 0  ;;  %s25920_s24 = smov [#allocation5]   ;;  %s25921_s26 = smov [#allocation8]  }
   0x5   :  { %s34_s25 = sshll.u32 %s25920_s24, 4  ;;  %s59_s27 = sshll.u32 %s25921_s26, 4  ;;  %s35_s25 = int_to_ptr.vmem [resolvable:$true] %s34_s25  ;;  %s60_s27 = int_to_ptr.vmem [resolvable:$true] %s59_s27 }
   0x6   :  { %s25756_s30 = scalar_lea.hbm %s26567_s1, 16384 }
   0x7   :  { %p25757_p0 = scmp.ne.s32.totalorder %s26567_s1, %s25756_s30  ;;  %p25760_p1 = scmp.lt.u32.totalorder %s25756_s30, %s26567_s1 }
   0x9   :  { %p25762_p2 = pnand %p25760_p1, %p25757_p0 }
   0xb   :  { %25765 = shalt.err (!%p25762_p2)
}
   0xc   :  { %s25766_s12 = scalar_lea.vmem %s35_s25, 16384  ;;  %p25771_p4 = scmp.lt.s32.totalorder %s35_s25, %s35_s25 }
   0xd   :  { %p25767_p3 = scmp.ne.s32.totalorder %s35_s25, %s25766_s12  ;;  %p25772_p5 = scmp.lt.s32.totalorder %s25766_s12, %s25766_s12 }
   0xf   :  { %p25773_p6 = por %p25772_p5, %p25771_p4 }
  0x11   :  { %p25774_p7 = pnand %p25773_p6, %p25767_p3 }
  0x13   :  { %25777 = shalt.err (!%p25774_p7)
}
  0x14   :  { %s25922_s13 = smov 2048   ;;  %s25923_s14 = smov 128  }
  0x15   :  { %40 = dma.hbm_to_vmem [thread:$0]  %s26567_s1, 16384, %s35_s25, [#allocation6], %s25922_s13, %s25922_s13, %s25923_s14  }
  0x16   :  { %s25778_s19 = scalar_lea.hbm %s26569_s3, 64 }
  0x17   :  { %p25779_p8 = scmp.ne.s32.totalorder %s26569_s3, %s25778_s19  ;;  %p25782_p9 = scmp.lt.u32.totalorder %s25778_s19, %s26569_s3 }
  0x19   :  { %p25784_p10 = pnand %p25782_p9, %p25779_p8 }
  0x1b   :  { %25787 = shalt.err (!%p25784_p10)
}
  0x1c   :  { %s25788_s24 = scalar_lea.vmem %s60_s27, 64  ;;  %p25793_p12 = scmp.lt.s32.totalorder %s60_s27, %s60_s27 }
  0x1d   :  { %p25789_p11 = scmp.ne.s32.totalorder %s60_s27, %s25788_s24  ;;  %p25794_p13 = scmp.lt.s32.totalorder %s25788_s24, %s25788_s24 }
  0x1f   :  { %p25795_p0 = por %p25794_p13, %p25793_p12 }
  0x21   :  { %p25796_p1 = pnand %p25795_p0, %p25789_p11 }
  0x23   :  { %25799 = shalt.err (!%p25796_p1)
}
  0x24   :  { %62 = dma.hbm_to_vmem [thread:$0]  %s26569_s3, 64, %s60_s27, [#allocation9]  }
  0x25   :  { %s25924_s26 = smov [#allocation2]   ;;  %s25925_s29 = smov [#allocation7]  }
  0x26   :  { %s22_s28 = sshll.u32 %s25924_s26, 4  ;;  %s46_s30 = sshll.u32 %s25925_s29, 4  ;;  %s23_s28 = int_to_ptr.vmem [resolvable:$true] %s22_s28  ;;  %s26002_s30 = int_to_ptr.vmem [resolvable:$true] %s46_s30 }
  0x27   :  { %s25800_s10 = scalar_lea.hbm %s26566_s0, 16384 }
  0x28   :  { %p25801_p2 = scmp.ne.s32.totalorder %s26566_s0, %s25800_s10  ;;  %p25804_p3 = scmp.lt.u32.totalorder %s25800_s10, %s26566_s0 }
  0x2a   :  { %p25806_p4 = pnand %p25804_p3, %p25801_p2 }
  0x2c   :  { %25809 = shalt.err (!%p25806_p4)
}
  0x2d   :  { %s25810_s3 = scalar_lea.vmem %s23_s28, 16384  ;;  %p25815_p6 = scmp.lt.s32.totalorder %s23_s28, %s23_s28 }
  0x2e   :  { %p25811_p5 = scmp.ne.s32.totalorder %s23_s28, %s25810_s3  ;;  %p25816_p7 = scmp.lt.s32.totalorder %s25810_s3, %s25810_s3 }
  0x30   :  { %p25817_p8 = por %p25816_p7, %p25815_p6 }
  0x32   :  { %p25818_p9 = pnand %p25817_p8, %p25811_p5 }
  0x34   :  { %25821 = shalt.err (!%p25818_p9)
}
  0x35   :  { %28 = dma.hbm_to_vmem [thread:$0]  %s26566_s0, 16384, %s23_s28, [#allocation3], %s25922_s13, %s25922_s13, %s25923_s14  }
  0x36   :  { %s25822_s20 = scalar_lea.hbm %s26568_s2, 262144 }
  0x37   :  { %p25823_p10 = scmp.ne.s32.totalorder %s26568_s2, %s25822_s20  ;;  %p25826_p11 = scmp.lt.u32.totalorder %s25822_s20, %s26568_s2 }
  0x39   :  { %p25828_p12 = pnand %p25826_p11, %p25823_p10 }
  0x3b   :  { %25831 = shalt.err (!%p25828_p12)
}
  0x3c   :  { %s25832_s1 = scalar_lea.vmem %s26002_s30, 262144  ;;  %p25837_p0 = scmp.lt.s32.totalorder %s26002_s30, %s26002_s30 }
  0x3d   :  { %p25833_p13 = scmp.ne.s32.totalorder %s26002_s30, %s25832_s1  ;;  %p25838_p1 = scmp.lt.s32.totalorder %s25832_s1, %s25832_s1 }
  0x3f   :  { %p25839_p2 = por %p25838_p1, %p25837_p0 }
  0x41   :  { %p25840_p3 = pnand %p25839_p2, %p25833_p13 }
  0x43   :  { %25843 = shalt.err (!%p25840_p3)
}
  0x44   :  { %s25926_s0 = smov 256   ;;  %s25927_s13 = smov 16  }
  0x45   :  { %52 = dma.hbm_to_vmem [thread:$0]  %s26568_s2, 262144, %s26002_s30, [#allocation6], %s25926_s0, %s25926_s0, %s25927_s13  }
  0x46   :  { %s25928_s26 = smov [#allocation10]   ;;  %s25929_s29 = smov [#allocation11]  }
  0x47   :  { %s71_s28 = sshll.u32 %s25928_s26, 4  ;;  %s81_s8 = sshll.u32 %s25929_s29, 4  ;;  %s72_s28 = int_to_ptr.vmem [resolvable:$true] %s71_s28  ;;  %s82_s8 = int_to_ptr.vmem [resolvable:$true] %s81_s8 }
  0x48   :  { %s25844_s11 = scalar_lea.hbm %s26571_s5, 16 }
  0x49   :  { %p25845_p4 = scmp.ne.s32.totalorder %s26571_s5, %s25844_s11  ;;  %p25848_p5 = scmp.lt.u32.totalorder %s25844_s11, %s26571_s5 }
  0x4b   :  { %p25850_p6 = pnand %p25848_p5, %p25845_p4 }
  0x4d   :  { %25853 = shalt.err (!%p25850_p6)
}
  0x4e   :  { %s25854_s2 = scalar_lea.vmem %s72_s28, 16  ;;  %s25858_s30 = scalar_lea.vmem %s72_s28, 32 }
  0x4f   :  { %p25855_p7 = scmp.ne.s32.totalorder %s72_s28, %s25854_s2  ;;  %p25859_p8 = scmp.lt.s32.totalorder %s72_s28, %s72_s28 }
  0x50   :  { %p25860_p9 = scmp.lt.s32.totalorder %s25858_s30, %s25854_s2 }
  0x52   :  { %p25861_p10 = por %p25860_p9, %p25859_p8 }
  0x54   :  { %p25862_p11 = pnand %p25861_p10, %p25855_p7 }
  0x56   :  { %25865 = shalt.err (!%p25862_p11)
}
  0x57   :  { %74 = dma.hbm_to_vmem [thread:$0]  %s26571_s5, 16, %s72_s28, [#allocation9]  }
  0x58   :  { %s25866_s20 = scalar_lea.hbm %s26572_s6, 64 }
  0x59   :  { %p25867_p12 = scmp.ne.s32.totalorder %s26572_s6, %s25866_s20  ;;  %p25870_p13 = scmp.lt.u32.totalorder %s25866_s20, %s26572_s6 }
  0x5b   :  { %p25872_p0 = pnand %p25870_p13, %p25867_p12 }
  0x5d   :  { %25875 = shalt.err (!%p25872_p0)
}
  0x5e   :  { %s25876_s1 = scalar_lea.vmem %s82_s8, 64  ;;  %p25881_p2 = scmp.lt.s32.totalorder %s82_s8, %s82_s8 }
  0x5f   :  { %p25877_p1 = scmp.ne.s32.totalorder %s82_s8, %s25876_s1  ;;  %p25882_p3 = scmp.lt.s32.totalorder %s25876_s1, %s25876_s1 }
  0x61   :  { %p25883_p4 = por %p25882_p3, %p25881_p2 }
  0x63   :  { %p25884_p5 = pnand %p25883_p4, %p25877_p1 }
  0x65   :  { %25887 = shalt.err (!%p25884_p5)
}
  0x66   :  { %84 = dma.hbm_to_vmem [thread:$0]  %s26572_s6, 64, %s82_s8, [#allocation12]  }
  0x67   :  { %25910 = dma.done.wait [#allocation3], 16384  }
  0x68   :  { %25911 = vsyncadd [#allocation3], 4294950912 }
  0x69   :  { %25912 = dma.done.wait [#allocation6], 278528  }
  0x6a   :  { %25913 = vsyncadd [#allocation6], 4294688768 }
  0x6b   :  { %25914 = dma.done.wait [#allocation9], 80  }
  0x6c   :  { %25915 = vsyncadd [#allocation9], 4294967216 }
  0x6d   :  { %25916 = dma.done.wait [#allocation12], 64  }
  0x6e   :  { %25917 = vsyncadd [#allocation12], 4294967232  ;;  %v22652_v0 = vld [vmem:[#allocation7 + $0x2004] ss:$16 sps:$4 sm:$0xff]   ;;  %v22654_v1 = vld [vmem:[#allocation7 + $0x200c] ss:$16 sps:$4 sm:$0xff]  }
  0x6f   :  { %8167 = vmatprep.subr.bf16.mxu0 %v22652_v0  ;;  %v22656_v2 = vld [vmem:[#allocation7 + $0x2000] ss:$16 sps:$4 sm:$0xff]   ;;  %v22657_v3 = vld [vmem:[#allocation7 + $0x2008] ss:$16 sps:$4 sm:$0xff]   ;;  %9335 = vmatprep.subr.bf16.mxu1 %v22654_v1  ;;  %v22658_v4 = vld [vmem:[#allocation7 + $0x2024] ss:$16 sps:$4 sm:$0xff]  }
  0x70   :  { %8168 = vmatpush1.bf16.msra.mxu0 %v22656_v2  ;;  %9336 = vmatpush1.bf16.msra.mxu1 %v22657_v3  ;;  %v22660_v5 = vld [vmem:[#allocation7 + $0x202c] ss:$16 sps:$4 sm:$0xff]   ;;  %v22662_v6 = vld [vmem:[#allocation7 + $0x2020] ss:$16 sps:$4 sm:$0xff]   ;;  %v22663_v7 = vld [vmem:[#allocation7 + $0x2028] ss:$16 sps:$4 sm:$0xff]  }
  0x71   :  { %8169 = vmatprep.subr.bf16.mxu0 %v22658_v4  ;;  %9337 = vmatprep.subr.bf16.mxu1 %v22660_v5  ;;  %v22664_v8 = vld [vmem:[#allocation7 + $0x2044] ss:$16 sps:$4 sm:$0xff]   ;;  %v22666_v9 = vld [vmem:[#allocation7 + $0x204c] ss:$16 sps:$4 sm:$0xff]   ;;  %v22668_v10 = vld [vmem:[#allocation7 + $0x2040] ss:$16 sps:$4 sm:$0xff]  }
  0x72   :  { %v22669_v11 = vld [vmem:[#allocation7 + $0x2048] ss:$16 sps:$4 sm:$0xff]   ;;  %v22670_v12 = vld [vmem:[#allocation7 + $0x2064] ss:$16 sps:$4 sm:$0xff]   ;;  %v22672_v13 = vld [vmem:[#allocation7 + $0x206c] ss:$16 sps:$4 sm:$0xff]  }
  0x73   :  { %v22674_v14 = vld [vmem:[#allocation7 + $0x2060] ss:$16 sps:$4 sm:$0xff]   ;;  %v22675_v15 = vld [vmem:[#allocation7 + $0x2068] ss:$16 sps:$4 sm:$0xff]   ;;  %v22676_v16 = vld [vmem:[#allocation7 + $0x2084] ss:$16 sps:$4 sm:$0xff]  }
  0x74   :  { %8170 = vmatpush1.bf16.msra.mxu0 %v22662_v6  ;;  %9338 = vmatpush1.bf16.msra.mxu1 %v22663_v7  ;;  %v22678_v17 = vld [vmem:[#allocation7 + $0x208c] ss:$16 sps:$4 sm:$0xff]   ;;  %v22680_v18 = vld [vmem:[#allocation7 + $0x2080] ss:$16 sps:$4 sm:$0xff]   ;;  %v22681_v19 = vld [vmem:[#allocation7 + $0x2088] ss:$16 sps:$4 sm:$0xff]  }
  0x75   :  { %8171 = vmatprep.subr.bf16.mxu0 %v22664_v8  ;;  %9339 = vmatprep.subr.bf16.mxu1 %v22666_v9  ;;  %v22682_v20 = vld [vmem:[#allocation7 + $0x20a4] ss:$16 sps:$4 sm:$0xff]   ;;  %v22684_v21 = vld [vmem:[#allocation7 + $0x20ac] ss:$16 sps:$4 sm:$0xff]   ;;  %v22686_v22 = vld [vmem:[#allocation7 + $0x20a0] ss:$16 sps:$4 sm:$0xff]  }
  0x76   :  { %v22687_v23 = vld [vmem:[#allocation7 + $0x20a8] ss:$16 sps:$4 sm:$0xff]   ;;  %v22688_v24 = vld [vmem:[#allocation7 + $0x20c4] ss:$16 sps:$4 sm:$0xff]   ;;  %v22690_v25 = vld [vmem:[#allocation7 + $0x20cc] ss:$16 sps:$4 sm:$0xff]  }
  0x77   :  { %v22692_v26 = vld [vmem:[#allocation7 + $0x20c0] ss:$16 sps:$4 sm:$0xff]   ;;  %v22693_v27 = vld [vmem:[#allocation7 + $0x20c8] ss:$16 sps:$4 sm:$0xff]   ;;  %v22694_v28 = vld [vmem:[#allocation7 + $0x20e4] ss:$16 sps:$4 sm:$0xff]  }
  0x78   :  { %8172 = vmatpush1.bf16.msra.mxu0 %v22668_v10  ;;  %9340 = vmatpush1.bf16.msra.mxu1 %v22669_v11  ;;  %v22696_v29 = vld [vmem:[#allocation7 + $0x20ec] ss:$16 sps:$4 sm:$0xff]   ;;  %v22698_v30 = vld [vmem:[#allocation7 + $0x20e0] ss:$16 sps:$4 sm:$0xff]   ;;  %v22699_v31 = vld [vmem:[#allocation7 + $0x20e8] ss:$16 sps:$4 sm:$0xff]  }
  0x79   :  { %8173 = vmatprep.subr.bf16.mxu0 %v22670_v12  ;;  %9341 = vmatprep.subr.bf16.mxu1 %v22672_v13  ;;  %v22700_v32 = vld [vmem:[#allocation7 + $0x2104] ss:$16 sps:$4 sm:$0xff]   ;;  %v22702_v33 = vld [vmem:[#allocation7 + $0x210c] ss:$16 sps:$4 sm:$0xff]   ;;  %v22704_v34 = vld [vmem:[#allocation7 + $0x2100] ss:$16 sps:$4 sm:$0xff]  }
  0x7a   :  { %v22705_v35 = vld [vmem:[#allocation7 + $0x2108] ss:$16 sps:$4 sm:$0xff]   ;;  %v22706_v36 = vld [vmem:[#allocation7 + $0x2124] ss:$16 sps:$4 sm:$0xff]   ;;  %v22708_v37 = vld [vmem:[#allocation7 + $0x212c] ss:$16 sps:$4 sm:$0xff]  }
  0x7b   :  { %v22710_v38 = vld [vmem:[#allocation7 + $0x2120] ss:$16 sps:$4 sm:$0xff]   ;;  %v22711_v39 = vld [vmem:[#allocation7 + $0x2128] ss:$16 sps:$4 sm:$0xff]   ;;  %v22712_v40 = vld [vmem:[#allocation7 + $0x2144] ss:$16 sps:$4 sm:$0xff]  }
  0x7c   :  { %8174 = vmatpush1.bf16.msra.mxu0 %v22674_v14  ;;  %9342 = vmatpush1.bf16.msra.mxu1 %v22675_v15  ;;  %v22714_v41 = vld [vmem:[#allocation7 + $0x214c] ss:$16 sps:$4 sm:$0xff]   ;;  %v22716_v42 = vld [vmem:[#allocation7 + $0x2140] ss:$16 sps:$4 sm:$0xff]   ;;  %v22717_v43 = vld [vmem:[#allocation7 + $0x2148] ss:$16 sps:$4 sm:$0xff]  }
  0x7d   :  { %8175 = vmatprep.subr.bf16.mxu0 %v22676_v16  ;;  %9343 = vmatprep.subr.bf16.mxu1 %v22678_v17  ;;  %v22718_v44 = vld [vmem:[#allocation7 + $0x2164] ss:$16 sps:$4 sm:$0xff]   ;;  %v22720_v45 = vld [vmem:[#allocation7 + $0x216c] ss:$16 sps:$4 sm:$0xff]   ;;  %v22722_v48 = vld [vmem:[#allocation7 + $0x2160] ss:$16 sps:$4 sm:$0xff]  }
  0x7e   :  { %v1255_v46 = vld [vmem:[#allocation5] sm:$0xff]  ;;  %v22723_v49 = vld [vmem:[#allocation7 + $0x2168] ss:$16 sps:$4 sm:$0xff]   ;;  %v22726_v52 = vld [vmem:[#allocation7 + $0x218c] ss:$16 sps:$4 sm:$0xff]   ;;  %vm25931_vm0 = vmmov 0  }
  0x7f   :  { %v1271_v47 = vld [vmem:[#allocation5 + $0x80] sm:$0xff]  ;;  %v22729_v54 = vld [vmem:[#allocation7 + $0x2188] ss:$16 sps:$4 sm:$0xff]   ;;  %v22732_v56 = vld [vmem:[#allocation7 + $0x21ac] ss:$16 sps:$4 sm:$0xff]   ;;  %vm19019_vm1 = vcmask 1043456  }
  0x80   :  { %8176 = vmatpush1.bf16.msra.mxu0 %v22680_v18  ;;  %9344 = vmatpush1.bf16.msra.mxu1 %v22681_v19  ;;  %v19114_v50 = vcombine.high %v1255_v46, %v1271_v47  ;;  %v22724_v51 = vld [vmem:[#allocation7 + $0x2184] ss:$16 sps:$4 sm:$0xff]   ;;  %v22728_v53 = vld [vmem:[#allocation7 + $0x2180] ss:$16 sps:$4 sm:$0xff]   ;;  %v22735_v58 = vld [vmem:[#allocation7 + $0x21a8] ss:$16 sps:$4 sm:$0xff]   ;;  %v19113_v5 = vcombine.low %v1255_v46, %v1271_v47 }
  0x81   :  { %8177 = vmatprep.subr.bf16.mxu0 %v22682_v20  ;;  %9345 = vmatprep.subr.bf16.mxu1 %v22684_v21  ;;  %v22730_v55 = vld [vmem:[#allocation7 + $0x21a4] ss:$16 sps:$4 sm:$0xff]   ;;  %v22734_v57 = vld [vmem:[#allocation7 + $0x21a0] ss:$16 sps:$4 sm:$0xff]   ;;  %v22738_v60 = vld [vmem:[#allocation7 + $0x21cc] ss:$16 sps:$4 sm:$0xff]  }
  0x82   :  { %8199 = vmatprep.mubr.bf16.mxu0 %v19114_v50  ;;  %9367 = vmatprep.mubr.bf16.mxu1 %v19114_v50  ;;  %v22736_v59 = vld [vmem:[#allocation7 + $0x21c4] ss:$16 sps:$4 sm:$0xff]   ;;  %v22740_v61 = vld [vmem:[#allocation7 + $0x21c0] ss:$16 sps:$4 sm:$0xff]   ;;  %v22741_v62 = vld [vmem:[#allocation7 + $0x21c8] ss:$16 sps:$4 sm:$0xff]  }
  0x83   :  { %v22742_v63 = vld [vmem:[#allocation7 + $0x21e4] ss:$16 sps:$4 sm:$0xff]   ;;  %v22744_v0 = vld [vmem:[#allocation7 + $0x21ec] ss:$16 sps:$4 sm:$0xff]   ;;  %v22746_v1 = vld [vmem:[#allocation7 + $0x21e0] ss:$16 sps:$4 sm:$0xff]  }
  0x84   :  { %8178 = vmatpush1.bf16.msra.mxu0 %v22686_v22  ;;  %9346 = vmatpush1.bf16.msra.mxu1 %v22687_v23  ;;  %v22747_v2 = vld [vmem:[#allocation7 + $0x21e8] ss:$16 sps:$4 sm:$0xff]   ;;  %v22750_v3 = vld [vmem:[#allocation7 + $0x2204] ss:$16 sps:$4 sm:$0xff]   ;;  %v22753_v4 = vld [vmem:[#allocation7 + $0x220c] ss:$16 sps:$4 sm:$0xff]  }
  0x85   :  { %8179 = vmatprep.subr.bf16.mxu0 %v22688_v24  ;;  %9347 = vmatprep.subr.bf16.mxu1 %v22690_v25  ;;  %v22748_v6 = vld [vmem:[#allocation7 + $0x2200] ss:$16 sps:$4 sm:$0xff]   ;;  %v22751_v7 = vld [vmem:[#allocation7 + $0x2208] ss:$16 sps:$4 sm:$0xff]   ;;  %v22756_v8 = vld [vmem:[#allocation7 + $0x2224] ss:$16 sps:$4 sm:$0xff]  }
  0x86   :  { %v22759_v9 = vld [vmem:[#allocation7 + $0x222c] ss:$16 sps:$4 sm:$0xff]   ;;  %v22754_v10 = vld [vmem:[#allocation7 + $0x2220] ss:$16 sps:$4 sm:$0xff]   ;;  %v22757_v11 = vld [vmem:[#allocation7 + $0x2228] ss:$16 sps:$4 sm:$0xff]  }
  0x87   :  { %v22762_v12 = vld [vmem:[#allocation7 + $0x2244] ss:$16 sps:$4 sm:$0xff]   ;;  %v22765_v13 = vld [vmem:[#allocation7 + $0x224c] ss:$16 sps:$4 sm:$0xff]   ;;  %v22760_v16 = vld [vmem:[#allocation7 + $0x2240] ss:$16 sps:$4 sm:$0xff]  }
  0x88   :  { %8180 = vmatpush1.bf16.msra.mxu0 %v22692_v26  ;;  %9348 = vmatpush1.bf16.msra.mxu1 %v22693_v27  ;;  %v1287_v14 = vld [vmem:[#allocation5 + $0x100] sm:$0xff]  ;;  %v22763_v17 = vld [vmem:[#allocation7 + $0x2248] ss:$16 sps:$4 sm:$0xff]   ;;  %v22771_v21 = vld [vmem:[#allocation7 + $0x226c] ss:$16 sps:$4 sm:$0xff]   ;;  %vm25933_vm2 = vmmov 1  }
  0x89   :  { %8181 = vmatprep.subr.bf16.mxu0 %v22694_v28  ;;  %9349 = vmatprep.subr.bf16.mxu1 %v22696_v29  ;;  %v1303_v15 = vld [vmem:[#allocation5 + $0x180] sm:$0xff]  ;;  %v22769_v23 = vld [vmem:[#allocation7 + $0x2268] ss:$16 sps:$4 sm:$0xff]   ;;  %v22777_v27 = vld [vmem:[#allocation7 + $0x228c] ss:$16 sps:$4 sm:$0xff]   ;;  %vm19015_vm4 = vcmask 490496  }
  0x8a   :  { %v19146_v18 = vcombine.high %v1287_v14, %v1303_v15  ;;  %v19145_v19 = vcombine.low %v1287_v14, %v1303_v15  ;;  %v22768_v20 = vld [vmem:[#allocation7 + $0x2264] ss:$16 sps:$4 sm:$0xff]   ;;  %v22766_v22 = vld [vmem:[#allocation7 + $0x2260] ss:$16 sps:$4 sm:$0xff]   ;;  %v22795_v47 = vld [vmem:[#allocation7 + $0x22ec] ss:$16 sps:$4 sm:$0xff]  }
  0x8b   :  { %v1319_v24 = vld [vmem:[#allocation5 + $0x200] sm:$0xff]  ;;  %v22793_v50 = vld [vmem:[#allocation7 + $0x22e8] ss:$16 sps:$4 sm:$0xff]   ;;  %vm21643_vm3 = vmpackc.low %vm19019_vm1, %vm25933_vm2  ;;  %vm19093_vm5 = vcmask 44032  }
  0x8c   :  { %8182 = vmatpush1.bf16.msra.mxu0 %v22698_v30  ;;  %9350 = vmatpush1.bf16.msra.mxu1 %v22699_v31  ;;  %v1335_v25 = vld [vmem:[#allocation5 + $0x280] sm:$0xff]  ;;  %v22775_v31 = vld [vmem:[#allocation7 + $0x2288] ss:$16 sps:$4 sm:$0xff]  }
  0x8d   :  { %8183 = vmatprep.subr.bf16.mxu0 %v22700_v32  ;;  %9351 = vmatprep.subr.bf16.mxu1 %v22702_v33  ;;  %v22774_v26 = vld [vmem:[#allocation7 + $0x2284] ss:$16 sps:$4 sm:$0xff]   ;;  %v19178_v28 = vcombine.high %v1319_v24, %v1335_v25  ;;  %v19177_v29 = vcombine.low %v1319_v24, %v1335_v25  ;;  %v22772_v30 = vld [vmem:[#allocation7 + $0x2280] ss:$16 sps:$4 sm:$0xff]   ;;  %v22783_v33 = vld [vmem:[#allocation7 + $0x22ac] ss:$16 sps:$4 sm:$0xff]  }
  0x8e   :  { %v22780_v32 = vld [vmem:[#allocation7 + $0x22a4] ss:$16 sps:$4 sm:$0xff]   ;;  %v22835_v14 = vld [vmem:[#allocation7 + $0x23c8] ss:$16 sps:$4 sm:$0xff]  }
  0x8f   :  { %v22792_v46 = vld [vmem:[#allocation7 + $0x22e4] ss:$16 sps:$4 sm:$0xff]   ;;  %v1288_v24 = vld [vmem:[#allocation5 + $0x108] sm:$0xff] }
  0x90   :  { %8184 = vmatpush1.bf16.msra.mxu0 %v22704_v34  ;;  %9352 = vmatpush1.bf16.msra.mxu1 %v22705_v35  ;;  %v1351_v34 = vld [vmem:[#allocation5 + $0x300] sm:$0xff]  ;;  %v1304_v25 = vld [vmem:[#allocation5 + $0x188] sm:$0xff] }
  0x91   :  { %8185 = vmatprep.subr.bf16.mxu0 %v22706_v36  ;;  %9353 = vmatprep.subr.bf16.mxu1 %v22708_v37  ;;  %v1367_v35 = vld [vmem:[#allocation5 + $0x380] sm:$0x33]  ;;  %v22781_v37 = vld [vmem:[#allocation7 + $0x22a8] ss:$16 sps:$4 sm:$0xff]  }
  0x92   :  { %v22778_v36 = vld [vmem:[#allocation7 + $0x22a0] ss:$16 sps:$4 sm:$0xff]   ;;  %v22840_v15 = vld [vmem:[#allocation7 + $0x23e4] ss:$16 sps:$4 sm:$0xff]  }
  0x94   :  { %8186 = vmatpush1.bf16.msra.mxu0 %v22710_v38  ;;  %9354 = vmatpush1.bf16.msra.mxu1 %v22711_v39  ;;  %v19210_v38 = vcombine.high %v1351_v34, %v1367_v35  ;;  %v22786_v39 = vld [vmem:[#allocation7 + $0x22c4] ss:$16 sps:$4 sm:$0xff]  }
  0x95   :  { %8187 = vmatprep.subr.bf16.mxu0 %v22712_v40  ;;  %9355 = vmatprep.subr.bf16.mxu1 %v22714_v41  ;;  %v22789_v40 = vld [vmem:[#allocation7 + $0x22cc] ss:$16 sps:$4 sm:$0xff]   ;;  %v22784_v41 = vld [vmem:[#allocation7 + $0x22c0] ss:$16 sps:$4 sm:$0xff]  }
  0x98   :  { %8188 = vmatpush1.bf16.msra.mxu0 %v22716_v42  ;;  %9356 = vmatpush1.bf16.msra.mxu1 %v22717_v43  ;;  %v22787_v42 = vld [vmem:[#allocation7 + $0x22c8] ss:$16 sps:$4 sm:$0xff]   ;;  %v19209_v43 = vcombine.low %v1351_v34, %v1367_v35  ;;  %v19147_v34 = vcombine.low %v1288_v24, %v1304_v25 }
  0x99   :  { %8189 = vmatprep.subr.bf16.mxu0 %v22718_v44  ;;  %9357 = vmatprep.subr.bf16.mxu1 %v22720_v45  ;;  %v26060_v44 = vld [vmem:[#allocation5 + $0x8] sm:$0xff] }
  0x9a   :  { %v26062_v45 = vld [vmem:[#allocation5 + $0x88] sm:$0xff] }
  0x9b   :  { %v1336_v35 = vld [vmem:[#allocation5 + $0x288] sm:$0xff] }
  0x9c   :  { %8190 = vmatpush1.bf16.msra.mxu0 %v22722_v48  ;;  %9358 = vmatpush1.bf16.msra.mxu1 %v22723_v49  ;;  %v19116_v48 = vcombine.high %v26060_v44, %v26062_v45  ;;  %v22790_v49 = vld [vmem:[#allocation7 + $0x22e0] ss:$16 sps:$4 sm:$0xff]  }
  0x9d   :  { %8191 = vmatprep.subr.bf16.mxu0 %v22724_v51  ;;  %9359 = vmatprep.subr.bf16.mxu1 %v22726_v52  ;;  %v22798_v51 = vld [vmem:[#allocation7 + $0x2304] ss:$16 sps:$4 sm:$0xff]   ;;  %v22801_v52 = vld [vmem:[#allocation7 + $0x230c] ss:$16 sps:$4 sm:$0xff]  }
  0xa0   :  { %8192 = vmatpush1.bf16.msra.mxu0 %v22728_v53  ;;  %9360 = vmatpush1.bf16.msra.mxu1 %v22729_v54  ;;  %v22796_v53 = vld [vmem:[#allocation7 + $0x2300] ss:$16 sps:$4 sm:$0xff]   ;;  %v22799_v54 = vld [vmem:[#allocation7 + $0x2308] ss:$16 sps:$4 sm:$0xff]  }
  0xa1   :  { %8193 = vmatprep.subr.bf16.mxu0 %v22730_v55  ;;  %9361 = vmatprep.subr.bf16.mxu1 %v22732_v56  ;;  %v22804_v55 = vld [vmem:[#allocation7 + $0x2324] ss:$16 sps:$4 sm:$0xff]   ;;  %v22807_v56 = vld [vmem:[#allocation7 + $0x232c] ss:$16 sps:$4 sm:$0xff]  }
  0xa4   :  { %8194 = vmatpush1.bf16.msra.mxu0 %v22734_v57  ;;  %9362 = vmatpush1.bf16.msra.mxu1 %v22735_v58  ;;  %v22802_v57 = vld [vmem:[#allocation7 + $0x2320] ss:$16 sps:$4 sm:$0xff]   ;;  %v22805_v58 = vld [vmem:[#allocation7 + $0x2328] ss:$16 sps:$4 sm:$0xff]  }
  0xa5   :  { %8195 = vmatprep.subr.bf16.mxu0 %v22736_v59  ;;  %9363 = vmatprep.subr.bf16.mxu1 %v22738_v60  ;;  %v22810_v59 = vld [vmem:[#allocation7 + $0x2344] ss:$16 sps:$4 sm:$0xff]   ;;  %v22813_v60 = vld [vmem:[#allocation7 + $0x234c] ss:$16 sps:$4 sm:$0xff]  }
  0xa8   :  { %8196 = vmatpush1.bf16.msra.mxu0 %v22740_v61  ;;  %9364 = vmatpush1.bf16.msra.mxu1 %v22741_v62  ;;  %v22808_v61 = vld [vmem:[#allocation7 + $0x2340] ss:$16 sps:$4 sm:$0xff]   ;;  %v22811_v62 = vld [vmem:[#allocation7 + $0x2348] ss:$16 sps:$4 sm:$0xff]  }
  0xa9   :  { %8197 = vmatprep.subr.bf16.mxu0 %v22742_v63  ;;  %9365 = vmatprep.subr.bf16.mxu1 %v22744_v0  ;;  %v22816_v63 = vld [vmem:[#allocation7 + $0x2364] ss:$16 sps:$4 sm:$0xff]   ;;  %v22819_v0 = vld [vmem:[#allocation7 + $0x236c] ss:$16 sps:$4 sm:$0xff]  }
  0xac   :  { %8198 = vmatpush1.bf16.msra.mxu0 %v22746_v1  ;;  %9366 = vmatpush1.bf16.msra.mxu1 %v22747_v2  ;;  %v22814_v1 = vld [vmem:[#allocation7 + $0x2360] ss:$16 sps:$4 sm:$0xff]   ;;  %v22817_v2 = vld [vmem:[#allocation7 + $0x2368] ss:$16 sps:$4 sm:$0xff]  }
  0xad   :  { %8240 = vmatprep.subr.bf16.mxu0 %v22750_v3  ;;  %9408 = vmatprep.subr.bf16.mxu1 %v22753_v4  ;;  %v22822_v3 = vld [vmem:[#allocation7 + $0x2384] ss:$16 sps:$4 sm:$0xff]   ;;  %v22825_v4 = vld [vmem:[#allocation7 + $0x238c] ss:$16 sps:$4 sm:$0xff]  }
  0xaf   :  { %8200 = vmatmul.mubr.bf16.vlgmr.msra.gmra.mrb[0].mxu0 %v19113_v5  ;;  %9368 = vmatmul.mubr.bf16.vlgmr.msra.gmra.mrb[0].mxu1 %v19113_v5  ;;  %v22820_v5 = vld [vmem:[#allocation7 + $0x2380] ss:$16 sps:$4 sm:$0xff]  }
  0xb0   :  { %8241 = vmatpush1.bf16.msra.mxu0 %v22748_v6  ;;  %9409 = vmatpush1.bf16.msra.mxu1 %v22751_v7  ;;  %v22823_v6 = vld [vmem:[#allocation7 + $0x2388] ss:$16 sps:$4 sm:$0xff]   ;;  %v22828_v7 = vld [vmem:[#allocation7 + $0x23a4] ss:$16 sps:$4 sm:$0xff]  }
  0xb1   :  { %8242 = vmatprep.subr.bf16.mxu0 %v22756_v8  ;;  %9410 = vmatprep.subr.bf16.mxu1 %v22759_v9  ;;  %v22831_v8 = vld [vmem:[#allocation7 + $0x23ac] ss:$16 sps:$4 sm:$0xff]   ;;  %v22826_v9 = vld [vmem:[#allocation7 + $0x23a0] ss:$16 sps:$4 sm:$0xff]  }
  0xb2   :  { %8209 = vmatprep.mubr.bf16.mxu0 %v19146_v18  ;;  %9377 = vmatprep.mubr.bf16.mxu1 %v19146_v18  ;;  %v22841_v18 = vld [vmem:[#allocation7 + $0x23e8] ss:$16 sps:$4 sm:$0xff]  }
  0xb4   :  { %8243 = vmatpush1.bf16.msra.mxu0 %v22754_v10  ;;  %9411 = vmatpush1.bf16.msra.mxu1 %v22757_v11  ;;  %v22829_v10 = vld [vmem:[#allocation7 + $0x23a8] ss:$16 sps:$4 sm:$0xff]   ;;  %v22834_v11 = vld [vmem:[#allocation7 + $0x23c4] ss:$16 sps:$4 sm:$0xff]  }
  0xb5   :  { %8244 = vmatprep.subr.bf16.mxu0 %v22762_v12  ;;  %9412 = vmatprep.subr.bf16.mxu1 %v22765_v13  ;;  %v22837_v12 = vld [vmem:[#allocation7 + $0x23cc] ss:$16 sps:$4 sm:$0xff]   ;;  %v22832_v13 = vld [vmem:[#allocation7 + $0x23c0] ss:$16 sps:$4 sm:$0xff]  }
  0xb7   :  { %8210 = vmatmul.mubr.bf16.gmra.mrb[4].mxu0 %v19145_v19  ;;  %9378 = vmatmul.mubr.bf16.gmra.mrb[4].mxu1 %v19145_v19  ;;  %v22846_v19 = vld [vmem:[#allocation7 + $0x2404] ss:$16 sps:$4 sm:$0xff]  }
  0xb8   :  { %8245 = vmatpush1.bf16.msra.mxu0 %v22760_v16  ;;  %9413 = vmatpush1.bf16.msra.mxu1 %v22763_v17  ;;  %v22843_v16 = vld [vmem:[#allocation7 + $0x23ec] ss:$16 sps:$4 sm:$0xff]   ;;  %v22838_v17 = vld [vmem:[#allocation7 + $0x23e0] ss:$16 sps:$4 sm:$0xff]  }
  0xb9   :  { %8246 = vmatprep.subr.bf16.mxu0 %v22768_v20  ;;  %9414 = vmatprep.subr.bf16.mxu1 %v22771_v21  ;;  %v22849_v20 = vld [vmem:[#allocation7 + $0x240c] ss:$16 sps:$4 sm:$0xff]   ;;  %v22844_v21 = vld [vmem:[#allocation7 + $0x2400] ss:$16 sps:$4 sm:$0xff]  }
  0xba   :  { %8219 = vmatprep.mubr.bf16.mxu0 %v19178_v28  ;;  %9387 = vmatprep.mubr.bf16.mxu1 %v19178_v28  ;;  %v19148_v28 = vcombine.high %v1288_v24, %v1304_v25  ;;  %v22927_v24 = vld [vmem:[#allocation7 + $0x25ac] ss:$16 sps:$4 sm:$0xff]   ;;  %v22922_v25 = vld [vmem:[#allocation7 + $0x25a0] ss:$16 sps:$4 sm:$0xff]  }
  0xbc   :  { %8247 = vmatpush1.bf16.msra.mxu0 %v22766_v22  ;;  %9415 = vmatpush1.bf16.msra.mxu1 %v22769_v23  ;;  %v19115_v22 = vcombine.low %v26060_v44, %v26062_v45  ;;  %v22847_v23 = vld [vmem:[#allocation7 + $0x2408] ss:$16 sps:$4 sm:$0xff]   ;;  %v22873_v44 = vld [vmem:[#allocation7 + $0x248c] ss:$16 sps:$4 sm:$0xff]  }
  0xbd   :  { %8248 = vmatprep.subr.bf16.mxu0 %v22774_v26  ;;  %9416 = vmatprep.subr.bf16.mxu1 %v22777_v27  ;;  %v22852_v26 = vld [vmem:[#allocation7 + $0x2424] ss:$16 sps:$4 sm:$0xff]   ;;  %v22855_v27 = vld [vmem:[#allocation7 + $0x242c] ss:$16 sps:$4 sm:$0xff]  }
  0xbe   :  { %v1352_v45 = vld [vmem:[#allocation5 + $0x308] sm:$0xff] }
  0xbf   :  { %8220 = vmatmul.mubr.bf16.gmra.mrb[8].mxu0 %v19177_v29  ;;  %9388 = vmatmul.mubr.bf16.gmra.mrb[8].mxu1 %v19177_v29  ;;  %v22850_v29 = vld [vmem:[#allocation7 + $0x2420] ss:$16 sps:$4 sm:$0xff]  }
  0xc0   :  { %8249 = vmatpush1.bf16.msra.mxu0 %v22772_v30  ;;  %9417 = vmatpush1.bf16.msra.mxu1 %v22775_v31  ;;  %v22853_v30 = vld [vmem:[#allocation7 + $0x2428] ss:$16 sps:$4 sm:$0xff]   ;;  %v22858_v31 = vld [vmem:[#allocation7 + $0x2444] ss:$16 sps:$4 sm:$0xff]  }
  0xc1   :  { %8250 = vmatprep.subr.bf16.mxu0 %v22780_v32  ;;  %9418 = vmatprep.subr.bf16.mxu1 %v22783_v33  ;;  %v22861_v32 = vld [vmem:[#allocation7 + $0x244c] ss:$16 sps:$4 sm:$0xff]  }
  0xc2   :  { %8229 = vmatprep.mubr.bf16.mxu0 %v19210_v38  ;;  %9397 = vmatprep.mubr.bf16.mxu1 %v19210_v38  ;;  %v1320_v33 = vld [vmem:[#allocation5 + $0x208] sm:$0xff]  ;;  %v22864_v38 = vld [vmem:[#allocation7 + $0x2464] ss:$16 sps:$4 sm:$0xff]  }
  0xc4   :  { %8251 = vmatpush1.bf16.msra.mxu0 %v22778_v36  ;;  %9419 = vmatpush1.bf16.msra.mxu1 %v22781_v37  ;;  %v22856_v36 = vld [vmem:[#allocation7 + $0x2440] ss:$16 sps:$4 sm:$0xff]   ;;  %v22859_v37 = vld [vmem:[#allocation7 + $0x2448] ss:$16 sps:$4 sm:$0xff]  }
  0xc5   :  { %8252 = vmatprep.subr.bf16.mxu0 %v22786_v39  ;;  %9420 = vmatprep.subr.bf16.mxu1 %v22789_v40  ;;  %v22867_v39 = vld [vmem:[#allocation7 + $0x246c] ss:$16 sps:$4 sm:$0xff]   ;;  %v19180_v40 = vcombine.high %v1320_v33, %v1336_v35 }
  0xc7   :  { %8230 = vmatmul.mubr.bf16.gmra.mrb[12].mxu0 %v19209_v43  ;;  %9398 = vmatmul.mubr.bf16.gmra.mrb[12].mxu1 %v19209_v43  ;;  %v22870_v43 = vld [vmem:[#allocation7 + $0x2484] ss:$16 sps:$4 sm:$0xff]  }
  0xc8   :  { %8253 = vmatpush1.bf16.msra.mxu0 %v22784_v41  ;;  %9421 = vmatpush1.bf16.msra.mxu1 %v22787_v42  ;;  %v22862_v41 = vld [vmem:[#allocation7 + $0x2460] ss:$16 sps:$4 sm:$0xff]   ;;  %v22865_v42 = vld [vmem:[#allocation7 + $0x2468] ss:$16 sps:$4 sm:$0xff]  }
  0xc9   :  { %8254 = vmatprep.subr.bf16.mxu0 %v22792_v46  ;;  %9422 = vmatprep.subr.bf16.mxu1 %v22795_v47  ;;  %v19179_v46 = vcombine.low %v1320_v33, %v1336_v35  ;;  %v1368_v47 = vld [vmem:[#allocation5 + $0x388] sm:$0x33]  ;;  %v22934_v33 = vld [vmem:[#allocation7 + $0x25e0] ss:$16 sps:$4 sm:$0xff]   ;;  %v22942_v35 = vld [vmem:[#allocation7 + $0x2604] ss:$16 sps:$4 sm:$0xff]  }
  0xca   :  { %8272 = vmatprep.mubr.bf16.mxu0 %v19116_v48  ;;  %9440 = vmatprep.mubr.bf16.mxu1 %v19116_v48  ;;  %v22868_v48 = vld [vmem:[#allocation7 + $0x2480] ss:$16 sps:$4 sm:$0xff]  }
  0xcc   :  { %8255 = vmatpush1.bf16.msra.mxu0 %v22790_v49  ;;  %9423 = vmatpush1.bf16.msra.mxu1 %v22793_v50  ;;  %v22871_v49 = vld [vmem:[#allocation7 + $0x2488] ss:$16 sps:$4 sm:$0xff]   ;;  %v22876_v50 = vld [vmem:[#allocation7 + $0x24a4] ss:$16 sps:$4 sm:$0xff]  }
  0xcd   :  { %8256 = vmatprep.subr.bf16.mxu0 %v22798_v51  ;;  %9424 = vmatprep.subr.bf16.mxu1 %v22801_v52  ;;  %v22879_v51 = vld [vmem:[#allocation7 + $0x24ac] ss:$16 sps:$4 sm:$0xff]   ;;  %v19212_v52 = vcombine.high %v1352_v45, %v1368_v47 }
  0xd0   :  { %8257 = vmatpush1.bf16.msra.mxu0 %v22796_v53  ;;  %9425 = vmatpush1.bf16.msra.mxu1 %v22799_v54  ;;  %v22874_v53 = vld [vmem:[#allocation7 + $0x24a0] ss:$16 sps:$4 sm:$0xff]   ;;  %v22877_v54 = vld [vmem:[#allocation7 + $0x24a8] ss:$16 sps:$4 sm:$0xff]  }
  0xd1   :  { %8258 = vmatprep.subr.bf16.mxu0 %v22804_v55  ;;  %9426 = vmatprep.subr.bf16.mxu1 %v22807_v56  ;;  %v22882_v55 = vld [vmem:[#allocation7 + $0x24c4] ss:$16 sps:$4 sm:$0xff]   ;;  %v22885_v56 = vld [vmem:[#allocation7 + $0x24cc] ss:$16 sps:$4 sm:$0xff]  }
  0xd4   :  { %8259 = vmatpush1.bf16.msra.mxu0 %v22802_v57  ;;  %9427 = vmatpush1.bf16.msra.mxu1 %v22805_v58  ;;  %v26068_v57 = vld [vmem:[#allocation5 + $0x10] sm:$0xff]  ;;  %v19211_v58 = vcombine.low %v1352_v45, %v1368_v47 }
  0xd5   :  { %8260 = vmatprep.subr.bf16.mxu0 %v22810_v59  ;;  %9428 = vmatprep.subr.bf16.mxu1 %v22813_v60  ;;  %v26070_v59 = vld [vmem:[#allocation5 + $0x90] sm:$0xff] }
  0xd6   :  { %v22880_v60 = vld [vmem:[#allocation7 + $0x24c0] ss:$16 sps:$4 sm:$0xff]   ;;  %v22954_v47 = vld [vmem:[#allocation7 + $0x2644] ss:$16 sps:$4 sm:$0xff]  }
  0xd7   :  { %v22946_v45 = vld [vmem:[#allocation7 + $0x2620] ss:$16 sps:$4 sm:$0xff]  }
  0xd8   :  { %8261 = vmatpush1.bf16.msra.mxu0 %v22808_v61  ;;  %9429 = vmatpush1.bf16.msra.mxu1 %v22811_v62  ;;  %v22883_v61 = vld [vmem:[#allocation7 + $0x24c8] ss:$16 sps:$4 sm:$0xff]   ;;  %v22888_v62 = vld [vmem:[#allocation7 + $0x24e4] ss:$16 sps:$4 sm:$0xff]  }
  0xd9   :  { %8262 = vmatprep.subr.bf16.mxu0 %v22816_v63  ;;  %9430 = vmatprep.subr.bf16.mxu1 %v22819_v0  ;;  %v22891_v63 = vld [vmem:[#allocation7 + $0x24ec] ss:$16 sps:$4 sm:$0xff]   ;;  %v19118_v0 = vcombine.high %v26068_v57, %v26070_v59 }
  0xdc   :  { %8263 = vmatpush1.bf16.msra.mxu0 %v22814_v1  ;;  %9431 = vmatpush1.bf16.msra.mxu1 %v22817_v2  ;;  %v22886_v1 = vld [vmem:[#allocation7 + $0x24e0] ss:$16 sps:$4 sm:$0xff]   ;;  %v22889_v2 = vld [vmem:[#allocation7 + $0x24e8] ss:$16 sps:$4 sm:$0xff]  }
  0xdd   :  { %8264 = vmatprep.subr.bf16.mxu0 %v22822_v3  ;;  %9432 = vmatprep.subr.bf16.mxu1 %v22825_v4  ;;  %v22894_v3 = vld [vmem:[#allocation7 + $0x2504] ss:$16 sps:$4 sm:$0xff]   ;;  %v22897_v4 = vld [vmem:[#allocation7 + $0x250c] ss:$16 sps:$4 sm:$0xff]  }
  0xe0   :  { %8265 = vmatpush1.bf16.msra.mxu0 %v22820_v5  ;;  %9433 = vmatpush1.bf16.msra.mxu1 %v22823_v6  ;;  %v22892_v5 = vld [vmem:[#allocation7 + $0x2500] ss:$16 sps:$4 sm:$0xff]   ;;  %v22895_v6 = vld [vmem:[#allocation7 + $0x2508] ss:$16 sps:$4 sm:$0xff]  }
  0xe1   :  { %8266 = vmatprep.subr.bf16.mxu0 %v22828_v7  ;;  %9434 = vmatprep.subr.bf16.mxu1 %v22831_v8  ;;  %v22900_v7 = vld [vmem:[#allocation7 + $0x2524] ss:$16 sps:$4 sm:$0xff]   ;;  %v22903_v8 = vld [vmem:[#allocation7 + $0x252c] ss:$16 sps:$4 sm:$0xff]  }
  0xe4   :  { %8267 = vmatpush1.bf16.msra.mxu0 %v22826_v9  ;;  %9435 = vmatpush1.bf16.msra.mxu1 %v22829_v10  ;;  %v22898_v9 = vld [vmem:[#allocation7 + $0x2520] ss:$16 sps:$4 sm:$0xff]   ;;  %v22901_v10 = vld [vmem:[#allocation7 + $0x2528] ss:$16 sps:$4 sm:$0xff]  }
  0xe5   :  { %8268 = vmatprep.subr.bf16.mxu0 %v22834_v11  ;;  %9436 = vmatprep.subr.bf16.mxu1 %v22837_v12  ;;  %v22906_v11 = vld [vmem:[#allocation7 + $0x2544] ss:$16 sps:$4 sm:$0xff]   ;;  %v22909_v12 = vld [vmem:[#allocation7 + $0x254c] ss:$16 sps:$4 sm:$0xff]  }
  0xe8   :  { %8269 = vmatpush1.bf16.msra.mxu0 %v22832_v13  ;;  %9437 = vmatpush1.bf16.msra.mxu1 %v22835_v14  ;;  %v22904_v13 = vld [vmem:[#allocation7 + $0x2540] ss:$16 sps:$4 sm:$0xff]   ;;  %v22907_v14 = vld [vmem:[#allocation7 + $0x2548] ss:$16 sps:$4 sm:$0xff]  }
  0xe9   :  { %8270 = vmatprep.subr.bf16.mxu0 %v22840_v15  ;;  %9438 = vmatprep.subr.bf16.mxu1 %v22843_v16  ;;  %v22912_v15 = vld [vmem:[#allocation7 + $0x2564] ss:$16 sps:$4 sm:$0xff]   ;;  %v22915_v16 = vld [vmem:[#allocation7 + $0x256c] ss:$16 sps:$4 sm:$0xff]  }
  0xec   :  { %8271 = vmatpush1.bf16.msra.mxu0 %v22838_v17  ;;  %9439 = vmatpush1.bf16.msra.mxu1 %v22841_v18  ;;  %v22910_v17 = vld [vmem:[#allocation7 + $0x2560] ss:$16 sps:$4 sm:$0xff]   ;;  %v22913_v18 = vld [vmem:[#allocation7 + $0x2568] ss:$16 sps:$4 sm:$0xff]  }
  0xed   :  { %8313 = vmatprep.subr.bf16.mxu0 %v22846_v19  ;;  %9481 = vmatprep.subr.bf16.mxu1 %v22849_v20  ;;  %v22918_v19 = vld [vmem:[#allocation7 + $0x2584] ss:$16 sps:$4 sm:$0xff]   ;;  %v22921_v20 = vld [vmem:[#allocation7 + $0x258c] ss:$16 sps:$4 sm:$0xff]  }
  0xef   :  { %8273 = vmatmul.mubr.bf16.vlgmr.msra.gmra.mrb[0].mxu0 %v19115_v22  ;;  %9441 = vmatmul.mubr.bf16.vlgmr.msra.gmra.mrb[0].mxu1 %v19115_v22  ;;  %v22919_v22 = vld [vmem:[#allocation7 + $0x2588] ss:$16 sps:$4 sm:$0xff]  }
  0xf0   :  { %8314 = vmatpush1.bf16.msra.mxu0 %v22844_v21  ;;  %9482 = vmatpush1.bf16.msra.mxu1 %v22847_v23  ;;  %v22916_v21 = vld [vmem:[#allocation7 + $0x2580] ss:$16 sps:$4 sm:$0xff]   ;;  %v22924_v23 = vld [vmem:[#allocation7 + $0x25a4] ss:$16 sps:$4 sm:$0xff]  }
  0xf1   :  { %8315 = vmatprep.subr.bf16.mxu0 %v22852_v26  ;;  %9483 = vmatprep.subr.bf16.mxu1 %v22855_v27  ;;  %v22925_v26 = vld [vmem:[#allocation7 + $0x25a8] ss:$16 sps:$4 sm:$0xff]   ;;  %v22930_v27 = vld [vmem:[#allocation7 + $0x25c4] ss:$16 sps:$4 sm:$0xff]  }
  0xf2   :  { %8282 = vmatprep.mubr.bf16.mxu0 %v19148_v28  ;;  %9450 = vmatprep.mubr.bf16.mxu1 %v19148_v28  ;;  %v22933_v28 = vld [vmem:[#allocation7 + $0x25cc] ss:$16 sps:$4 sm:$0xff]  }
  0xf4   :  { %8316 = vmatpush1.bf16.msra.mxu0 %v22850_v29  ;;  %9484 = vmatpush1.bf16.msra.mxu1 %v22853_v30  ;;  %v22928_v29 = vld [vmem:[#allocation7 + $0x25c0] ss:$16 sps:$4 sm:$0xff]   ;;  %v22931_v30 = vld [vmem:[#allocation7 + $0x25c8] ss:$16 sps:$4 sm:$0xff]  }
  0xf5   :  { %8317 = vmatprep.subr.bf16.mxu0 %v22858_v31  ;;  %9485 = vmatprep.subr.bf16.mxu1 %v22861_v32  ;;  %v22936_v31 = vld [vmem:[#allocation7 + $0x25e4] ss:$16 sps:$4 sm:$0xff]   ;;  %v22939_v32 = vld [vmem:[#allocation7 + $0x25ec] ss:$16 sps:$4 sm:$0xff]  }
  0xf7   :  { %8283 = vmatmul.mubr.bf16.gmra.mrb[4].mxu0 %v19147_v34  ;;  %9451 = vmatmul.mubr.bf16.gmra.mrb[4].mxu1 %v19147_v34  ;;  %v22937_v34 = vld [vmem:[#allocation7 + $0x25e8] ss:$16 sps:$4 sm:$0xff]  }
  0xf8   :  { %8318 = vmatpush1.bf16.msra.mxu0 %v22856_v36  ;;  %9486 = vmatpush1.bf16.msra.mxu1 %v22859_v37  ;;  %v22945_v36 = vld [vmem:[#allocation7 + $0x260c] ss:$16 sps:$4 sm:$0xff]   ;;  %v1289_v37 = vld [vmem:[#allocation5 + $0x110] sm:$0xff] }
  0xf9   :  { %8319 = vmatprep.subr.bf16.mxu0 %v22864_v38  ;;  %9487 = vmatprep.subr.bf16.mxu1 %v22867_v39  ;;  %v19117_v38 = vcombine.low %v26068_v57, %v26070_v59  ;;  %v1305_v39 = vld [vmem:[#allocation5 + $0x190] sm:$0xff] }
  0xfa   :  { %8292 = vmatprep.mubr.bf16.mxu0 %v19180_v40  ;;  %9460 = vmatprep.mubr.bf16.mxu1 %v19180_v40  ;;  %v22940_v40 = vld [vmem:[#allocation7 + $0x2600] ss:$16 sps:$4 sm:$0xff]   ;;  %v22966_v59 = vld [vmem:[#allocation7 + $0x2684] ss:$16 sps:$4 sm:$0xff]  }
  0xfb   :  { %v22958_v57 = vld [vmem:[#allocation7 + $0x2660] ss:$16 sps:$4 sm:$0xff]  }
  0xfc   :  { %8320 = vmatpush1.bf16.msra.mxu0 %v22862_v41  ;;  %9488 = vmatpush1.bf16.msra.mxu1 %v22865_v42  ;;  %v22943_v41 = vld [vmem:[#allocation7 + $0x2608] ss:$16 sps:$4 sm:$0xff]   ;;  %v22948_v42 = vld [vmem:[#allocation7 + $0x2624] ss:$16 sps:$4 sm:$0xff]  }
  0xfd   :  { %8321 = vmatprep.subr.bf16.mxu0 %v22870_v43  ;;  %9489 = vmatprep.subr.bf16.mxu1 %v22873_v44  ;;  %v22951_v43 = vld [vmem:[#allocation7 + $0x262c] ss:$16 sps:$4 sm:$0xff]   ;;  %v19150_v44 = vcombine.high %v1289_v37, %v1305_v39 }
  0xff   :  { %8293 = vmatmul.mubr.bf16.gmra.mrb[8].mxu0 %v19179_v46  ;;  %9461 = vmatmul.mubr.bf16.gmra.mrb[8].mxu1 %v19179_v46  ;;  %v22949_v46 = vld [vmem:[#allocation7 + $0x2628] ss:$16 sps:$4 sm:$0xff]  }
 0x100   :  { %8322 = vmatpush1.bf16.msra.mxu0 %v22868_v48  ;;  %9490 = vmatpush1.bf16.msra.mxu1 %v22871_v49  ;;  %v22957_v48 = vld [vmem:[#allocation7 + $0x264c] ss:$16 sps:$4 sm:$0xff]   ;;  %v1321_v49 = vld [vmem:[#allocation5 + $0x210] sm:$0xff] }
 0x101   :  { %8323 = vmatprep.subr.bf16.mxu0 %v22876_v50  ;;  %9491 = vmatprep.subr.bf16.mxu1 %v22879_v51  ;;  %v19149_v50 = vcombine.low %v1289_v37, %v1305_v39  ;;  %v1337_v51 = vld [vmem:[#allocation5 + $0x290] sm:$0xff] }
 0x102   :  { %8302 = vmatprep.mubr.bf16.mxu0 %v19212_v52  ;;  %9470 = vmatprep.mubr.bf16.mxu1 %v19212_v52  ;;  %v22952_v52 = vld [vmem:[#allocation7 + $0x2640] ss:$16 sps:$4 sm:$0xff]   ;;  %v23020_v39 = vld [vmem:[#allocation7 + $0x27a4] ss:$16 sps:$4 sm:$0xff]  }
 0x103   :  { %v23012_v37 = vld [vmem:[#allocation7 + $0x2780] ss:$16 sps:$4 sm:$0xff]  }
 0x104   :  { %8324 = vmatpush1.bf16.msra.mxu0 %v22874_v53  ;;  %9492 = vmatpush1.bf16.msra.mxu1 %v22877_v54  ;;  %v22955_v53 = vld [vmem:[#allocation7 + $0x2648] ss:$16 sps:$4 sm:$0xff]   ;;  %v22960_v54 = vld [vmem:[#allocation7 + $0x2664] ss:$16 sps:$4 sm:$0xff]  }
 0x105   :  { %8325 = vmatprep.subr.bf16.mxu0 %v22882_v55  ;;  %9493 = vmatprep.subr.bf16.mxu1 %v22885_v56  ;;  %v22963_v55 = vld [vmem:[#allocation7 + $0x266c] ss:$16 sps:$4 sm:$0xff]   ;;  %v19182_v56 = vcombine.high %v1321_v49, %v1337_v51 }
 0x107   :  { %8303 = vmatmul.mubr.bf16.gmra.mrb[12].mxu0 %v19211_v58  ;;  %9471 = vmatmul.mubr.bf16.gmra.mrb[12].mxu1 %v19211_v58  ;;  %v22961_v58 = vld [vmem:[#allocation7 + $0x2668] ss:$16 sps:$4 sm:$0xff]  }
 0x108   :  { %8326 = vmatpush1.bf16.msra.mxu0 %v22880_v60  ;;  %9494 = vmatpush1.bf16.msra.mxu1 %v22883_v61  ;;  %v22969_v60 = vld [vmem:[#allocation7 + $0x268c] ss:$16 sps:$4 sm:$0xff]   ;;  %v22964_v61 = vld [vmem:[#allocation7 + $0x2680] ss:$16 sps:$4 sm:$0xff]  }
 0x109   :  { %8327 = vmatprep.subr.bf16.mxu0 %v22888_v62  ;;  %9495 = vmatprep.subr.bf16.mxu1 %v22891_v63  ;;  %v22967_v62 = vld [vmem:[#allocation7 + $0x2688] ss:$16 sps:$4 sm:$0xff]   ;;  %v19181_v63 = vcombine.low %v1321_v49, %v1337_v51  ;;  %v23030_v49 = vld [vmem:[#allocation7 + $0x27e0] ss:$16 sps:$4 sm:$0xff]   ;;  %v23038_v51 = vld [vmem:[#allocation7 + $0x2804] ss:$16 sps:$4 sm:$0xff]  }
 0x10a   :  { %8345 = vmatprep.mubr.bf16.mxu0 %v19118_v0  ;;  %9513 = vmatprep.mubr.bf16.mxu1 %v19118_v0  ;;  %v1353_v0 = vld [vmem:[#allocation5 + $0x310] sm:$0xff] }
 0x10c   :  { %8328 = vmatpush1.bf16.msra.mxu0 %v22886_v1  ;;  %9496 = vmatpush1.bf16.msra.mxu1 %v22889_v2  ;;  %v1369_v1 = vld [vmem:[#allocation5 + $0x390] sm:$0x33] }
 0x10d   :  { %8329 = vmatprep.subr.bf16.mxu0 %v22894_v3  ;;  %9497 = vmatprep.subr.bf16.mxu1 %v22897_v4  ;;  %v22972_v2 = vld [vmem:[#allocation7 + $0x26a4] ss:$16 sps:$4 sm:$0xff]   ;;  %v22975_v3 = vld [vmem:[#allocation7 + $0x26ac] ss:$16 sps:$4 sm:$0xff]   ;;  %v19214_v4 = vcombine.high %v1353_v0, %v1369_v1 }
 0x110   :  { %8330 = vmatpush1.bf16.msra.mxu0 %v22892_v5  ;;  %9498 = vmatpush1.bf16.msra.mxu1 %v22895_v6  ;;  %v22970_v5 = vld [vmem:[#allocation7 + $0x26a0] ss:$16 sps:$4 sm:$0xff]   ;;  %v22973_v6 = vld [vmem:[#allocation7 + $0x26a8] ss:$16 sps:$4 sm:$0xff]  }
 0x111   :  { %8331 = vmatprep.subr.bf16.mxu0 %v22900_v7  ;;  %9499 = vmatprep.subr.bf16.mxu1 %v22903_v8  ;;  %v22978_v7 = vld [vmem:[#allocation7 + $0x26c4] ss:$16 sps:$4 sm:$0xff]   ;;  %v22981_v8 = vld [vmem:[#allocation7 + $0x26cc] ss:$16 sps:$4 sm:$0xff]  }
 0x114   :  { %8332 = vmatpush1.bf16.msra.mxu0 %v22898_v9  ;;  %9500 = vmatpush1.bf16.msra.mxu1 %v22901_v10  ;;  %v26076_v9 = vld [vmem:[#allocation5 + $0x18] sm:$0xff]  ;;  %v19213_v10 = vcombine.low %v1353_v0, %v1369_v1  ;;  %v23048_v1 = vld [vmem:[#allocation7 + $0x2840] ss:$16 sps:$4 sm:$0xff]  }
 0x115   :  { %8333 = vmatprep.subr.bf16.mxu0 %v22906_v11  ;;  %9501 = vmatprep.subr.bf16.mxu1 %v22909_v12  ;;  %v26078_v11 = vld [vmem:[#allocation5 + $0x98] sm:$0xff]  ;;  %v22976_v12 = vld [vmem:[#allocation7 + $0x26c0] ss:$16 sps:$4 sm:$0xff]  }
 0x116   :  { %v23053_v0 = vld [vmem:[#allocation7 + $0x284c] ss:$16 sps:$4 sm:$0xff]  }
 0x118   :  { %8334 = vmatpush1.bf16.msra.mxu0 %v22904_v13  ;;  %9502 = vmatpush1.bf16.msra.mxu1 %v22907_v14  ;;  %v22979_v13 = vld [vmem:[#allocation7 + $0x26c8] ss:$16 sps:$4 sm:$0xff]   ;;  %v22984_v14 = vld [vmem:[#allocation7 + $0x26e4] ss:$16 sps:$4 sm:$0xff]  }
 0x119   :  { %8335 = vmatprep.subr.bf16.mxu0 %v22912_v15  ;;  %9503 = vmatprep.subr.bf16.mxu1 %v22915_v16  ;;  %v22987_v15 = vld [vmem:[#allocation7 + $0x26ec] ss:$16 sps:$4 sm:$0xff]   ;;  %v19120_v16 = vcombine.high %v26076_v9, %v26078_v11 }
 0x11c   :  { %8336 = vmatpush1.bf16.msra.mxu0 %v22910_v17  ;;  %9504 = vmatpush1.bf16.msra.mxu1 %v22913_v18  ;;  %v22982_v17 = vld [vmem:[#allocation7 + $0x26e0] ss:$16 sps:$4 sm:$0xff]   ;;  %v22985_v18 = vld [vmem:[#allocation7 + $0x26e8] ss:$16 sps:$4 sm:$0xff]  }
 0x11d   :  { %8337 = vmatprep.subr.bf16.mxu0 %v22918_v19  ;;  %9505 = vmatprep.subr.bf16.mxu1 %v22921_v20  ;;  %v22990_v19 = vld [vmem:[#allocation7 + $0x2704] ss:$16 sps:$4 sm:$0xff]   ;;  %v22993_v20 = vld [vmem:[#allocation7 + $0x270c] ss:$16 sps:$4 sm:$0xff]  }
 0x120   :  { %8338 = vmatpush1.bf16.msra.mxu0 %v22916_v21  ;;  %9506 = vmatpush1.bf16.msra.mxu1 %v22919_v22  ;;  %v22988_v21 = vld [vmem:[#allocation7 + $0x2700] ss:$16 sps:$4 sm:$0xff]   ;;  %v22991_v22 = vld [vmem:[#allocation7 + $0x2708] ss:$16 sps:$4 sm:$0xff]  }
 0x121   :  { %8339 = vmatprep.subr.bf16.mxu0 %v22924_v23  ;;  %9507 = vmatprep.subr.bf16.mxu1 %v22927_v24  ;;  %v22996_v23 = vld [vmem:[#allocation7 + $0x2724] ss:$16 sps:$4 sm:$0xff]   ;;  %v22999_v24 = vld [vmem:[#allocation7 + $0x272c] ss:$16 sps:$4 sm:$0xff]  }
 0x124   :  { %8340 = vmatpush1.bf16.msra.mxu0 %v22922_v25  ;;  %9508 = vmatpush1.bf16.msra.mxu1 %v22925_v26  ;;  %v22994_v25 = vld [vmem:[#allocation7 + $0x2720] ss:$16 sps:$4 sm:$0xff]   ;;  %v22997_v26 = vld [vmem:[#allocation7 + $0x2728] ss:$16 sps:$4 sm:$0xff]  }
 0x125   :  { %8341 = vmatprep.subr.bf16.mxu0 %v22930_v27  ;;  %9509 = vmatprep.subr.bf16.mxu1 %v22933_v28  ;;  %v23002_v27 = vld [vmem:[#allocation7 + $0x2744] ss:$16 sps:$4 sm:$0xff]   ;;  %v23005_v28 = vld [vmem:[#allocation7 + $0x274c] ss:$16 sps:$4 sm:$0xff]  }
 0x128   :  { %8342 = vmatpush1.bf16.msra.mxu0 %v22928_v29  ;;  %9510 = vmatpush1.bf16.msra.mxu1 %v22931_v30  ;;  %v23000_v29 = vld [vmem:[#allocation7 + $0x2740] ss:$16 sps:$4 sm:$0xff]   ;;  %v23003_v30 = vld [vmem:[#allocation7 + $0x2748] ss:$16 sps:$4 sm:$0xff]  }
 0x129   :  { %8343 = vmatprep.subr.bf16.mxu0 %v22936_v31  ;;  %9511 = vmatprep.subr.bf16.mxu1 %v22939_v32  ;;  %v23008_v31 = vld [vmem:[#allocation7 + $0x2764] ss:$16 sps:$4 sm:$0xff]   ;;  %v23011_v32 = vld [vmem:[#allocation7 + $0x276c] ss:$16 sps:$4 sm:$0xff]  }
 0x12c   :  { %8344 = vmatpush1.bf16.msra.mxu0 %v22934_v33  ;;  %9512 = vmatpush1.bf16.msra.mxu1 %v22937_v34  ;;  %v23006_v33 = vld [vmem:[#allocation7 + $0x2760] ss:$16 sps:$4 sm:$0xff]   ;;  %v23009_v34 = vld [vmem:[#allocation7 + $0x2768] ss:$16 sps:$4 sm:$0xff]  }
 0x12d   :  { %8386 = vmatprep.subr.bf16.mxu0 %v22942_v35  ;;  %9554 = vmatprep.subr.bf16.mxu1 %v22945_v36  ;;  %v23014_v35 = vld [vmem:[#allocation7 + $0x2784] ss:$16 sps:$4 sm:$0xff]   ;;  %v23017_v36 = vld [vmem:[#allocation7 + $0x278c] ss:$16 sps:$4 sm:$0xff]  }
 0x12f   :  { %8346 = vmatmul.mubr.bf16.vlgmr.msra.gmra.mrb[0].mxu0 %v19117_v38  ;;  %9514 = vmatmul.mubr.bf16.vlgmr.msra.gmra.mrb[0].mxu1 %v19117_v38  ;;  %v23015_v38 = vld [vmem:[#allocation7 + $0x2788] ss:$16 sps:$4 sm:$0xff]  }
 0x130   :  { %8387 = vmatpush1.bf16.msra.mxu0 %v22940_v40  ;;  %9555 = vmatpush1.bf16.msra.mxu1 %v22943_v41  ;;  %v23023_v40 = vld [vmem:[#allocation7 + $0x27ac] ss:$16 sps:$4 sm:$0xff]   ;;  %v23018_v41 = vld [vmem:[#allocation7 + $0x27a0] ss:$16 sps:$4 sm:$0xff]  }
 0x131   :  { %8388 = vmatprep.subr.bf16.mxu0 %v22948_v42  ;;  %9556 = vmatprep.subr.bf16.mxu1 %v22951_v43  ;;  %v23021_v42 = vld [vmem:[#allocation7 + $0x27a8] ss:$16 sps:$4 sm:$0xff]   ;;  %v23026_v43 = vld [vmem:[#allocation7 + $0x27c4] ss:$16 sps:$4 sm:$0xff]  }
 0x132   :  { %8355 = vmatprep.mubr.bf16.mxu0 %v19150_v44  ;;  %9523 = vmatprep.mubr.bf16.mxu1 %v19150_v44  ;;  %v23029_v44 = vld [vmem:[#allocation7 + $0x27cc] ss:$16 sps:$4 sm:$0xff]  }
 0x134   :  { %8389 = vmatpush1.bf16.msra.mxu0 %v22946_v45  ;;  %9557 = vmatpush1.bf16.msra.mxu1 %v22949_v46  ;;  %v23024_v45 = vld [vmem:[#allocation7 + $0x27c0] ss:$16 sps:$4 sm:$0xff]   ;;  %v23027_v46 = vld [vmem:[#allocation7 + $0x27c8] ss:$16 sps:$4 sm:$0xff]  }
 0x135   :  { %8390 = vmatprep.subr.bf16.mxu0 %v22954_v47  ;;  %9558 = vmatprep.subr.bf16.mxu1 %v22957_v48  ;;  %v23032_v47 = vld [vmem:[#allocation7 + $0x27e4] ss:$16 sps:$4 sm:$0xff]   ;;  %v23035_v48 = vld [vmem:[#allocation7 + $0x27ec] ss:$16 sps:$4 sm:$0xff]  }
 0x137   :  { %8356 = vmatmul.mubr.bf16.gmra.mrb[4].mxu0 %v19149_v50  ;;  %9524 = vmatmul.mubr.bf16.gmra.mrb[4].mxu1 %v19149_v50  ;;  %v23033_v50 = vld [vmem:[#allocation7 + $0x27e8] ss:$16 sps:$4 sm:$0xff]  }
 0x138   :  { %8391 = vmatpush1.bf16.msra.mxu0 %v22952_v52  ;;  %9559 = vmatpush1.bf16.msra.mxu1 %v22955_v53  ;;  %v23041_v52 = vld [vmem:[#allocation7 + $0x280c] ss:$16 sps:$4 sm:$0xff]   ;;  %v23036_v53 = vld [vmem:[#allocation7 + $0x2800] ss:$16 sps:$4 sm:$0xff]  }
 0x139   :  { %8392 = vmatprep.subr.bf16.mxu0 %v22960_v54  ;;  %9560 = vmatprep.subr.bf16.mxu1 %v22963_v55  ;;  %v19119_v54 = vcombine.low %v26076_v9, %v26078_v11  ;;  %v1290_v55 = vld [vmem:[#allocation5 + $0x118] sm:$0xff]  ;;  %v23054_v9 = vld [vmem:[#allocation7 + $0x2860] ss:$16 sps:$4 sm:$0xff]   ;;  %v23062_v11 = vld [vmem:[#allocation7 + $0x2884] ss:$16 sps:$4 sm:$0xff]  }
 0x13a   :  { %8365 = vmatprep.mubr.bf16.mxu0 %v19182_v56  ;;  %9533 = vmatprep.mubr.bf16.mxu1 %v19182_v56  ;;  %v1306_v56 = vld [vmem:[#allocation5 + $0x198] sm:$0xff] }
 0x13c   :  { %8393 = vmatpush1.bf16.msra.mxu0 %v22958_v57  ;;  %9561 = vmatpush1.bf16.msra.mxu1 %v22961_v58  ;;  %v23039_v57 = vld [vmem:[#allocation7 + $0x2808] ss:$16 sps:$4 sm:$0xff]   ;;  %v23044_v58 = vld [vmem:[#allocation7 + $0x2824] ss:$16 sps:$4 sm:$0xff]  }
 0x13d   :  { %8394 = vmatprep.subr.bf16.mxu0 %v22966_v59  ;;  %9562 = vmatprep.subr.bf16.mxu1 %v22969_v60  ;;  %v23047_v59 = vld [vmem:[#allocation7 + $0x282c] ss:$16 sps:$4 sm:$0xff]   ;;  %v19152_v60 = vcombine.high %v1290_v55, %v1306_v56 }
 0x13f   :  { %8366 = vmatmul.mubr.bf16.gmra.mrb[8].mxu0 %v19181_v63  ;;  %9534 = vmatmul.mubr.bf16.gmra.mrb[8].mxu1 %v19181_v63  ;;  %v23050_v63 = vld [vmem:[#allocation7 + $0x2844] ss:$16 sps:$4 sm:$0xff]  }
 0x140   :  { %8395 = vmatpush1.bf16.msra.mxu0 %v22964_v61  ;;  %9563 = vmatpush1.bf16.msra.mxu1 %v22967_v62  ;;  %v23042_v61 = vld [vmem:[#allocation7 + $0x2820] ss:$16 sps:$4 sm:$0xff]   ;;  %v23045_v62 = vld [vmem:[#allocation7 + $0x2828] ss:$16 sps:$4 sm:$0xff]  }
 0x141   :  { %8396 = vmatprep.subr.bf16.mxu0 %v22972_v2  ;;  %9564 = vmatprep.subr.bf16.mxu1 %v22975_v3  ;;  %v23051_v2 = vld [vmem:[#allocation7 + $0x2848] ss:$16 sps:$4 sm:$0xff]   ;;  %v19151_v3 = vcombine.low %v1290_v55, %v1306_v56  ;;  %v23116_v55 = vld [vmem:[#allocation7 + $0x29a4] ss:$16 sps:$4 sm:$0xff]   ;;  %v23119_v56 = vld [vmem:[#allocation7 + $0x29ac] ss:$16 sps:$4 sm:$0xff]  }
 0x142   :  { %8375 = vmatprep.mubr.bf16.mxu0 %v19214_v4  ;;  %9543 = vmatprep.mubr.bf16.mxu1 %v19214_v4  ;;  %v1322_v4 = vld [vmem:[#allocation5 + $0x218] sm:$0xff] }
 0x144   :  { %8397 = vmatpush1.bf16.msra.mxu0 %v22970_v5  ;;  %9565 = vmatpush1.bf16.msra.mxu1 %v22973_v6  ;;  %v1338_v5 = vld [vmem:[#allocation5 + $0x298] sm:$0xff]  ;;  %v23056_v6 = vld [vmem:[#allocation7 + $0x2864] ss:$16 sps:$4 sm:$0xff]  }
 0x145   :  { %8398 = vmatprep.subr.bf16.mxu0 %v22978_v7  ;;  %9566 = vmatprep.subr.bf16.mxu1 %v22981_v8  ;;  %v23059_v7 = vld [vmem:[#allocation7 + $0x286c] ss:$16 sps:$4 sm:$0xff]   ;;  %v19184_v8 = vcombine.high %v1322_v4, %v1338_v5 }
 0x147   :  { %8376 = vmatmul.mubr.bf16.gmra.mrb[12].mxu0 %v19213_v10  ;;  %9544 = vmatmul.mubr.bf16.gmra.mrb[12].mxu1 %v19213_v10  ;;  %v23057_v10 = vld [vmem:[#allocation7 + $0x2868] ss:$16 sps:$4 sm:$0xff]  }
 0x148   :  { %8399 = vmatpush1.bf16.msra.mxu0 %v22976_v12  ;;  %9567 = vmatpush1.bf16.msra.mxu1 %v22979_v13  ;;  %v23065_v12 = vld [vmem:[#allocation7 + $0x288c] ss:$16 sps:$4 sm:$0xff]  }
 0x149   :  { %8400 = vmatprep.subr.bf16.mxu0 %v22984_v14  ;;  %9568 = vmatprep.subr.bf16.mxu1 %v22987_v15  ;;  %v1354_v13 = vld [vmem:[#allocation5 + $0x318] sm:$0xff]  ;;  %v19183_v14 = vcombine.low %v1322_v4, %v1338_v5  ;;  %v1291_v5 = vld [vmem:[#allocation5 + $0x120] sm:$0xff] }
 0x14a   :  { %8418 = vmatprep.mubr.bf16.mxu0 %v19120_v16  ;;  %9586 = vmatprep.mubr.bf16.mxu1 %v19120_v16  ;;  %v1370_v15 = vld [vmem:[#allocation5 + $0x398] sm:$0x33]  ;;  %v23060_v16 = vld [vmem:[#allocation7 + $0x2880] ss:$16 sps:$4 sm:$0xff]  }
 0x14b   :  { %v23137_v4 = vld [vmem:[#allocation7 + $0x2a0c] ss:$16 sps:$4 sm:$0xff]  }
 0x14c   :  { %8401 = vmatpush1.bf16.msra.mxu0 %v22982_v17  ;;  %9569 = vmatpush1.bf16.msra.mxu1 %v22985_v18  ;;  %v23063_v17 = vld [vmem:[#allocation7 + $0x2888] ss:$16 sps:$4 sm:$0xff]   ;;  %v23068_v18 = vld [vmem:[#allocation7 + $0x28a4] ss:$16 sps:$4 sm:$0xff]  }
 0x14d   :  { %8402 = vmatprep.subr.bf16.mxu0 %v22990_v19  ;;  %9570 = vmatprep.subr.bf16.mxu1 %v22993_v20  ;;  %v23071_v19 = vld [vmem:[#allocation7 + $0x28ac] ss:$16 sps:$4 sm:$0xff]   ;;  %v19216_v20 = vcombine.high %v1354_v13, %v1370_v15 }
 0x150   :  { %8403 = vmatpush1.bf16.msra.mxu0 %v22988_v21  ;;  %9571 = vmatpush1.bf16.msra.mxu1 %v22991_v22  ;;  %v23066_v21 = vld [vmem:[#allocation7 + $0x28a0] ss:$16 sps:$4 sm:$0xff]   ;;  %v23069_v22 = vld [vmem:[#allocation7 + $0x28a8] ss:$16 sps:$4 sm:$0xff]  }
 0x151   :  { %8404 = vmatprep.subr.bf16.mxu0 %v22996_v23  ;;  %9572 = vmatprep.subr.bf16.mxu1 %v22999_v24  ;;  %v23074_v23 = vld [vmem:[#allocation7 + $0x28c4] ss:$16 sps:$4 sm:$0xff]   ;;  %v23077_v24 = vld [vmem:[#allocation7 + $0x28cc] ss:$16 sps:$4 sm:$0xff]  }
 0x154   :  { %8405 = vmatpush1.bf16.msra.mxu0 %v22994_v25  ;;  %9573 = vmatpush1.bf16.msra.mxu1 %v22997_v26  ;;  %v26084_v25 = vld [vmem:[#allocation5 + $0x20] sm:$0xff]  ;;  %v19215_v26 = vcombine.low %v1354_v13, %v1370_v15  ;;  %v23141_v13 = vld [vmem:[#allocation7 + $0x2a28] ss:$16 sps:$4 sm:$0xff]  }
 0x155   :  { %8406 = vmatprep.subr.bf16.mxu0 %v23002_v27  ;;  %9574 = vmatprep.subr.bf16.mxu1 %v23005_v28  ;;  %v26086_v27 = vld [vmem:[#allocation5 + $0xa0] sm:$0xff] }
 0x156   :  { %v23072_v28 = vld [vmem:[#allocation7 + $0x28c0] ss:$16 sps:$4 sm:$0xff]   ;;  %v23146_v15 = vld [vmem:[#allocation7 + $0x2a44] ss:$16 sps:$4 sm:$0xff]  }
 0x158   :  { %8407 = vmatpush1.bf16.msra.mxu0 %v23000_v29  ;;  %9575 = vmatpush1.bf16.msra.mxu1 %v23003_v30  ;;  %v23075_v29 = vld [vmem:[#allocation7 + $0x28c8] ss:$16 sps:$4 sm:$0xff]   ;;  %v23080_v30 = vld [vmem:[#allocation7 + $0x28e4] ss:$16 sps:$4 sm:$0xff]  }
 0x159   :  { %8408 = vmatprep.subr.bf16.mxu0 %v23008_v31  ;;  %9576 = vmatprep.subr.bf16.mxu1 %v23011_v32  ;;  %v23083_v31 = vld [vmem:[#allocation7 + $0x28ec] ss:$16 sps:$4 sm:$0xff]   ;;  %v19122_v32 = vcombine.high %v26084_v25, %v26086_v27 }
 0x15c   :  { %8409 = vmatpush1.bf16.msra.mxu0 %v23006_v33  ;;  %9577 = vmatpush1.bf16.msra.mxu1 %v23009_v34  ;;  %v23078_v33 = vld [vmem:[#allocation7 + $0x28e0] ss:$16 sps:$4 sm:$0xff]   ;;  %v23081_v34 = vld [vmem:[#allocation7 + $0x28e8] ss:$16 sps:$4 sm:$0xff]  }
 0x15d   :  { %8410 = vmatprep.subr.bf16.mxu0 %v23014_v35  ;;  %9578 = vmatprep.subr.bf16.mxu1 %v23017_v36  ;;  %v23086_v35 = vld [vmem:[#allocation7 + $0x2904] ss:$16 sps:$4 sm:$0xff]   ;;  %v23089_v36 = vld [vmem:[#allocation7 + $0x290c] ss:$16 sps:$4 sm:$0xff]  }
 0x160   :  { %8411 = vmatpush1.bf16.msra.mxu0 %v23012_v37  ;;  %9579 = vmatpush1.bf16.msra.mxu1 %v23015_v38  ;;  %v23084_v37 = vld [vmem:[#allocation7 + $0x2900] ss:$16 sps:$4 sm:$0xff]   ;;  %v23087_v38 = vld [vmem:[#allocation7 + $0x2908] ss:$16 sps:$4 sm:$0xff]  }
 0x161   :  { %8412 = vmatprep.subr.bf16.mxu0 %v23020_v39  ;;  %9580 = vmatprep.subr.bf16.mxu1 %v23023_v40  ;;  %v23092_v39 = vld [vmem:[#allocation7 + $0x2924] ss:$16 sps:$4 sm:$0xff]   ;;  %v23095_v40 = vld [vmem:[#allocation7 + $0x292c] ss:$16 sps:$4 sm:$0xff]  }
 0x164   :  { %8413 = vmatpush1.bf16.msra.mxu0 %v23018_v41  ;;  %9581 = vmatpush1.bf16.msra.mxu1 %v23021_v42  ;;  %v23090_v41 = vld [vmem:[#allocation7 + $0x2920] ss:$16 sps:$4 sm:$0xff]   ;;  %v23093_v42 = vld [vmem:[#allocation7 + $0x2928] ss:$16 sps:$4 sm:$0xff]  }
 0x165   :  { %8414 = vmatprep.subr.bf16.mxu0 %v23026_v43  ;;  %9582 = vmatprep.subr.bf16.mxu1 %v23029_v44  ;;  %v23098_v43 = vld [vmem:[#allocation7 + $0x2944] ss:$16 sps:$4 sm:$0xff]   ;;  %v23101_v44 = vld [vmem:[#allocation7 + $0x294c] ss:$16 sps:$4 sm:$0xff]  }
 0x168   :  { %8415 = vmatpush1.bf16.msra.mxu0 %v23024_v45  ;;  %9583 = vmatpush1.bf16.msra.mxu1 %v23027_v46  ;;  %v23096_v45 = vld [vmem:[#allocation7 + $0x2940] ss:$16 sps:$4 sm:$0xff]   ;;  %v23099_v46 = vld [vmem:[#allocation7 + $0x2948] ss:$16 sps:$4 sm:$0xff]  }
 0x169   :  { %8416 = vmatprep.subr.bf16.mxu0 %v23032_v47  ;;  %9584 = vmatprep.subr.bf16.mxu1 %v23035_v48  ;;  %v23104_v47 = vld [vmem:[#allocation7 + $0x2964] ss:$16 sps:$4 sm:$0xff]   ;;  %v23107_v48 = vld [vmem:[#allocation7 + $0x296c] ss:$16 sps:$4 sm:$0xff]  }
 0x16c   :  { %8417 = vmatpush1.bf16.msra.mxu0 %v23030_v49  ;;  %9585 = vmatpush1.bf16.msra.mxu1 %v23033_v50  ;;  %v23102_v49 = vld [vmem:[#allocation7 + $0x2960] ss:$16 sps:$4 sm:$0xff]   ;;  %v23105_v50 = vld [vmem:[#allocation7 + $0x2968] ss:$16 sps:$4 sm:$0xff]  }
 0x16d   :  { %8459 = vmatprep.subr.bf16.mxu0 %v23038_v51  ;;  %9627 = vmatprep.subr.bf16.mxu1 %v23041_v52  ;;  %v23110_v51 = vld [vmem:[#allocation7 + $0x2984] ss:$16 sps:$4 sm:$0xff]   ;;  %v23113_v52 = vld [vmem:[#allocation7 + $0x298c] ss:$16 sps:$4 sm:$0xff]  }
 0x16f   :  { %8419 = vmatmul.mubr.bf16.vlgmr.msra.gmra.mrb[0].mxu0 %v19119_v54  ;;  %9587 = vmatmul.mubr.bf16.vlgmr.msra.gmra.mrb[0].mxu1 %v19119_v54  ;;  %v23111_v54 = vld [vmem:[#allocation7 + $0x2988] ss:$16 sps:$4 sm:$0xff]  }
 0x170   :  { %8460 = vmatpush1.bf16.msra.mxu0 %v23036_v53  ;;  %9628 = vmatpush1.bf16.msra.mxu1 %v23039_v57  ;;  %v23108_v53 = vld [vmem:[#allocation7 + $0x2980] ss:$16 sps:$4 sm:$0xff]  }
 0x171   :  { %8461 = vmatprep.subr.bf16.mxu0 %v23044_v58  ;;  %9629 = vmatprep.subr.bf16.mxu1 %v23047_v59  ;;  %v23114_v57 = vld [vmem:[#allocation7 + $0x29a0] ss:$16 sps:$4 sm:$0xff]   ;;  %v23117_v58 = vld [vmem:[#allocation7 + $0x29a8] ss:$16 sps:$4 sm:$0xff]   ;;  %v23122_v59 = vld [vmem:[#allocation7 + $0x29c4] ss:$16 sps:$4 sm:$0xff]  }
 0x172   :  { %8428 = vmatprep.mubr.bf16.mxu0 %v19152_v60  ;;  %9596 = vmatprep.mubr.bf16.mxu1 %v19152_v60  ;;  %v23125_v60 = vld [vmem:[#allocation7 + $0x29cc] ss:$16 sps:$4 sm:$0xff]  }
 0x174   :  { %8462 = vmatpush1.bf16.msra.mxu0 %v23042_v61  ;;  %9630 = vmatpush1.bf16.msra.mxu1 %v23045_v62  ;;  %v23120_v61 = vld [vmem:[#allocation7 + $0x29c0] ss:$16 sps:$4 sm:$0xff]   ;;  %v23123_v62 = vld [vmem:[#allocation7 + $0x29c8] ss:$16 sps:$4 sm:$0xff]  }
 0x175   :  { %8463 = vmatprep.subr.bf16.mxu0 %v23050_v63  ;;  %9631 = vmatprep.subr.bf16.mxu1 %v23053_v0  ;;  %v23128_v63 = vld [vmem:[#allocation7 + $0x29e4] ss:$16 sps:$4 sm:$0xff]   ;;  %v23131_v0 = vld [vmem:[#allocation7 + $0x29ec] ss:$16 sps:$4 sm:$0xff]  }
 0x177   :  { %8429 = vmatmul.mubr.bf16.gmra.mrb[4].mxu0 %v19151_v3  ;;  %9597 = vmatmul.mubr.bf16.gmra.mrb[4].mxu1 %v19151_v3  ;;  %v23134_v3 = vld [vmem:[#allocation7 + $0x2a04] ss:$16 sps:$4 sm:$0xff]  }
 0x178   :  { %8464 = vmatpush1.bf16.msra.mxu0 %v23048_v1  ;;  %9632 = vmatpush1.bf16.msra.mxu1 %v23051_v2  ;;  %v23126_v1 = vld [vmem:[#allocation7 + $0x29e0] ss:$16 sps:$4 sm:$0xff]   ;;  %v23129_v2 = vld [vmem:[#allocation7 + $0x29e8] ss:$16 sps:$4 sm:$0xff]  }
 0x179   :  { %8465 = vmatprep.subr.bf16.mxu0 %v23056_v6  ;;  %9633 = vmatprep.subr.bf16.mxu1 %v23059_v7  ;;  %v1307_v6 = vld [vmem:[#allocation5 + $0x1a0] sm:$0xff]  ;;  %v19121_v7 = vcombine.low %v26084_v25, %v26086_v27  ;;  %v23153_v25 = vld [vmem:[#allocation7 + $0x2a68] ss:$16 sps:$4 sm:$0xff]  }
 0x17a   :  { %8438 = vmatprep.mubr.bf16.mxu0 %v19184_v8  ;;  %9606 = vmatprep.mubr.bf16.mxu1 %v19184_v8  ;;  %v23132_v8 = vld [vmem:[#allocation7 + $0x2a00] ss:$16 sps:$4 sm:$0xff]   ;;  %v23158_v27 = vld [vmem:[#allocation7 + $0x2a84] ss:$16 sps:$4 sm:$0xff]  }
 0x17c   :  { %8466 = vmatpush1.bf16.msra.mxu0 %v23054_v9  ;;  %9634 = vmatpush1.bf16.msra.mxu1 %v23057_v10  ;;  %v23135_v9 = vld [vmem:[#allocation7 + $0x2a08] ss:$16 sps:$4 sm:$0xff]   ;;  %v23140_v10 = vld [vmem:[#allocation7 + $0x2a24] ss:$16 sps:$4 sm:$0xff]  }
 0x17d   :  { %8467 = vmatprep.subr.bf16.mxu0 %v23062_v11  ;;  %9635 = vmatprep.subr.bf16.mxu1 %v23065_v12  ;;  %v23143_v11 = vld [vmem:[#allocation7 + $0x2a2c] ss:$16 sps:$4 sm:$0xff]   ;;  %v23138_v12 = vld [vmem:[#allocation7 + $0x2a20] ss:$16 sps:$4 sm:$0xff]  }
 0x17f   :  { %8439 = vmatmul.mubr.bf16.gmra.mrb[8].mxu0 %v19183_v14  ;;  %9607 = vmatmul.mubr.bf16.gmra.mrb[8].mxu1 %v19183_v14  ;;  %v19154_v14 = vcombine.high %v1291_v5, %v1307_v6 }
 0x180   :  { %8468 = vmatpush1.bf16.msra.mxu0 %v23060_v16  ;;  %9636 = vmatpush1.bf16.msra.mxu1 %v23063_v17  ;;  %v23149_v16 = vld [vmem:[#allocation7 + $0x2a4c] ss:$16 sps:$4 sm:$0xff]   ;;  %v1323_v17 = vld [vmem:[#allocation5 + $0x220] sm:$0xff] }
 0x181   :  { %8469 = vmatprep.subr.bf16.mxu0 %v23068_v18  ;;  %9637 = vmatprep.subr.bf16.mxu1 %v23071_v19  ;;  %v1339_v18 = vld [vmem:[#allocation5 + $0x2a0] sm:$0xff]  ;;  %v19153_v19 = vcombine.low %v1291_v5, %v1307_v6  ;;  %v23207_v6 = vld [vmem:[#allocation7 + $0x2b88] ss:$16 sps:$4 sm:$0xff]  }
 0x182   :  { %8448 = vmatprep.mubr.bf16.mxu0 %v19216_v20  ;;  %9616 = vmatprep.mubr.bf16.mxu1 %v19216_v20  ;;  %v23144_v20 = vld [vmem:[#allocation7 + $0x2a40] ss:$16 sps:$4 sm:$0xff]  }
 0x183   :  { %v23204_v5 = vld [vmem:[#allocation7 + $0x2b80] ss:$16 sps:$4 sm:$0xff]  }
 0x184   :  { %8470 = vmatpush1.bf16.msra.mxu0 %v23066_v21  ;;  %9638 = vmatpush1.bf16.msra.mxu1 %v23069_v22  ;;  %v23147_v21 = vld [vmem:[#allocation7 + $0x2a48] ss:$16 sps:$4 sm:$0xff]   ;;  %v23152_v22 = vld [vmem:[#allocation7 + $0x2a64] ss:$16 sps:$4 sm:$0xff]  }
 0x185   :  { %8471 = vmatprep.subr.bf16.mxu0 %v23074_v23  ;;  %9639 = vmatprep.subr.bf16.mxu1 %v23077_v24  ;;  %v23155_v23 = vld [vmem:[#allocation7 + $0x2a6c] ss:$16 sps:$4 sm:$0xff]   ;;  %v23150_v24 = vld [vmem:[#allocation7 + $0x2a60] ss:$16 sps:$4 sm:$0xff]  }
 0x187   :  { %8449 = vmatmul.mubr.bf16.gmra.mrb[12].mxu0 %v19215_v26  ;;  %9617 = vmatmul.mubr.bf16.gmra.mrb[12].mxu1 %v19215_v26  ;;  %v19186_v26 = vcombine.high %v1323_v17, %v1339_v18 }
 0x188   :  { %8472 = vmatpush1.bf16.msra.mxu0 %v23072_v28  ;;  %9640 = vmatpush1.bf16.msra.mxu1 %v23075_v29  ;;  %v23161_v28 = vld [vmem:[#allocation7 + $0x2a8c] ss:$16 sps:$4 sm:$0xff]   ;;  %v1355_v29 = vld [vmem:[#allocation5 + $0x320] sm:$0xff] }
 0x189   :  { %8473 = vmatprep.subr.bf16.mxu0 %v23080_v30  ;;  %9641 = vmatprep.subr.bf16.mxu1 %v23083_v31  ;;  %v1371_v30 = vld [vmem:[#allocation5 + $0x3a0] sm:$0x33]  ;;  %v19185_v31 = vcombine.low %v1323_v17, %v1339_v18  ;;  %v23225_v18 = vld [vmem:[#allocation7 + $0x2be8] ss:$16 sps:$4 sm:$0xff]  }
 0x18a   :  { %8491 = vmatprep.mubr.bf16.mxu0 %v19122_v32  ;;  %9659 = vmatprep.mubr.bf16.mxu1 %v19122_v32  ;;  %v23156_v32 = vld [vmem:[#allocation7 + $0x2a80] ss:$16 sps:$4 sm:$0xff]  }
 0x18b   :  { %v23222_v17 = vld [vmem:[#allocation7 + $0x2be0] ss:$16 sps:$4 sm:$0xff]  }
 0x18c   :  { %8474 = vmatpush1.bf16.msra.mxu0 %v23078_v33  ;;  %9642 = vmatpush1.bf16.msra.mxu1 %v23081_v34  ;;  %v23159_v33 = vld [vmem:[#allocation7 + $0x2a88] ss:$16 sps:$4 sm:$0xff]   ;;  %v23164_v34 = vld [vmem:[#allocation7 + $0x2aa4] ss:$16 sps:$4 sm:$0xff]  }
 0x18d   :  { %8475 = vmatprep.subr.bf16.mxu0 %v23086_v35  ;;  %9643 = vmatprep.subr.bf16.mxu1 %v23089_v36  ;;  %v23167_v35 = vld [vmem:[#allocation7 + $0x2aac] ss:$16 sps:$4 sm:$0xff]   ;;  %v23162_v36 = vld [vmem:[#allocation7 + $0x2aa0] ss:$16 sps:$4 sm:$0xff]  }
 0x190   :  { %8476 = vmatpush1.bf16.msra.mxu0 %v23084_v37  ;;  %9644 = vmatpush1.bf16.msra.mxu1 %v23087_v38  ;;  %v23165_v37 = vld [vmem:[#allocation7 + $0x2aa8] ss:$16 sps:$4 sm:$0xff]   ;;  %v19218_v38 = vcombine.high %v1355_v29, %v1371_v30 }
 0x191   :  { %8477 = vmatprep.subr.bf16.mxu0 %v23092_v39  ;;  %9645 = vmatprep.subr.bf16.mxu1 %v23095_v40  ;;  %v23170_v39 = vld [vmem:[#allocation7 + $0x2ac4] ss:$16 sps:$4 sm:$0xff]   ;;  %v23173_v40 = vld [vmem:[#allocation7 + $0x2acc] ss:$16 sps:$4 sm:$0xff]  }
 0x194   :  { %8478 = vmatpush1.bf16.msra.mxu0 %v23090_v41  ;;  %9646 = vmatpush1.bf16.msra.mxu1 %v23093_v42  ;;  %v26092_v41 = vld [vmem:[#allocation5 + $0x28] sm:$0xff] }
 0x195   :  { %8479 = vmatprep.subr.bf16.mxu0 %v23098_v43  ;;  %9647 = vmatprep.subr.bf16.mxu1 %v23101_v44  ;;  %v26094_v42 = vld [vmem:[#allocation5 + $0xa8] sm:$0xff]  ;;  %v19217_v43 = vcombine.low %v1355_v29, %v1371_v30  ;;  %v23168_v44 = vld [vmem:[#allocation7 + $0x2ac0] ss:$16 sps:$4 sm:$0xff]  }
 0x196   :  { %v23237_v29 = vld [vmem:[#allocation7 + $0x2c28] ss:$16 sps:$4 sm:$0xff]  }
 0x198   :  { %8480 = vmatpush1.bf16.msra.mxu0 %v23096_v45  ;;  %9648 = vmatpush1.bf16.msra.mxu1 %v23099_v46  ;;  %v23171_v45 = vld [vmem:[#allocation7 + $0x2ac8] ss:$16 sps:$4 sm:$0xff]   ;;  %v23176_v46 = vld [vmem:[#allocation7 + $0x2ae4] ss:$16 sps:$4 sm:$0xff]  }
 0x199   :  { %8481 = vmatprep.subr.bf16.mxu0 %v23104_v47  ;;  %9649 = vmatprep.subr.bf16.mxu1 %v23107_v48  ;;  %v23179_v47 = vld [vmem:[#allocation7 + $0x2aec] ss:$16 sps:$4 sm:$0xff]   ;;  %v19124_v48 = vcombine.high %v26092_v41, %v26094_v42 }
 0x19c   :  { %8482 = vmatpush1.bf16.msra.mxu0 %v23102_v49  ;;  %9650 = vmatpush1.bf16.msra.mxu1 %v23105_v50  ;;  %v23174_v49 = vld [vmem:[#allocation7 + $0x2ae0] ss:$16 sps:$4 sm:$0xff]   ;;  %v23177_v50 = vld [vmem:[#allocation7 + $0x2ae8] ss:$16 sps:$4 sm:$0xff]  }
 0x19d   :  { %8483 = vmatprep.subr.bf16.mxu0 %v23110_v51  ;;  %9651 = vmatprep.subr.bf16.mxu1 %v23113_v52  ;;  %v23182_v51 = vld [vmem:[#allocation7 + $0x2b04] ss:$16 sps:$4 sm:$0xff]   ;;  %v23185_v52 = vld [vmem:[#allocation7 + $0x2b0c] ss:$16 sps:$4 sm:$0xff]  }
 0x1a0   :  { %8484 = vmatpush1.bf16.msra.mxu0 %v23108_v53  ;;  %9652 = vmatpush1.bf16.msra.mxu1 %v23111_v54  ;;  %v23180_v53 = vld [vmem:[#allocation7 + $0x2b00] ss:$16 sps:$4 sm:$0xff]   ;;  %v23183_v54 = vld [vmem:[#allocation7 + $0x2b08] ss:$16 sps:$4 sm:$0xff]  }
 0x1a1   :  { %8485 = vmatprep.subr.bf16.mxu0 %v23116_v55  ;;  %9653 = vmatprep.subr.bf16.mxu1 %v23119_v56  ;;  %v23188_v55 = vld [vmem:[#allocation7 + $0x2b24] ss:$16 sps:$4 sm:$0xff]   ;;  %v23191_v56 = vld [vmem:[#allocation7 + $0x2b2c] ss:$16 sps:$4 sm:$0xff]  }
 0x1a4   :  { %8486 = vmatpush1.bf16.msra.mxu0 %v23114_v57  ;;  %9654 = vmatpush1.bf16.msra.mxu1 %v23117_v58  ;;  %v23186_v57 = vld [vmem:[#allocation7 + $0x2b20] ss:$16 sps:$4 sm:$0xff]   ;;  %v23189_v58 = vld [vmem:[#allocation7 + $0x2b28] ss:$16 sps:$4 sm:$0xff]  }
 0x1a5   :  { %8487 = vmatprep.subr.bf16.mxu0 %v23122_v59  ;;  %9655 = vmatprep.subr.bf16.mxu1 %v23125_v60  ;;  %v23194_v59 = vld [vmem:[#allocation7 + $0x2b44] ss:$16 sps:$4 sm:$0xff]   ;;  %v23197_v60 = vld [vmem:[#allocation7 + $0x2b4c] ss:$16 sps:$4 sm:$0xff]  }
 0x1a8   :  { %8488 = vmatpush1.bf16.msra.mxu0 %v23120_v61  ;;  %9656 = vmatpush1.bf16.msra.mxu1 %v23123_v62  ;;  %v23192_v61 = vld [vmem:[#allocation7 + $0x2b40] ss:$16 sps:$4 sm:$0xff]   ;;  %v23195_v62 = vld [vmem:[#allocation7 + $0x2b48] ss:$16 sps:$4 sm:$0xff]  }
 0x1a9   :  { %8489 = vmatprep.subr.bf16.mxu0 %v23128_v63  ;;  %9657 = vmatprep.subr.bf16.mxu1 %v23131_v0  ;;  %v23200_v63 = vld [vmem:[#allocation7 + $0x2b64] ss:$16 sps:$4 sm:$0xff]   ;;  %v23203_v0 = vld [vmem:[#allocation7 + $0x2b6c] ss:$16 sps:$4 sm:$0xff]  }
 0x1ac   :  { %8490 = vmatpush1.bf16.msra.mxu0 %v23126_v1  ;;  %9658 = vmatpush1.bf16.msra.mxu1 %v23129_v2  ;;  %v23198_v1 = vld [vmem:[#allocation7 + $0x2b60] ss:$16 sps:$4 sm:$0xff]   ;;  %v23201_v2 = vld [vmem:[#allocation7 + $0x2b68] ss:$16 sps:$4 sm:$0xff]  }
 0x1ad   :  { %8532 = vmatprep.subr.bf16.mxu0 %v23134_v3  ;;  %9700 = vmatprep.subr.bf16.mxu1 %v23137_v4  ;;  %v23206_v3 = vld [vmem:[#allocation7 + $0x2b84] ss:$16 sps:$4 sm:$0xff]   ;;  %v23209_v4 = vld [vmem:[#allocation7 + $0x2b8c] ss:$16 sps:$4 sm:$0xff]  }
 0x1af   :  { %8492 = vmatmul.mubr.bf16.vlgmr.msra.gmra.mrb[0].mxu0 %v19121_v7  ;;  %9660 = vmatmul.mubr.bf16.vlgmr.msra.gmra.mrb[0].mxu1 %v19121_v7  ;;  %v23212_v7 = vld [vmem:[#allocation7 + $0x2ba4] ss:$16 sps:$4 sm:$0xff]  }
 0x1b0   :  { %8533 = vmatpush1.bf16.msra.mxu0 %v23132_v8  ;;  %9701 = vmatpush1.bf16.msra.mxu1 %v23135_v9  ;;  %v23215_v8 = vld [vmem:[#allocation7 + $0x2bac] ss:$16 sps:$4 sm:$0xff]   ;;  %v23210_v9 = vld [vmem:[#allocation7 + $0x2ba0] ss:$16 sps:$4 sm:$0xff]  }
 0x1b1   :  { %8534 = vmatprep.subr.bf16.mxu0 %v23140_v10  ;;  %9702 = vmatprep.subr.bf16.mxu1 %v23143_v11  ;;  %v23213_v10 = vld [vmem:[#allocation7 + $0x2ba8] ss:$16 sps:$4 sm:$0xff]   ;;  %v23218_v11 = vld [vmem:[#allocation7 + $0x2bc4] ss:$16 sps:$4 sm:$0xff]  }
 0x1b2   :  { %8501 = vmatprep.mubr.bf16.mxu0 %v19154_v14  ;;  %9669 = vmatprep.mubr.bf16.mxu1 %v19154_v14  ;;  %v23219_v14 = vld [vmem:[#allocation7 + $0x2bc8] ss:$16 sps:$4 sm:$0xff]  }
 0x1b4   :  { %8535 = vmatpush1.bf16.msra.mxu0 %v23138_v12  ;;  %9703 = vmatpush1.bf16.msra.mxu1 %v23141_v13  ;;  %v23221_v12 = vld [vmem:[#allocation7 + $0x2bcc] ss:$16 sps:$4 sm:$0xff]   ;;  %v23216_v13 = vld [vmem:[#allocation7 + $0x2bc0] ss:$16 sps:$4 sm:$0xff]  }
 0x1b5   :  { %8536 = vmatprep.subr.bf16.mxu0 %v23146_v15  ;;  %9704 = vmatprep.subr.bf16.mxu1 %v23149_v16  ;;  %v23224_v15 = vld [vmem:[#allocation7 + $0x2be4] ss:$16 sps:$4 sm:$0xff]   ;;  %v23227_v16 = vld [vmem:[#allocation7 + $0x2bec] ss:$16 sps:$4 sm:$0xff]  }
 0x1b7   :  { %8502 = vmatmul.mubr.bf16.gmra.mrb[4].mxu0 %v19153_v19  ;;  %9670 = vmatmul.mubr.bf16.gmra.mrb[4].mxu1 %v19153_v19  ;;  %v23230_v19 = vld [vmem:[#allocation7 + $0x2c04] ss:$16 sps:$4 sm:$0xff]  }
 0x1b8   :  { %8537 = vmatpush1.bf16.msra.mxu0 %v23144_v20  ;;  %9705 = vmatpush1.bf16.msra.mxu1 %v23147_v21  ;;  %v23233_v20 = vld [vmem:[#allocation7 + $0x2c0c] ss:$16 sps:$4 sm:$0xff]  }
 0x1b9   :  { %8538 = vmatprep.subr.bf16.mxu0 %v23152_v22  ;;  %9706 = vmatprep.subr.bf16.mxu1 %v23155_v23  ;;  %v1292_v21 = vld [vmem:[#allocation5 + $0x128] sm:$0xff]  ;;  %v19123_v23 = vcombine.low %v26092_v41, %v26094_v42 }
 0x1ba   :  { %8511 = vmatprep.mubr.bf16.mxu0 %v19186_v26  ;;  %9679 = vmatprep.mubr.bf16.mxu1 %v19186_v26  ;;  %v1308_v22 = vld [vmem:[#allocation5 + $0x1a8] sm:$0xff]  ;;  %v23236_v26 = vld [vmem:[#allocation7 + $0x2c24] ss:$16 sps:$4 sm:$0xff]  }
 0x1bb   :  { %v19156_v30 = vcombine.high %v1292_v21, %v1308_v22  ;;  %v23249_v41 = vld [vmem:[#allocation7 + $0x2c68] ss:$16 sps:$4 sm:$0xff]  }
 0x1bc   :  { %8539 = vmatpush1.bf16.msra.mxu0 %v23150_v24  ;;  %9707 = vmatpush1.bf16.msra.mxu1 %v23153_v25  ;;  %v23228_v24 = vld [vmem:[#allocation7 + $0x2c00] ss:$16 sps:$4 sm:$0xff]   ;;  %v23231_v25 = vld [vmem:[#allocation7 + $0x2c08] ss:$16 sps:$4 sm:$0xff]  }
 0x1bd   :  { %8540 = vmatprep.subr.bf16.mxu0 %v23158_v27  ;;  %9708 = vmatprep.subr.bf16.mxu1 %v23161_v28  ;;  %v23239_v27 = vld [vmem:[#allocation7 + $0x2c2c] ss:$16 sps:$4 sm:$0xff]   ;;  %v23234_v28 = vld [vmem:[#allocation7 + $0x2c20] ss:$16 sps:$4 sm:$0xff]  }
 0x1bf   :  { %8512 = vmatmul.mubr.bf16.gmra.mrb[8].mxu0 %v19185_v31  ;;  %9680 = vmatmul.mubr.bf16.gmra.mrb[8].mxu1 %v19185_v31  ;;  %v23242_v31 = vld [vmem:[#allocation7 + $0x2c44] ss:$16 sps:$4 sm:$0xff]  }
 0x1c0   :  { %8541 = vmatpush1.bf16.msra.mxu0 %v23156_v32  ;;  %9709 = vmatpush1.bf16.msra.mxu1 %v23159_v33  ;;  %v23245_v32 = vld [vmem:[#allocation7 + $0x2c4c] ss:$16 sps:$4 sm:$0xff]  }
 0x1c1   :  { %8542 = vmatprep.subr.bf16.mxu0 %v23164_v34  ;;  %9710 = vmatprep.subr.bf16.mxu1 %v23167_v35  ;;  %v1324_v33 = vld [vmem:[#allocation5 + $0x228] sm:$0xff]  ;;  %v19155_v35 = vcombine.low %v1292_v21, %v1308_v22  ;;  %v23300_v21 = vld [vmem:[#allocation7 + $0x2d80] ss:$16 sps:$4 sm:$0xff]  }
 0x1c2   :  { %8521 = vmatprep.mubr.bf16.mxu0 %v19218_v38  ;;  %9689 = vmatprep.mubr.bf16.mxu1 %v19218_v38  ;;  %v1340_v34 = vld [vmem:[#allocation5 + $0x2a8] sm:$0xff]  ;;  %v23248_v38 = vld [vmem:[#allocation7 + $0x2c64] ss:$16 sps:$4 sm:$0xff]  }
 0x1c3   :  { %v19188_v42 = vcombine.high %v1324_v33, %v1340_v34  ;;  %v23303_v22 = vld [vmem:[#allocation7 + $0x2d88] ss:$16 sps:$4 sm:$0xff]  }
 0x1c4   :  { %8543 = vmatpush1.bf16.msra.mxu0 %v23162_v36  ;;  %9711 = vmatpush1.bf16.msra.mxu1 %v23165_v37  ;;  %v23240_v36 = vld [vmem:[#allocation7 + $0x2c40] ss:$16 sps:$4 sm:$0xff]   ;;  %v23243_v37 = vld [vmem:[#allocation7 + $0x2c48] ss:$16 sps:$4 sm:$0xff]  }
 0x1c5   :  { %8544 = vmatprep.subr.bf16.mxu0 %v23170_v39  ;;  %9712 = vmatprep.subr.bf16.mxu1 %v23173_v40  ;;  %v23251_v39 = vld [vmem:[#allocation7 + $0x2c6c] ss:$16 sps:$4 sm:$0xff]   ;;  %v23246_v40 = vld [vmem:[#allocation7 + $0x2c60] ss:$16 sps:$4 sm:$0xff]  }
 0x1c7   :  { %8522 = vmatmul.mubr.bf16.gmra.mrb[12].mxu0 %v19217_v43  ;;  %9690 = vmatmul.mubr.bf16.gmra.mrb[12].mxu1 %v19217_v43  ;;  %v23254_v43 = vld [vmem:[#allocation7 + $0x2c84] ss:$16 sps:$4 sm:$0xff]  }
 0x1c8   :  { %8545 = vmatpush1.bf16.msra.mxu0 %v23168_v44  ;;  %9713 = vmatpush1.bf16.msra.mxu1 %v23171_v45  ;;  %v23257_v44 = vld [vmem:[#allocation7 + $0x2c8c] ss:$16 sps:$4 sm:$0xff]  }
 0x1c9   :  { %8546 = vmatprep.subr.bf16.mxu0 %v23176_v46  ;;  %9714 = vmatprep.subr.bf16.mxu1 %v23179_v47  ;;  %v1356_v45 = vld [vmem:[#allocation5 + $0x328] sm:$0xff]  ;;  %v19187_v47 = vcombine.low %v1324_v33, %v1340_v34  ;;  %v23318_v33 = vld [vmem:[#allocation7 + $0x2de0] ss:$16 sps:$4 sm:$0xff]  }
 0x1ca   :  { %8564 = vmatprep.mubr.bf16.mxu0 %v19124_v48  ;;  %9732 = vmatprep.mubr.bf16.mxu1 %v19124_v48  ;;  %v1372_v46 = vld [vmem:[#allocation5 + $0x3a8] sm:$0x33]  ;;  %v23252_v48 = vld [vmem:[#allocation7 + $0x2c80] ss:$16 sps:$4 sm:$0xff]  }
 0x1cb   :  { %v23321_v34 = vld [vmem:[#allocation7 + $0x2de8] ss:$16 sps:$4 sm:$0xff]  }
 0x1cc   :  { %8547 = vmatpush1.bf16.msra.mxu0 %v23174_v49  ;;  %9715 = vmatpush1.bf16.msra.mxu1 %v23177_v50  ;;  %v23255_v49 = vld [vmem:[#allocation7 + $0x2c88] ss:$16 sps:$4 sm:$0xff]   ;;  %v23260_v50 = vld [vmem:[#allocation7 + $0x2ca4] ss:$16 sps:$4 sm:$0xff]  }
 0x1cd   :  { %8548 = vmatprep.subr.bf16.mxu0 %v23182_v51  ;;  %9716 = vmatprep.subr.bf16.mxu1 %v23185_v52  ;;  %v23263_v51 = vld [vmem:[#allocation7 + $0x2cac] ss:$16 sps:$4 sm:$0xff]   ;;  %v23258_v52 = vld [vmem:[#allocation7 + $0x2ca0] ss:$16 sps:$4 sm:$0xff]  }
 0x1d0   :  { %8549 = vmatpush1.bf16.msra.mxu0 %v23180_v53  ;;  %9717 = vmatpush1.bf16.msra.mxu1 %v23183_v54  ;;  %v23261_v53 = vld [vmem:[#allocation7 + $0x2ca8] ss:$16 sps:$4 sm:$0xff]   ;;  %v19220_v54 = vcombine.high %v1356_v45, %v1372_v46 }
 0x1d1   :  { %8550 = vmatprep.subr.bf16.mxu0 %v23188_v55  ;;  %9718 = vmatprep.subr.bf16.mxu1 %v23191_v56  ;;  %v23266_v55 = vld [vmem:[#allocation7 + $0x2cc4] ss:$16 sps:$4 sm:$0xff]   ;;  %v23269_v56 = vld [vmem:[#allocation7 + $0x2ccc] ss:$16 sps:$4 sm:$0xff]  }
 0x1d4   :  { %8551 = vmatpush1.bf16.msra.mxu0 %v23186_v57  ;;  %9719 = vmatpush1.bf16.msra.mxu1 %v23189_v58  ;;  %v26100_v57 = vld [vmem:[#allocation5 + $0x30] sm:$0xff] }
 0x1d5   :  { %8552 = vmatprep.subr.bf16.mxu0 %v23194_v59  ;;  %9720 = vmatprep.subr.bf16.mxu1 %v23197_v60  ;;  %v26102_v58 = vld [vmem:[#allocation5 + $0xb0] sm:$0xff]  ;;  %v19219_v59 = vcombine.low %v1356_v45, %v1372_v46  ;;  %v23333_v45 = vld [vmem:[#allocation7 + $0x2e28] ss:$16 sps:$4 sm:$0xff]  }
 0x1d6   :  { %v23264_v60 = vld [vmem:[#allocation7 + $0x2cc0] ss:$16 sps:$4 sm:$0xff]  }
 0x1d8   :  { %8553 = vmatpush1.bf16.msra.mxu0 %v23192_v61  ;;  %9721 = vmatpush1.bf16.msra.mxu1 %v23195_v62  ;;  %v23267_v61 = vld [vmem:[#allocation7 + $0x2cc8] ss:$16 sps:$4 sm:$0xff]   ;;  %v23272_v62 = vld [vmem:[#allocation7 + $0x2ce4] ss:$16 sps:$4 sm:$0xff]  }
 0x1d9   :  { %8554 = vmatprep.subr.bf16.mxu0 %v23200_v63  ;;  %9722 = vmatprep.subr.bf16.mxu1 %v23203_v0  ;;  %v23275_v63 = vld [vmem:[#allocation7 + $0x2cec] ss:$16 sps:$4 sm:$0xff]   ;;  %v19126_v0 = vcombine.high %v26100_v57, %v26102_v58 }
 0x1dc   :  { %8555 = vmatpush1.bf16.msra.mxu0 %v23198_v1  ;;  %9723 = vmatpush1.bf16.msra.mxu1 %v23201_v2  ;;  %v23270_v1 = vld [vmem:[#allocation7 + $0x2ce0] ss:$16 sps:$4 sm:$0xff]   ;;  %v23273_v2 = vld [vmem:[#allocation7 + $0x2ce8] ss:$16 sps:$4 sm:$0xff]  }
 0x1dd   :  { %8556 = vmatprep.subr.bf16.mxu0 %v23206_v3  ;;  %9724 = vmatprep.subr.bf16.mxu1 %v23209_v4  ;;  %v23278_v3 = vld [vmem:[#allocation7 + $0x2d04] ss:$16 sps:$4 sm:$0xff]   ;;  %v23281_v4 = vld [vmem:[#allocation7 + $0x2d0c] ss:$16 sps:$4 sm:$0xff]  }
 0x1e0   :  { %8557 = vmatpush1.bf16.msra.mxu0 %v23204_v5  ;;  %9725 = vmatpush1.bf16.msra.mxu1 %v23207_v6  ;;  %v23276_v5 = vld [vmem:[#allocation7 + $0x2d00] ss:$16 sps:$4 sm:$0xff]   ;;  %v23279_v6 = vld [vmem:[#allocation7 + $0x2d08] ss:$16 sps:$4 sm:$0xff]  }
 0x1e1   :  { %8558 = vmatprep.subr.bf16.mxu0 %v23212_v7  ;;  %9726 = vmatprep.subr.bf16.mxu1 %v23215_v8  ;;  %v23284_v7 = vld [vmem:[#allocation7 + $0x2d24] ss:$16 sps:$4 sm:$0xff]   ;;  %v23287_v8 = vld [vmem:[#allocation7 + $0x2d2c] ss:$16 sps:$4 sm:$0xff]  }
 0x1e4   :  { %8559 = vmatpush1.bf16.msra.mxu0 %v23210_v9  ;;  %9727 = vmatpush1.bf16.msra.mxu1 %v23213_v10  ;;  %v23282_v9 = vld [vmem:[#allocation7 + $0x2d20] ss:$16 sps:$4 sm:$0xff]   ;;  %v23285_v10 = vld [vmem:[#allocation7 + $0x2d28] ss:$16 sps:$4 sm:$0xff]  }
 0x1e5   :  { %8560 = vmatprep.subr.bf16.mxu0 %v23218_v11  ;;  %9728 = vmatprep.subr.bf16.mxu1 %v23221_v12  ;;  %v23290_v11 = vld [vmem:[#allocation7 + $0x2d44] ss:$16 sps:$4 sm:$0xff]   ;;  %v23293_v12 = vld [vmem:[#allocation7 + $0x2d4c] ss:$16 sps:$4 sm:$0xff]  }
 0x1e8   :  { %8561 = vmatpush1.bf16.msra.mxu0 %v23216_v13  ;;  %9729 = vmatpush1.bf16.msra.mxu1 %v23219_v14  ;;  %v23288_v13 = vld [vmem:[#allocation7 + $0x2d40] ss:$16 sps:$4 sm:$0xff]   ;;  %v23291_v14 = vld [vmem:[#allocation7 + $0x2d48] ss:$16 sps:$4 sm:$0xff]  }
 0x1e9   :  { %8562 = vmatprep.subr.bf16.mxu0 %v23224_v15  ;;  %9730 = vmatprep.subr.bf16.mxu1 %v23227_v16  ;;  %v23296_v15 = vld [vmem:[#allocation7 + $0x2d64] ss:$16 sps:$4 sm:$0xff]   ;;  %v23299_v16 = vld [vmem:[#allocation7 + $0x2d6c] ss:$16 sps:$4 sm:$0xff]  }
 0x1ec   :  { %8563 = vmatpush1.bf16.msra.mxu0 %v23222_v17  ;;  %9731 = vmatpush1.bf16.msra.mxu1 %v23225_v18  ;;  %v23294_v17 = vld [vmem:[#allocation7 + $0x2d60] ss:$16 sps:$4 sm:$0xff]   ;;  %v23297_v18 = vld [vmem:[#allocation7 + $0x2d68] ss:$16 sps:$4 sm:$0xff]  }
 0x1ed   :  { %8605 = vmatprep.subr.bf16.mxu0 %v23230_v19  ;;  %9773 = vmatprep.subr.bf16.mxu1 %v23233_v20  ;;  %v23302_v19 = vld [vmem:[#allocation7 + $0x2d84] ss:$16 sps:$4 sm:$0xff]   ;;  %v23305_v20 = vld [vmem:[#allocation7 + $0x2d8c] ss:$16 sps:$4 sm:$0xff]  }
 0x1ef   :  { %8565 = vmatmul.mubr.bf16.vlgmr.msra.gmra.mrb[0].mxu0 %v19123_v23  ;;  %9733 = vmatmul.mubr.bf16.vlgmr.msra.gmra.mrb[0].mxu1 %v19123_v23  ;;  %v23308_v23 = vld [vmem:[#allocation7 + $0x2da4] ss:$16 sps:$4 sm:$0xff]  }
 0x1f0   :  { %8606 = vmatpush1.bf16.msra.mxu0 %v23228_v24  ;;  %9774 = vmatpush1.bf16.msra.mxu1 %v23231_v25  ;;  %v23311_v24 = vld [vmem:[#allocation7 + $0x2dac] ss:$16 sps:$4 sm:$0xff]   ;;  %v23306_v25 = vld [vmem:[#allocation7 + $0x2da0] ss:$16 sps:$4 sm:$0xff]  }
 0x1f1   :  { %8607 = vmatprep.subr.bf16.mxu0 %v23236_v26  ;;  %9775 = vmatprep.subr.bf16.mxu1 %v23239_v27  ;;  %v23309_v26 = vld [vmem:[#allocation7 + $0x2da8] ss:$16 sps:$4 sm:$0xff]   ;;  %v23314_v27 = vld [vmem:[#allocation7 + $0x2dc4] ss:$16 sps:$4 sm:$0xff]  }
 0x1f2   :  { %8574 = vmatprep.mubr.bf16.mxu0 %v19156_v30  ;;  %9742 = vmatprep.mubr.bf16.mxu1 %v19156_v30  ;;  %v23315_v30 = vld [vmem:[#allocation7 + $0x2dc8] ss:$16 sps:$4 sm:$0xff]  }
 0x1f4   :  { %8608 = vmatpush1.bf16.msra.mxu0 %v23234_v28  ;;  %9776 = vmatpush1.bf16.msra.mxu1 %v23237_v29  ;;  %v23317_v28 = vld [vmem:[#allocation7 + $0x2dcc] ss:$16 sps:$4 sm:$0xff]   ;;  %v23312_v29 = vld [vmem:[#allocation7 + $0x2dc0] ss:$16 sps:$4 sm:$0xff]  }
 0x1f5   :  { %8609 = vmatprep.subr.bf16.mxu0 %v23242_v31  ;;  %9777 = vmatprep.subr.bf16.mxu1 %v23245_v32  ;;  %v23320_v31 = vld [vmem:[#allocation7 + $0x2de4] ss:$16 sps:$4 sm:$0xff]   ;;  %v23323_v32 = vld [vmem:[#allocation7 + $0x2dec] ss:$16 sps:$4 sm:$0xff]  }
 0x1f7   :  { %8575 = vmatmul.mubr.bf16.gmra.mrb[4].mxu0 %v19155_v35  ;;  %9743 = vmatmul.mubr.bf16.gmra.mrb[4].mxu1 %v19155_v35  ;;  %v23326_v35 = vld [vmem:[#allocation7 + $0x2e04] ss:$16 sps:$4 sm:$0xff]  }
 0x1f8   :  { %8610 = vmatpush1.bf16.msra.mxu0 %v23240_v36  ;;  %9778 = vmatpush1.bf16.msra.mxu1 %v23243_v37  ;;  %v23329_v36 = vld [vmem:[#allocation7 + $0x2e0c] ss:$16 sps:$4 sm:$0xff]   ;;  %v1293_v37 = vld [vmem:[#allocation5 + $0x130] sm:$0xff] }
 0x1f9   :  { %8611 = vmatprep.subr.bf16.mxu0 %v23248_v38  ;;  %9779 = vmatprep.subr.bf16.mxu1 %v23251_v39  ;;  %v1309_v38 = vld [vmem:[#allocation5 + $0x1b0] sm:$0xff]  ;;  %v19125_v39 = vcombine.low %v26100_v57, %v26102_v58  ;;  %v23345_v57 = vld [vmem:[#allocation7 + $0x2e68] ss:$16 sps:$4 sm:$0xff]  }
 0x1fa   :  { %8584 = vmatprep.mubr.bf16.mxu0 %v19188_v42  ;;  %9752 = vmatprep.mubr.bf16.mxu1 %v19188_v42  ;;  %v23332_v42 = vld [vmem:[#allocation7 + $0x2e24] ss:$16 sps:$4 sm:$0xff]   ;;  %v19158_v46 = vcombine.high %v1293_v37, %v1309_v38 }
 0x1fc   :  { %8612 = vmatpush1.bf16.msra.mxu0 %v23246_v40  ;;  %9780 = vmatpush1.bf16.msra.mxu1 %v23249_v41  ;;  %v23324_v40 = vld [vmem:[#allocation7 + $0x2e00] ss:$16 sps:$4 sm:$0xff]   ;;  %v23327_v41 = vld [vmem:[#allocation7 + $0x2e08] ss:$16 sps:$4 sm:$0xff]  }
 0x1fd   :  { %8613 = vmatprep.subr.bf16.mxu0 %v23254_v43  ;;  %9781 = vmatprep.subr.bf16.mxu1 %v23257_v44  ;;  %v23335_v43 = vld [vmem:[#allocation7 + $0x2e2c] ss:$16 sps:$4 sm:$0xff]   ;;  %v23330_v44 = vld [vmem:[#allocation7 + $0x2e20] ss:$16 sps:$4 sm:$0xff]  }
 0x1ff   :  { %8585 = vmatmul.mubr.bf16.gmra.mrb[8].mxu0 %v19187_v47  ;;  %9753 = vmatmul.mubr.bf16.gmra.mrb[8].mxu1 %v19187_v47  ;;  %v23338_v47 = vld [vmem:[#allocation7 + $0x2e44] ss:$16 sps:$4 sm:$0xff]  }
 0x200   :  { %8614 = vmatpush1.bf16.msra.mxu0 %v23252_v48  ;;  %9782 = vmatpush1.bf16.msra.mxu1 %v23255_v49  ;;  %v23341_v48 = vld [vmem:[#allocation7 + $0x2e4c] ss:$16 sps:$4 sm:$0xff]   ;;  %v1325_v49 = vld [vmem:[#allocation5 + $0x230] sm:$0xff] }
 0x201   :  { %8615 = vmatprep.subr.bf16.mxu0 %v23260_v50  ;;  %9783 = vmatprep.subr.bf16.mxu1 %v23263_v51  ;;  %v1341_v50 = vld [vmem:[#allocation5 + $0x2b0] sm:$0xff]  ;;  %v19157_v51 = vcombine.low %v1293_v37, %v1309_v38  ;;  %v23399_v38 = vld [vmem:[#allocation7 + $0x2f88] ss:$16 sps:$4 sm:$0xff]  }
 0x202   :  { %8594 = vmatprep.mubr.bf16.mxu0 %v19220_v54  ;;  %9762 = vmatprep.mubr.bf16.mxu1 %v19220_v54  ;;  %v23344_v54 = vld [vmem:[#allocation7 + $0x2e64] ss:$16 sps:$4 sm:$0xff]   ;;  %v19190_v58 = vcombine.high %v1325_v49, %v1341_v50  ;;  %v23396_v37 = vld [vmem:[#allocation7 + $0x2f80] ss:$16 sps:$4 sm:$0xff]  }
 0x204   :  { %8616 = vmatpush1.bf16.msra.mxu0 %v23258_v52  ;;  %9784 = vmatpush1.bf16.msra.mxu1 %v23261_v53  ;;  %v23336_v52 = vld [vmem:[#allocation7 + $0x2e40] ss:$16 sps:$4 sm:$0xff]   ;;  %v23339_v53 = vld [vmem:[#allocation7 + $0x2e48] ss:$16 sps:$4 sm:$0xff]  }
 0x205   :  { %8617 = vmatprep.subr.bf16.mxu0 %v23266_v55  ;;  %9785 = vmatprep.subr.bf16.mxu1 %v23269_v56  ;;  %v23347_v55 = vld [vmem:[#allocation7 + $0x2e6c] ss:$16 sps:$4 sm:$0xff]   ;;  %v23342_v56 = vld [vmem:[#allocation7 + $0x2e60] ss:$16 sps:$4 sm:$0xff]  }
 0x207   :  { %8595 = vmatmul.mubr.bf16.gmra.mrb[12].mxu0 %v19219_v59  ;;  %9763 = vmatmul.mubr.bf16.gmra.mrb[12].mxu1 %v19219_v59  ;;  %v23350_v59 = vld [vmem:[#allocation7 + $0x2e84] ss:$16 sps:$4 sm:$0xff]  }
 0x208   :  { %8618 = vmatpush1.bf16.msra.mxu0 %v23264_v60  ;;  %9786 = vmatpush1.bf16.msra.mxu1 %v23267_v61  ;;  %v23353_v60 = vld [vmem:[#allocation7 + $0x2e8c] ss:$16 sps:$4 sm:$0xff]   ;;  %v1357_v61 = vld [vmem:[#allocation5 + $0x330] sm:$0xff] }
 0x209   :  { %8619 = vmatprep.subr.bf16.mxu0 %v23272_v62  ;;  %9787 = vmatprep.subr.bf16.mxu1 %v23275_v63  ;;  %v1373_v62 = vld [vmem:[#allocation5 + $0x3b0] sm:$0x33]  ;;  %v19189_v63 = vcombine.low %v1325_v49, %v1341_v50  ;;  %v23417_v50 = vld [vmem:[#allocation7 + $0x2fe8] ss:$16 sps:$4 sm:$0xff]  }
 0x20a   :  { %8637 = vmatprep.mubr.bf16.mxu0 %v19126_v0  ;;  %9805 = vmatprep.mubr.bf16.mxu1 %v19126_v0  ;;  %v23348_v0 = vld [vmem:[#allocation7 + $0x2e80] ss:$16 sps:$4 sm:$0xff]  }
 0x20b   :  { %v23414_v49 = vld [vmem:[#allocation7 + $0x2fe0] ss:$16 sps:$4 sm:$0xff]  }
 0x20c   :  { %8620 = vmatpush1.bf16.msra.mxu0 %v23270_v1  ;;  %9788 = vmatpush1.bf16.msra.mxu1 %v23273_v2  ;;  %v23351_v1 = vld [vmem:[#allocation7 + $0x2e88] ss:$16 sps:$4 sm:$0xff]   ;;  %v23356_v2 = vld [vmem:[#allocation7 + $0x2ea4] ss:$16 sps:$4 sm:$0xff]  }
 0x20d   :  { %8621 = vmatprep.subr.bf16.mxu0 %v23278_v3  ;;  %9789 = vmatprep.subr.bf16.mxu1 %v23281_v4  ;;  %v23359_v3 = vld [vmem:[#allocation7 + $0x2eac] ss:$16 sps:$4 sm:$0xff]   ;;  %v23354_v4 = vld [vmem:[#allocation7 + $0x2ea0] ss:$16 sps:$4 sm:$0xff]  }
 0x210   :  { %8622 = vmatpush1.bf16.msra.mxu0 %v23276_v5  ;;  %9790 = vmatpush1.bf16.msra.mxu1 %v23279_v6  ;;  %v23357_v5 = vld [vmem:[#allocation7 + $0x2ea8] ss:$16 sps:$4 sm:$0xff]   ;;  %v19222_v6 = vcombine.high %v1357_v61, %v1373_v62 }
 0x211   :  { %8623 = vmatprep.subr.bf16.mxu0 %v23284_v7  ;;  %9791 = vmatprep.subr.bf16.mxu1 %v23287_v8  ;;  %v23362_v7 = vld [vmem:[#allocation7 + $0x2ec4] ss:$16 sps:$4 sm:$0xff]   ;;  %v23365_v8 = vld [vmem:[#allocation7 + $0x2ecc] ss:$16 sps:$4 sm:$0xff]  }
 0x214   :  { %8624 = vmatpush1.bf16.msra.mxu0 %v23282_v9  ;;  %9792 = vmatpush1.bf16.msra.mxu1 %v23285_v10  ;;  %v26108_v9 = vld [vmem:[#allocation5 + $0x38] sm:$0xff] }
 0x215   :  { %8625 = vmatprep.subr.bf16.mxu0 %v23290_v11  ;;  %9793 = vmatprep.subr.bf16.mxu1 %v23293_v12  ;;  %v26110_v10 = vld [vmem:[#allocation5 + $0xb8] sm:$0xff]  ;;  %v19221_v11 = vcombine.low %v1357_v61, %v1373_v62  ;;  %v23360_v12 = vld [vmem:[#allocation7 + $0x2ec0] ss:$16 sps:$4 sm:$0xff]  }
 0x216   :  { %v23429_v61 = vld [vmem:[#allocation7 + $0x3028] ss:$16 sps:$4 sm:$0xff]  }
 0x218   :  { %8626 = vmatpush1.bf16.msra.mxu0 %v23288_v13  ;;  %9794 = vmatpush1.bf16.msra.mxu1 %v23291_v14  ;;  %v23363_v13 = vld [vmem:[#allocation7 + $0x2ec8] ss:$16 sps:$4 sm:$0xff]   ;;  %v23368_v14 = vld [vmem:[#allocation7 + $0x2ee4] ss:$16 sps:$4 sm:$0xff]  }
 0x219   :  { %8627 = vmatprep.subr.bf16.mxu0 %v23296_v15  ;;  %9795 = vmatprep.subr.bf16.mxu1 %v23299_v16  ;;  %v23371_v15 = vld [vmem:[#allocation7 + $0x2eec] ss:$16 sps:$4 sm:$0xff]   ;;  %v19128_v16 = vcombine.high %v26108_v9, %v26110_v10 }
 0x21c   :  { %8628 = vmatpush1.bf16.msra.mxu0 %v23294_v17  ;;  %9796 = vmatpush1.bf16.msra.mxu1 %v23297_v18  ;;  %v23366_v17 = vld [vmem:[#allocation7 + $0x2ee0] ss:$16 sps:$4 sm:$0xff]   ;;  %v23369_v18 = vld [vmem:[#allocation7 + $0x2ee8] ss:$16 sps:$4 sm:$0xff]  }
 0x21d   :  { %8629 = vmatprep.subr.bf16.mxu0 %v23302_v19  ;;  %9797 = vmatprep.subr.bf16.mxu1 %v23305_v20  ;;  %v23374_v19 = vld [vmem:[#allocation7 + $0x2f04] ss:$16 sps:$4 sm:$0xff]   ;;  %v23377_v20 = vld [vmem:[#allocation7 + $0x2f0c] ss:$16 sps:$4 sm:$0xff]  }
 0x220   :  { %8630 = vmatpush1.bf16.msra.mxu0 %v23300_v21  ;;  %9798 = vmatpush1.bf16.msra.mxu1 %v23303_v22  ;;  %v23372_v21 = vld [vmem:[#allocation7 + $0x2f00] ss:$16 sps:$4 sm:$0xff]   ;;  %v23375_v22 = vld [vmem:[#allocation7 + $0x2f08] ss:$16 sps:$4 sm:$0xff]  }
 0x221   :  { %8631 = vmatprep.subr.bf16.mxu0 %v23308_v23  ;;  %9799 = vmatprep.subr.bf16.mxu1 %v23311_v24  ;;  %v23380_v23 = vld [vmem:[#allocation7 + $0x2f24] ss:$16 sps:$4 sm:$0xff]   ;;  %v23383_v24 = vld [vmem:[#allocation7 + $0x2f2c] ss:$16 sps:$4 sm:$0xff]  }
 0x224   :  { %8632 = vmatpush1.bf16.msra.mxu0 %v23306_v25  ;;  %9800 = vmatpush1.bf16.msra.mxu1 %v23309_v26  ;;  %v23378_v25 = vld [vmem:[#allocation7 + $0x2f20] ss:$16 sps:$4 sm:$0xff]   ;;  %v23381_v26 = vld [vmem:[#allocation7 + $0x2f28] ss:$16 sps:$4 sm:$0xff]  }
 0x225   :  { %8633 = vmatprep.subr.bf16.mxu0 %v23314_v27  ;;  %9801 = vmatprep.subr.bf16.mxu1 %v23317_v28  ;;  %v23386_v27 = vld [vmem:[#allocation7 + $0x2f44] ss:$16 sps:$4 sm:$0xff]   ;;  %v23389_v28 = vld [vmem:[#allocation7 + $0x2f4c] ss:$16 sps:$4 sm:$0xff]  }
 0x228   :  { %8634 = vmatpush1.bf16.msra.mxu0 %v23312_v29  ;;  %9802 = vmatpush1.bf16.msra.mxu1 %v23315_v30  ;;  %v23384_v29 = vld [vmem:[#allocation7 + $0x2f40] ss:$16 sps:$4 sm:$0xff]   ;;  %v23387_v30 = vld [vmem:[#allocation7 + $0x2f48] ss:$16 sps:$4 sm:$0xff]  }
 0x229   :  { %8635 = vmatprep.subr.bf16.mxu0 %v23320_v31  ;;  %9803 = vmatprep.subr.bf16.mxu1 %v23323_v32  ;;  %v23392_v31 = vld [vmem:[#allocation7 + $0x2f64] ss:$16 sps:$4 sm:$0xff]   ;;  %v23395_v32 = vld [vmem:[#allocation7 + $0x2f6c] ss:$16 sps:$4 sm:$0xff]  }
 0x22c   :  { %8636 = vmatpush1.bf16.msra.mxu0 %v23318_v33  ;;  %9804 = vmatpush1.bf16.msra.mxu1 %v23321_v34  ;;  %v23390_v33 = vld [vmem:[#allocation7 + $0x2f60] ss:$16 sps:$4 sm:$0xff]   ;;  %v23393_v34 = vld [vmem:[#allocation7 + $0x2f68] ss:$16 sps:$4 sm:$0xff]  }
 0x22d   :  { %8678 = vmatprep.subr.bf16.mxu0 %v23326_v35  ;;  %9846 = vmatprep.subr.bf16.mxu1 %v23329_v36  ;;  %v23398_v35 = vld [vmem:[#allocation7 + $0x2f84] ss:$16 sps:$4 sm:$0xff]   ;;  %v23401_v36 = vld [vmem:[#allocation7 + $0x2f8c] ss:$16 sps:$4 sm:$0xff]  }
 0x22f   :  { %8638 = vmatmul.mubr.bf16.vlgmr.msra.gmra.mrb[0].mxu0 %v19125_v39  ;;  %9806 = vmatmul.mubr.bf16.vlgmr.msra.gmra.mrb[0].mxu1 %v19125_v39  ;;  %v23404_v39 = vld [vmem:[#allocation7 + $0x2fa4] ss:$16 sps:$4 sm:$0xff]  }
 0x230   :  { %8679 = vmatpush1.bf16.msra.mxu0 %v23324_v40  ;;  %9847 = vmatpush1.bf16.msra.mxu1 %v23327_v41  ;;  %v23407_v40 = vld [vmem:[#allocation7 + $0x2fac] ss:$16 sps:$4 sm:$0xff]   ;;  %v23402_v41 = vld [vmem:[#allocation7 + $0x2fa0] ss:$16 sps:$4 sm:$0xff]  }
 0x231   :  { %8680 = vmatprep.subr.bf16.mxu0 %v23332_v42  ;;  %9848 = vmatprep.subr.bf16.mxu1 %v23335_v43  ;;  %v23405_v42 = vld [vmem:[#allocation7 + $0x2fa8] ss:$16 sps:$4 sm:$0xff]   ;;  %v23410_v43 = vld [vmem:[#allocation7 + $0x2fc4] ss:$16 sps:$4 sm:$0xff]  }
 0x232   :  { %8647 = vmatprep.mubr.bf16.mxu0 %v19158_v46  ;;  %9815 = vmatprep.mubr.bf16.mxu1 %v19158_v46  ;;  %v23411_v46 = vld [vmem:[#allocation7 + $0x2fc8] ss:$16 sps:$4 sm:$0xff]  }
 0x234   :  { %8681 = vmatpush1.bf16.msra.mxu0 %v23330_v44  ;;  %9849 = vmatpush1.bf16.msra.mxu1 %v23333_v45  ;;  %v23413_v44 = vld [vmem:[#allocation7 + $0x2fcc] ss:$16 sps:$4 sm:$0xff]   ;;  %v23408_v45 = vld [vmem:[#allocation7 + $0x2fc0] ss:$16 sps:$4 sm:$0xff]  }
 0x235   :  { %8682 = vmatprep.subr.bf16.mxu0 %v23338_v47  ;;  %9850 = vmatprep.subr.bf16.mxu1 %v23341_v48  ;;  %v23416_v47 = vld [vmem:[#allocation7 + $0x2fe4] ss:$16 sps:$4 sm:$0xff]   ;;  %v23419_v48 = vld [vmem:[#allocation7 + $0x2fec] ss:$16 sps:$4 sm:$0xff]  }
 0x237   :  { %8648 = vmatmul.mubr.bf16.gmra.mrb[4].mxu0 %v19157_v51  ;;  %9816 = vmatmul.mubr.bf16.gmra.mrb[4].mxu1 %v19157_v51  ;;  %v23422_v51 = vld [vmem:[#allocation7 + $0x3004] ss:$16 sps:$4 sm:$0xff]  }
 0x238   :  { %8683 = vmatpush1.bf16.msra.mxu0 %v23336_v52  ;;  %9851 = vmatpush1.bf16.msra.mxu1 %v23339_v53  ;;  %v23425_v52 = vld [vmem:[#allocation7 + $0x300c] ss:$16 sps:$4 sm:$0xff]  }
 0x239   :  { %8684 = vmatprep.subr.bf16.mxu0 %v23344_v54  ;;  %9852 = vmatprep.subr.bf16.mxu1 %v23347_v55  ;;  %v1294_v53 = vld [vmem:[#allocation5 + $0x138] sm:$0xff]  ;;  %v19127_v55 = vcombine.low %v26108_v9, %v26110_v10 }
 0x23a   :  { %8657 = vmatprep.mubr.bf16.mxu0 %v19190_v58  ;;  %9825 = vmatprep.mubr.bf16.mxu1 %v19190_v58  ;;  %v1310_v54 = vld [vmem:[#allocation5 + $0x1b8] sm:$0xff]  ;;  %v23428_v58 = vld [vmem:[#allocation7 + $0x3024] ss:$16 sps:$4 sm:$0xff]  }
 0x23b   :  { %v19160_v62 = vcombine.high %v1294_v53, %v1310_v54  ;;  %v23441_v9 = vld [vmem:[#allocation7 + $0x3068] ss:$16 sps:$4 sm:$0xff]  }
 0x23c   :  { %8685 = vmatpush1.bf16.msra.mxu0 %v23342_v56  ;;  %9853 = vmatpush1.bf16.msra.mxu1 %v23345_v57  ;;  %v23420_v56 = vld [vmem:[#allocation7 + $0x3000] ss:$16 sps:$4 sm:$0xff]   ;;  %v23423_v57 = vld [vmem:[#allocation7 + $0x3008] ss:$16 sps:$4 sm:$0xff]  }
 0x23d   :  { %8686 = vmatprep.subr.bf16.mxu0 %v23350_v59  ;;  %9854 = vmatprep.subr.bf16.mxu1 %v23353_v60  ;;  %v23431_v59 = vld [vmem:[#allocation7 + $0x302c] ss:$16 sps:$4 sm:$0xff]   ;;  %v23426_v60 = vld [vmem:[#allocation7 + $0x3020] ss:$16 sps:$4 sm:$0xff]  }
 0x23f   :  { %8658 = vmatmul.mubr.bf16.gmra.mrb[8].mxu0 %v19189_v63  ;;  %9826 = vmatmul.mubr.bf16.gmra.mrb[8].mxu1 %v19189_v63  ;;  %v23434_v63 = vld [vmem:[#allocation7 + $0x3044] ss:$16 sps:$4 sm:$0xff]  }
 0x240   :  { %8687 = vmatpush1.bf16.msra.mxu0 %v23348_v0  ;;  %9855 = vmatpush1.bf16.msra.mxu1 %v23351_v1  ;;  %v23437_v0 = vld [vmem:[#allocation7 + $0x304c] ss:$16 sps:$4 sm:$0xff]  }
 0x241   :  { %8688 = vmatprep.subr.bf16.mxu0 %v23356_v2  ;;  %9856 = vmatprep.subr.bf16.mxu1 %v23359_v3  ;;  %v1326_v1 = vld [vmem:[#allocation5 + $0x238] sm:$0xff]  ;;  %v19159_v3 = vcombine.low %v1294_v53, %v1310_v54  ;;  %v23492_v53 = vld [vmem:[#allocation7 + $0x3180] ss:$16 sps:$4 sm:$0xff]  }
 0x242   :  { %8667 = vmatprep.mubr.bf16.mxu0 %v19222_v6  ;;  %9835 = vmatprep.mubr.bf16.mxu1 %v19222_v6  ;;  %v1342_v2 = vld [vmem:[#allocation5 + $0x2b8] sm:$0xff]  ;;  %v23440_v6 = vld [vmem:[#allocation7 + $0x3064] ss:$16 sps:$4 sm:$0xff]  }
 0x243   :  { %v19192_v10 = vcombine.high %v1326_v1, %v1342_v2  ;;  %v23495_v54 = vld [vmem:[#allocation7 + $0x3188] ss:$16 sps:$4 sm:$0xff]  }
 0x244   :  { %8689 = vmatpush1.bf16.msra.mxu0 %v23354_v4  ;;  %9857 = vmatpush1.bf16.msra.mxu1 %v23357_v5  ;;  %v23432_v4 = vld [vmem:[#allocation7 + $0x3040] ss:$16 sps:$4 sm:$0xff]   ;;  %v23435_v5 = vld [vmem:[#allocation7 + $0x3048] ss:$16 sps:$4 sm:$0xff]  }
 0x245   :  { %8690 = vmatprep.subr.bf16.mxu0 %v23362_v7  ;;  %9858 = vmatprep.subr.bf16.mxu1 %v23365_v8  ;;  %v23443_v7 = vld [vmem:[#allocation7 + $0x306c] ss:$16 sps:$4 sm:$0xff]   ;;  %v23438_v8 = vld [vmem:[#allocation7 + $0x3060] ss:$16 sps:$4 sm:$0xff]  }
 0x247   :  { %8668 = vmatmul.mubr.bf16.gmra.mrb[12].mxu0 %v19221_v11  ;;  %9836 = vmatmul.mubr.bf16.gmra.mrb[12].mxu1 %v19221_v11  ;;  %v23446_v11 = vld [vmem:[#allocation7 + $0x3084] ss:$16 sps:$4 sm:$0xff]  }
 0x248   :  { %8691 = vmatpush1.bf16.msra.mxu0 %v23360_v12  ;;  %9859 = vmatpush1.bf16.msra.mxu1 %v23363_v13  ;;  %v23449_v12 = vld [vmem:[#allocation7 + $0x308c] ss:$16 sps:$4 sm:$0xff]  }
 0x249   :  { %8692 = vmatprep.subr.bf16.mxu0 %v23368_v14  ;;  %9860 = vmatprep.subr.bf16.mxu1 %v23371_v15  ;;  %v1358_v13 = vld [vmem:[#allocation5 + $0x338] sm:$0xff]  ;;  %v19191_v15 = vcombine.low %v1326_v1, %v1342_v2  ;;  %v23510_v1 = vld [vmem:[#allocation7 + $0x31e0] ss:$16 sps:$4 sm:$0xff]  }
 0x24a   :  { %8710 = vmatprep.mubr.bf16.mxu0 %v19128_v16  ;;  %9878 = vmatprep.mubr.bf16.mxu1 %v19128_v16  ;;  %v1374_v14 = vld [vmem:[#allocation5 + $0x3b8] sm:$0x33]  ;;  %v23444_v16 = vld [vmem:[#allocation7 + $0x3080] ss:$16 sps:$4 sm:$0xff]  }
 0x24b   :  { %v23513_v2 = vld [vmem:[#allocation7 + $0x31e8] ss:$16 sps:$4 sm:$0xff]  }
 0x24c   :  { %8693 = vmatpush1.bf16.msra.mxu0 %v23366_v17  ;;  %9861 = vmatpush1.bf16.msra.mxu1 %v23369_v18  ;;  %v23447_v17 = vld [vmem:[#allocation7 + $0x3088] ss:$16 sps:$4 sm:$0xff]   ;;  %v23452_v18 = vld [vmem:[#allocation7 + $0x30a4] ss:$16 sps:$4 sm:$0xff]  }
 0x24d   :  { %8694 = vmatprep.subr.bf16.mxu0 %v23374_v19  ;;  %9862 = vmatprep.subr.bf16.mxu1 %v23377_v20  ;;  %v23455_v19 = vld [vmem:[#allocation7 + $0x30ac] ss:$16 sps:$4 sm:$0xff]   ;;  %v23450_v20 = vld [vmem:[#allocation7 + $0x30a0] ss:$16 sps:$4 sm:$0xff]  }
 0x250   :  { %8695 = vmatpush1.bf16.msra.mxu0 %v23372_v21  ;;  %9863 = vmatpush1.bf16.msra.mxu1 %v23375_v22  ;;  %v23453_v21 = vld [vmem:[#allocation7 + $0x30a8] ss:$16 sps:$4 sm:$0xff]   ;;  %v19224_v22 = vcombine.high %v1358_v13, %v1374_v14 }
 0x251   :  { %8696 = vmatprep.subr.bf16.mxu0 %v23380_v23  ;;  %9864 = vmatprep.subr.bf16.mxu1 %v23383_v24  ;;  %v23458_v23 = vld [vmem:[#allocation7 + $0x30c4] ss:$16 sps:$4 sm:$0xff]   ;;  %v23461_v24 = vld [vmem:[#allocation7 + $0x30cc] ss:$16 sps:$4 sm:$0xff]  }
 0x254   :  { %8697 = vmatpush1.bf16.msra.mxu0 %v23378_v25  ;;  %9865 = vmatpush1.bf16.msra.mxu1 %v23381_v26  ;;  %v26116_v25 = vld [vmem:[#allocation5 + $0x40] sm:$0xff] }
 0x255   :  { %8698 = vmatprep.subr.bf16.mxu0 %v23386_v27  ;;  %9866 = vmatprep.subr.bf16.mxu1 %v23389_v28  ;;  %v26118_v26 = vld [vmem:[#allocation5 + $0xc0] sm:$0xff]  ;;  %v19223_v27 = vcombine.low %v1358_v13, %v1374_v14  ;;  %v23525_v13 = vld [vmem:[#allocation7 + $0x3228] ss:$16 sps:$4 sm:$0xff]  }
 0x256   :  { %v23456_v28 = vld [vmem:[#allocation7 + $0x30c0] ss:$16 sps:$4 sm:$0xff]  }
 0x258   :  { %8699 = vmatpush1.bf16.msra.mxu0 %v23384_v29  ;;  %9867 = vmatpush1.bf16.msra.mxu1 %v23387_v30  ;;  %v23459_v29 = vld [vmem:[#allocation7 + $0x30c8] ss:$16 sps:$4 sm:$0xff]   ;;  %v23464_v30 = vld [vmem:[#allocation7 + $0x30e4] ss:$16 sps:$4 sm:$0xff]  }
 0x259   :  { %8700 = vmatprep.subr.bf16.mxu0 %v23392_v31  ;;  %9868 = vmatprep.subr.bf16.mxu1 %v23395_v32  ;;  %v23467_v31 = vld [vmem:[#allocation7 + $0x30ec] ss:$16 sps:$4 sm:$0xff]   ;;  %v19130_v32 = vcombine.high %v26116_v25, %v26118_v26 }
 0x25c   :  { %8701 = vmatpush1.bf16.msra.mxu0 %v23390_v33  ;;  %9869 = vmatpush1.bf16.msra.mxu1 %v23393_v34  ;;  %v23462_v33 = vld [vmem:[#allocation7 + $0x30e0] ss:$16 sps:$4 sm:$0xff]   ;;  %v23465_v34 = vld [vmem:[#allocation7 + $0x30e8] ss:$16 sps:$4 sm:$0xff]  }
 0x25d   :  { %8702 = vmatprep.subr.bf16.mxu0 %v23398_v35  ;;  %9870 = vmatprep.subr.bf16.mxu1 %v23401_v36  ;;  %v23470_v35 = vld [vmem:[#allocation7 + $0x3104] ss:$16 sps:$4 sm:$0xff]   ;;  %v23473_v36 = vld [vmem:[#allocation7 + $0x310c] ss:$16 sps:$4 sm:$0xff]  }
 0x260   :  { %8703 = vmatpush1.bf16.msra.mxu0 %v23396_v37  ;;  %9871 = vmatpush1.bf16.msra.mxu1 %v23399_v38  ;;  %v23468_v37 = vld [vmem:[#allocation7 + $0x3100] ss:$16 sps:$4 sm:$0xff]   ;;  %v23471_v38 = vld [vmem:[#allocation7 + $0x3108] ss:$16 sps:$4 sm:$0xff]  }
 0x261   :  { %8704 = vmatprep.subr.bf16.mxu0 %v23404_v39  ;;  %9872 = vmatprep.subr.bf16.mxu1 %v23407_v40  ;;  %v23476_v39 = vld [vmem:[#allocation7 + $0x3124] ss:$16 sps:$4 sm:$0xff]   ;;  %v23479_v40 = vld [vmem:[#allocation7 + $0x312c] ss:$16 sps:$4 sm:$0xff]  }
 0x264   :  { %8705 = vmatpush1.bf16.msra.mxu0 %v23402_v41  ;;  %9873 = vmatpush1.bf16.msra.mxu1 %v23405_v42  ;;  %v23474_v41 = vld [vmem:[#allocation7 + $0x3120] ss:$16 sps:$4 sm:$0xff]   ;;  %v23477_v42 = vld [vmem:[#allocation7 + $0x3128] ss:$16 sps:$4 sm:$0xff]  }
 0x265   :  { %8706 = vmatprep.subr.bf16.mxu0 %v23410_v43  ;;  %9874 = vmatprep.subr.bf16.mxu1 %v23413_v44  ;;  %v23482_v43 = vld [vmem:[#allocation7 + $0x3144] ss:$16 sps:$4 sm:$0xff]   ;;  %v23485_v44 = vld [vmem:[#allocation7 + $0x314c] ss:$16 sps:$4 sm:$0xff]  }
 0x268   :  { %8707 = vmatpush1.bf16.msra.mxu0 %v23408_v45  ;;  %9875 = vmatpush1.bf16.msra.mxu1 %v23411_v46  ;;  %v23480_v45 = vld [vmem:[#allocation7 + $0x3140] ss:$16 sps:$4 sm:$0xff]   ;;  %v23483_v46 = vld [vmem:[#allocation7 + $0x3148] ss:$16 sps:$4 sm:$0xff]  }
 0x269   :  { %8708 = vmatprep.subr.bf16.mxu0 %v23416_v47  ;;  %9876 = vmatprep.subr.bf16.mxu1 %v23419_v48  ;;  %v23488_v47 = vld [vmem:[#allocation7 + $0x3164] ss:$16 sps:$4 sm:$0xff]   ;;  %v23491_v48 = vld [vmem:[#allocation7 + $0x316c] ss:$16 sps:$4 sm:$0xff]  }
 0x26c   :  { %8709 = vmatpush1.bf16.msra.mxu0 %v23414_v49  ;;  %9877 = vmatpush1.bf16.msra.mxu1 %v23417_v50  ;;  %v23486_v49 = vld [vmem:[#allocation7 + $0x3160] ss:$16 sps:$4 sm:$0xff]   ;;  %v23489_v50 = vld [vmem:[#allocation7 + $0x3168] ss:$16 sps:$4 sm:$0xff]  }
 0x26d   :  { %8751 = vmatprep.subr.bf16.mxu0 %v23422_v51  ;;  %9919 = vmatprep.subr.bf16.mxu1 %v23425_v52  ;;  %v23494_v51 = vld [vmem:[#allocation7 + $0x3184] ss:$16 sps:$4 sm:$0xff]   ;;  %v23497_v52 = vld [vmem:[#allocation7 + $0x318c] ss:$16 sps:$4 sm:$0xff]  }
 0x26f   :  { %8711 = vmatmul.mubr.bf16.vlgmr.msra.gmra.mrb[0].mxu0 %v19127_v55  ;;  %9879 = vmatmul.mubr.bf16.vlgmr.msra.gmra.mrb[0].mxu1 %v19127_v55  ;;  %v23500_v55 = vld [vmem:[#allocation7 + $0x31a4] ss:$16 sps:$4 sm:$0xff]  }
 0x270   :  { %8752 = vmatpush1.bf16.msra.mxu0 %v23420_v56  ;;  %9920 = vmatpush1.bf16.msra.mxu1 %v23423_v57  ;;  %v23503_v56 = vld [vmem:[#allocation7 + $0x31ac] ss:$16 sps:$4 sm:$0xff]   ;;  %v23498_v57 = vld [vmem:[#allocation7 + $0x31a0] ss:$16 sps:$4 sm:$0xff]  }
 0x271   :  { %8753 = vmatprep.subr.bf16.mxu0 %v23428_v58  ;;  %9921 = vmatprep.subr.bf16.mxu1 %v23431_v59  ;;  %v23501_v58 = vld [vmem:[#allocation7 + $0x31a8] ss:$16 sps:$4 sm:$0xff]   ;;  %v23506_v59 = vld [vmem:[#allocation7 + $0x31c4] ss:$16 sps:$4 sm:$0xff]  }
 0x272   :  { %8720 = vmatprep.mubr.bf16.mxu0 %v19160_v62  ;;  %9888 = vmatprep.mubr.bf16.mxu1 %v19160_v62  ;;  %v23507_v62 = vld [vmem:[#allocation7 + $0x31c8] ss:$16 sps:$4 sm:$0xff]  }
 0x274   :  { %8754 = vmatpush1.bf16.msra.mxu0 %v23426_v60  ;;  %9922 = vmatpush1.bf16.msra.mxu1 %v23429_v61  ;;  %v23509_v60 = vld [vmem:[#allocation7 + $0x31cc] ss:$16 sps:$4 sm:$0xff]   ;;  %v23504_v61 = vld [vmem:[#allocation7 + $0x31c0] ss:$16 sps:$4 sm:$0xff]  }
 0x275   :  { %8755 = vmatprep.subr.bf16.mxu0 %v23434_v63  ;;  %9923 = vmatprep.subr.bf16.mxu1 %v23437_v0  ;;  %v23512_v63 = vld [vmem:[#allocation7 + $0x31e4] ss:$16 sps:$4 sm:$0xff]   ;;  %v23515_v0 = vld [vmem:[#allocation7 + $0x31ec] ss:$16 sps:$4 sm:$0xff]  }
 0x277   :  { %8721 = vmatmul.mubr.bf16.gmra.mrb[4].mxu0 %v19159_v3  ;;  %9889 = vmatmul.mubr.bf16.gmra.mrb[4].mxu1 %v19159_v3  ;;  %v23518_v3 = vld [vmem:[#allocation7 + $0x3204] ss:$16 sps:$4 sm:$0xff]  }
 0x278   :  { %8756 = vmatpush1.bf16.msra.mxu0 %v23432_v4  ;;  %9924 = vmatpush1.bf16.msra.mxu1 %v23435_v5  ;;  %v23521_v4 = vld [vmem:[#allocation7 + $0x320c] ss:$16 sps:$4 sm:$0xff]   ;;  %v1295_v5 = vld [vmem:[#allocation5 + $0x140] sm:$0xff] }
 0x279   :  { %8757 = vmatprep.subr.bf16.mxu0 %v23440_v6  ;;  %9925 = vmatprep.subr.bf16.mxu1 %v23443_v7  ;;  %v1311_v6 = vld [vmem:[#allocation5 + $0x1c0] sm:$0xff]  ;;  %v19129_v7 = vcombine.low %v26116_v25, %v26118_v26  ;;  %v23537_v25 = vld [vmem:[#allocation7 + $0x3268] ss:$16 sps:$4 sm:$0xff]  }
 0x27a   :  { %8730 = vmatprep.mubr.bf16.mxu0 %v19192_v10  ;;  %9898 = vmatprep.mubr.bf16.mxu1 %v19192_v10  ;;  %v23524_v10 = vld [vmem:[#allocation7 + $0x3224] ss:$16 sps:$4 sm:$0xff]   ;;  %v19162_v14 = vcombine.high %v1295_v5, %v1311_v6 }
 0x27c   :  { %8758 = vmatpush1.bf16.msra.mxu0 %v23438_v8  ;;  %9926 = vmatpush1.bf16.msra.mxu1 %v23441_v9  ;;  %v23516_v8 = vld [vmem:[#allocation7 + $0x3200] ss:$16 sps:$4 sm:$0xff]   ;;  %v23519_v9 = vld [vmem:[#allocation7 + $0x3208] ss:$16 sps:$4 sm:$0xff]  }
 0x27d   :  { %8759 = vmatprep.subr.bf16.mxu0 %v23446_v11  ;;  %9927 = vmatprep.subr.bf16.mxu1 %v23449_v12  ;;  %v23527_v11 = vld [vmem:[#allocation7 + $0x322c] ss:$16 sps:$4 sm:$0xff]   ;;  %v23522_v12 = vld [vmem:[#allocation7 + $0x3220] ss:$16 sps:$4 sm:$0xff]  }
 0x27f   :  { %8731 = vmatmul.mubr.bf16.gmra.mrb[8].mxu0 %v19191_v15  ;;  %9899 = vmatmul.mubr.bf16.gmra.mrb[8].mxu1 %v19191_v15  ;;  %v23530_v15 = vld [vmem:[#allocation7 + $0x3244] ss:$16 sps:$4 sm:$0xff]  }
 0x280   :  { %8760 = vmatpush1.bf16.msra.mxu0 %v23444_v16  ;;  %9928 = vmatpush1.bf16.msra.mxu1 %v23447_v17  ;;  %v23533_v16 = vld [vmem:[#allocation7 + $0x324c] ss:$16 sps:$4 sm:$0xff]   ;;  %v1327_v17 = vld [vmem:[#allocation5 + $0x240] sm:$0xff] }
 0x281   :  { %8761 = vmatprep.subr.bf16.mxu0 %v23452_v18  ;;  %9929 = vmatprep.subr.bf16.mxu1 %v23455_v19  ;;  %v1343_v18 = vld [vmem:[#allocation5 + $0x2c0] sm:$0xff]  ;;  %v19161_v19 = vcombine.low %v1295_v5, %v1311_v6  ;;  %v23591_v6 = vld [vmem:[#allocation7 + $0x3388] ss:$16 sps:$4 sm:$0xff]  }
 0x282   :  { %8740 = vmatprep.mubr.bf16.mxu0 %v19224_v22  ;;  %9908 = vmatprep.mubr.bf16.mxu1 %v19224_v22  ;;  %v23536_v22 = vld [vmem:[#allocation7 + $0x3264] ss:$16 sps:$4 sm:$0xff]   ;;  %v19194_v26 = vcombine.high %v1327_v17, %v1343_v18  ;;  %v23588_v5 = vld [vmem:[#allocation7 + $0x3380] ss:$16 sps:$4 sm:$0xff]  }
 0x284   :  { %8762 = vmatpush1.bf16.msra.mxu0 %v23450_v20  ;;  %9930 = vmatpush1.bf16.msra.mxu1 %v23453_v21  ;;  %v23528_v20 = vld [vmem:[#allocation7 + $0x3240] ss:$16 sps:$4 sm:$0xff]   ;;  %v23531_v21 = vld [vmem:[#allocation7 + $0x3248] ss:$16 sps:$4 sm:$0xff]  }
 0x285   :  { %8763 = vmatprep.subr.bf16.mxu0 %v23458_v23  ;;  %9931 = vmatprep.subr.bf16.mxu1 %v23461_v24  ;;  %v23539_v23 = vld [vmem:[#allocation7 + $0x326c] ss:$16 sps:$4 sm:$0xff]   ;;  %v23534_v24 = vld [vmem:[#allocation7 + $0x3260] ss:$16 sps:$4 sm:$0xff]  }
 0x287   :  { %8741 = vmatmul.mubr.bf16.gmra.mrb[12].mxu0 %v19223_v27  ;;  %9909 = vmatmul.mubr.bf16.gmra.mrb[12].mxu1 %v19223_v27  ;;  %v23542_v27 = vld [vmem:[#allocation7 + $0x3284] ss:$16 sps:$4 sm:$0xff]  }
 0x288   :  { %8764 = vmatpush1.bf16.msra.mxu0 %v23456_v28  ;;  %9932 = vmatpush1.bf16.msra.mxu1 %v23459_v29  ;;  %v23545_v28 = vld [vmem:[#allocation7 + $0x328c] ss:$16 sps:$4 sm:$0xff]   ;;  %v1359_v29 = vld [vmem:[#allocation5 + $0x340] sm:$0xff] }
 0x289   :  { %8765 = vmatprep.subr.bf16.mxu0 %v23464_v30  ;;  %9933 = vmatprep.subr.bf16.mxu1 %v23467_v31  ;;  %v1375_v30 = vld [vmem:[#allocation5 + $0x3c0] sm:$0x33]  ;;  %v19193_v31 = vcombine.low %v1327_v17, %v1343_v18  ;;  %v23609_v18 = vld [vmem:[#allocation7 + $0x33e8] ss:$16 sps:$4 sm:$0xff]  }
 0x28a   :  { %8783 = vmatprep.mubr.bf16.mxu0 %v19130_v32  ;;  %9951 = vmatprep.mubr.bf16.mxu1 %v19130_v32  ;;  %v23540_v32 = vld [vmem:[#allocation7 + $0x3280] ss:$16 sps:$4 sm:$0xff]  }
 0x28b   :  { %v23606_v17 = vld [vmem:[#allocation7 + $0x33e0] ss:$16 sps:$4 sm:$0xff]  }
 0x28c   :  { %8766 = vmatpush1.bf16.msra.mxu0 %v23462_v33  ;;  %9934 = vmatpush1.bf16.msra.mxu1 %v23465_v34  ;;  %v23543_v33 = vld [vmem:[#allocation7 + $0x3288] ss:$16 sps:$4 sm:$0xff]   ;;  %v23548_v34 = vld [vmem:[#allocation7 + $0x32a4] ss:$16 sps:$4 sm:$0xff]  }
 0x28d   :  { %8767 = vmatprep.subr.bf16.mxu0 %v23470_v35  ;;  %9935 = vmatprep.subr.bf16.mxu1 %v23473_v36  ;;  %v23551_v35 = vld [vmem:[#allocation7 + $0x32ac] ss:$16 sps:$4 sm:$0xff]   ;;  %v23546_v36 = vld [vmem:[#allocation7 + $0x32a0] ss:$16 sps:$4 sm:$0xff]  }
 0x290   :  { %8768 = vmatpush1.bf16.msra.mxu0 %v23468_v37  ;;  %9936 = vmatpush1.bf16.msra.mxu1 %v23471_v38  ;;  %v23549_v37 = vld [vmem:[#allocation7 + $0x32a8] ss:$16 sps:$4 sm:$0xff]   ;;  %v19226_v38 = vcombine.high %v1359_v29, %v1375_v30 }
 0x291   :  { %8769 = vmatprep.subr.bf16.mxu0 %v23476_v39  ;;  %9937 = vmatprep.subr.bf16.mxu1 %v23479_v40  ;;  %v23554_v39 = vld [vmem:[#allocation7 + $0x32c4] ss:$16 sps:$4 sm:$0xff]   ;;  %v23557_v40 = vld [vmem:[#allocation7 + $0x32cc] ss:$16 sps:$4 sm:$0xff]  }
 0x294   :  { %8770 = vmatpush1.bf16.msra.mxu0 %v23474_v41  ;;  %9938 = vmatpush1.bf16.msra.mxu1 %v23477_v42  ;;  %v26124_v41 = vld [vmem:[#allocation5 + $0x48] sm:$0xff] }
 0x295   :  { %8771 = vmatprep.subr.bf16.mxu0 %v23482_v43  ;;  %9939 = vmatprep.subr.bf16.mxu1 %v23485_v44  ;;  %v26126_v42 = vld [vmem:[#allocation5 + $0xc8] sm:$0xff]  ;;  %v19225_v43 = vcombine.low %v1359_v29, %v1375_v30  ;;  %v23552_v44 = vld [vmem:[#allocation7 + $0x32c0] ss:$16 sps:$4 sm:$0xff]  }
 0x296   :  { %v23621_v29 = vld [vmem:[#allocation7 + $0x3428] ss:$16 sps:$4 sm:$0xff]  }
 0x298   :  { %8772 = vmatpush1.bf16.msra.mxu0 %v23480_v45  ;;  %9940 = vmatpush1.bf16.msra.mxu1 %v23483_v46  ;;  %v23555_v45 = vld [vmem:[#allocation7 + $0x32c8] ss:$16 sps:$4 sm:$0xff]   ;;  %v23560_v46 = vld [vmem:[#allocation7 + $0x32e4] ss:$16 sps:$4 sm:$0xff]  }
 0x299   :  { %8773 = vmatprep.subr.bf16.mxu0 %v23488_v47  ;;  %9941 = vmatprep.subr.bf16.mxu1 %v23491_v48  ;;  %v23563_v47 = vld [vmem:[#allocation7 + $0x32ec] ss:$16 sps:$4 sm:$0xff]   ;;  %v19132_v48 = vcombine.high %v26124_v41, %v26126_v42 }
 0x29c   :  { %8774 = vmatpush1.bf16.msra.mxu0 %v23486_v49  ;;  %9942 = vmatpush1.bf16.msra.mxu1 %v23489_v50  ;;  %v23558_v49 = vld [vmem:[#allocation7 + $0x32e0] ss:$16 sps:$4 sm:$0xff]   ;;  %v23561_v50 = vld [vmem:[#allocation7 + $0x32e8] ss:$16 sps:$4 sm:$0xff]  }
 0x29d   :  { %8775 = vmatprep.subr.bf16.mxu0 %v23494_v51  ;;  %9943 = vmatprep.subr.bf16.mxu1 %v23497_v52  ;;  %v23566_v51 = vld [vmem:[#allocation7 + $0x3304] ss:$16 sps:$4 sm:$0xff]   ;;  %v23569_v52 = vld [vmem:[#allocation7 + $0x330c] ss:$16 sps:$4 sm:$0xff]  }
 0x2a0   :  { %8776 = vmatpush1.bf16.msra.mxu0 %v23492_v53  ;;  %9944 = vmatpush1.bf16.msra.mxu1 %v23495_v54  ;;  %v23564_v53 = vld [vmem:[#allocation7 + $0x3300] ss:$16 sps:$4 sm:$0xff]   ;;  %v23567_v54 = vld [vmem:[#allocation7 + $0x3308] ss:$16 sps:$4 sm:$0xff]  }
 0x2a1   :  { %8777 = vmatprep.subr.bf16.mxu0 %v23500_v55  ;;  %9945 = vmatprep.subr.bf16.mxu1 %v23503_v56  ;;  %v23572_v55 = vld [vmem:[#allocation7 + $0x3324] ss:$16 sps:$4 sm:$0xff]   ;;  %v23575_v56 = vld [vmem:[#allocation7 + $0x332c] ss:$16 sps:$4 sm:$0xff]  }
 0x2a4   :  { %8778 = vmatpush1.bf16.msra.mxu0 %v23498_v57  ;;  %9946 = vmatpush1.bf16.msra.mxu1 %v23501_v58  ;;  %v23570_v57 = vld [vmem:[#allocation7 + $0x3320] ss:$16 sps:$4 sm:$0xff]   ;;  %v23573_v58 = vld [vmem:[#allocation7 + $0x3328] ss:$16 sps:$4 sm:$0xff]  }
 0x2a5   :  { %8779 = vmatprep.subr.bf16.mxu0 %v23506_v59  ;;  %9947 = vmatprep.subr.bf16.mxu1 %v23509_v60  ;;  %v23578_v59 = vld [vmem:[#allocation7 + $0x3344] ss:$16 sps:$4 sm:$0xff]   ;;  %v23581_v60 = vld [vmem:[#allocation7 + $0x334c] ss:$16 sps:$4 sm:$0xff]  }
 0x2a8   :  { %8780 = vmatpush1.bf16.msra.mxu0 %v23504_v61  ;;  %9948 = vmatpush1.bf16.msra.mxu1 %v23507_v62  ;;  %v23576_v61 = vld [vmem:[#allocation7 + $0x3340] ss:$16 sps:$4 sm:$0xff]   ;;  %v23579_v62 = vld [vmem:[#allocation7 + $0x3348] ss:$16 sps:$4 sm:$0xff]  }
 0x2a9   :  { %8781 = vmatprep.subr.bf16.mxu0 %v23512_v63  ;;  %9949 = vmatprep.subr.bf16.mxu1 %v23515_v0  ;;  %v23584_v63 = vld [vmem:[#allocation7 + $0x3364] ss:$16 sps:$4 sm:$0xff]   ;;  %v23587_v0 = vld [vmem:[#allocation7 + $0x336c] ss:$16 sps:$4 sm:$0xff]  }
 0x2ac   :  { %8782 = vmatpush1.bf16.msra.mxu0 %v23510_v1  ;;  %9950 = vmatpush1.bf16.msra.mxu1 %v23513_v2  ;;  %v23582_v1 = vld [vmem:[#allocation7 + $0x3360] ss:$16 sps:$4 sm:$0xff]   ;;  %v23585_v2 = vld [vmem:[#allocation7 + $0x3368] ss:$16 sps:$4 sm:$0xff]  }
 0x2ad   :  { %8824 = vmatprep.subr.bf16.mxu0 %v23518_v3  ;;  %9992 = vmatprep.subr.bf16.mxu1 %v23521_v4  ;;  %v23590_v3 = vld [vmem:[#allocation7 + $0x3384] ss:$16 sps:$4 sm:$0xff]   ;;  %v23593_v4 = vld [vmem:[#allocation7 + $0x338c] ss:$16 sps:$4 sm:$0xff]  }
 0x2af   :  { %8784 = vmatmul.mubr.bf16.vlgmr.msra.gmra.mrb[0].mxu0 %v19129_v7  ;;  %9952 = vmatmul.mubr.bf16.vlgmr.msra.gmra.mrb[0].mxu1 %v19129_v7  ;;  %v23596_v7 = vld [vmem:[#allocation7 + $0x33a4] ss:$16 sps:$4 sm:$0xff]  }
 0x2b0   :  { %8825 = vmatpush1.bf16.msra.mxu0 %v23516_v8  ;;  %9993 = vmatpush1.bf16.msra.mxu1 %v23519_v9  ;;  %v23599_v8 = vld [vmem:[#allocation7 + $0x33ac] ss:$16 sps:$4 sm:$0xff]   ;;  %v23594_v9 = vld [vmem:[#allocation7 + $0x33a0] ss:$16 sps:$4 sm:$0xff]  }
 0x2b1   :  { %8826 = vmatprep.subr.bf16.mxu0 %v23524_v10  ;;  %9994 = vmatprep.subr.bf16.mxu1 %v23527_v11  ;;  %v23597_v10 = vld [vmem:[#allocation7 + $0x33a8] ss:$16 sps:$4 sm:$0xff]   ;;  %v23602_v11 = vld [vmem:[#allocation7 + $0x33c4] ss:$16 sps:$4 sm:$0xff]  }
 0x2b2   :  { %8793 = vmatprep.mubr.bf16.mxu0 %v19162_v14  ;;  %9961 = vmatprep.mubr.bf16.mxu1 %v19162_v14  ;;  %v23603_v14 = vld [vmem:[#allocation7 + $0x33c8] ss:$16 sps:$4 sm:$0xff]  }
 0x2b4   :  { %8827 = vmatpush1.bf16.msra.mxu0 %v23522_v12  ;;  %9995 = vmatpush1.bf16.msra.mxu1 %v23525_v13  ;;  %v23605_v12 = vld [vmem:[#allocation7 + $0x33cc] ss:$16 sps:$4 sm:$0xff]   ;;  %v23600_v13 = vld [vmem:[#allocation7 + $0x33c0] ss:$16 sps:$4 sm:$0xff]  }
 0x2b5   :  { %8828 = vmatprep.subr.bf16.mxu0 %v23530_v15  ;;  %9996 = vmatprep.subr.bf16.mxu1 %v23533_v16  ;;  %v23608_v15 = vld [vmem:[#allocation7 + $0x33e4] ss:$16 sps:$4 sm:$0xff]   ;;  %v23611_v16 = vld [vmem:[#allocation7 + $0x33ec] ss:$16 sps:$4 sm:$0xff]  }
 0x2b7   :  { %8794 = vmatmul.mubr.bf16.gmra.mrb[4].mxu0 %v19161_v19  ;;  %9962 = vmatmul.mubr.bf16.gmra.mrb[4].mxu1 %v19161_v19  ;;  %v23614_v19 = vld [vmem:[#allocation7 + $0x3404] ss:$16 sps:$4 sm:$0xff]  }
 0x2b8   :  { %8829 = vmatpush1.bf16.msra.mxu0 %v23528_v20  ;;  %9997 = vmatpush1.bf16.msra.mxu1 %v23531_v21  ;;  %v23617_v20 = vld [vmem:[#allocation7 + $0x340c] ss:$16 sps:$4 sm:$0xff]  }
 0x2b9   :  { %8830 = vmatprep.subr.bf16.mxu0 %v23536_v22  ;;  %9998 = vmatprep.subr.bf16.mxu1 %v23539_v23  ;;  %v1296_v21 = vld [vmem:[#allocation5 + $0x148] sm:$0xff]  ;;  %v19131_v23 = vcombine.low %v26124_v41, %v26126_v42 }
 0x2ba   :  { %8803 = vmatprep.mubr.bf16.mxu0 %v19194_v26  ;;  %9971 = vmatprep.mubr.bf16.mxu1 %v19194_v26  ;;  %v1312_v22 = vld [vmem:[#allocation5 + $0x1c8] sm:$0xff]  ;;  %v23620_v26 = vld [vmem:[#allocation7 + $0x3424] ss:$16 sps:$4 sm:$0xff]  }
 0x2bb   :  { %v19164_v30 = vcombine.high %v1296_v21, %v1312_v22  ;;  %v23633_v41 = vld [vmem:[#allocation7 + $0x3468] ss:$16 sps:$4 sm:$0xff]  }
 0x2bc   :  { %8831 = vmatpush1.bf16.msra.mxu0 %v23534_v24  ;;  %9999 = vmatpush1.bf16.msra.mxu1 %v23537_v25  ;;  %v23612_v24 = vld [vmem:[#allocation7 + $0x3400] ss:$16 sps:$4 sm:$0xff]   ;;  %v23615_v25 = vld [vmem:[#allocation7 + $0x3408] ss:$16 sps:$4 sm:$0xff]  }
 0x2bd   :  { %8832 = vmatprep.subr.bf16.mxu0 %v23542_v27  ;;  %10000 = vmatprep.subr.bf16.mxu1 %v23545_v28  ;;  %v23623_v27 = vld [vmem:[#allocation7 + $0x342c] ss:$16 sps:$4 sm:$0xff]   ;;  %v23618_v28 = vld [vmem:[#allocation7 + $0x3420] ss:$16 sps:$4 sm:$0xff]  }
 0x2bf   :  { %8804 = vmatmul.mubr.bf16.gmra.mrb[8].mxu0 %v19193_v31  ;;  %9972 = vmatmul.mubr.bf16.gmra.mrb[8].mxu1 %v19193_v31  ;;  %v23626_v31 = vld [vmem:[#allocation7 + $0x3444] ss:$16 sps:$4 sm:$0xff]  }
 0x2c0   :  { %8833 = vmatpush1.bf16.msra.mxu0 %v23540_v32  ;;  %10001 = vmatpush1.bf16.msra.mxu1 %v23543_v33  ;;  %v23629_v32 = vld [vmem:[#allocation7 + $0x344c] ss:$16 sps:$4 sm:$0xff]  }
 0x2c1   :  { %8834 = vmatprep.subr.bf16.mxu0 %v23548_v34  ;;  %10002 = vmatprep.subr.bf16.mxu1 %v23551_v35  ;;  %v1328_v33 = vld [vmem:[#allocation5 + $0x248] sm:$0xff]  ;;  %v19163_v35 = vcombine.low %v1296_v21, %v1312_v22  ;;  %v23684_v21 = vld [vmem:[#allocation7 + $0x3580] ss:$16 sps:$4 sm:$0xff]  }
 0x2c2   :  { %8813 = vmatprep.mubr.bf16.mxu0 %v19226_v38  ;;  %9981 = vmatprep.mubr.bf16.mxu1 %v19226_v38  ;;  %v1344_v34 = vld [vmem:[#allocation5 + $0x2c8] sm:$0xff]  ;;  %v23632_v38 = vld [vmem:[#allocation7 + $0x3464] ss:$16 sps:$4 sm:$0xff]  }
 0x2c3   :  { %v19196_v42 = vcombine.high %v1328_v33, %v1344_v34  ;;  %v23687_v22 = vld [vmem:[#allocation7 + $0x3588] ss:$16 sps:$4 sm:$0xff]  }
 0x2c4   :  { %8835 = vmatpush1.bf16.msra.mxu0 %v23546_v36  ;;  %10003 = vmatpush1.bf16.msra.mxu1 %v23549_v37  ;;  %v23624_v36 = vld [vmem:[#allocation7 + $0x3440] ss:$16 sps:$4 sm:$0xff]   ;;  %v23627_v37 = vld [vmem:[#allocation7 + $0x3448] ss:$16 sps:$4 sm:$0xff]  }
 0x2c5   :  { %8836 = vmatprep.subr.bf16.mxu0 %v23554_v39  ;;  %10004 = vmatprep.subr.bf16.mxu1 %v23557_v40  ;;  %v23635_v39 = vld [vmem:[#allocation7 + $0x346c] ss:$16 sps:$4 sm:$0xff]   ;;  %v23630_v40 = vld [vmem:[#allocation7 + $0x3460] ss:$16 sps:$4 sm:$0xff]  }
 0x2c7   :  { %8814 = vmatmul.mubr.bf16.gmra.mrb[12].mxu0 %v19225_v43  ;;  %9982 = vmatmul.mubr.bf16.gmra.mrb[12].mxu1 %v19225_v43  ;;  %v23638_v43 = vld [vmem:[#allocation7 + $0x3484] ss:$16 sps:$4 sm:$0xff]  }
 0x2c8   :  { %8837 = vmatpush1.bf16.msra.mxu0 %v23552_v44  ;;  %10005 = vmatpush1.bf16.msra.mxu1 %v23555_v45  ;;  %v23641_v44 = vld [vmem:[#allocation7 + $0x348c] ss:$16 sps:$4 sm:$0xff]  }
 0x2c9   :  { %8838 = vmatprep.subr.bf16.mxu0 %v23560_v46  ;;  %10006 = vmatprep.subr.bf16.mxu1 %v23563_v47  ;;  %v1360_v45 = vld [vmem:[#allocation5 + $0x348] sm:$0xff]  ;;  %v19195_v47 = vcombine.low %v1328_v33, %v1344_v34  ;;  %v23702_v33 = vld [vmem:[#allocation7 + $0x35e0] ss:$16 sps:$4 sm:$0xff]  }
 0x2ca   :  { %8856 = vmatprep.mubr.bf16.mxu0 %v19132_v48  ;;  %10024 = vmatprep.mubr.bf16.mxu1 %v19132_v48  ;;  %v1376_v46 = vld [vmem:[#allocation5 + $0x3c8] sm:$0x33]  ;;  %v23636_v48 = vld [vmem:[#allocation7 + $0x3480] ss:$16 sps:$4 sm:$0xff]  }
 0x2cb   :  { %v23705_v34 = vld [vmem:[#allocation7 + $0x35e8] ss:$16 sps:$4 sm:$0xff]  }
 0x2cc   :  { %8839 = vmatpush1.bf16.msra.mxu0 %v23558_v49  ;;  %10007 = vmatpush1.bf16.msra.mxu1 %v23561_v50  ;;  %v23639_v49 = vld [vmem:[#allocation7 + $0x3488] ss:$16 sps:$4 sm:$0xff]   ;;  %v23644_v50 = vld [vmem:[#allocation7 + $0x34a4] ss:$16 sps:$4 sm:$0xff]  }
 0x2cd   :  { %8840 = vmatprep.subr.bf16.mxu0 %v23566_v51  ;;  %10008 = vmatprep.subr.bf16.mxu1 %v23569_v52  ;;  %v23647_v51 = vld [vmem:[#allocation7 + $0x34ac] ss:$16 sps:$4 sm:$0xff]   ;;  %v23642_v52 = vld [vmem:[#allocation7 + $0x34a0] ss:$16 sps:$4 sm:$0xff]  }
 0x2d0   :  { %8841 = vmatpush1.bf16.msra.mxu0 %v23564_v53  ;;  %10009 = vmatpush1.bf16.msra.mxu1 %v23567_v54  ;;  %v23645_v53 = vld [vmem:[#allocation7 + $0x34a8] ss:$16 sps:$4 sm:$0xff]   ;;  %v19228_v54 = vcombine.high %v1360_v45, %v1376_v46 }
 0x2d1   :  { %8842 = vmatprep.subr.bf16.mxu0 %v23572_v55  ;;  %10010 = vmatprep.subr.bf16.mxu1 %v23575_v56  ;;  %v23650_v55 = vld [vmem:[#allocation7 + $0x34c4] ss:$16 sps:$4 sm:$0xff]   ;;  %v23653_v56 = vld [vmem:[#allocation7 + $0x34cc] ss:$16 sps:$4 sm:$0xff]  }
 0x2d4   :  { %8843 = vmatpush1.bf16.msra.mxu0 %v23570_v57  ;;  %10011 = vmatpush1.bf16.msra.mxu1 %v23573_v58  ;;  %v26132_v57 = vld [vmem:[#allocation5 + $0x50] sm:$0xff] }
 0x2d5   :  { %8844 = vmatprep.subr.bf16.mxu0 %v23578_v59  ;;  %10012 = vmatprep.subr.bf16.mxu1 %v23581_v60  ;;  %v26134_v58 = vld [vmem:[#allocation5 + $0xd0] sm:$0xff]  ;;  %v19227_v59 = vcombine.low %v1360_v45, %v1376_v46  ;;  %v23717_v45 = vld [vmem:[#allocation7 + $0x3628] ss:$16 sps:$4 sm:$0xff]  }
 0x2d6   :  { %v23648_v60 = vld [vmem:[#allocation7 + $0x34c0] ss:$16 sps:$4 sm:$0xff]  }
 0x2d8   :  { %8845 = vmatpush1.bf16.msra.mxu0 %v23576_v61  ;;  %10013 = vmatpush1.bf16.msra.mxu1 %v23579_v62  ;;  %v23651_v61 = vld [vmem:[#allocation7 + $0x34c8] ss:$16 sps:$4 sm:$0xff]   ;;  %v23656_v62 = vld [vmem:[#allocation7 + $0x34e4] ss:$16 sps:$4 sm:$0xff]  }
 0x2d9   :  { %8846 = vmatprep.subr.bf16.mxu0 %v23584_v63  ;;  %10014 = vmatprep.subr.bf16.mxu1 %v23587_v0  ;;  %v23659_v63 = vld [vmem:[#allocation7 + $0x34ec] ss:$16 sps:$4 sm:$0xff]   ;;  %v19134_v0 = vcombine.high %v26132_v57, %v26134_v58 }
 0x2dc   :  { %8847 = vmatpush1.bf16.msra.mxu0 %v23582_v1  ;;  %10015 = vmatpush1.bf16.msra.mxu1 %v23585_v2  ;;  %v23654_v1 = vld [vmem:[#allocation7 + $0x34e0] ss:$16 sps:$4 sm:$0xff]   ;;  %v23657_v2 = vld [vmem:[#allocation7 + $0x34e8] ss:$16 sps:$4 sm:$0xff]  }
 0x2dd   :  { %8848 = vmatprep.subr.bf16.mxu0 %v23590_v3  ;;  %10016 = vmatprep.subr.bf16.mxu1 %v23593_v4  ;;  %v23662_v3 = vld [vmem:[#allocation7 + $0x3504] ss:$16 sps:$4 sm:$0xff]   ;;  %v23665_v4 = vld [vmem:[#allocation7 + $0x350c] ss:$16 sps:$4 sm:$0xff]  }
 0x2e0   :  { %8849 = vmatpush1.bf16.msra.mxu0 %v23588_v5  ;;  %10017 = vmatpush1.bf16.msra.mxu1 %v23591_v6  ;;  %v23660_v5 = vld [vmem:[#allocation7 + $0x3500] ss:$16 sps:$4 sm:$0xff]   ;;  %v23663_v6 = vld [vmem:[#allocation7 + $0x3508] ss:$16 sps:$4 sm:$0xff]  }
 0x2e1   :  { %8850 = vmatprep.subr.bf16.mxu0 %v23596_v7  ;;  %10018 = vmatprep.subr.bf16.mxu1 %v23599_v8  ;;  %v23668_v7 = vld [vmem:[#allocation7 + $0x3524] ss:$16 sps:$4 sm:$0xff]   ;;  %v23671_v8 = vld [vmem:[#allocation7 + $0x352c] ss:$16 sps:$4 sm:$0xff]  }
 0x2e4   :  { %8851 = vmatpush1.bf16.msra.mxu0 %v23594_v9  ;;  %10019 = vmatpush1.bf16.msra.mxu1 %v23597_v10  ;;  %v23666_v9 = vld [vmem:[#allocation7 + $0x3520] ss:$16 sps:$4 sm:$0xff]   ;;  %v23669_v10 = vld [vmem:[#allocation7 + $0x3528] ss:$16 sps:$4 sm:$0xff]  }
 0x2e5   :  { %8852 = vmatprep.subr.bf16.mxu0 %v23602_v11  ;;  %10020 = vmatprep.subr.bf16.mxu1 %v23605_v12  ;;  %v23674_v11 = vld [vmem:[#allocation7 + $0x3544] ss:$16 sps:$4 sm:$0xff]   ;;  %v23677_v12 = vld [vmem:[#allocation7 + $0x354c] ss:$16 sps:$4 sm:$0xff]  }
 0x2e8   :  { %8853 = vmatpush1.bf16.msra.mxu0 %v23600_v13  ;;  %10021 = vmatpush1.bf16.msra.mxu1 %v23603_v14  ;;  %v23672_v13 = vld [vmem:[#allocation7 + $0x3540] ss:$16 sps:$4 sm:$0xff]   ;;  %v23675_v14 = vld [vmem:[#allocation7 + $0x3548] ss:$16 sps:$4 sm:$0xff]  }
 0x2e9   :  { %8854 = vmatprep.subr.bf16.mxu0 %v23608_v15  ;;  %10022 = vmatprep.subr.bf16.mxu1 %v23611_v16  ;;  %v23680_v15 = vld [vmem:[#allocation7 + $0x3564] ss:$16 sps:$4 sm:$0xff]   ;;  %v23683_v16 = vld [vmem:[#allocation7 + $0x356c] ss:$16 sps:$4 sm:$0xff]  }
 0x2ec   :  { %8855 = vmatpush1.bf16.msra.mxu0 %v23606_v17  ;;  %10023 = vmatpush1.bf16.msra.mxu1 %v23609_v18  ;;  %v23678_v17 = vld [vmem:[#allocation7 + $0x3560] ss:$16 sps:$4 sm:$0xff]   ;;  %v23681_v18 = vld [vmem:[#allocation7 + $0x3568] ss:$16 sps:$4 sm:$0xff]  }
 0x2ed   :  { %8897 = vmatprep.subr.bf16.mxu0 %v23614_v19  ;;  %10065 = vmatprep.subr.bf16.mxu1 %v23617_v20  ;;  %v23686_v19 = vld [vmem:[#allocation7 + $0x3584] ss:$16 sps:$4 sm:$0xff]   ;;  %v23689_v20 = vld [vmem:[#allocation7 + $0x358c] ss:$16 sps:$4 sm:$0xff]  }
 0x2ef   :  { %8857 = vmatmul.mubr.bf16.vlgmr.msra.gmra.mrb[0].mxu0 %v19131_v23  ;;  %10025 = vmatmul.mubr.bf16.vlgmr.msra.gmra.mrb[0].mxu1 %v19131_v23  ;;  %v23692_v23 = vld [vmem:[#allocation7 + $0x35a4] ss:$16 sps:$4 sm:$0xff]  }
 0x2f0   :  { %8898 = vmatpush1.bf16.msra.mxu0 %v23612_v24  ;;  %10066 = vmatpush1.bf16.msra.mxu1 %v23615_v25  ;;  %v23695_v24 = vld [vmem:[#allocation7 + $0x35ac] ss:$16 sps:$4 sm:$0xff]   ;;  %v23690_v25 = vld [vmem:[#allocation7 + $0x35a0] ss:$16 sps:$4 sm:$0xff]  }
 0x2f1   :  { %8899 = vmatprep.subr.bf16.mxu0 %v23620_v26  ;;  %10067 = vmatprep.subr.bf16.mxu1 %v23623_v27  ;;  %v23693_v26 = vld [vmem:[#allocation7 + $0x35a8] ss:$16 sps:$4 sm:$0xff]   ;;  %v23698_v27 = vld [vmem:[#allocation7 + $0x35c4] ss:$16 sps:$4 sm:$0xff]  }
 0x2f2   :  { %8866 = vmatprep.mubr.bf16.mxu0 %v19164_v30  ;;  %10034 = vmatprep.mubr.bf16.mxu1 %v19164_v30  ;;  %v23699_v30 = vld [vmem:[#allocation7 + $0x35c8] ss:$16 sps:$4 sm:$0xff]  }
 0x2f4   :  { %8900 = vmatpush1.bf16.msra.mxu0 %v23618_v28  ;;  %10068 = vmatpush1.bf16.msra.mxu1 %v23621_v29  ;;  %v23701_v28 = vld [vmem:[#allocation7 + $0x35cc] ss:$16 sps:$4 sm:$0xff]   ;;  %v23696_v29 = vld [vmem:[#allocation7 + $0x35c0] ss:$16 sps:$4 sm:$0xff]  }
 0x2f5   :  { %8901 = vmatprep.subr.bf16.mxu0 %v23626_v31  ;;  %10069 = vmatprep.subr.bf16.mxu1 %v23629_v32  ;;  %v23704_v31 = vld [vmem:[#allocation7 + $0x35e4] ss:$16 sps:$4 sm:$0xff]   ;;  %v23707_v32 = vld [vmem:[#allocation7 + $0x35ec] ss:$16 sps:$4 sm:$0xff]  }
 0x2f7   :  { %8867 = vmatmul.mubr.bf16.gmra.mrb[4].mxu0 %v19163_v35  ;;  %10035 = vmatmul.mubr.bf16.gmra.mrb[4].mxu1 %v19163_v35  ;;  %v23710_v35 = vld [vmem:[#allocation7 + $0x3604] ss:$16 sps:$4 sm:$0xff]  }
 0x2f8   :  { %8902 = vmatpush1.bf16.msra.mxu0 %v23624_v36  ;;  %10070 = vmatpush1.bf16.msra.mxu1 %v23627_v37  ;;  %v23713_v36 = vld [vmem:[#allocation7 + $0x360c] ss:$16 sps:$4 sm:$0xff]   ;;  %v1297_v37 = vld [vmem:[#allocation5 + $0x150] sm:$0xff] }
 0x2f9   :  { %8903 = vmatprep.subr.bf16.mxu0 %v23632_v38  ;;  %10071 = vmatprep.subr.bf16.mxu1 %v23635_v39  ;;  %v1313_v38 = vld [vmem:[#allocation5 + $0x1d0] sm:$0xff]  ;;  %v19133_v39 = vcombine.low %v26132_v57, %v26134_v58  ;;  %v23729_v57 = vld [vmem:[#allocation7 + $0x3668] ss:$16 sps:$4 sm:$0xff]  }
 0x2fa   :  { %8876 = vmatprep.mubr.bf16.mxu0 %v19196_v42  ;;  %10044 = vmatprep.mubr.bf16.mxu1 %v19196_v42  ;;  %v23716_v42 = vld [vmem:[#allocation7 + $0x3624] ss:$16 sps:$4 sm:$0xff]   ;;  %v19166_v46 = vcombine.high %v1297_v37, %v1313_v38 }
 0x2fc   :  { %8904 = vmatpush1.bf16.msra.mxu0 %v23630_v40  ;;  %10072 = vmatpush1.bf16.msra.mxu1 %v23633_v41  ;;  %v23708_v40 = vld [vmem:[#allocation7 + $0x3600] ss:$16 sps:$4 sm:$0xff]   ;;  %v23711_v41 = vld [vmem:[#allocation7 + $0x3608] ss:$16 sps:$4 sm:$0xff]  }
 0x2fd   :  { %8905 = vmatprep.subr.bf16.mxu0 %v23638_v43  ;;  %10073 = vmatprep.subr.bf16.mxu1 %v23641_v44  ;;  %v23719_v43 = vld [vmem:[#allocation7 + $0x362c] ss:$16 sps:$4 sm:$0xff]   ;;  %v23714_v44 = vld [vmem:[#allocation7 + $0x3620] ss:$16 sps:$4 sm:$0xff]  }
 0x2ff   :  { %8877 = vmatmul.mubr.bf16.gmra.mrb[8].mxu0 %v19195_v47  ;;  %10045 = vmatmul.mubr.bf16.gmra.mrb[8].mxu1 %v19195_v47  ;;  %v23722_v47 = vld [vmem:[#allocation7 + $0x3644] ss:$16 sps:$4 sm:$0xff]  }
 0x300   :  { %8906 = vmatpush1.bf16.msra.mxu0 %v23636_v48  ;;  %10074 = vmatpush1.bf16.msra.mxu1 %v23639_v49  ;;  %v23725_v48 = vld [vmem:[#allocation7 + $0x364c] ss:$16 sps:$4 sm:$0xff]   ;;  %v1329_v49 = vld [vmem:[#allocation5 + $0x250] sm:$0xff] }
 0x301   :  { %8907 = vmatprep.subr.bf16.mxu0 %v23644_v50  ;;  %10075 = vmatprep.subr.bf16.mxu1 %v23647_v51  ;;  %v1345_v50 = vld [vmem:[#allocation5 + $0x2d0] sm:$0xff]  ;;  %v19165_v51 = vcombine.low %v1297_v37, %v1313_v38  ;;  %v23783_v38 = vld [vmem:[#allocation7 + $0x3788] ss:$16 sps:$4 sm:$0xff]  }
 0x302   :  { %8886 = vmatprep.mubr.bf16.mxu0 %v19228_v54  ;;  %10054 = vmatprep.mubr.bf16.mxu1 %v19228_v54  ;;  %v23728_v54 = vld [vmem:[#allocation7 + $0x3664] ss:$16 sps:$4 sm:$0xff]   ;;  %v19198_v58 = vcombine.high %v1329_v49, %v1345_v50  ;;  %v23780_v37 = vld [vmem:[#allocation7 + $0x3780] ss:$16 sps:$4 sm:$0xff]  }
 0x304   :  { %8908 = vmatpush1.bf16.msra.mxu0 %v23642_v52  ;;  %10076 = vmatpush1.bf16.msra.mxu1 %v23645_v53  ;;  %v23720_v52 = vld [vmem:[#allocation7 + $0x3640] ss:$16 sps:$4 sm:$0xff]   ;;  %v23723_v53 = vld [vmem:[#allocation7 + $0x3648] ss:$16 sps:$4 sm:$0xff]  }
 0x305   :  { %8909 = vmatprep.subr.bf16.mxu0 %v23650_v55  ;;  %10077 = vmatprep.subr.bf16.mxu1 %v23653_v56  ;;  %v23731_v55 = vld [vmem:[#allocation7 + $0x366c] ss:$16 sps:$4 sm:$0xff]   ;;  %v23726_v56 = vld [vmem:[#allocation7 + $0x3660] ss:$16 sps:$4 sm:$0xff]  }
 0x307   :  { %8887 = vmatmul.mubr.bf16.gmra.mrb[12].mxu0 %v19227_v59  ;;  %10055 = vmatmul.mubr.bf16.gmra.mrb[12].mxu1 %v19227_v59  ;;  %v23734_v59 = vld [vmem:[#allocation7 + $0x3684] ss:$16 sps:$4 sm:$0xff]  }
 0x308   :  { %8910 = vmatpush1.bf16.msra.mxu0 %v23648_v60  ;;  %10078 = vmatpush1.bf16.msra.mxu1 %v23651_v61  ;;  %v23737_v60 = vld [vmem:[#allocation7 + $0x368c] ss:$16 sps:$4 sm:$0xff]   ;;  %v1361_v61 = vld [vmem:[#allocation5 + $0x350] sm:$0xff] }
 0x309   :  { %8911 = vmatprep.subr.bf16.mxu0 %v23656_v62  ;;  %10079 = vmatprep.subr.bf16.mxu1 %v23659_v63  ;;  %v1377_v62 = vld [vmem:[#allocation5 + $0x3d0] sm:$0x33]  ;;  %v19197_v63 = vcombine.low %v1329_v49, %v1345_v50  ;;  %v23801_v50 = vld [vmem:[#allocation7 + $0x37e8] ss:$16 sps:$4 sm:$0xff]  }
 0x30a   :  { %8929 = vmatprep.mubr.bf16.mxu0 %v19134_v0  ;;  %10097 = vmatprep.mubr.bf16.mxu1 %v19134_v0  ;;  %v23732_v0 = vld [vmem:[#allocation7 + $0x3680] ss:$16 sps:$4 sm:$0xff]  }
 0x30b   :  { %v23798_v49 = vld [vmem:[#allocation7 + $0x37e0] ss:$16 sps:$4 sm:$0xff]  }
 0x30c   :  { %8912 = vmatpush1.bf16.msra.mxu0 %v23654_v1  ;;  %10080 = vmatpush1.bf16.msra.mxu1 %v23657_v2  ;;  %v23735_v1 = vld [vmem:[#allocation7 + $0x3688] ss:$16 sps:$4 sm:$0xff]   ;;  %v23740_v2 = vld [vmem:[#allocation7 + $0x36a4] ss:$16 sps:$4 sm:$0xff]  }
 0x30d   :  { %8913 = vmatprep.subr.bf16.mxu0 %v23662_v3  ;;  %10081 = vmatprep.subr.bf16.mxu1 %v23665_v4  ;;  %v23743_v3 = vld [vmem:[#allocation7 + $0x36ac] ss:$16 sps:$4 sm:$0xff]   ;;  %v23738_v4 = vld [vmem:[#allocation7 + $0x36a0] ss:$16 sps:$4 sm:$0xff]  }
 0x310   :  { %8914 = vmatpush1.bf16.msra.mxu0 %v23660_v5  ;;  %10082 = vmatpush1.bf16.msra.mxu1 %v23663_v6  ;;  %v23741_v5 = vld [vmem:[#allocation7 + $0x36a8] ss:$16 sps:$4 sm:$0xff]   ;;  %v19230_v6 = vcombine.high %v1361_v61, %v1377_v62 }
 0x311   :  { %8915 = vmatprep.subr.bf16.mxu0 %v23668_v7  ;;  %10083 = vmatprep.subr.bf16.mxu1 %v23671_v8  ;;  %v23746_v7 = vld [vmem:[#allocation7 + $0x36c4] ss:$16 sps:$4 sm:$0xff]   ;;  %v23749_v8 = vld [vmem:[#allocation7 + $0x36cc] ss:$16 sps:$4 sm:$0xff]  }
 0x314   :  { %8916 = vmatpush1.bf16.msra.mxu0 %v23666_v9  ;;  %10084 = vmatpush1.bf16.msra.mxu1 %v23669_v10  ;;  %v26140_v9 = vld [vmem:[#allocation5 + $0x58] sm:$0xff] }
 0x315   :  { %8917 = vmatprep.subr.bf16.mxu0 %v23674_v11  ;;  %10085 = vmatprep.subr.bf16.mxu1 %v23677_v12  ;;  %v26142_v10 = vld [vmem:[#allocation5 + $0xd8] sm:$0xff]  ;;  %v19229_v11 = vcombine.low %v1361_v61, %v1377_v62  ;;  %v23744_v12 = vld [vmem:[#allocation7 + $0x36c0] ss:$16 sps:$4 sm:$0xff]  }
 0x316   :  { %v23813_v61 = vld [vmem:[#allocation7 + $0x3828] ss:$16 sps:$4 sm:$0xff]  }
 0x318   :  { %8918 = vmatpush1.bf16.msra.mxu0 %v23672_v13  ;;  %10086 = vmatpush1.bf16.msra.mxu1 %v23675_v14  ;;  %v23747_v13 = vld [vmem:[#allocation7 + $0x36c8] ss:$16 sps:$4 sm:$0xff]   ;;  %v23752_v14 = vld [vmem:[#allocation7 + $0x36e4] ss:$16 sps:$4 sm:$0xff]  }
 0x319   :  { %8919 = vmatprep.subr.bf16.mxu0 %v23680_v15  ;;  %10087 = vmatprep.subr.bf16.mxu1 %v23683_v16  ;;  %v23755_v15 = vld [vmem:[#allocation7 + $0x36ec] ss:$16 sps:$4 sm:$0xff]   ;;  %v19136_v16 = vcombine.high %v26140_v9, %v26142_v10 }
 0x31c   :  { %8920 = vmatpush1.bf16.msra.mxu0 %v23678_v17  ;;  %10088 = vmatpush1.bf16.msra.mxu1 %v23681_v18  ;;  %v23750_v17 = vld [vmem:[#allocation7 + $0x36e0] ss:$16 sps:$4 sm:$0xff]   ;;  %v23753_v18 = vld [vmem:[#allocation7 + $0x36e8] ss:$16 sps:$4 sm:$0xff]  }
 0x31d   :  { %8921 = vmatprep.subr.bf16.mxu0 %v23686_v19  ;;  %10089 = vmatprep.subr.bf16.mxu1 %v23689_v20  ;;  %v23758_v19 = vld [vmem:[#allocation7 + $0x3704] ss:$16 sps:$4 sm:$0xff]   ;;  %v23761_v20 = vld [vmem:[#allocation7 + $0x370c] ss:$16 sps:$4 sm:$0xff]  }
 0x320   :  { %8922 = vmatpush1.bf16.msra.mxu0 %v23684_v21  ;;  %10090 = vmatpush1.bf16.msra.mxu1 %v23687_v22  ;;  %v23756_v21 = vld [vmem:[#allocation7 + $0x3700] ss:$16 sps:$4 sm:$0xff]   ;;  %v23759_v22 = vld [vmem:[#allocation7 + $0x3708] ss:$16 sps:$4 sm:$0xff]  }
 0x321   :  { %8923 = vmatprep.subr.bf16.mxu0 %v23692_v23  ;;  %10091 = vmatprep.subr.bf16.mxu1 %v23695_v24  ;;  %v23764_v23 = vld [vmem:[#allocation7 + $0x3724] ss:$16 sps:$4 sm:$0xff]   ;;  %v23767_v24 = vld [vmem:[#allocation7 + $0x372c] ss:$16 sps:$4 sm:$0xff]  }
 0x324   :  { %8924 = vmatpush1.bf16.msra.mxu0 %v23690_v25  ;;  %10092 = vmatpush1.bf16.msra.mxu1 %v23693_v26  ;;  %v23762_v25 = vld [vmem:[#allocation7 + $0x3720] ss:$16 sps:$4 sm:$0xff]   ;;  %v23765_v26 = vld [vmem:[#allocation7 + $0x3728] ss:$16 sps:$4 sm:$0xff]  }
 0x325   :  { %8925 = vmatprep.subr.bf16.mxu0 %v23698_v27  ;;  %10093 = vmatprep.subr.bf16.mxu1 %v23701_v28  ;;  %v23770_v27 = vld [vmem:[#allocation7 + $0x3744] ss:$16 sps:$4 sm:$0xff]   ;;  %v23773_v28 = vld [vmem:[#allocation7 + $0x374c] ss:$16 sps:$4 sm:$0xff]  }
 0x328   :  { %8926 = vmatpush1.bf16.msra.mxu0 %v23696_v29  ;;  %10094 = vmatpush1.bf16.msra.mxu1 %v23699_v30  ;;  %v23768_v29 = vld [vmem:[#allocation7 + $0x3740] ss:$16 sps:$4 sm:$0xff]   ;;  %v23771_v30 = vld [vmem:[#allocation7 + $0x3748] ss:$16 sps:$4 sm:$0xff]  }
 0x329   :  { %8927 = vmatprep.subr.bf16.mxu0 %v23704_v31  ;;  %10095 = vmatprep.subr.bf16.mxu1 %v23707_v32  ;;  %v23776_v31 = vld [vmem:[#allocation7 + $0x3764] ss:$16 sps:$4 sm:$0xff]   ;;  %v23779_v32 = vld [vmem:[#allocation7 + $0x376c] ss:$16 sps:$4 sm:$0xff]  }
 0x32c   :  { %8928 = vmatpush1.bf16.msra.mxu0 %v23702_v33  ;;  %10096 = vmatpush1.bf16.msra.mxu1 %v23705_v34  ;;  %v23774_v33 = vld [vmem:[#allocation7 + $0x3760] ss:$16 sps:$4 sm:$0xff]   ;;  %v23777_v34 = vld [vmem:[#allocation7 + $0x3768] ss:$16 sps:$4 sm:$0xff]  }
 0x32d   :  { %8970 = vmatprep.subr.bf16.mxu0 %v23710_v35  ;;  %10138 = vmatprep.subr.bf16.mxu1 %v23713_v36  ;;  %v23782_v35 = vld [vmem:[#allocation7 + $0x3784] ss:$16 sps:$4 sm:$0xff]   ;;  %v23785_v36 = vld [vmem:[#allocation7 + $0x378c] ss:$16 sps:$4 sm:$0xff]  }
 0x32f   :  { %8930 = vmatmul.mubr.bf16.vlgmr.msra.gmra.mrb[0].mxu0 %v19133_v39  ;;  %10098 = vmatmul.mubr.bf16.vlgmr.msra.gmra.mrb[0].mxu1 %v19133_v39  ;;  %v23788_v39 = vld [vmem:[#allocation7 + $0x37a4] ss:$16 sps:$4 sm:$0xff]  }
 0x330   :  { %8971 = vmatpush1.bf16.msra.mxu0 %v23708_v40  ;;  %10139 = vmatpush1.bf16.msra.mxu1 %v23711_v41  ;;  %v23791_v40 = vld [vmem:[#allocation7 + $0x37ac] ss:$16 sps:$4 sm:$0xff]   ;;  %v23786_v41 = vld [vmem:[#allocation7 + $0x37a0] ss:$16 sps:$4 sm:$0xff]  }
 0x331   :  { %8972 = vmatprep.subr.bf16.mxu0 %v23716_v42  ;;  %10140 = vmatprep.subr.bf16.mxu1 %v23719_v43  ;;  %v23789_v42 = vld [vmem:[#allocation7 + $0x37a8] ss:$16 sps:$4 sm:$0xff]   ;;  %v23794_v43 = vld [vmem:[#allocation7 + $0x37c4] ss:$16 sps:$4 sm:$0xff]  }
 0x332   :  { %8939 = vmatprep.mubr.bf16.mxu0 %v19166_v46  ;;  %10107 = vmatprep.mubr.bf16.mxu1 %v19166_v46  ;;  %v23795_v46 = vld [vmem:[#allocation7 + $0x37c8] ss:$16 sps:$4 sm:$0xff]  }
 0x334   :  { %8973 = vmatpush1.bf16.msra.mxu0 %v23714_v44  ;;  %10141 = vmatpush1.bf16.msra.mxu1 %v23717_v45  ;;  %v23797_v44 = vld [vmem:[#allocation7 + $0x37cc] ss:$16 sps:$4 sm:$0xff]   ;;  %v23792_v45 = vld [vmem:[#allocation7 + $0x37c0] ss:$16 sps:$4 sm:$0xff]  }
 0x335   :  { %8974 = vmatprep.subr.bf16.mxu0 %v23722_v47  ;;  %10142 = vmatprep.subr.bf16.mxu1 %v23725_v48  ;;  %v23800_v47 = vld [vmem:[#allocation7 + $0x37e4] ss:$16 sps:$4 sm:$0xff]   ;;  %v23803_v48 = vld [vmem:[#allocation7 + $0x37ec] ss:$16 sps:$4 sm:$0xff]  }
 0x337   :  { %8940 = vmatmul.mubr.bf16.gmra.mrb[4].mxu0 %v19165_v51  ;;  %10108 = vmatmul.mubr.bf16.gmra.mrb[4].mxu1 %v19165_v51  ;;  %v23806_v51 = vld [vmem:[#allocation7 + $0x3804] ss:$16 sps:$4 sm:$0xff]  }
 0x338   :  { %8975 = vmatpush1.bf16.msra.mxu0 %v23720_v52  ;;  %10143 = vmatpush1.bf16.msra.mxu1 %v23723_v53  ;;  %v23809_v52 = vld [vmem:[#allocation7 + $0x380c] ss:$16 sps:$4 sm:$0xff]  }
 0x339   :  { %8976 = vmatprep.subr.bf16.mxu0 %v23728_v54  ;;  %10144 = vmatprep.subr.bf16.mxu1 %v23731_v55  ;;  %v1298_v53 = vld [vmem:[#allocation5 + $0x158] sm:$0xff]  ;;  %v19135_v55 = vcombine.low %v26140_v9, %v26142_v10 }
 0x33a   :  { %8949 = vmatprep.mubr.bf16.mxu0 %v19198_v58  ;;  %10117 = vmatprep.mubr.bf16.mxu1 %v19198_v58  ;;  %v1314_v54 = vld [vmem:[#allocation5 + $0x1d8] sm:$0xff]  ;;  %v23812_v58 = vld [vmem:[#allocation7 + $0x3824] ss:$16 sps:$4 sm:$0xff]  }
 0x33b   :  { %v19168_v62 = vcombine.high %v1298_v53, %v1314_v54  ;;  %v23825_v9 = vld [vmem:[#allocation7 + $0x3868] ss:$16 sps:$4 sm:$0xff]  }
 0x33c   :  { %8977 = vmatpush1.bf16.msra.mxu0 %v23726_v56  ;;  %10145 = vmatpush1.bf16.msra.mxu1 %v23729_v57  ;;  %v23804_v56 = vld [vmem:[#allocation7 + $0x3800] ss:$16 sps:$4 sm:$0xff]   ;;  %v23807_v57 = vld [vmem:[#allocation7 + $0x3808] ss:$16 sps:$4 sm:$0xff]  }
 0x33d   :  { %8978 = vmatprep.subr.bf16.mxu0 %v23734_v59  ;;  %10146 = vmatprep.subr.bf16.mxu1 %v23737_v60  ;;  %v23815_v59 = vld [vmem:[#allocation7 + $0x382c] ss:$16 sps:$4 sm:$0xff]   ;;  %v23810_v60 = vld [vmem:[#allocation7 + $0x3820] ss:$16 sps:$4 sm:$0xff]  }
 0x33f   :  { %8950 = vmatmul.mubr.bf16.gmra.mrb[8].mxu0 %v19197_v63  ;;  %10118 = vmatmul.mubr.bf16.gmra.mrb[8].mxu1 %v19197_v63  ;;  %v23818_v63 = vld [vmem:[#allocation7 + $0x3844] ss:$16 sps:$4 sm:$0xff]  }
 0x340   :  { %8979 = vmatpush1.bf16.msra.mxu0 %v23732_v0  ;;  %10147 = vmatpush1.bf16.msra.mxu1 %v23735_v1  ;;  %v23821_v0 = vld [vmem:[#allocation7 + $0x384c] ss:$16 sps:$4 sm:$0xff]  }
 0x341   :  { %8980 = vmatprep.subr.bf16.mxu0 %v23740_v2  ;;  %10148 = vmatprep.subr.bf16.mxu1 %v23743_v3  ;;  %v1330_v1 = vld [vmem:[#allocation5 + $0x258] sm:$0xff]  ;;  %v19167_v3 = vcombine.low %v1298_v53, %v1314_v54  ;;  %v23876_v53 = vld [vmem:[#allocation7 + $0x3980] ss:$16 sps:$4 sm:$0xff]  }
 0x342   :  { %8959 = vmatprep.mubr.bf16.mxu0 %v19230_v6  ;;  %10127 = vmatprep.mubr.bf16.mxu1 %v19230_v6  ;;  %v1346_v2 = vld [vmem:[#allocation5 + $0x2d8] sm:$0xff]  ;;  %v23824_v6 = vld [vmem:[#allocation7 + $0x3864] ss:$16 sps:$4 sm:$0xff]  }
 0x343   :  { %v19200_v10 = vcombine.high %v1330_v1, %v1346_v2  ;;  %v23879_v54 = vld [vmem:[#allocation7 + $0x3988] ss:$16 sps:$4 sm:$0xff]  }
 0x344   :  { %8981 = vmatpush1.bf16.msra.mxu0 %v23738_v4  ;;  %10149 = vmatpush1.bf16.msra.mxu1 %v23741_v5  ;;  %v23816_v4 = vld [vmem:[#allocation7 + $0x3840] ss:$16 sps:$4 sm:$0xff]   ;;  %v23819_v5 = vld [vmem:[#allocation7 + $0x3848] ss:$16 sps:$4 sm:$0xff]  }
 0x345   :  { %8982 = vmatprep.subr.bf16.mxu0 %v23746_v7  ;;  %10150 = vmatprep.subr.bf16.mxu1 %v23749_v8  ;;  %v23827_v7 = vld [vmem:[#allocation7 + $0x386c] ss:$16 sps:$4 sm:$0xff]   ;;  %v23822_v8 = vld [vmem:[#allocation7 + $0x3860] ss:$16 sps:$4 sm:$0xff]  }
 0x347   :  { %8960 = vmatmul.mubr.bf16.gmra.mrb[12].mxu0 %v19229_v11  ;;  %10128 = vmatmul.mubr.bf16.gmra.mrb[12].mxu1 %v19229_v11  ;;  %v23830_v11 = vld [vmem:[#allocation7 + $0x3884] ss:$16 sps:$4 sm:$0xff]  }
 0x348   :  { %8983 = vmatpush1.bf16.msra.mxu0 %v23744_v12  ;;  %10151 = vmatpush1.bf16.msra.mxu1 %v23747_v13  ;;  %v23833_v12 = vld [vmem:[#allocation7 + $0x388c] ss:$16 sps:$4 sm:$0xff]  }
 0x349   :  { %8984 = vmatprep.subr.bf16.mxu0 %v23752_v14  ;;  %10152 = vmatprep.subr.bf16.mxu1 %v23755_v15  ;;  %v1362_v13 = vld [vmem:[#allocation5 + $0x358] sm:$0xff]  ;;  %v19199_v15 = vcombine.low %v1330_v1, %v1346_v2  ;;  %v23894_v1 = vld [vmem:[#allocation7 + $0x39e0] ss:$16 sps:$4 sm:$0xff]  }
 0x34a   :  { %9002 = vmatprep.mubr.bf16.mxu0 %v19136_v16  ;;  %10170 = vmatprep.mubr.bf16.mxu1 %v19136_v16  ;;  %v1378_v14 = vld [vmem:[#allocation5 + $0x3d8] sm:$0x33]  ;;  %v23828_v16 = vld [vmem:[#allocation7 + $0x3880] ss:$16 sps:$4 sm:$0xff]  }
 0x34b   :  { %v23897_v2 = vld [vmem:[#allocation7 + $0x39e8] ss:$16 sps:$4 sm:$0xff]  }
 0x34c   :  { %8985 = vmatpush1.bf16.msra.mxu0 %v23750_v17  ;;  %10153 = vmatpush1.bf16.msra.mxu1 %v23753_v18  ;;  %v23831_v17 = vld [vmem:[#allocation7 + $0x3888] ss:$16 sps:$4 sm:$0xff]   ;;  %v23836_v18 = vld [vmem:[#allocation7 + $0x38a4] ss:$16 sps:$4 sm:$0xff]  }
 0x34d   :  { %8986 = vmatprep.subr.bf16.mxu0 %v23758_v19  ;;  %10154 = vmatprep.subr.bf16.mxu1 %v23761_v20  ;;  %v23839_v19 = vld [vmem:[#allocation7 + $0x38ac] ss:$16 sps:$4 sm:$0xff]   ;;  %v23834_v20 = vld [vmem:[#allocation7 + $0x38a0] ss:$16 sps:$4 sm:$0xff]  }
 0x350   :  { %8987 = vmatpush1.bf16.msra.mxu0 %v23756_v21  ;;  %10155 = vmatpush1.bf16.msra.mxu1 %v23759_v22  ;;  %v23837_v21 = vld [vmem:[#allocation7 + $0x38a8] ss:$16 sps:$4 sm:$0xff]   ;;  %v19232_v22 = vcombine.high %v1362_v13, %v1378_v14 }
 0x351   :  { %8988 = vmatprep.subr.bf16.mxu0 %v23764_v23  ;;  %10156 = vmatprep.subr.bf16.mxu1 %v23767_v24  ;;  %v23842_v23 = vld [vmem:[#allocation7 + $0x38c4] ss:$16 sps:$4 sm:$0xff]   ;;  %v23845_v24 = vld [vmem:[#allocation7 + $0x38cc] ss:$16 sps:$4 sm:$0xff]  }
 0x354   :  { %8989 = vmatpush1.bf16.msra.mxu0 %v23762_v25  ;;  %10157 = vmatpush1.bf16.msra.mxu1 %v23765_v26  ;;  %v26148_v25 = vld [vmem:[#allocation5 + $0x60] sm:$0xff] }
 0x355   :  { %8990 = vmatprep.subr.bf16.mxu0 %v23770_v27  ;;  %10158 = vmatprep.subr.bf16.mxu1 %v23773_v28  ;;  %v26150_v26 = vld [vmem:[#allocation5 + $0xe0] sm:$0xff]  ;;  %v19231_v27 = vcombine.low %v1362_v13, %v1378_v14  ;;  %v23909_v13 = vld [vmem:[#allocation7 + $0x3a28] ss:$16 sps:$4 sm:$0xff]  }
 0x356   :  { %v23840_v28 = vld [vmem:[#allocation7 + $0x38c0] ss:$16 sps:$4 sm:$0xff]  }
 0x358   :  { %8991 = vmatpush1.bf16.msra.mxu0 %v23768_v29  ;;  %10159 = vmatpush1.bf16.msra.mxu1 %v23771_v30  ;;  %v23843_v29 = vld [vmem:[#allocation7 + $0x38c8] ss:$16 sps:$4 sm:$0xff]   ;;  %v23848_v30 = vld [vmem:[#allocation7 + $0x38e4] ss:$16 sps:$4 sm:$0xff]  }
 0x359   :  { %8992 = vmatprep.subr.bf16.mxu0 %v23776_v31  ;;  %10160 = vmatprep.subr.bf16.mxu1 %v23779_v32  ;;  %v23851_v31 = vld [vmem:[#allocation7 + $0x38ec] ss:$16 sps:$4 sm:$0xff]   ;;  %v19138_v32 = vcombine.high %v26148_v25, %v26150_v26 }
 0x35c   :  { %8993 = vmatpush1.bf16.msra.mxu0 %v23774_v33  ;;  %10161 = vmatpush1.bf16.msra.mxu1 %v23777_v34  ;;  %v23846_v33 = vld [vmem:[#allocation7 + $0x38e0] ss:$16 sps:$4 sm:$0xff]   ;;  %v23849_v34 = vld [vmem:[#allocation7 + $0x38e8] ss:$16 sps:$4 sm:$0xff]  }
 0x35d   :  { %8994 = vmatprep.subr.bf16.mxu0 %v23782_v35  ;;  %10162 = vmatprep.subr.bf16.mxu1 %v23785_v36  ;;  %v23854_v35 = vld [vmem:[#allocation7 + $0x3904] ss:$16 sps:$4 sm:$0xff]   ;;  %v23857_v36 = vld [vmem:[#allocation7 + $0x390c] ss:$16 sps:$4 sm:$0xff]  }
 0x360   :  { %8995 = vmatpush1.bf16.msra.mxu0 %v23780_v37  ;;  %10163 = vmatpush1.bf16.msra.mxu1 %v23783_v38  ;;  %v23852_v37 = vld [vmem:[#allocation7 + $0x3900] ss:$16 sps:$4 sm:$0xff]   ;;  %v23855_v38 = vld [vmem:[#allocation7 + $0x3908] ss:$16 sps:$4 sm:$0xff]  }
 0x361   :  { %8996 = vmatprep.subr.bf16.mxu0 %v23788_v39  ;;  %10164 = vmatprep.subr.bf16.mxu1 %v23791_v40  ;;  %v23860_v39 = vld [vmem:[#allocation7 + $0x3924] ss:$16 sps:$4 sm:$0xff]   ;;  %v23863_v40 = vld [vmem:[#allocation7 + $0x392c] ss:$16 sps:$4 sm:$0xff]  }
 0x364   :  { %8997 = vmatpush1.bf16.msra.mxu0 %v23786_v41  ;;  %10165 = vmatpush1.bf16.msra.mxu1 %v23789_v42  ;;  %v23858_v41 = vld [vmem:[#allocation7 + $0x3920] ss:$16 sps:$4 sm:$0xff]   ;;  %v23861_v42 = vld [vmem:[#allocation7 + $0x3928] ss:$16 sps:$4 sm:$0xff]  }
 0x365   :  { %8998 = vmatprep.subr.bf16.mxu0 %v23794_v43  ;;  %10166 = vmatprep.subr.bf16.mxu1 %v23797_v44  ;;  %v23866_v43 = vld [vmem:[#allocation7 + $0x3944] ss:$16 sps:$4 sm:$0xff]   ;;  %v23869_v44 = vld [vmem:[#allocation7 + $0x394c] ss:$16 sps:$4 sm:$0xff]  }
 0x368   :  { %8999 = vmatpush1.bf16.msra.mxu0 %v23792_v45  ;;  %10167 = vmatpush1.bf16.msra.mxu1 %v23795_v46  ;;  %v23864_v45 = vld [vmem:[#allocation7 + $0x3940] ss:$16 sps:$4 sm:$0xff]   ;;  %v23867_v46 = vld [vmem:[#allocation7 + $0x3948] ss:$16 sps:$4 sm:$0xff]  }
 0x369   :  { %9000 = vmatprep.subr.bf16.mxu0 %v23800_v47  ;;  %10168 = vmatprep.subr.bf16.mxu1 %v23803_v48  ;;  %v23872_v47 = vld [vmem:[#allocation7 + $0x3964] ss:$16 sps:$4 sm:$0xff]   ;;  %v23875_v48 = vld [vmem:[#allocation7 + $0x396c] ss:$16 sps:$4 sm:$0xff]  }
 0x36c   :  { %9001 = vmatpush1.bf16.msra.mxu0 %v23798_v49  ;;  %10169 = vmatpush1.bf16.msra.mxu1 %v23801_v50  ;;  %v23870_v49 = vld [vmem:[#allocation7 + $0x3960] ss:$16 sps:$4 sm:$0xff]   ;;  %v23873_v50 = vld [vmem:[#allocation7 + $0x3968] ss:$16 sps:$4 sm:$0xff]  }
 0x36d   :  { %9043 = vmatprep.subr.bf16.mxu0 %v23806_v51  ;;  %10211 = vmatprep.subr.bf16.mxu1 %v23809_v52  ;;  %v23878_v51 = vld [vmem:[#allocation7 + $0x3984] ss:$16 sps:$4 sm:$0xff]   ;;  %v23881_v52 = vld [vmem:[#allocation7 + $0x398c] ss:$16 sps:$4 sm:$0xff]  }
 0x36f   :  { %9003 = vmatmul.mubr.bf16.vlgmr.msra.gmra.mrb[0].mxu0 %v19135_v55  ;;  %10171 = vmatmul.mubr.bf16.vlgmr.msra.gmra.mrb[0].mxu1 %v19135_v55  ;;  %v23884_v55 = vld [vmem:[#allocation7 + $0x39a4] ss:$16 sps:$4 sm:$0xff]  }
 0x370   :  { %9044 = vmatpush1.bf16.msra.mxu0 %v23804_v56  ;;  %10212 = vmatpush1.bf16.msra.mxu1 %v23807_v57  ;;  %v23887_v56 = vld [vmem:[#allocation7 + $0x39ac] ss:$16 sps:$4 sm:$0xff]   ;;  %v23882_v57 = vld [vmem:[#allocation7 + $0x39a0] ss:$16 sps:$4 sm:$0xff]  }
 0x371   :  { %9045 = vmatprep.subr.bf16.mxu0 %v23812_v58  ;;  %10213 = vmatprep.subr.bf16.mxu1 %v23815_v59  ;;  %v23885_v58 = vld [vmem:[#allocation7 + $0x39a8] ss:$16 sps:$4 sm:$0xff]   ;;  %v23890_v59 = vld [vmem:[#allocation7 + $0x39c4] ss:$16 sps:$4 sm:$0xff]  }
 0x372   :  { %9012 = vmatprep.mubr.bf16.mxu0 %v19168_v62  ;;  %10180 = vmatprep.mubr.bf16.mxu1 %v19168_v62  ;;  %v23891_v62 = vld [vmem:[#allocation7 + $0x39c8] ss:$16 sps:$4 sm:$0xff]  }
 0x374   :  { %9046 = vmatpush1.bf16.msra.mxu0 %v23810_v60  ;;  %10214 = vmatpush1.bf16.msra.mxu1 %v23813_v61  ;;  %v23893_v60 = vld [vmem:[#allocation7 + $0x39cc] ss:$16 sps:$4 sm:$0xff]   ;;  %v23888_v61 = vld [vmem:[#allocation7 + $0x39c0] ss:$16 sps:$4 sm:$0xff]  }
 0x375   :  { %9047 = vmatprep.subr.bf16.mxu0 %v23818_v63  ;;  %10215 = vmatprep.subr.bf16.mxu1 %v23821_v0  ;;  %v23896_v63 = vld [vmem:[#allocation7 + $0x39e4] ss:$16 sps:$4 sm:$0xff]   ;;  %v23899_v0 = vld [vmem:[#allocation7 + $0x39ec] ss:$16 sps:$4 sm:$0xff]  }
 0x377   :  { %9013 = vmatmul.mubr.bf16.gmra.mrb[4].mxu0 %v19167_v3  ;;  %10181 = vmatmul.mubr.bf16.gmra.mrb[4].mxu1 %v19167_v3  ;;  %v23902_v3 = vld [vmem:[#allocation7 + $0x3a04] ss:$16 sps:$4 sm:$0xff]  }
 0x378   :  { %9048 = vmatpush1.bf16.msra.mxu0 %v23816_v4  ;;  %10216 = vmatpush1.bf16.msra.mxu1 %v23819_v5  ;;  %v23905_v4 = vld [vmem:[#allocation7 + $0x3a0c] ss:$16 sps:$4 sm:$0xff]   ;;  %v1299_v5 = vld [vmem:[#allocation5 + $0x160] sm:$0xff] }
 0x379   :  { %9049 = vmatprep.subr.bf16.mxu0 %v23824_v6  ;;  %10217 = vmatprep.subr.bf16.mxu1 %v23827_v7  ;;  %v1315_v6 = vld [vmem:[#allocation5 + $0x1e0] sm:$0xff]  ;;  %v19137_v7 = vcombine.low %v26148_v25, %v26150_v26  ;;  %v23921_v25 = vld [vmem:[#allocation7 + $0x3a68] ss:$16 sps:$4 sm:$0xff]  }
 0x37a   :  { %9022 = vmatprep.mubr.bf16.mxu0 %v19200_v10  ;;  %10190 = vmatprep.mubr.bf16.mxu1 %v19200_v10  ;;  %v23908_v10 = vld [vmem:[#allocation7 + $0x3a24] ss:$16 sps:$4 sm:$0xff]   ;;  %v19170_v14 = vcombine.high %v1299_v5, %v1315_v6 }
 0x37c   :  { %9050 = vmatpush1.bf16.msra.mxu0 %v23822_v8  ;;  %10218 = vmatpush1.bf16.msra.mxu1 %v23825_v9  ;;  %v23900_v8 = vld [vmem:[#allocation7 + $0x3a00] ss:$16 sps:$4 sm:$0xff]   ;;  %v23903_v9 = vld [vmem:[#allocation7 + $0x3a08] ss:$16 sps:$4 sm:$0xff]  }
 0x37d   :  { %9051 = vmatprep.subr.bf16.mxu0 %v23830_v11  ;;  %10219 = vmatprep.subr.bf16.mxu1 %v23833_v12  ;;  %v23911_v11 = vld [vmem:[#allocation7 + $0x3a2c] ss:$16 sps:$4 sm:$0xff]   ;;  %v23906_v12 = vld [vmem:[#allocation7 + $0x3a20] ss:$16 sps:$4 sm:$0xff]  }
 0x37f   :  { %9023 = vmatmul.mubr.bf16.gmra.mrb[8].mxu0 %v19199_v15  ;;  %10191 = vmatmul.mubr.bf16.gmra.mrb[8].mxu1 %v19199_v15  ;;  %v23914_v15 = vld [vmem:[#allocation7 + $0x3a44] ss:$16 sps:$4 sm:$0xff]  }
 0x380   :  { %9052 = vmatpush1.bf16.msra.mxu0 %v23828_v16  ;;  %10220 = vmatpush1.bf16.msra.mxu1 %v23831_v17  ;;  %v23917_v16 = vld [vmem:[#allocation7 + $0x3a4c] ss:$16 sps:$4 sm:$0xff]   ;;  %v1331_v17 = vld [vmem:[#allocation5 + $0x260] sm:$0xff] }
 0x381   :  { %9053 = vmatprep.subr.bf16.mxu0 %v23836_v18  ;;  %10221 = vmatprep.subr.bf16.mxu1 %v23839_v19  ;;  %v1347_v18 = vld [vmem:[#allocation5 + $0x2e0] sm:$0xff]  ;;  %v19169_v19 = vcombine.low %v1299_v5, %v1315_v6  ;;  %v23975_v6 = vld [vmem:[#allocation7 + $0x3b88] ss:$16 sps:$4 sm:$0xff]  }
 0x382   :  { %9032 = vmatprep.mubr.bf16.mxu0 %v19232_v22  ;;  %10200 = vmatprep.mubr.bf16.mxu1 %v19232_v22  ;;  %v23920_v22 = vld [vmem:[#allocation7 + $0x3a64] ss:$16 sps:$4 sm:$0xff]   ;;  %v19202_v26 = vcombine.high %v1331_v17, %v1347_v18  ;;  %v23972_v5 = vld [vmem:[#allocation7 + $0x3b80] ss:$16 sps:$4 sm:$0xff]  }
 0x384   :  { %9054 = vmatpush1.bf16.msra.mxu0 %v23834_v20  ;;  %10222 = vmatpush1.bf16.msra.mxu1 %v23837_v21  ;;  %v23912_v20 = vld [vmem:[#allocation7 + $0x3a40] ss:$16 sps:$4 sm:$0xff]   ;;  %v23915_v21 = vld [vmem:[#allocation7 + $0x3a48] ss:$16 sps:$4 sm:$0xff]  }
 0x385   :  { %9055 = vmatprep.subr.bf16.mxu0 %v23842_v23  ;;  %10223 = vmatprep.subr.bf16.mxu1 %v23845_v24  ;;  %v23923_v23 = vld [vmem:[#allocation7 + $0x3a6c] ss:$16 sps:$4 sm:$0xff]   ;;  %v23918_v24 = vld [vmem:[#allocation7 + $0x3a60] ss:$16 sps:$4 sm:$0xff]  }
 0x387   :  { %9033 = vmatmul.mubr.bf16.gmra.mrb[12].mxu0 %v19231_v27  ;;  %10201 = vmatmul.mubr.bf16.gmra.mrb[12].mxu1 %v19231_v27  ;;  %v23926_v27 = vld [vmem:[#allocation7 + $0x3a84] ss:$16 sps:$4 sm:$0xff]  }
 0x388   :  { %9056 = vmatpush1.bf16.msra.mxu0 %v23840_v28  ;;  %10224 = vmatpush1.bf16.msra.mxu1 %v23843_v29  ;;  %v23929_v28 = vld [vmem:[#allocation7 + $0x3a8c] ss:$16 sps:$4 sm:$0xff]   ;;  %v1363_v29 = vld [vmem:[#allocation5 + $0x360] sm:$0xff] }
 0x389   :  { %9057 = vmatprep.subr.bf16.mxu0 %v23848_v30  ;;  %10225 = vmatprep.subr.bf16.mxu1 %v23851_v31  ;;  %v1379_v30 = vld [vmem:[#allocation5 + $0x3e0] sm:$0x33]  ;;  %v19201_v31 = vcombine.low %v1331_v17, %v1347_v18  ;;  %v23993_v18 = vld [vmem:[#allocation7 + $0x3be8] ss:$16 sps:$4 sm:$0xff]  }
 0x38a   :  { %9075 = vmatprep.mubr.bf16.mxu0 %v19138_v32  ;;  %10243 = vmatprep.mubr.bf16.mxu1 %v19138_v32  ;;  %v23924_v32 = vld [vmem:[#allocation7 + $0x3a80] ss:$16 sps:$4 sm:$0xff]  }
 0x38b   :  { %v23990_v17 = vld [vmem:[#allocation7 + $0x3be0] ss:$16 sps:$4 sm:$0xff]  }
 0x38c   :  { %9058 = vmatpush1.bf16.msra.mxu0 %v23846_v33  ;;  %10226 = vmatpush1.bf16.msra.mxu1 %v23849_v34  ;;  %v23927_v33 = vld [vmem:[#allocation7 + $0x3a88] ss:$16 sps:$4 sm:$0xff]   ;;  %v23932_v34 = vld [vmem:[#allocation7 + $0x3aa4] ss:$16 sps:$4 sm:$0xff]  }
 0x38d   :  { %9059 = vmatprep.subr.bf16.mxu0 %v23854_v35  ;;  %10227 = vmatprep.subr.bf16.mxu1 %v23857_v36  ;;  %v23935_v35 = vld [vmem:[#allocation7 + $0x3aac] ss:$16 sps:$4 sm:$0xff]   ;;  %v23930_v36 = vld [vmem:[#allocation7 + $0x3aa0] ss:$16 sps:$4 sm:$0xff]  }
 0x390   :  { %9060 = vmatpush1.bf16.msra.mxu0 %v23852_v37  ;;  %10228 = vmatpush1.bf16.msra.mxu1 %v23855_v38  ;;  %v23933_v37 = vld [vmem:[#allocation7 + $0x3aa8] ss:$16 sps:$4 sm:$0xff]   ;;  %v19234_v38 = vcombine.high %v1363_v29, %v1379_v30 }
 0x391   :  { %9061 = vmatprep.subr.bf16.mxu0 %v23860_v39  ;;  %10229 = vmatprep.subr.bf16.mxu1 %v23863_v40  ;;  %v23938_v39 = vld [vmem:[#allocation7 + $0x3ac4] ss:$16 sps:$4 sm:$0xff]   ;;  %v23941_v40 = vld [vmem:[#allocation7 + $0x3acc] ss:$16 sps:$4 sm:$0xff]  }
 0x394   :  { %9062 = vmatpush1.bf16.msra.mxu0 %v23858_v41  ;;  %10230 = vmatpush1.bf16.msra.mxu1 %v23861_v42  ;;  %v26156_v41 = vld [vmem:[#allocation5 + $0x68] sm:$0xff] }
 0x395   :  { %9063 = vmatprep.subr.bf16.mxu0 %v23866_v43  ;;  %10231 = vmatprep.subr.bf16.mxu1 %v23869_v44  ;;  %v26158_v42 = vld [vmem:[#allocation5 + $0xe8] sm:$0xff]  ;;  %v19233_v43 = vcombine.low %v1363_v29, %v1379_v30  ;;  %v23936_v44 = vld [vmem:[#allocation7 + $0x3ac0] ss:$16 sps:$4 sm:$0xff]  }
 0x396   :  { %v24005_v29 = vld [vmem:[#allocation7 + $0x3c28] ss:$16 sps:$4 sm:$0xff]  }
 0x398   :  { %9064 = vmatpush1.bf16.msra.mxu0 %v23864_v45  ;;  %10232 = vmatpush1.bf16.msra.mxu1 %v23867_v46  ;;  %v23939_v45 = vld [vmem:[#allocation7 + $0x3ac8] ss:$16 sps:$4 sm:$0xff]   ;;  %v23944_v46 = vld [vmem:[#allocation7 + $0x3ae4] ss:$16 sps:$4 sm:$0xff]  }
 0x399   :  { %9065 = vmatprep.subr.bf16.mxu0 %v23872_v47  ;;  %10233 = vmatprep.subr.bf16.mxu1 %v23875_v48  ;;  %v23947_v47 = vld [vmem:[#allocation7 + $0x3aec] ss:$16 sps:$4 sm:$0xff]   ;;  %v19140_v48 = vcombine.high %v26156_v41, %v26158_v42 }
 0x39c   :  { %9066 = vmatpush1.bf16.msra.mxu0 %v23870_v49  ;;  %10234 = vmatpush1.bf16.msra.mxu1 %v23873_v50  ;;  %v23942_v49 = vld [vmem:[#allocation7 + $0x3ae0] ss:$16 sps:$4 sm:$0xff]   ;;  %v23945_v50 = vld [vmem:[#allocation7 + $0x3ae8] ss:$16 sps:$4 sm:$0xff]  }
 0x39d   :  { %9067 = vmatprep.subr.bf16.mxu0 %v23878_v51  ;;  %10235 = vmatprep.subr.bf16.mxu1 %v23881_v52  ;;  %v23950_v51 = vld [vmem:[#allocation7 + $0x3b04] ss:$16 sps:$4 sm:$0xff]   ;;  %v23953_v52 = vld [vmem:[#allocation7 + $0x3b0c] ss:$16 sps:$4 sm:$0xff]  }
 0x3a0   :  { %9068 = vmatpush1.bf16.msra.mxu0 %v23876_v53  ;;  %10236 = vmatpush1.bf16.msra.mxu1 %v23879_v54  ;;  %v23948_v53 = vld [vmem:[#allocation7 + $0x3b00] ss:$16 sps:$4 sm:$0xff]   ;;  %v23951_v54 = vld [vmem:[#allocation7 + $0x3b08] ss:$16 sps:$4 sm:$0xff]  }
 0x3a1   :  { %9069 = vmatprep.subr.bf16.mxu0 %v23884_v55  ;;  %10237 = vmatprep.subr.bf16.mxu1 %v23887_v56  ;;  %v23956_v55 = vld [vmem:[#allocation7 + $0x3b24] ss:$16 sps:$4 sm:$0xff]   ;;  %v23959_v56 = vld [vmem:[#allocation7 + $0x3b2c] ss:$16 sps:$4 sm:$0xff]  }
 0x3a4   :  { %9070 = vmatpush1.bf16.msra.mxu0 %v23882_v57  ;;  %10238 = vmatpush1.bf16.msra.mxu1 %v23885_v58  ;;  %v23954_v57 = vld [vmem:[#allocation7 + $0x3b20] ss:$16 sps:$4 sm:$0xff]   ;;  %v23957_v58 = vld [vmem:[#allocation7 + $0x3b28] ss:$16 sps:$4 sm:$0xff]  }
 0x3a5   :  { %9071 = vmatprep.subr.bf16.mxu0 %v23890_v59  ;;  %10239 = vmatprep.subr.bf16.mxu1 %v23893_v60  ;;  %v23962_v59 = vld [vmem:[#allocation7 + $0x3b44] ss:$16 sps:$4 sm:$0xff]   ;;  %v23965_v60 = vld [vmem:[#allocation7 + $0x3b4c] ss:$16 sps:$4 sm:$0xff]  }
 0x3a8   :  { %9072 = vmatpush1.bf16.msra.mxu0 %v23888_v61  ;;  %10240 = vmatpush1.bf16.msra.mxu1 %v23891_v62  ;;  %v23960_v61 = vld [vmem:[#allocation7 + $0x3b40] ss:$16 sps:$4 sm:$0xff]   ;;  %v23963_v62 = vld [vmem:[#allocation7 + $0x3b48] ss:$16 sps:$4 sm:$0xff]  }
 0x3a9   :  { %9073 = vmatprep.subr.bf16.mxu0 %v23896_v63  ;;  %10241 = vmatprep.subr.bf16.mxu1 %v23899_v0  ;;  %v23968_v63 = vld [vmem:[#allocation7 + $0x3b64] ss:$16 sps:$4 sm:$0xff]   ;;  %v23971_v0 = vld [vmem:[#allocation7 + $0x3b6c] ss:$16 sps:$4 sm:$0xff]  }
 0x3ac   :  { %9074 = vmatpush1.bf16.msra.mxu0 %v23894_v1  ;;  %10242 = vmatpush1.bf16.msra.mxu1 %v23897_v2  ;;  %v23966_v1 = vld [vmem:[#allocation7 + $0x3b60] ss:$16 sps:$4 sm:$0xff]   ;;  %v23969_v2 = vld [vmem:[#allocation7 + $0x3b68] ss:$16 sps:$4 sm:$0xff]  }
 0x3ad   :  { %9116 = vmatprep.subr.bf16.mxu0 %v23902_v3  ;;  %10284 = vmatprep.subr.bf16.mxu1 %v23905_v4  ;;  %v23974_v3 = vld [vmem:[#allocation7 + $0x3b84] ss:$16 sps:$4 sm:$0xff]   ;;  %v23977_v4 = vld [vmem:[#allocation7 + $0x3b8c] ss:$16 sps:$4 sm:$0xff]  }
 0x3af   :  { %9076 = vmatmul.mubr.bf16.vlgmr.msra.gmra.mrb[0].mxu0 %v19137_v7  ;;  %10244 = vmatmul.mubr.bf16.vlgmr.msra.gmra.mrb[0].mxu1 %v19137_v7  ;;  %v23980_v7 = vld [vmem:[#allocation7 + $0x3ba4] ss:$16 sps:$4 sm:$0xff]  }
 0x3b0   :  { %9117 = vmatpush1.bf16.msra.mxu0 %v23900_v8  ;;  %10285 = vmatpush1.bf16.msra.mxu1 %v23903_v9  ;;  %v23983_v8 = vld [vmem:[#allocation7 + $0x3bac] ss:$16 sps:$4 sm:$0xff]   ;;  %v23978_v9 = vld [vmem:[#allocation7 + $0x3ba0] ss:$16 sps:$4 sm:$0xff]  }
 0x3b1   :  { %9118 = vmatprep.subr.bf16.mxu0 %v23908_v10  ;;  %10286 = vmatprep.subr.bf16.mxu1 %v23911_v11  ;;  %v23981_v10 = vld [vmem:[#allocation7 + $0x3ba8] ss:$16 sps:$4 sm:$0xff]   ;;  %v23986_v11 = vld [vmem:[#allocation7 + $0x3bc4] ss:$16 sps:$4 sm:$0xff]  }
 0x3b2   :  { %9085 = vmatprep.mubr.bf16.mxu0 %v19170_v14  ;;  %10253 = vmatprep.mubr.bf16.mxu1 %v19170_v14  ;;  %v23987_v14 = vld [vmem:[#allocation7 + $0x3bc8] ss:$16 sps:$4 sm:$0xff]  }
 0x3b4   :  { %9119 = vmatpush1.bf16.msra.mxu0 %v23906_v12  ;;  %10287 = vmatpush1.bf16.msra.mxu1 %v23909_v13  ;;  %v23989_v12 = vld [vmem:[#allocation7 + $0x3bcc] ss:$16 sps:$4 sm:$0xff]   ;;  %v23984_v13 = vld [vmem:[#allocation7 + $0x3bc0] ss:$16 sps:$4 sm:$0xff]  }
 0x3b5   :  { %9120 = vmatprep.subr.bf16.mxu0 %v23914_v15  ;;  %10288 = vmatprep.subr.bf16.mxu1 %v23917_v16  ;;  %v23992_v15 = vld [vmem:[#allocation7 + $0x3be4] ss:$16 sps:$4 sm:$0xff]   ;;  %v23995_v16 = vld [vmem:[#allocation7 + $0x3bec] ss:$16 sps:$4 sm:$0xff]  }
 0x3b7   :  { %9086 = vmatmul.mubr.bf16.gmra.mrb[4].mxu0 %v19169_v19  ;;  %10254 = vmatmul.mubr.bf16.gmra.mrb[4].mxu1 %v19169_v19  ;;  %v23998_v19 = vld [vmem:[#allocation7 + $0x3c04] ss:$16 sps:$4 sm:$0xff]  }
 0x3b8   :  { %9121 = vmatpush1.bf16.msra.mxu0 %v23912_v20  ;;  %10289 = vmatpush1.bf16.msra.mxu1 %v23915_v21  ;;  %v24001_v20 = vld [vmem:[#allocation7 + $0x3c0c] ss:$16 sps:$4 sm:$0xff]  }
 0x3b9   :  { %9122 = vmatprep.subr.bf16.mxu0 %v23920_v22  ;;  %10290 = vmatprep.subr.bf16.mxu1 %v23923_v23  ;;  %v1300_v21 = vld [vmem:[#allocation5 + $0x168] sm:$0xff]  ;;  %v19139_v23 = vcombine.low %v26156_v41, %v26158_v42 }
 0x3ba   :  { %9095 = vmatprep.mubr.bf16.mxu0 %v19202_v26  ;;  %10263 = vmatprep.mubr.bf16.mxu1 %v19202_v26  ;;  %v1316_v22 = vld [vmem:[#allocation5 + $0x1e8] sm:$0xff]  ;;  %v24004_v26 = vld [vmem:[#allocation7 + $0x3c24] ss:$16 sps:$4 sm:$0xff]  }
 0x3bb   :  { %v19172_v30 = vcombine.high %v1300_v21, %v1316_v22  ;;  %v24017_v41 = vld [vmem:[#allocation7 + $0x3c68] ss:$16 sps:$4 sm:$0xff]  }
 0x3bc   :  { %9123 = vmatpush1.bf16.msra.mxu0 %v23918_v24  ;;  %10291 = vmatpush1.bf16.msra.mxu1 %v23921_v25  ;;  %v23996_v24 = vld [vmem:[#allocation7 + $0x3c00] ss:$16 sps:$4 sm:$0xff]   ;;  %v23999_v25 = vld [vmem:[#allocation7 + $0x3c08] ss:$16 sps:$4 sm:$0xff]  }
 0x3bd   :  { %9124 = vmatprep.subr.bf16.mxu0 %v23926_v27  ;;  %10292 = vmatprep.subr.bf16.mxu1 %v23929_v28  ;;  %v24007_v27 = vld [vmem:[#allocation7 + $0x3c2c] ss:$16 sps:$4 sm:$0xff]   ;;  %v24002_v28 = vld [vmem:[#allocation7 + $0x3c20] ss:$16 sps:$4 sm:$0xff]  }
 0x3bf   :  { %9096 = vmatmul.mubr.bf16.gmra.mrb[8].mxu0 %v19201_v31  ;;  %10264 = vmatmul.mubr.bf16.gmra.mrb[8].mxu1 %v19201_v31  ;;  %v24010_v31 = vld [vmem:[#allocation7 + $0x3c44] ss:$16 sps:$4 sm:$0xff]  }
 0x3c0   :  { %9125 = vmatpush1.bf16.msra.mxu0 %v23924_v32  ;;  %10293 = vmatpush1.bf16.msra.mxu1 %v23927_v33  ;;  %v24013_v32 = vld [vmem:[#allocation7 + $0x3c4c] ss:$16 sps:$4 sm:$0xff]  }
 0x3c1   :  { %9126 = vmatprep.subr.bf16.mxu0 %v23932_v34  ;;  %10294 = vmatprep.subr.bf16.mxu1 %v23935_v35  ;;  %v1332_v33 = vld [vmem:[#allocation5 + $0x268] sm:$0xff]  ;;  %v19171_v35 = vcombine.low %v1300_v21, %v1316_v22  ;;  %v24068_v21 = vld [vmem:[#allocation7 + $0x3d80] ss:$16 sps:$4 sm:$0xff]  }
 0x3c2   :  { %9105 = vmatprep.mubr.bf16.mxu0 %v19234_v38  ;;  %10273 = vmatprep.mubr.bf16.mxu1 %v19234_v38  ;;  %v1348_v34 = vld [vmem:[#allocation5 + $0x2e8] sm:$0xff]  ;;  %v24016_v38 = vld [vmem:[#allocation7 + $0x3c64] ss:$16 sps:$4 sm:$0xff]  }
 0x3c3   :  { %v19204_v42 = vcombine.high %v1332_v33, %v1348_v34  ;;  %v24071_v22 = vld [vmem:[#allocation7 + $0x3d88] ss:$16 sps:$4 sm:$0xff]  }
 0x3c4   :  { %9127 = vmatpush1.bf16.msra.mxu0 %v23930_v36  ;;  %10295 = vmatpush1.bf16.msra.mxu1 %v23933_v37  ;;  %v24008_v36 = vld [vmem:[#allocation7 + $0x3c40] ss:$16 sps:$4 sm:$0xff]   ;;  %v24011_v37 = vld [vmem:[#allocation7 + $0x3c48] ss:$16 sps:$4 sm:$0xff]  }
 0x3c5   :  { %9128 = vmatprep.subr.bf16.mxu0 %v23938_v39  ;;  %10296 = vmatprep.subr.bf16.mxu1 %v23941_v40  ;;  %v24019_v39 = vld [vmem:[#allocation7 + $0x3c6c] ss:$16 sps:$4 sm:$0xff]   ;;  %v24014_v40 = vld [vmem:[#allocation7 + $0x3c60] ss:$16 sps:$4 sm:$0xff]  }
 0x3c7   :  { %9106 = vmatmul.mubr.bf16.gmra.mrb[12].mxu0 %v19233_v43  ;;  %10274 = vmatmul.mubr.bf16.gmra.mrb[12].mxu1 %v19233_v43  ;;  %v24022_v43 = vld [vmem:[#allocation7 + $0x3c84] ss:$16 sps:$4 sm:$0xff]  }
 0x3c8   :  { %9129 = vmatpush1.bf16.msra.mxu0 %v23936_v44  ;;  %10297 = vmatpush1.bf16.msra.mxu1 %v23939_v45  ;;  %v24025_v44 = vld [vmem:[#allocation7 + $0x3c8c] ss:$16 sps:$4 sm:$0xff]  }
 0x3c9   :  { %9130 = vmatprep.subr.bf16.mxu0 %v23944_v46  ;;  %10298 = vmatprep.subr.bf16.mxu1 %v23947_v47  ;;  %v1364_v45 = vld [vmem:[#allocation5 + $0x368] sm:$0xff]  ;;  %v19203_v47 = vcombine.low %v1332_v33, %v1348_v34  ;;  %v24086_v33 = vld [vmem:[#allocation7 + $0x3de0] ss:$16 sps:$4 sm:$0xff]  }
 0x3ca   :  { %9148 = vmatprep.mubr.bf16.mxu0 %v19140_v48  ;;  %10316 = vmatprep.mubr.bf16.mxu1 %v19140_v48  ;;  %v1380_v46 = vld [vmem:[#allocation5 + $0x3e8] sm:$0x33]  ;;  %v24020_v48 = vld [vmem:[#allocation7 + $0x3c80] ss:$16 sps:$4 sm:$0xff]  }
 0x3cb   :  { %v24089_v34 = vld [vmem:[#allocation7 + $0x3de8] ss:$16 sps:$4 sm:$0xff]  }
 0x3cc   :  { %9131 = vmatpush1.bf16.msra.mxu0 %v23942_v49  ;;  %10299 = vmatpush1.bf16.msra.mxu1 %v23945_v50  ;;  %v24023_v49 = vld [vmem:[#allocation7 + $0x3c88] ss:$16 sps:$4 sm:$0xff]   ;;  %v24028_v50 = vld [vmem:[#allocation7 + $0x3ca4] ss:$16 sps:$4 sm:$0xff]  }
 0x3cd   :  { %9132 = vmatprep.subr.bf16.mxu0 %v23950_v51  ;;  %10300 = vmatprep.subr.bf16.mxu1 %v23953_v52  ;;  %v24031_v51 = vld [vmem:[#allocation7 + $0x3cac] ss:$16 sps:$4 sm:$0xff]   ;;  %v24026_v52 = vld [vmem:[#allocation7 + $0x3ca0] ss:$16 sps:$4 sm:$0xff]  }
 0x3d0   :  { %9133 = vmatpush1.bf16.msra.mxu0 %v23948_v53  ;;  %10301 = vmatpush1.bf16.msra.mxu1 %v23951_v54  ;;  %v24029_v53 = vld [vmem:[#allocation7 + $0x3ca8] ss:$16 sps:$4 sm:$0xff]   ;;  %v19236_v54 = vcombine.high %v1364_v45, %v1380_v46 }
 0x3d1   :  { %9134 = vmatprep.subr.bf16.mxu0 %v23956_v55  ;;  %10302 = vmatprep.subr.bf16.mxu1 %v23959_v56  ;;  %v24034_v55 = vld [vmem:[#allocation7 + $0x3cc4] ss:$16 sps:$4 sm:$0xff]   ;;  %v24037_v56 = vld [vmem:[#allocation7 + $0x3ccc] ss:$16 sps:$4 sm:$0xff]  }
 0x3d4   :  { %9135 = vmatpush1.bf16.msra.mxu0 %v23954_v57  ;;  %10303 = vmatpush1.bf16.msra.mxu1 %v23957_v58  ;;  %v26164_v57 = vld [vmem:[#allocation5 + $0x70] sm:$0xff] }
 0x3d5   :  { %9136 = vmatprep.subr.bf16.mxu0 %v23962_v59  ;;  %10304 = vmatprep.subr.bf16.mxu1 %v23965_v60  ;;  %v26166_v58 = vld [vmem:[#allocation5 + $0xf0] sm:$0xff]  ;;  %v19235_v59 = vcombine.low %v1364_v45, %v1380_v46  ;;  %v24101_v45 = vld [vmem:[#allocation7 + $0x3e28] ss:$16 sps:$4 sm:$0xff]  }
 0x3d6   :  { %v24032_v60 = vld [vmem:[#allocation7 + $0x3cc0] ss:$16 sps:$4 sm:$0xff]  }
 0x3d8   :  { %9137 = vmatpush1.bf16.msra.mxu0 %v23960_v61  ;;  %10305 = vmatpush1.bf16.msra.mxu1 %v23963_v62  ;;  %v24035_v61 = vld [vmem:[#allocation7 + $0x3cc8] ss:$16 sps:$4 sm:$0xff]   ;;  %v24040_v62 = vld [vmem:[#allocation7 + $0x3ce4] ss:$16 sps:$4 sm:$0xff]  }
 0x3d9   :  { %9138 = vmatprep.subr.bf16.mxu0 %v23968_v63  ;;  %10306 = vmatprep.subr.bf16.mxu1 %v23971_v0  ;;  %v24043_v63 = vld [vmem:[#allocation7 + $0x3cec] ss:$16 sps:$4 sm:$0xff]   ;;  %v19142_v0 = vcombine.high %v26164_v57, %v26166_v58 }
 0x3dc   :  { %9139 = vmatpush1.bf16.msra.mxu0 %v23966_v1  ;;  %10307 = vmatpush1.bf16.msra.mxu1 %v23969_v2  ;;  %v24038_v1 = vld [vmem:[#allocation7 + $0x3ce0] ss:$16 sps:$4 sm:$0xff]   ;;  %v24041_v2 = vld [vmem:[#allocation7 + $0x3ce8] ss:$16 sps:$4 sm:$0xff]  }
 0x3dd   :  { %9140 = vmatprep.subr.bf16.mxu0 %v23974_v3  ;;  %10308 = vmatprep.subr.bf16.mxu1 %v23977_v4  ;;  %v24046_v3 = vld [vmem:[#allocation7 + $0x3d04] ss:$16 sps:$4 sm:$0xff]   ;;  %v24049_v4 = vld [vmem:[#allocation7 + $0x3d0c] ss:$16 sps:$4 sm:$0xff]  }
 0x3e0   :  { %9141 = vmatpush1.bf16.msra.mxu0 %v23972_v5  ;;  %10309 = vmatpush1.bf16.msra.mxu1 %v23975_v6  ;;  %v24044_v5 = vld [vmem:[#allocation7 + $0x3d00] ss:$16 sps:$4 sm:$0xff]   ;;  %v24047_v6 = vld [vmem:[#allocation7 + $0x3d08] ss:$16 sps:$4 sm:$0xff]  }
 0x3e1   :  { %9142 = vmatprep.subr.bf16.mxu0 %v23980_v7  ;;  %10310 = vmatprep.subr.bf16.mxu1 %v23983_v8  ;;  %v24052_v7 = vld [vmem:[#allocation7 + $0x3d24] ss:$16 sps:$4 sm:$0xff]   ;;  %v24055_v8 = vld [vmem:[#allocation7 + $0x3d2c] ss:$16 sps:$4 sm:$0xff]  }
 0x3e4   :  { %9143 = vmatpush1.bf16.msra.mxu0 %v23978_v9  ;;  %10311 = vmatpush1.bf16.msra.mxu1 %v23981_v10  ;;  %v24050_v9 = vld [vmem:[#allocation7 + $0x3d20] ss:$16 sps:$4 sm:$0xff]   ;;  %v24053_v10 = vld [vmem:[#allocation7 + $0x3d28] ss:$16 sps:$4 sm:$0xff]  }
 0x3e5   :  { %9144 = vmatprep.subr.bf16.mxu0 %v23986_v11  ;;  %10312 = vmatprep.subr.bf16.mxu1 %v23989_v12  ;;  %v24058_v11 = vld [vmem:[#allocation7 + $0x3d44] ss:$16 sps:$4 sm:$0xff]   ;;  %v24061_v12 = vld [vmem:[#allocation7 + $0x3d4c] ss:$16 sps:$4 sm:$0xff]  }
 0x3e8   :  { %9145 = vmatpush1.bf16.msra.mxu0 %v23984_v13  ;;  %10313 = vmatpush1.bf16.msra.mxu1 %v23987_v14  ;;  %v24056_v13 = vld [vmem:[#allocation7 + $0x3d40] ss:$16 sps:$4 sm:$0xff]   ;;  %v24059_v14 = vld [vmem:[#allocation7 + $0x3d48] ss:$16 sps:$4 sm:$0xff]  }
 0x3e9   :  { %9146 = vmatprep.subr.bf16.mxu0 %v23992_v15  ;;  %10314 = vmatprep.subr.bf16.mxu1 %v23995_v16  ;;  %v24064_v15 = vld [vmem:[#allocation7 + $0x3d64] ss:$16 sps:$4 sm:$0xff]   ;;  %v24067_v16 = vld [vmem:[#allocation7 + $0x3d6c] ss:$16 sps:$4 sm:$0xff]  }
 0x3ec   :  { %9147 = vmatpush1.bf16.msra.mxu0 %v23990_v17  ;;  %10315 = vmatpush1.bf16.msra.mxu1 %v23993_v18  ;;  %v24062_v17 = vld [vmem:[#allocation7 + $0x3d60] ss:$16 sps:$4 sm:$0xff]   ;;  %v24065_v18 = vld [vmem:[#allocation7 + $0x3d68] ss:$16 sps:$4 sm:$0xff]  }
 0x3ed   :  { %9189 = vmatprep.subr.bf16.mxu0 %v23998_v19  ;;  %10357 = vmatprep.subr.bf16.mxu1 %v24001_v20  ;;  %v24070_v19 = vld [vmem:[#allocation7 + $0x3d84] ss:$16 sps:$4 sm:$0xff]   ;;  %v24073_v20 = vld [vmem:[#allocation7 + $0x3d8c] ss:$16 sps:$4 sm:$0xff]  }
 0x3ef   :  { %9149 = vmatmul.mubr.bf16.vlgmr.msra.gmra.mrb[0].mxu0 %v19139_v23  ;;  %10317 = vmatmul.mubr.bf16.vlgmr.msra.gmra.mrb[0].mxu1 %v19139_v23  ;;  %v24076_v23 = vld [vmem:[#allocation7 + $0x3da4] ss:$16 sps:$4 sm:$0xff]  }
 0x3f0   :  { %9190 = vmatpush1.bf16.msra.mxu0 %v23996_v24  ;;  %10358 = vmatpush1.bf16.msra.mxu1 %v23999_v25  ;;  %v24079_v24 = vld [vmem:[#allocation7 + $0x3dac] ss:$16 sps:$4 sm:$0xff]   ;;  %v24074_v25 = vld [vmem:[#allocation7 + $0x3da0] ss:$16 sps:$4 sm:$0xff]  }
 0x3f1   :  { %9191 = vmatprep.subr.bf16.mxu0 %v24004_v26  ;;  %10359 = vmatprep.subr.bf16.mxu1 %v24007_v27  ;;  %v24077_v26 = vld [vmem:[#allocation7 + $0x3da8] ss:$16 sps:$4 sm:$0xff]   ;;  %v24082_v27 = vld [vmem:[#allocation7 + $0x3dc4] ss:$16 sps:$4 sm:$0xff]  }
 0x3f2   :  { %9158 = vmatprep.mubr.bf16.mxu0 %v19172_v30  ;;  %10326 = vmatprep.mubr.bf16.mxu1 %v19172_v30  ;;  %v24083_v30 = vld [vmem:[#allocation7 + $0x3dc8] ss:$16 sps:$4 sm:$0xff]  }
 0x3f4   :  { %9192 = vmatpush1.bf16.msra.mxu0 %v24002_v28  ;;  %10360 = vmatpush1.bf16.msra.mxu1 %v24005_v29  ;;  %v24085_v28 = vld [vmem:[#allocation7 + $0x3dcc] ss:$16 sps:$4 sm:$0xff]   ;;  %v24080_v29 = vld [vmem:[#allocation7 + $0x3dc0] ss:$16 sps:$4 sm:$0xff]  }
 0x3f5   :  { %9193 = vmatprep.subr.bf16.mxu0 %v24010_v31  ;;  %10361 = vmatprep.subr.bf16.mxu1 %v24013_v32  ;;  %v24088_v31 = vld [vmem:[#allocation7 + $0x3de4] ss:$16 sps:$4 sm:$0xff]   ;;  %v24091_v32 = vld [vmem:[#allocation7 + $0x3dec] ss:$16 sps:$4 sm:$0xff]  }
 0x3f7   :  { %9159 = vmatmul.mubr.bf16.gmra.mrb[4].mxu0 %v19171_v35  ;;  %10327 = vmatmul.mubr.bf16.gmra.mrb[4].mxu1 %v19171_v35  ;;  %v24094_v35 = vld [vmem:[#allocation7 + $0x3e04] ss:$16 sps:$4 sm:$0xff]  }
 0x3f8   :  { %9194 = vmatpush1.bf16.msra.mxu0 %v24008_v36  ;;  %10362 = vmatpush1.bf16.msra.mxu1 %v24011_v37  ;;  %v24097_v36 = vld [vmem:[#allocation7 + $0x3e0c] ss:$16 sps:$4 sm:$0xff]   ;;  %v1301_v37 = vld [vmem:[#allocation5 + $0x170] sm:$0xff] }
 0x3f9   :  { %9195 = vmatprep.subr.bf16.mxu0 %v24016_v38  ;;  %10363 = vmatprep.subr.bf16.mxu1 %v24019_v39  ;;  %v1317_v38 = vld [vmem:[#allocation5 + $0x1f0] sm:$0xff]  ;;  %v19141_v39 = vcombine.low %v26164_v57, %v26166_v58  ;;  %v24113_v57 = vld [vmem:[#allocation7 + $0x3e68] ss:$16 sps:$4 sm:$0xff]  }
 0x3fa   :  { %9168 = vmatprep.mubr.bf16.mxu0 %v19204_v42  ;;  %10336 = vmatprep.mubr.bf16.mxu1 %v19204_v42  ;;  %v24100_v42 = vld [vmem:[#allocation7 + $0x3e24] ss:$16 sps:$4 sm:$0xff]   ;;  %v19174_v46 = vcombine.high %v1301_v37, %v1317_v38 }
 0x3fc   :  { %9196 = vmatpush1.bf16.msra.mxu0 %v24014_v40  ;;  %10364 = vmatpush1.bf16.msra.mxu1 %v24017_v41  ;;  %v24092_v40 = vld [vmem:[#allocation7 + $0x3e00] ss:$16 sps:$4 sm:$0xff]   ;;  %v24095_v41 = vld [vmem:[#allocation7 + $0x3e08] ss:$16 sps:$4 sm:$0xff]  }
 0x3fd   :  { %9197 = vmatprep.subr.bf16.mxu0 %v24022_v43  ;;  %10365 = vmatprep.subr.bf16.mxu1 %v24025_v44  ;;  %v24103_v43 = vld [vmem:[#allocation7 + $0x3e2c] ss:$16 sps:$4 sm:$0xff]   ;;  %v24098_v44 = vld [vmem:[#allocation7 + $0x3e20] ss:$16 sps:$4 sm:$0xff]  }
 0x3ff   :  { %9169 = vmatmul.mubr.bf16.gmra.mrb[8].mxu0 %v19203_v47  ;;  %10337 = vmatmul.mubr.bf16.gmra.mrb[8].mxu1 %v19203_v47  ;;  %v24106_v47 = vld [vmem:[#allocation7 + $0x3e44] ss:$16 sps:$4 sm:$0xff]  }
 0x400   :  { %9198 = vmatpush1.bf16.msra.mxu0 %v24020_v48  ;;  %10366 = vmatpush1.bf16.msra.mxu1 %v24023_v49  ;;  %v24109_v48 = vld [vmem:[#allocation7 + $0x3e4c] ss:$16 sps:$4 sm:$0xff]   ;;  %v1333_v49 = vld [vmem:[#allocation5 + $0x270] sm:$0xff] }
 0x401   :  { %9199 = vmatprep.subr.bf16.mxu0 %v24028_v50  ;;  %10367 = vmatprep.subr.bf16.mxu1 %v24031_v51  ;;  %v1349_v50 = vld [vmem:[#allocation5 + $0x2f0] sm:$0xff]  ;;  %v19173_v51 = vcombine.low %v1301_v37, %v1317_v38  ;;  %v24167_v38 = vld [vmem:[#allocation7 + $0x3f88] ss:$16 sps:$4 sm:$0xff]  }
 0x402   :  { %9178 = vmatprep.mubr.bf16.mxu0 %v19236_v54  ;;  %10346 = vmatprep.mubr.bf16.mxu1 %v19236_v54  ;;  %v24112_v54 = vld [vmem:[#allocation7 + $0x3e64] ss:$16 sps:$4 sm:$0xff]   ;;  %v19206_v58 = vcombine.high %v1333_v49, %v1349_v50  ;;  %v24164_v37 = vld [vmem:[#allocation7 + $0x3f80] ss:$16 sps:$4 sm:$0xff]  }
 0x404   :  { %9200 = vmatpush1.bf16.msra.mxu0 %v24026_v52  ;;  %10368 = vmatpush1.bf16.msra.mxu1 %v24029_v53  ;;  %v24104_v52 = vld [vmem:[#allocation7 + $0x3e40] ss:$16 sps:$4 sm:$0xff]   ;;  %v24107_v53 = vld [vmem:[#allocation7 + $0x3e48] ss:$16 sps:$4 sm:$0xff]  }
 0x405   :  { %9201 = vmatprep.subr.bf16.mxu0 %v24034_v55  ;;  %10369 = vmatprep.subr.bf16.mxu1 %v24037_v56  ;;  %v24115_v55 = vld [vmem:[#allocation7 + $0x3e6c] ss:$16 sps:$4 sm:$0xff]   ;;  %v24110_v56 = vld [vmem:[#allocation7 + $0x3e60] ss:$16 sps:$4 sm:$0xff]  }
 0x407   :  { %9179 = vmatmul.mubr.bf16.gmra.mrb[12].mxu0 %v19235_v59  ;;  %10347 = vmatmul.mubr.bf16.gmra.mrb[12].mxu1 %v19235_v59  ;;  %v24118_v59 = vld [vmem:[#allocation7 + $0x3e84] ss:$16 sps:$4 sm:$0xff]  }
 0x408   :  { %9202 = vmatpush1.bf16.msra.mxu0 %v24032_v60  ;;  %10370 = vmatpush1.bf16.msra.mxu1 %v24035_v61  ;;  %v24121_v60 = vld [vmem:[#allocation7 + $0x3e8c] ss:$16 sps:$4 sm:$0xff]   ;;  %v1365_v61 = vld [vmem:[#allocation5 + $0x370] sm:$0xff] }
 0x409   :  { %9203 = vmatprep.subr.bf16.mxu0 %v24040_v62  ;;  %10371 = vmatprep.subr.bf16.mxu1 %v24043_v63  ;;  %v1381_v62 = vld [vmem:[#allocation5 + $0x3f0] sm:$0x33]  ;;  %v19205_v63 = vcombine.low %v1333_v49, %v1349_v50  ;;  %v24185_v50 = vld [vmem:[#allocation7 + $0x3fe8] ss:$16 sps:$4 sm:$0xff]  }
 0x40a   :  { %9221 = vmatprep.mubr.bf16.mxu0 %v19142_v0  ;;  %10389 = vmatprep.mubr.bf16.mxu1 %v19142_v0  ;;  %v24116_v0 = vld [vmem:[#allocation7 + $0x3e80] ss:$16 sps:$4 sm:$0xff]  }
 0x40b   :  { %v24182_v49 = vld [vmem:[#allocation7 + $0x3fe0] ss:$16 sps:$4 sm:$0xff]  }
 0x40c   :  { %9204 = vmatpush1.bf16.msra.mxu0 %v24038_v1  ;;  %10372 = vmatpush1.bf16.msra.mxu1 %v24041_v2  ;;  %v24119_v1 = vld [vmem:[#allocation7 + $0x3e88] ss:$16 sps:$4 sm:$0xff]   ;;  %v24124_v2 = vld [vmem:[#allocation7 + $0x3ea4] ss:$16 sps:$4 sm:$0xff]  }
 0x40d   :  { %9205 = vmatprep.subr.bf16.mxu0 %v24046_v3  ;;  %10373 = vmatprep.subr.bf16.mxu1 %v24049_v4  ;;  %v24127_v3 = vld [vmem:[#allocation7 + $0x3eac] ss:$16 sps:$4 sm:$0xff]   ;;  %v24122_v4 = vld [vmem:[#allocation7 + $0x3ea0] ss:$16 sps:$4 sm:$0xff]  }
 0x410   :  { %9206 = vmatpush1.bf16.msra.mxu0 %v24044_v5  ;;  %10374 = vmatpush1.bf16.msra.mxu1 %v24047_v6  ;;  %v24125_v5 = vld [vmem:[#allocation7 + $0x3ea8] ss:$16 sps:$4 sm:$0xff]   ;;  %v19238_v6 = vcombine.high %v1365_v61, %v1381_v62 }
 0x411   :  { %9207 = vmatprep.subr.bf16.mxu0 %v24052_v7  ;;  %10375 = vmatprep.subr.bf16.mxu1 %v24055_v8  ;;  %v24130_v7 = vld [vmem:[#allocation7 + $0x3ec4] ss:$16 sps:$4 sm:$0xff]   ;;  %v24133_v8 = vld [vmem:[#allocation7 + $0x3ecc] ss:$16 sps:$4 sm:$0xff]  }
 0x414   :  { %9208 = vmatpush1.bf16.msra.mxu0 %v24050_v9  ;;  %10376 = vmatpush1.bf16.msra.mxu1 %v24053_v10  ;;  %v26172_v9 = vld [vmem:[#allocation5 + $0x78] sm:$0xff] }
 0x415   :  { %9209 = vmatprep.subr.bf16.mxu0 %v24058_v11  ;;  %10377 = vmatprep.subr.bf16.mxu1 %v24061_v12  ;;  %v26174_v10 = vld [vmem:[#allocation5 + $0xf8] sm:$0xff]  ;;  %v19237_v11 = vcombine.low %v1365_v61, %v1381_v62  ;;  %v24128_v12 = vld [vmem:[#allocation7 + $0x3ec0] ss:$16 sps:$4 sm:$0xff]  }
 0x416   :  { %v24197_v61 = vld [vmem:[#allocation7 + $0x28] ss:$16 sps:$4 sm:$0xff]  }
 0x418   :  { %9210 = vmatpush1.bf16.msra.mxu0 %v24056_v13  ;;  %10378 = vmatpush1.bf16.msra.mxu1 %v24059_v14  ;;  %v24131_v13 = vld [vmem:[#allocation7 + $0x3ec8] ss:$16 sps:$4 sm:$0xff]   ;;  %v24136_v14 = vld [vmem:[#allocation7 + $0x3ee4] ss:$16 sps:$4 sm:$0xff]  }
 0x419   :  { %9211 = vmatprep.subr.bf16.mxu0 %v24064_v15  ;;  %10379 = vmatprep.subr.bf16.mxu1 %v24067_v16  ;;  %v24139_v15 = vld [vmem:[#allocation7 + $0x3eec] ss:$16 sps:$4 sm:$0xff]   ;;  %v19144_v16 = vcombine.high %v26172_v9, %v26174_v10 }
 0x41c   :  { %9212 = vmatpush1.bf16.msra.mxu0 %v24062_v17  ;;  %10380 = vmatpush1.bf16.msra.mxu1 %v24065_v18  ;;  %v24134_v17 = vld [vmem:[#allocation7 + $0x3ee0] ss:$16 sps:$4 sm:$0xff]   ;;  %v24137_v18 = vld [vmem:[#allocation7 + $0x3ee8] ss:$16 sps:$4 sm:$0xff]  }
 0x41d   :  { %9213 = vmatprep.subr.bf16.mxu0 %v24070_v19  ;;  %10381 = vmatprep.subr.bf16.mxu1 %v24073_v20  ;;  %v24142_v19 = vld [vmem:[#allocation7 + $0x3f04] ss:$16 sps:$4 sm:$0xff]   ;;  %v24145_v20 = vld [vmem:[#allocation7 + $0x3f0c] ss:$16 sps:$4 sm:$0xff]  }
 0x420   :  { %9214 = vmatpush1.bf16.msra.mxu0 %v24068_v21  ;;  %10382 = vmatpush1.bf16.msra.mxu1 %v24071_v22  ;;  %v24140_v21 = vld [vmem:[#allocation7 + $0x3f00] ss:$16 sps:$4 sm:$0xff]   ;;  %v24143_v22 = vld [vmem:[#allocation7 + $0x3f08] ss:$16 sps:$4 sm:$0xff]  }
 0x421   :  { %9215 = vmatprep.subr.bf16.mxu0 %v24076_v23  ;;  %10383 = vmatprep.subr.bf16.mxu1 %v24079_v24  ;;  %v24148_v23 = vld [vmem:[#allocation7 + $0x3f24] ss:$16 sps:$4 sm:$0xff]   ;;  %v24151_v24 = vld [vmem:[#allocation7 + $0x3f2c] ss:$16 sps:$4 sm:$0xff]  }
 0x424   :  { %9216 = vmatpush1.bf16.msra.mxu0 %v24074_v25  ;;  %10384 = vmatpush1.bf16.msra.mxu1 %v24077_v26  ;;  %v24146_v25 = vld [vmem:[#allocation7 + $0x3f20] ss:$16 sps:$4 sm:$0xff]   ;;  %v24149_v26 = vld [vmem:[#allocation7 + $0x3f28] ss:$16 sps:$4 sm:$0xff]  }
 0x425   :  { %9217 = vmatprep.subr.bf16.mxu0 %v24082_v27  ;;  %10385 = vmatprep.subr.bf16.mxu1 %v24085_v28  ;;  %v24154_v27 = vld [vmem:[#allocation7 + $0x3f44] ss:$16 sps:$4 sm:$0xff]   ;;  %v24157_v28 = vld [vmem:[#allocation7 + $0x3f4c] ss:$16 sps:$4 sm:$0xff]  }
 0x428   :  { %9218 = vmatpush1.bf16.msra.mxu0 %v24080_v29  ;;  %10386 = vmatpush1.bf16.msra.mxu1 %v24083_v30  ;;  %v24152_v29 = vld [vmem:[#allocation7 + $0x3f40] ss:$16 sps:$4 sm:$0xff]   ;;  %v24155_v30 = vld [vmem:[#allocation7 + $0x3f48] ss:$16 sps:$4 sm:$0xff]  }
 0x429   :  { %9219 = vmatprep.subr.bf16.mxu0 %v24088_v31  ;;  %10387 = vmatprep.subr.bf16.mxu1 %v24091_v32  ;;  %v24160_v31 = vld [vmem:[#allocation7 + $0x3f64] ss:$16 sps:$4 sm:$0xff]   ;;  %v24163_v32 = vld [vmem:[#allocation7 + $0x3f6c] ss:$16 sps:$4 sm:$0xff]  }
 0x42c   :  { %9220 = vmatpush1.bf16.msra.mxu0 %v24086_v33  ;;  %10388 = vmatpush1.bf16.msra.mxu1 %v24089_v34  ;;  %v24158_v33 = vld [vmem:[#allocation7 + $0x3f60] ss:$16 sps:$4 sm:$0xff]   ;;  %v24161_v34 = vld [vmem:[#allocation7 + $0x3f68] ss:$16 sps:$4 sm:$0xff]  }
 0x42d   :  { %9262 = vmatprep.subr.bf16.mxu0 %v24094_v35  ;;  %10430 = vmatprep.subr.bf16.mxu1 %v24097_v36  ;;  %v24166_v35 = vld [vmem:[#allocation7 + $0x3f84] ss:$16 sps:$4 sm:$0xff]   ;;  %v24169_v36 = vld [vmem:[#allocation7 + $0x3f8c] ss:$16 sps:$4 sm:$0xff]  }
 0x42f   :  { %9222 = vmatmul.mubr.bf16.vlgmr.msra.gmra.mrb[0].mxu0 %v19141_v39  ;;  %10390 = vmatmul.mubr.bf16.vlgmr.msra.gmra.mrb[0].mxu1 %v19141_v39  ;;  %v24172_v39 = vld [vmem:[#allocation7 + $0x3fa4] ss:$16 sps:$4 sm:$0xff]  }
 0x430   :  { %9263 = vmatpush1.bf16.msra.mxu0 %v24092_v40  ;;  %10431 = vmatpush1.bf16.msra.mxu1 %v24095_v41  ;;  %v24175_v40 = vld [vmem:[#allocation7 + $0x3fac] ss:$16 sps:$4 sm:$0xff]   ;;  %v24170_v41 = vld [vmem:[#allocation7 + $0x3fa0] ss:$16 sps:$4 sm:$0xff]  }
 0x431   :  { %9264 = vmatprep.subr.bf16.mxu0 %v24100_v42  ;;  %10432 = vmatprep.subr.bf16.mxu1 %v24103_v43  ;;  %v24173_v42 = vld [vmem:[#allocation7 + $0x3fa8] ss:$16 sps:$4 sm:$0xff]   ;;  %v24178_v43 = vld [vmem:[#allocation7 + $0x3fc4] ss:$16 sps:$4 sm:$0xff]  }
 0x432   :  { %9231 = vmatprep.mubr.bf16.mxu0 %v19174_v46  ;;  %10399 = vmatprep.mubr.bf16.mxu1 %v19174_v46  ;;  %v24179_v46 = vld [vmem:[#allocation7 + $0x3fc8] ss:$16 sps:$4 sm:$0xff]  }
 0x434   :  { %9265 = vmatpush1.bf16.msra.mxu0 %v24098_v44  ;;  %10433 = vmatpush1.bf16.msra.mxu1 %v24101_v45  ;;  %v24181_v44 = vld [vmem:[#allocation7 + $0x3fcc] ss:$16 sps:$4 sm:$0xff]   ;;  %v24176_v45 = vld [vmem:[#allocation7 + $0x3fc0] ss:$16 sps:$4 sm:$0xff]  }
 0x435   :  { %9266 = vmatprep.subr.bf16.mxu0 %v24106_v47  ;;  %10434 = vmatprep.subr.bf16.mxu1 %v24109_v48  ;;  %v24184_v47 = vld [vmem:[#allocation7 + $0x3fe4] ss:$16 sps:$4 sm:$0xff]   ;;  %v24187_v48 = vld [vmem:[#allocation7 + $0x3fec] ss:$16 sps:$4 sm:$0xff]  }
 0x437   :  { %9232 = vmatmul.mubr.bf16.gmra.mrb[4].mxu0 %v19173_v51  ;;  %10400 = vmatmul.mubr.bf16.gmra.mrb[4].mxu1 %v19173_v51  ;;  %v24190_v51 = vld [vmem:[#allocation7 + $0x4] ss:$16 sps:$4 sm:$0xff]  }
 0x438   :  { %9267 = vmatpush1.bf16.msra.mxu0 %v24104_v52  ;;  %10435 = vmatpush1.bf16.msra.mxu1 %v24107_v53  ;;  %v24193_v52 = vld [vmem:[#allocation7 + $0xc] ss:$16 sps:$4 sm:$0xff]  }
 0x439   :  { %9268 = vmatprep.subr.bf16.mxu0 %v24112_v54  ;;  %10436 = vmatprep.subr.bf16.mxu1 %v24115_v55  ;;  %v1302_v53 = vld [vmem:[#allocation5 + $0x178] sm:$0xff]  ;;  %v19143_v55 = vcombine.low %v26172_v9, %v26174_v10 }
 0x43a   :  { %9241 = vmatprep.mubr.bf16.mxu0 %v19206_v58  ;;  %10409 = vmatprep.mubr.bf16.mxu1 %v19206_v58  ;;  %v1318_v54 = vld [vmem:[#allocation5 + $0x1f8] sm:$0xff]  ;;  %v24196_v58 = vld [vmem:[#allocation7 + $0x24] ss:$16 sps:$4 sm:$0xff]  }
 0x43b   :  { %v19176_v62 = vcombine.high %v1302_v53, %v1318_v54  ;;  %v24209_v9 = vld [vmem:[#allocation7 + $0x68] ss:$16 sps:$4 sm:$0xff]  }
 0x43c   :  { %9269 = vmatpush1.bf16.msra.mxu0 %v24110_v56  ;;  %10437 = vmatpush1.bf16.msra.mxu1 %v24113_v57  ;;  %v24188_v56 = vld [vmem:[#allocation7] ss:$16 sps:$4 sm:$0xff]   ;;  %v24191_v57 = vld [vmem:[#allocation7 + $0x8] ss:$16 sps:$4 sm:$0xff]  }
 0x43d   :  { %9270 = vmatprep.subr.bf16.mxu0 %v24118_v59  ;;  %10438 = vmatprep.subr.bf16.mxu1 %v24121_v60  ;;  %v24199_v59 = vld [vmem:[#allocation7 + $0x2c] ss:$16 sps:$4 sm:$0xff]   ;;  %v24194_v60 = vld [vmem:[#allocation7 + $0x20] ss:$16 sps:$4 sm:$0xff]  }
 0x43f   :  { %9242 = vmatmul.mubr.bf16.gmra.mrb[8].mxu0 %v19205_v63  ;;  %10410 = vmatmul.mubr.bf16.gmra.mrb[8].mxu1 %v19205_v63  ;;  %v24202_v63 = vld [vmem:[#allocation7 + $0x44] ss:$16 sps:$4 sm:$0xff]  }
 0x440   :  { %9271 = vmatpush1.bf16.msra.mxu0 %v24116_v0  ;;  %10439 = vmatpush1.bf16.msra.mxu1 %v24119_v1  ;;  %v24205_v0 = vld [vmem:[#allocation7 + $0x4c] ss:$16 sps:$4 sm:$0xff]  }
 0x441   :  { %9272 = vmatprep.subr.bf16.mxu0 %v24124_v2  ;;  %10440 = vmatprep.subr.bf16.mxu1 %v24127_v3  ;;  %v1334_v1 = vld [vmem:[#allocation5 + $0x278] sm:$0xff]  ;;  %v19175_v3 = vcombine.low %v1302_v53, %v1318_v54  ;;  %v24260_v53 = vld [vmem:[#allocation7 + $0x180] ss:$16 sps:$4 sm:$0xff]  }
 0x442   :  { %9251 = vmatprep.mubr.bf16.mxu0 %v19238_v6  ;;  %10419 = vmatprep.mubr.bf16.mxu1 %v19238_v6  ;;  %v1350_v2 = vld [vmem:[#allocation5 + $0x2f8] sm:$0xff]  ;;  %v24208_v6 = vld [vmem:[#allocation7 + $0x64] ss:$16 sps:$4 sm:$0xff]  }
 0x443   :  { %v19208_v10 = vcombine.high %v1334_v1, %v1350_v2  ;;  %v24263_v54 = vld [vmem:[#allocation7 + $0x188] ss:$16 sps:$4 sm:$0xff]  }
 0x444   :  { %9273 = vmatpush1.bf16.msra.mxu0 %v24122_v4  ;;  %10441 = vmatpush1.bf16.msra.mxu1 %v24125_v5  ;;  %v24200_v4 = vld [vmem:[#allocation7 + $0x40] ss:$16 sps:$4 sm:$0xff]   ;;  %v24203_v5 = vld [vmem:[#allocation7 + $0x48] ss:$16 sps:$4 sm:$0xff]  }
 0x445   :  { %9274 = vmatprep.subr.bf16.mxu0 %v24130_v7  ;;  %10442 = vmatprep.subr.bf16.mxu1 %v24133_v8  ;;  %v24211_v7 = vld [vmem:[#allocation7 + $0x6c] ss:$16 sps:$4 sm:$0xff]   ;;  %v24206_v8 = vld [vmem:[#allocation7 + $0x60] ss:$16 sps:$4 sm:$0xff]  }
 0x447   :  { %9252 = vmatmul.mubr.bf16.gmra.mrb[12].mxu0 %v19237_v11  ;;  %10420 = vmatmul.mubr.bf16.gmra.mrb[12].mxu1 %v19237_v11  ;;  %v24214_v11 = vld [vmem:[#allocation7 + $0x84] ss:$16 sps:$4 sm:$0xff]  }
 0x448   :  { %9275 = vmatpush1.bf16.msra.mxu0 %v24128_v12  ;;  %10443 = vmatpush1.bf16.msra.mxu1 %v24131_v13  ;;  %v24217_v12 = vld [vmem:[#allocation7 + $0x8c] ss:$16 sps:$4 sm:$0xff]  }
 0x449   :  { %9276 = vmatprep.subr.bf16.mxu0 %v24136_v14  ;;  %10444 = vmatprep.subr.bf16.mxu1 %v24139_v15  ;;  %v1366_v13 = vld [vmem:[#allocation5 + $0x378] sm:$0xff]  ;;  %v19207_v15 = vcombine.low %v1334_v1, %v1350_v2  ;;  %v24278_v1 = vld [vmem:[#allocation7 + $0x1e0] ss:$16 sps:$4 sm:$0xff]  }
 0x44a   :  { %9294 = vmatprep.mubr.bf16.mxu0 %v19144_v16  ;;  %10462 = vmatprep.mubr.bf16.mxu1 %v19144_v16  ;;  %v1382_v14 = vld [vmem:[#allocation5 + $0x3f8] sm:$0x33]  ;;  %v24212_v16 = vld [vmem:[#allocation7 + $0x80] ss:$16 sps:$4 sm:$0xff]  }
 0x44b   :  { %v24281_v2 = vld [vmem:[#allocation7 + $0x1e8] ss:$16 sps:$4 sm:$0xff]  }
 0x44c   :  { %9277 = vmatpush1.bf16.msra.mxu0 %v24134_v17  ;;  %10445 = vmatpush1.bf16.msra.mxu1 %v24137_v18  ;;  %v24215_v17 = vld [vmem:[#allocation7 + $0x88] ss:$16 sps:$4 sm:$0xff]   ;;  %v24220_v18 = vld [vmem:[#allocation7 + $0xa4] ss:$16 sps:$4 sm:$0xff]  }
 0x44d   :  { %9278 = vmatprep.subr.bf16.mxu0 %v24142_v19  ;;  %10446 = vmatprep.subr.bf16.mxu1 %v24145_v20  ;;  %v24223_v19 = vld [vmem:[#allocation7 + $0xac] ss:$16 sps:$4 sm:$0xff]   ;;  %v24218_v20 = vld [vmem:[#allocation7 + $0xa0] ss:$16 sps:$4 sm:$0xff]  }
 0x450   :  { %9279 = vmatpush1.bf16.msra.mxu0 %v24140_v21  ;;  %10447 = vmatpush1.bf16.msra.mxu1 %v24143_v22  ;;  %v24221_v21 = vld [vmem:[#allocation7 + $0xa8] ss:$16 sps:$4 sm:$0xff]   ;;  %v19240_v22 = vcombine.high %v1366_v13, %v1382_v14 }
 0x451   :  { %9280 = vmatprep.subr.bf16.mxu0 %v24148_v23  ;;  %10448 = vmatprep.subr.bf16.mxu1 %v24151_v24  ;;  %v24226_v23 = vld [vmem:[#allocation7 + $0xc4] ss:$16 sps:$4 sm:$0xff]   ;;  %v24229_v24 = vld [vmem:[#allocation7 + $0xcc] ss:$16 sps:$4 sm:$0xff]  }
 0x454   :  { %9281 = vmatpush1.bf16.msra.mxu0 %v24146_v25  ;;  %10449 = vmatpush1.bf16.msra.mxu1 %v24149_v26  ;;  %v26180_v25 = vld [vmem:[#allocation2] sm:$0xff] }
 0x455   :  { %9282 = vmatprep.subr.bf16.mxu0 %v24154_v27  ;;  %10450 = vmatprep.subr.bf16.mxu1 %v24157_v28  ;;  %v26182_v26 = vld [vmem:[#allocation2 + $0x80] sm:$0xff]  ;;  %v19239_v27 = vcombine.low %v1366_v13, %v1382_v14  ;;  %v24293_v13 = vld [vmem:[#allocation7 + $0x228] ss:$16 sps:$4 sm:$0xff]  }
 0x456   :  { %v24224_v28 = vld [vmem:[#allocation7 + $0xc0] ss:$16 sps:$4 sm:$0xff]  }
 0x458   :  { %9283 = vmatpush1.bf16.msra.mxu0 %v24152_v29  ;;  %10451 = vmatpush1.bf16.msra.mxu1 %v24155_v30  ;;  %v24227_v29 = vld [vmem:[#allocation7 + $0xc8] ss:$16 sps:$4 sm:$0xff]   ;;  %v24232_v30 = vld [vmem:[#allocation7 + $0xe4] ss:$16 sps:$4 sm:$0xff]  }
 0x459   :  { %9284 = vmatprep.subr.bf16.mxu0 %v24160_v31  ;;  %10452 = vmatprep.subr.bf16.mxu1 %v24163_v32  ;;  %v24235_v31 = vld [vmem:[#allocation7 + $0xec] ss:$16 sps:$4 sm:$0xff]   ;;  %v20266_v32 = vcombine.high %v26180_v25, %v26182_v26 }
 0x45c   :  { %9285 = vmatpush1.bf16.msra.mxu0 %v24158_v33  ;;  %10453 = vmatpush1.bf16.msra.mxu1 %v24161_v34  ;;  %v24230_v33 = vld [vmem:[#allocation7 + $0xe0] ss:$16 sps:$4 sm:$0xff]   ;;  %v24233_v34 = vld [vmem:[#allocation7 + $0xe8] ss:$16 sps:$4 sm:$0xff]  }
 0x45d   :  { %9286 = vmatprep.subr.bf16.mxu0 %v24166_v35  ;;  %10454 = vmatprep.subr.bf16.mxu1 %v24169_v36  ;;  %v24238_v35 = vld [vmem:[#allocation7 + $0x104] ss:$16 sps:$4 sm:$0xff]   ;;  %v24241_v36 = vld [vmem:[#allocation7 + $0x10c] ss:$16 sps:$4 sm:$0xff]  }
 0x460   :  { %9287 = vmatpush1.bf16.msra.mxu0 %v24164_v37  ;;  %10455 = vmatpush1.bf16.msra.mxu1 %v24167_v38  ;;  %v24236_v37 = vld [vmem:[#allocation7 + $0x100] ss:$16 sps:$4 sm:$0xff]   ;;  %v24239_v38 = vld [vmem:[#allocation7 + $0x108] ss:$16 sps:$4 sm:$0xff]  }
 0x461   :  { %9288 = vmatprep.subr.bf16.mxu0 %v24172_v39  ;;  %10456 = vmatprep.subr.bf16.mxu1 %v24175_v40  ;;  %v24244_v39 = vld [vmem:[#allocation7 + $0x124] ss:$16 sps:$4 sm:$0xff]   ;;  %v24247_v40 = vld [vmem:[#allocation7 + $0x12c] ss:$16 sps:$4 sm:$0xff]  }
 0x464   :  { %9289 = vmatpush1.bf16.msra.mxu0 %v24170_v41  ;;  %10457 = vmatpush1.bf16.msra.mxu1 %v24173_v42  ;;  %v24242_v41 = vld [vmem:[#allocation7 + $0x120] ss:$16 sps:$4 sm:$0xff]   ;;  %v24245_v42 = vld [vmem:[#allocation7 + $0x128] ss:$16 sps:$4 sm:$0xff]  }
 0x465   :  { %9290 = vmatprep.subr.bf16.mxu0 %v24178_v43  ;;  %10458 = vmatprep.subr.bf16.mxu1 %v24181_v44  ;;  %v24250_v43 = vld [vmem:[#allocation7 + $0x144] ss:$16 sps:$4 sm:$0xff]   ;;  %v24253_v44 = vld [vmem:[#allocation7 + $0x14c] ss:$16 sps:$4 sm:$0xff]  }
 0x468   :  { %9291 = vmatpush1.bf16.msra.mxu0 %v24176_v45  ;;  %10459 = vmatpush1.bf16.msra.mxu1 %v24179_v46  ;;  %v24248_v45 = vld [vmem:[#allocation7 + $0x140] ss:$16 sps:$4 sm:$0xff]   ;;  %v24251_v46 = vld [vmem:[#allocation7 + $0x148] ss:$16 sps:$4 sm:$0xff]  }
 0x469   :  { %9292 = vmatprep.subr.bf16.mxu0 %v24184_v47  ;;  %10460 = vmatprep.subr.bf16.mxu1 %v24187_v48  ;;  %v24256_v47 = vld [vmem:[#allocation7 + $0x164] ss:$16 sps:$4 sm:$0xff]   ;;  %v24259_v48 = vld [vmem:[#allocation7 + $0x16c] ss:$16 sps:$4 sm:$0xff]  }
 0x46c   :  { %9293 = vmatpush1.bf16.msra.mxu0 %v24182_v49  ;;  %10461 = vmatpush1.bf16.msra.mxu1 %v24185_v50  ;;  %v24254_v49 = vld [vmem:[#allocation7 + $0x160] ss:$16 sps:$4 sm:$0xff]   ;;  %v24257_v50 = vld [vmem:[#allocation7 + $0x168] ss:$16 sps:$4 sm:$0xff]  }
 0x46d   :  { %16263 = vmatprep.subr.bf16.mxu0 %v24190_v51  ;;  %17431 = vmatprep.subr.bf16.mxu1 %v24193_v52  ;;  %v24262_v51 = vld [vmem:[#allocation7 + $0x184] ss:$16 sps:$4 sm:$0xff]   ;;  %v24265_v52 = vld [vmem:[#allocation7 + $0x18c] ss:$16 sps:$4 sm:$0xff]  }
 0x46f   :  { %9295 = vmatmul.mubr.bf16.vlgmr.msra.gmra.mrb[0].mxu0 %v19143_v55  ;;  %10463 = vmatmul.mubr.bf16.vlgmr.msra.gmra.mrb[0].mxu1 %v19143_v55  ;;  %v24268_v55 = vld [vmem:[#allocation7 + $0x1a4] ss:$16 sps:$4 sm:$0xff]  }
 0x470   :  { %16264 = vmatpush1.bf16.msra.mxu0 %v24188_v56  ;;  %17432 = vmatpush1.bf16.msra.mxu1 %v24191_v57  ;;  %v24271_v56 = vld [vmem:[#allocation7 + $0x1ac] ss:$16 sps:$4 sm:$0xff]   ;;  %v24266_v57 = vld [vmem:[#allocation7 + $0x1a0] ss:$16 sps:$4 sm:$0xff]  }
 0x471   :  { %16265 = vmatprep.subr.bf16.mxu0 %v24196_v58  ;;  %17433 = vmatprep.subr.bf16.mxu1 %v24199_v59  ;;  %v24269_v58 = vld [vmem:[#allocation7 + $0x1a8] ss:$16 sps:$4 sm:$0xff]   ;;  %v24274_v59 = vld [vmem:[#allocation7 + $0x1c4] ss:$16 sps:$4 sm:$0xff]  }
 0x472   :  { %9304 = vmatprep.mubr.bf16.mxu0 %v19176_v62  ;;  %10472 = vmatprep.mubr.bf16.mxu1 %v19176_v62  ;;  %v24275_v62 = vld [vmem:[#allocation7 + $0x1c8] ss:$16 sps:$4 sm:$0xff]  }
 0x474   :  { %16266 = vmatpush1.bf16.msra.mxu0 %v24194_v60  ;;  %17434 = vmatpush1.bf16.msra.mxu1 %v24197_v61  ;;  %v24277_v60 = vld [vmem:[#allocation7 + $0x1cc] ss:$16 sps:$4 sm:$0xff]   ;;  %v24272_v61 = vld [vmem:[#allocation7 + $0x1c0] ss:$16 sps:$4 sm:$0xff]  }
 0x475   :  { %16267 = vmatprep.subr.bf16.mxu0 %v24202_v63  ;;  %17435 = vmatprep.subr.bf16.mxu1 %v24205_v0  ;;  %v24280_v63 = vld [vmem:[#allocation7 + $0x1e4] ss:$16 sps:$4 sm:$0xff]   ;;  %v24283_v0 = vld [vmem:[#allocation7 + $0x1ec] ss:$16 sps:$4 sm:$0xff]  }
 0x477   :  { %9305 = vmatmul.mubr.bf16.gmra.mrb[4].mxu0 %v19175_v3  ;;  %10473 = vmatmul.mubr.bf16.gmra.mrb[4].mxu1 %v19175_v3  ;;  %v24286_v3 = vld [vmem:[#allocation7 + $0x204] ss:$16 sps:$4 sm:$0xff]  }
 0x478   :  { %16268 = vmatpush1.bf16.msra.mxu0 %v24200_v4  ;;  %17436 = vmatpush1.bf16.msra.mxu1 %v24203_v5  ;;  %v24289_v4 = vld [vmem:[#allocation7 + $0x20c] ss:$16 sps:$4 sm:$0xff]   ;;  %v135_v5 = vld [vmem:[#allocation2 + $0x100] sm:$0xff] }
 0x479   :  { %16269 = vmatprep.subr.bf16.mxu0 %v24208_v6  ;;  %17437 = vmatprep.subr.bf16.mxu1 %v24211_v7  ;;  %v151_v6 = vld [vmem:[#allocation2 + $0x180] sm:$0xff]  ;;  %v20265_v7 = vcombine.low %v26180_v25, %v26182_v26  ;;  %v24305_v25 = vld [vmem:[#allocation7 + $0x268] ss:$16 sps:$4 sm:$0xff]  }
 0x47a   :  { %9314 = vmatprep.mubr.bf16.mxu0 %v19208_v10  ;;  %10482 = vmatprep.mubr.bf16.mxu1 %v19208_v10  ;;  %v24292_v10 = vld [vmem:[#allocation7 + $0x224] ss:$16 sps:$4 sm:$0xff]   ;;  %v20298_v14 = vcombine.high %v135_v5, %v151_v6 }
 0x47c   :  { %16270 = vmatpush1.bf16.msra.mxu0 %v24206_v8  ;;  %17438 = vmatpush1.bf16.msra.mxu1 %v24209_v9  ;;  %v24284_v8 = vld [vmem:[#allocation7 + $0x200] ss:$16 sps:$4 sm:$0xff]   ;;  %v24287_v9 = vld [vmem:[#allocation7 + $0x208] ss:$16 sps:$4 sm:$0xff]  }
 0x47d   :  { %16271 = vmatprep.subr.bf16.mxu0 %v24214_v11  ;;  %17439 = vmatprep.subr.bf16.mxu1 %v24217_v12  ;;  %v24295_v11 = vld [vmem:[#allocation7 + $0x22c] ss:$16 sps:$4 sm:$0xff]   ;;  %v24290_v12 = vld [vmem:[#allocation7 + $0x220] ss:$16 sps:$4 sm:$0xff]  }
 0x47f   :  { %9315 = vmatmul.mubr.bf16.gmra.mrb[8].mxu0 %v19207_v15  ;;  %10483 = vmatmul.mubr.bf16.gmra.mrb[8].mxu1 %v19207_v15  ;;  %v24298_v15 = vld [vmem:[#allocation7 + $0x244] ss:$16 sps:$4 sm:$0xff]  }
 0x480   :  { %16272 = vmatpush1.bf16.msra.mxu0 %v24212_v16  ;;  %17440 = vmatpush1.bf16.msra.mxu1 %v24215_v17  ;;  %v24301_v16 = vld [vmem:[#allocation7 + $0x24c] ss:$16 sps:$4 sm:$0xff]   ;;  %v167_v17 = vld [vmem:[#allocation2 + $0x200] sm:$0xff] }
 0x481   :  { %16273 = vmatprep.subr.bf16.mxu0 %v24220_v18  ;;  %17441 = vmatprep.subr.bf16.mxu1 %v24223_v19  ;;  %v183_v18 = vld [vmem:[#allocation2 + $0x280] sm:$0xff]  ;;  %v20297_v19 = vcombine.low %v135_v5, %v151_v6  ;;  %v24359_v6 = vld [vmem:[#allocation7 + $0x388] ss:$16 sps:$4 sm:$0xff]  }
 0x482   :  { %9324 = vmatprep.mubr.bf16.mxu0 %v19240_v22  ;;  %10492 = vmatprep.mubr.bf16.mxu1 %v19240_v22  ;;  %v24304_v22 = vld [vmem:[#allocation7 + $0x264] ss:$16 sps:$4 sm:$0xff]   ;;  %v20330_v26 = vcombine.high %v167_v17, %v183_v18  ;;  %v24356_v5 = vld [vmem:[#allocation7 + $0x380] ss:$16 sps:$4 sm:$0xff]  }
 0x484   :  { %16274 = vmatpush1.bf16.msra.mxu0 %v24218_v20  ;;  %17442 = vmatpush1.bf16.msra.mxu1 %v24221_v21  ;;  %v24296_v20 = vld [vmem:[#allocation7 + $0x240] ss:$16 sps:$4 sm:$0xff]   ;;  %v24299_v21 = vld [vmem:[#allocation7 + $0x248] ss:$16 sps:$4 sm:$0xff]  }
 0x485   :  { %16275 = vmatprep.subr.bf16.mxu0 %v24226_v23  ;;  %17443 = vmatprep.subr.bf16.mxu1 %v24229_v24  ;;  %v24307_v23 = vld [vmem:[#allocation7 + $0x26c] ss:$16 sps:$4 sm:$0xff]   ;;  %v24302_v24 = vld [vmem:[#allocation7 + $0x260] ss:$16 sps:$4 sm:$0xff]  }
 0x487   :  { %9325 = vmatmul.mubr.bf16.gmra.mrb[12].mxu0 %v19239_v27  ;;  %10493 = vmatmul.mubr.bf16.gmra.mrb[12].mxu1 %v19239_v27  ;;  %v24310_v27 = vld [vmem:[#allocation7 + $0x284] ss:$16 sps:$4 sm:$0xff]  }
 0x488   :  { %16276 = vmatpush1.bf16.msra.mxu0 %v24224_v28  ;;  %17444 = vmatpush1.bf16.msra.mxu1 %v24227_v29  ;;  %v24313_v28 = vld [vmem:[#allocation7 + $0x28c] ss:$16 sps:$4 sm:$0xff]   ;;  %v199_v29 = vld [vmem:[#allocation2 + $0x300] sm:$0xff] }
 0x489   :  { %16277 = vmatprep.subr.bf16.mxu0 %v24232_v30  ;;  %17445 = vmatprep.subr.bf16.mxu1 %v24235_v31  ;;  %v215_v30 = vld [vmem:[#allocation2 + $0x380] sm:$0x33]  ;;  %v20329_v31 = vcombine.low %v167_v17, %v183_v18  ;;  %v24377_v18 = vld [vmem:[#allocation7 + $0x3e8] ss:$16 sps:$4 sm:$0xff]  }
 0x48a   :  { %16295 = vmatprep.mubr.bf16.mxu0 %v20266_v32  ;;  %17463 = vmatprep.mubr.bf16.mxu1 %v20266_v32  ;;  %v24308_v32 = vld [vmem:[#allocation7 + $0x280] ss:$16 sps:$4 sm:$0xff]  }
 0x48b   :  { %v24374_v17 = vld [vmem:[#allocation7 + $0x3e0] ss:$16 sps:$4 sm:$0xff]  }
 0x48c   :  { %16278 = vmatpush1.bf16.msra.mxu0 %v24230_v33  ;;  %17446 = vmatpush1.bf16.msra.mxu1 %v24233_v34  ;;  %v24311_v33 = vld [vmem:[#allocation7 + $0x288] ss:$16 sps:$4 sm:$0xff]   ;;  %v24316_v34 = vld [vmem:[#allocation7 + $0x2a4] ss:$16 sps:$4 sm:$0xff]  }
 0x48d   :  { %16279 = vmatprep.subr.bf16.mxu0 %v24238_v35  ;;  %17447 = vmatprep.subr.bf16.mxu1 %v24241_v36  ;;  %v24319_v35 = vld [vmem:[#allocation7 + $0x2ac] ss:$16 sps:$4 sm:$0xff]   ;;  %v24314_v36 = vld [vmem:[#allocation7 + $0x2a0] ss:$16 sps:$4 sm:$0xff]  }
 0x490   :  { %16280 = vmatpush1.bf16.msra.mxu0 %v24236_v37  ;;  %17448 = vmatpush1.bf16.msra.mxu1 %v24239_v38  ;;  %v24317_v37 = vld [vmem:[#allocation7 + $0x2a8] ss:$16 sps:$4 sm:$0xff]   ;;  %v20362_v38 = vcombine.high %v199_v29, %v215_v30 }
 0x491   :  { %16281 = vmatprep.subr.bf16.mxu0 %v24244_v39  ;;  %17449 = vmatprep.subr.bf16.mxu1 %v24247_v40  ;;  %v24322_v39 = vld [vmem:[#allocation7 + $0x2c4] ss:$16 sps:$4 sm:$0xff]   ;;  %v24325_v40 = vld [vmem:[#allocation7 + $0x2cc] ss:$16 sps:$4 sm:$0xff]  }
 0x494   :  { %16282 = vmatpush1.bf16.msra.mxu0 %v24242_v41  ;;  %17450 = vmatpush1.bf16.msra.mxu1 %v24245_v42  ;;  %v26188_v41 = vld [vmem:[#allocation2 + $0x8] sm:$0xff] }
 0x495   :  { %16283 = vmatprep.subr.bf16.mxu0 %v24250_v43  ;;  %17451 = vmatprep.subr.bf16.mxu1 %v24253_v44  ;;  %v26190_v42 = vld [vmem:[#allocation2 + $0x88] sm:$0xff]  ;;  %v20361_v43 = vcombine.low %v199_v29, %v215_v30  ;;  %v24320_v44 = vld [vmem:[#allocation7 + $0x2c0] ss:$16 sps:$4 sm:$0xff]  }
 0x496   :  { %v24389_v29 = vld [vmem:[#allocation7 + $0x428] ss:$16 sps:$4 sm:$0xff]  }
 0x498   :  { %16284 = vmatpush1.bf16.msra.mxu0 %v24248_v45  ;;  %17452 = vmatpush1.bf16.msra.mxu1 %v24251_v46  ;;  %v24323_v45 = vld [vmem:[#allocation7 + $0x2c8] ss:$16 sps:$4 sm:$0xff]   ;;  %v24328_v46 = vld [vmem:[#allocation7 + $0x2e4] ss:$16 sps:$4 sm:$0xff]  }
 0x499   :  { %16285 = vmatprep.subr.bf16.mxu0 %v24256_v47  ;;  %17453 = vmatprep.subr.bf16.mxu1 %v24259_v48  ;;  %v24331_v47 = vld [vmem:[#allocation7 + $0x2ec] ss:$16 sps:$4 sm:$0xff]   ;;  %v20268_v48 = vcombine.high %v26188_v41, %v26190_v42 }
 0x49c   :  { %16286 = vmatpush1.bf16.msra.mxu0 %v24254_v49  ;;  %17454 = vmatpush1.bf16.msra.mxu1 %v24257_v50  ;;  %v24326_v49 = vld [vmem:[#allocation7 + $0x2e0] ss:$16 sps:$4 sm:$0xff]   ;;  %v24329_v50 = vld [vmem:[#allocation7 + $0x2e8] ss:$16 sps:$4 sm:$0xff]  }
 0x49d   :  { %16287 = vmatprep.subr.bf16.mxu0 %v24262_v51  ;;  %17455 = vmatprep.subr.bf16.mxu1 %v24265_v52  ;;  %v24334_v51 = vld [vmem:[#allocation7 + $0x304] ss:$16 sps:$4 sm:$0xff]   ;;  %v24337_v52 = vld [vmem:[#allocation7 + $0x30c] ss:$16 sps:$4 sm:$0xff]  }
 0x4a0   :  { %16288 = vmatpush1.bf16.msra.mxu0 %v24260_v53  ;;  %17456 = vmatpush1.bf16.msra.mxu1 %v24263_v54  ;;  %v24332_v53 = vld [vmem:[#allocation7 + $0x300] ss:$16 sps:$4 sm:$0xff]   ;;  %v24335_v54 = vld [vmem:[#allocation7 + $0x308] ss:$16 sps:$4 sm:$0xff]  }
 0x4a1   :  { %16289 = vmatprep.subr.bf16.mxu0 %v24268_v55  ;;  %17457 = vmatprep.subr.bf16.mxu1 %v24271_v56  ;;  %v24340_v55 = vld [vmem:[#allocation7 + $0x324] ss:$16 sps:$4 sm:$0xff]   ;;  %v24343_v56 = vld [vmem:[#allocation7 + $0x32c] ss:$16 sps:$4 sm:$0xff]  }
 0x4a4   :  { %16290 = vmatpush1.bf16.msra.mxu0 %v24266_v57  ;;  %17458 = vmatpush1.bf16.msra.mxu1 %v24269_v58  ;;  %v24338_v57 = vld [vmem:[#allocation7 + $0x320] ss:$16 sps:$4 sm:$0xff]   ;;  %v24341_v58 = vld [vmem:[#allocation7 + $0x328] ss:$16 sps:$4 sm:$0xff]  }
 0x4a5   :  { %16291 = vmatprep.subr.bf16.mxu0 %v24274_v59  ;;  %17459 = vmatprep.subr.bf16.mxu1 %v24277_v60  ;;  %v24346_v59 = vld [vmem:[#allocation7 + $0x344] ss:$16 sps:$4 sm:$0xff]   ;;  %v24349_v60 = vld [vmem:[#allocation7 + $0x34c] ss:$16 sps:$4 sm:$0xff]  }
 0x4a8   :  { %16292 = vmatpush1.bf16.msra.mxu0 %v24272_v61  ;;  %17460 = vmatpush1.bf16.msra.mxu1 %v24275_v62  ;;  %v24344_v61 = vld [vmem:[#allocation7 + $0x340] ss:$16 sps:$4 sm:$0xff]   ;;  %v24347_v62 = vld [vmem:[#allocation7 + $0x348] ss:$16 sps:$4 sm:$0xff]  }
 0x4a9   :  { %16293 = vmatprep.subr.bf16.mxu0 %v24280_v63  ;;  %17461 = vmatprep.subr.bf16.mxu1 %v24283_v0  ;;  %v24352_v63 = vld [vmem:[#allocation7 + $0x364] ss:$16 sps:$4 sm:$0xff]   ;;  %v24355_v0 = vld [vmem:[#allocation7 + $0x36c] ss:$16 sps:$4 sm:$0xff]  }
 0x4ac   :  { %16294 = vmatpush1.bf16.msra.mxu0 %v24278_v1  ;;  %17462 = vmatpush1.bf16.msra.mxu1 %v24281_v2  ;;  %v24350_v1 = vld [vmem:[#allocation7 + $0x360] ss:$16 sps:$4 sm:$0xff]   ;;  %v24353_v2 = vld [vmem:[#allocation7 + $0x368] ss:$16 sps:$4 sm:$0xff]  }
 0x4ad   :  { %16336 = vmatprep.subr.bf16.mxu0 %v24286_v3  ;;  %17504 = vmatprep.subr.bf16.mxu1 %v24289_v4  ;;  %v24358_v3 = vld [vmem:[#allocation7 + $0x384] ss:$16 sps:$4 sm:$0xff]   ;;  %v24361_v4 = vld [vmem:[#allocation7 + $0x38c] ss:$16 sps:$4 sm:$0xff]  }
 0x4af   :  { %16296 = vmatmul.mubr.bf16.vlgmr.msra.gmra.mrb[0].mxu0 %v20265_v7  ;;  %17464 = vmatmul.mubr.bf16.vlgmr.msra.gmra.mrb[0].mxu1 %v20265_v7  ;;  %v24364_v7 = vld [vmem:[#allocation7 + $0x3a4] ss:$16 sps:$4 sm:$0xff]  }
 0x4b0   :  { %16337 = vmatpush1.bf16.msra.mxu0 %v24284_v8  ;;  %17505 = vmatpush1.bf16.msra.mxu1 %v24287_v9  ;;  %v24367_v8 = vld [vmem:[#allocation7 + $0x3ac] ss:$16 sps:$4 sm:$0xff]   ;;  %v24362_v9 = vld [vmem:[#allocation7 + $0x3a0] ss:$16 sps:$4 sm:$0xff]  }
 0x4b1   :  { %16338 = vmatprep.subr.bf16.mxu0 %v24292_v10  ;;  %17506 = vmatprep.subr.bf16.mxu1 %v24295_v11  ;;  %v24365_v10 = vld [vmem:[#allocation7 + $0x3a8] ss:$16 sps:$4 sm:$0xff]   ;;  %v24370_v11 = vld [vmem:[#allocation7 + $0x3c4] ss:$16 sps:$4 sm:$0xff]  }
 0x4b2   :  { %16305 = vmatprep.mubr.bf16.mxu0 %v20298_v14  ;;  %17473 = vmatprep.mubr.bf16.mxu1 %v20298_v14  ;;  %v24371_v14 = vld [vmem:[#allocation7 + $0x3c8] ss:$16 sps:$4 sm:$0xff]  }
 0x4b4   :  { %16339 = vmatpush1.bf16.msra.mxu0 %v24290_v12  ;;  %17507 = vmatpush1.bf16.msra.mxu1 %v24293_v13  ;;  %v24373_v12 = vld [vmem:[#allocation7 + $0x3cc] ss:$16 sps:$4 sm:$0xff]   ;;  %v24368_v13 = vld [vmem:[#allocation7 + $0x3c0] ss:$16 sps:$4 sm:$0xff]  }
 0x4b5   :  { %16340 = vmatprep.subr.bf16.mxu0 %v24298_v15  ;;  %17508 = vmatprep.subr.bf16.mxu1 %v24301_v16  ;;  %v24376_v15 = vld [vmem:[#allocation7 + $0x3e4] ss:$16 sps:$4 sm:$0xff]   ;;  %v24379_v16 = vld [vmem:[#allocation7 + $0x3ec] ss:$16 sps:$4 sm:$0xff]  }
 0x4b7   :  { %16306 = vmatmul.mubr.bf16.gmra.mrb[4].mxu0 %v20297_v19  ;;  %17474 = vmatmul.mubr.bf16.gmra.mrb[4].mxu1 %v20297_v19  ;;  %v24382_v19 = vld [vmem:[#allocation7 + $0x404] ss:$16 sps:$4 sm:$0xff]  }
 0x4b8   :  { %16341 = vmatpush1.bf16.msra.mxu0 %v24296_v20  ;;  %17509 = vmatpush1.bf16.msra.mxu1 %v24299_v21  ;;  %v24385_v20 = vld [vmem:[#allocation7 + $0x40c] ss:$16 sps:$4 sm:$0xff]  }
 0x4b9   :  { %16342 = vmatprep.subr.bf16.mxu0 %v24304_v22  ;;  %17510 = vmatprep.subr.bf16.mxu1 %v24307_v23  ;;  %v136_v21 = vld [vmem:[#allocation2 + $0x108] sm:$0xff]  ;;  %v20267_v23 = vcombine.low %v26188_v41, %v26190_v42  ;;  %v24398_v41 = vld [vmem:[#allocation7 + $0x460] ss:$16 sps:$4 sm:$0xff]  }
 0x4ba   :  { %16315 = vmatprep.mubr.bf16.mxu0 %v20330_v26  ;;  %17483 = vmatprep.mubr.bf16.mxu1 %v20330_v26  ;;  %v152_v22 = vld [vmem:[#allocation2 + $0x188] sm:$0xff]  ;;  %v24388_v26 = vld [vmem:[#allocation7 + $0x424] ss:$16 sps:$4 sm:$0xff]  }
 0x4bb   :  { %v20300_v30 = vcombine.high %v136_v21, %v152_v22  ;;  %v24401_v42 = vld [vmem:[#allocation7 + $0x468] ss:$16 sps:$4 sm:$0xff]  }
 0x4bc   :  { %16343 = vmatpush1.bf16.msra.mxu0 %v24302_v24  ;;  %17511 = vmatpush1.bf16.msra.mxu1 %v24305_v25  ;;  %v24380_v24 = vld [vmem:[#allocation7 + $0x400] ss:$16 sps:$4 sm:$0xff]   ;;  %v24383_v25 = vld [vmem:[#allocation7 + $0x408] ss:$16 sps:$4 sm:$0xff]  }
 0x4bd   :  { %16344 = vmatprep.subr.bf16.mxu0 %v24310_v27  ;;  %17512 = vmatprep.subr.bf16.mxu1 %v24313_v28  ;;  %v24391_v27 = vld [vmem:[#allocation7 + $0x42c] ss:$16 sps:$4 sm:$0xff]   ;;  %v24386_v28 = vld [vmem:[#allocation7 + $0x420] ss:$16 sps:$4 sm:$0xff]  }
 0x4bf   :  { %16316 = vmatmul.mubr.bf16.gmra.mrb[8].mxu0 %v20329_v31  ;;  %17484 = vmatmul.mubr.bf16.gmra.mrb[8].mxu1 %v20329_v31  ;;  %v24394_v31 = vld [vmem:[#allocation7 + $0x444] ss:$16 sps:$4 sm:$0xff]  }
 0x4c0   :  { %16345 = vmatpush1.bf16.msra.mxu0 %v24308_v32  ;;  %17513 = vmatpush1.bf16.msra.mxu1 %v24311_v33  ;;  %v24397_v32 = vld [vmem:[#allocation7 + $0x44c] ss:$16 sps:$4 sm:$0xff]  }
 0x4c1   :  { %16346 = vmatprep.subr.bf16.mxu0 %v24316_v34  ;;  %17514 = vmatprep.subr.bf16.mxu1 %v24319_v35  ;;  %v168_v33 = vld [vmem:[#allocation2 + $0x208] sm:$0xff]  ;;  %v20299_v35 = vcombine.low %v136_v21, %v152_v22  ;;  %v24452_v21 = vld [vmem:[#allocation7 + $0x580] ss:$16 sps:$4 sm:$0xff]  }
 0x4c2   :  { %16325 = vmatprep.mubr.bf16.mxu0 %v20362_v38  ;;  %17493 = vmatprep.mubr.bf16.mxu1 %v20362_v38  ;;  %v184_v34 = vld [vmem:[#allocation2 + $0x288] sm:$0xff]  ;;  %v24400_v38 = vld [vmem:[#allocation7 + $0x464] ss:$16 sps:$4 sm:$0xff]  }
 0x4c3   :  { %v24455_v22 = vld [vmem:[#allocation7 + $0x588] ss:$16 sps:$4 sm:$0xff]  }
 0x4c4   :  { %16347 = vmatpush1.bf16.msra.mxu0 %v24314_v36  ;;  %17515 = vmatpush1.bf16.msra.mxu1 %v24317_v37  ;;  %v24392_v36 = vld [vmem:[#allocation7 + $0x440] ss:$16 sps:$4 sm:$0xff]   ;;  %v24395_v37 = vld [vmem:[#allocation7 + $0x448] ss:$16 sps:$4 sm:$0xff]  }
 0x4c5   :  { %16348 = vmatprep.subr.bf16.mxu0 %v24322_v39  ;;  %17516 = vmatprep.subr.bf16.mxu1 %v24325_v40  ;;  %v24403_v39 = vld [vmem:[#allocation7 + $0x46c] ss:$16 sps:$4 sm:$0xff]   ;;  %v20332_v40 = vcombine.high %v168_v33, %v184_v34 }
 0x4c7   :  { %16326 = vmatmul.mubr.bf16.gmra.mrb[12].mxu0 %v20361_v43  ;;  %17494 = vmatmul.mubr.bf16.gmra.mrb[12].mxu1 %v20361_v43  ;;  %v24406_v43 = vld [vmem:[#allocation7 + $0x484] ss:$16 sps:$4 sm:$0xff]  }
 0x4c8   :  { %16349 = vmatpush1.bf16.msra.mxu0 %v24320_v44  ;;  %17517 = vmatpush1.bf16.msra.mxu1 %v24323_v45  ;;  %v24409_v44 = vld [vmem:[#allocation7 + $0x48c] ss:$16 sps:$4 sm:$0xff]   ;;  %v20331_v45 = vcombine.low %v168_v33, %v184_v34  ;;  %v24470_v33 = vld [vmem:[#allocation7 + $0x5e0] ss:$16 sps:$4 sm:$0xff]   ;;  %v24473_v34 = vld [vmem:[#allocation7 + $0x5e8] ss:$16 sps:$4 sm:$0xff]  }
 0x4c9   :  { %16350 = vmatprep.subr.bf16.mxu0 %v24328_v46  ;;  %17518 = vmatprep.subr.bf16.mxu1 %v24331_v47  ;;  %v200_v46 = vld [vmem:[#allocation2 + $0x308] sm:$0xff] }
 0x4ca   :  { %16368 = vmatprep.mubr.bf16.mxu0 %v20268_v48  ;;  %17536 = vmatprep.mubr.bf16.mxu1 %v20268_v48  ;;  %v216_v47 = vld [vmem:[#allocation2 + $0x388] sm:$0x33]  ;;  %v24404_v48 = vld [vmem:[#allocation7 + $0x480] ss:$16 sps:$4 sm:$0xff]  }
 0x4cc   :  { %16351 = vmatpush1.bf16.msra.mxu0 %v24326_v49  ;;  %17519 = vmatpush1.bf16.msra.mxu1 %v24329_v50  ;;  %v24407_v49 = vld [vmem:[#allocation7 + $0x488] ss:$16 sps:$4 sm:$0xff]   ;;  %v24412_v50 = vld [vmem:[#allocation7 + $0x4a4] ss:$16 sps:$4 sm:$0xff]  }
 0x4cd   :  { %16352 = vmatprep.subr.bf16.mxu0 %v24334_v51  ;;  %17520 = vmatprep.subr.bf16.mxu1 %v24337_v52  ;;  %v24415_v51 = vld [vmem:[#allocation7 + $0x4ac] ss:$16 sps:$4 sm:$0xff]   ;;  %v20364_v52 = vcombine.high %v200_v46, %v216_v47 }
 0x4d0   :  { %16353 = vmatpush1.bf16.msra.mxu0 %v24332_v53  ;;  %17521 = vmatpush1.bf16.msra.mxu1 %v24335_v54  ;;  %v24410_v53 = vld [vmem:[#allocation7 + $0x4a0] ss:$16 sps:$4 sm:$0xff]   ;;  %v24413_v54 = vld [vmem:[#allocation7 + $0x4a8] ss:$16 sps:$4 sm:$0xff]  }
 0x4d1   :  { %16354 = vmatprep.subr.bf16.mxu0 %v24340_v55  ;;  %17522 = vmatprep.subr.bf16.mxu1 %v24343_v56  ;;  %v24418_v55 = vld [vmem:[#allocation7 + $0x4c4] ss:$16 sps:$4 sm:$0xff]   ;;  %v24421_v56 = vld [vmem:[#allocation7 + $0x4cc] ss:$16 sps:$4 sm:$0xff]  }
 0x4d4   :  { %16355 = vmatpush1.bf16.msra.mxu0 %v24338_v57  ;;  %17523 = vmatpush1.bf16.msra.mxu1 %v24341_v58  ;;  %v20363_v57 = vcombine.low %v200_v46, %v216_v47  ;;  %v26196_v58 = vld [vmem:[#allocation2 + $0x10] sm:$0xff]  ;;  %v24485_v46 = vld [vmem:[#allocation7 + $0x628] ss:$16 sps:$4 sm:$0xff]  }
 0x4d5   :  { %16356 = vmatprep.subr.bf16.mxu0 %v24346_v59  ;;  %17524 = vmatprep.subr.bf16.mxu1 %v24349_v60  ;;  %v26198_v59 = vld [vmem:[#allocation2 + $0x90] sm:$0xff] }
 0x4d6   :  { %v24416_v60 = vld [vmem:[#allocation7 + $0x4c0] ss:$16 sps:$4 sm:$0xff]   ;;  %v24490_v47 = vld [vmem:[#allocation7 + $0x644] ss:$16 sps:$4 sm:$0xff]  }
 0x4d8   :  { %16357 = vmatpush1.bf16.msra.mxu0 %v24344_v61  ;;  %17525 = vmatpush1.bf16.msra.mxu1 %v24347_v62  ;;  %v24419_v61 = vld [vmem:[#allocation7 + $0x4c8] ss:$16 sps:$4 sm:$0xff]   ;;  %v24424_v62 = vld [vmem:[#allocation7 + $0x4e4] ss:$16 sps:$4 sm:$0xff]  }
 0x4d9   :  { %16358 = vmatprep.subr.bf16.mxu0 %v24352_v63  ;;  %17526 = vmatprep.subr.bf16.mxu1 %v24355_v0  ;;  %v24427_v63 = vld [vmem:[#allocation7 + $0x4ec] ss:$16 sps:$4 sm:$0xff]   ;;  %v20270_v0 = vcombine.high %v26196_v58, %v26198_v59 }
 0x4dc   :  { %16359 = vmatpush1.bf16.msra.mxu0 %v24350_v1  ;;  %17527 = vmatpush1.bf16.msra.mxu1 %v24353_v2  ;;  %v24422_v1 = vld [vmem:[#allocation7 + $0x4e0] ss:$16 sps:$4 sm:$0xff]   ;;  %v24425_v2 = vld [vmem:[#allocation7 + $0x4e8] ss:$16 sps:$4 sm:$0xff]  }
 0x4dd   :  { %16360 = vmatprep.subr.bf16.mxu0 %v24358_v3  ;;  %17528 = vmatprep.subr.bf16.mxu1 %v24361_v4  ;;  %v24430_v3 = vld [vmem:[#allocation7 + $0x504] ss:$16 sps:$4 sm:$0xff]   ;;  %v24433_v4 = vld [vmem:[#allocation7 + $0x50c] ss:$16 sps:$4 sm:$0xff]  }
 0x4e0   :  { %16361 = vmatpush1.bf16.msra.mxu0 %v24356_v5  ;;  %17529 = vmatpush1.bf16.msra.mxu1 %v24359_v6  ;;  %v24428_v5 = vld [vmem:[#allocation7 + $0x500] ss:$16 sps:$4 sm:$0xff]   ;;  %v24431_v6 = vld [vmem:[#allocation7 + $0x508] ss:$16 sps:$4 sm:$0xff]  }
 0x4e1   :  { %16362 = vmatprep.subr.bf16.mxu0 %v24364_v7  ;;  %17530 = vmatprep.subr.bf16.mxu1 %v24367_v8  ;;  %v24436_v7 = vld [vmem:[#allocation7 + $0x524] ss:$16 sps:$4 sm:$0xff]   ;;  %v24439_v8 = vld [vmem:[#allocation7 + $0x52c] ss:$16 sps:$4 sm:$0xff]  }
 0x4e4   :  { %16363 = vmatpush1.bf16.msra.mxu0 %v24362_v9  ;;  %17531 = vmatpush1.bf16.msra.mxu1 %v24365_v10  ;;  %v24434_v9 = vld [vmem:[#allocation7 + $0x520] ss:$16 sps:$4 sm:$0xff]   ;;  %v24437_v10 = vld [vmem:[#allocation7 + $0x528] ss:$16 sps:$4 sm:$0xff]  }
 0x4e5   :  { %16364 = vmatprep.subr.bf16.mxu0 %v24370_v11  ;;  %17532 = vmatprep.subr.bf16.mxu1 %v24373_v12  ;;  %v24442_v11 = vld [vmem:[#allocation7 + $0x544] ss:$16 sps:$4 sm:$0xff]   ;;  %v24445_v12 = vld [vmem:[#allocation7 + $0x54c] ss:$16 sps:$4 sm:$0xff]  }
 0x4e8   :  { %16365 = vmatpush1.bf16.msra.mxu0 %v24368_v13  ;;  %17533 = vmatpush1.bf16.msra.mxu1 %v24371_v14  ;;  %v24440_v13 = vld [vmem:[#allocation7 + $0x540] ss:$16 sps:$4 sm:$0xff]   ;;  %v24443_v14 = vld [vmem:[#allocation7 + $0x548] ss:$16 sps:$4 sm:$0xff]  }
 0x4e9   :  { %16366 = vmatprep.subr.bf16.mxu0 %v24376_v15  ;;  %17534 = vmatprep.subr.bf16.mxu1 %v24379_v16  ;;  %v24448_v15 = vld [vmem:[#allocation7 + $0x564] ss:$16 sps:$4 sm:$0xff]   ;;  %v24451_v16 = vld [vmem:[#allocation7 + $0x56c] ss:$16 sps:$4 sm:$0xff]  }
 0x4ec   :  { %16367 = vmatpush1.bf16.msra.mxu0 %v24374_v17  ;;  %17535 = vmatpush1.bf16.msra.mxu1 %v24377_v18  ;;  %v24446_v17 = vld [vmem:[#allocation7 + $0x560] ss:$16 sps:$4 sm:$0xff]   ;;  %v24449_v18 = vld [vmem:[#allocation7 + $0x568] ss:$16 sps:$4 sm:$0xff]  }
 0x4ed   :  { %16409 = vmatprep.subr.bf16.mxu0 %v24382_v19  ;;  %17577 = vmatprep.subr.bf16.mxu1 %v24385_v20  ;;  %v24454_v19 = vld [vmem:[#allocation7 + $0x584] ss:$16 sps:$4 sm:$0xff]   ;;  %v24457_v20 = vld [vmem:[#allocation7 + $0x58c] ss:$16 sps:$4 sm:$0xff]  }
 0x4ef   :  { %16369 = vmatmul.mubr.bf16.vlgmr.msra.gmra.mrb[0].mxu0 %v20267_v23  ;;  %17537 = vmatmul.mubr.bf16.vlgmr.msra.gmra.mrb[0].mxu1 %v20267_v23  ;;  %v24460_v23 = vld [vmem:[#allocation7 + $0x5a4] ss:$16 sps:$4 sm:$0xff]  }
 0x4f0   :  { %16410 = vmatpush1.bf16.msra.mxu0 %v24380_v24  ;;  %17578 = vmatpush1.bf16.msra.mxu1 %v24383_v25  ;;  %v24463_v24 = vld [vmem:[#allocation7 + $0x5ac] ss:$16 sps:$4 sm:$0xff]   ;;  %v24458_v25 = vld [vmem:[#allocation7 + $0x5a0] ss:$16 sps:$4 sm:$0xff]  }
 0x4f1   :  { %16411 = vmatprep.subr.bf16.mxu0 %v24388_v26  ;;  %17579 = vmatprep.subr.bf16.mxu1 %v24391_v27  ;;  %v24461_v26 = vld [vmem:[#allocation7 + $0x5a8] ss:$16 sps:$4 sm:$0xff]   ;;  %v24466_v27 = vld [vmem:[#allocation7 + $0x5c4] ss:$16 sps:$4 sm:$0xff]  }
 0x4f2   :  { %16378 = vmatprep.mubr.bf16.mxu0 %v20300_v30  ;;  %17546 = vmatprep.mubr.bf16.mxu1 %v20300_v30  ;;  %v24467_v30 = vld [vmem:[#allocation7 + $0x5c8] ss:$16 sps:$4 sm:$0xff]  }
 0x4f4   :  { %16412 = vmatpush1.bf16.msra.mxu0 %v24386_v28  ;;  %17580 = vmatpush1.bf16.msra.mxu1 %v24389_v29  ;;  %v24469_v28 = vld [vmem:[#allocation7 + $0x5cc] ss:$16 sps:$4 sm:$0xff]   ;;  %v24464_v29 = vld [vmem:[#allocation7 + $0x5c0] ss:$16 sps:$4 sm:$0xff]  }
 0x4f5   :  { %16413 = vmatprep.subr.bf16.mxu0 %v24394_v31  ;;  %17581 = vmatprep.subr.bf16.mxu1 %v24397_v32  ;;  %v24472_v31 = vld [vmem:[#allocation7 + $0x5e4] ss:$16 sps:$4 sm:$0xff]   ;;  %v24475_v32 = vld [vmem:[#allocation7 + $0x5ec] ss:$16 sps:$4 sm:$0xff]  }
 0x4f7   :  { %16379 = vmatmul.mubr.bf16.gmra.mrb[4].mxu0 %v20299_v35  ;;  %17547 = vmatmul.mubr.bf16.gmra.mrb[4].mxu1 %v20299_v35  ;;  %v24478_v35 = vld [vmem:[#allocation7 + $0x604] ss:$16 sps:$4 sm:$0xff]  }
 0x4f8   :  { %16414 = vmatpush1.bf16.msra.mxu0 %v24392_v36  ;;  %17582 = vmatpush1.bf16.msra.mxu1 %v24395_v37  ;;  %v24481_v36 = vld [vmem:[#allocation7 + $0x60c] ss:$16 sps:$4 sm:$0xff]   ;;  %v20269_v37 = vcombine.low %v26196_v58, %v26198_v59  ;;  %v24497_v58 = vld [vmem:[#allocation7 + $0x668] ss:$16 sps:$4 sm:$0xff]   ;;  %v24502_v59 = vld [vmem:[#allocation7 + $0x684] ss:$16 sps:$4 sm:$0xff]  }
 0x4f9   :  { %16415 = vmatprep.subr.bf16.mxu0 %v24400_v38  ;;  %17583 = vmatprep.subr.bf16.mxu1 %v24403_v39  ;;  %v137_v38 = vld [vmem:[#allocation2 + $0x110] sm:$0xff] }
 0x4fa   :  { %16388 = vmatprep.mubr.bf16.mxu0 %v20332_v40  ;;  %17556 = vmatprep.mubr.bf16.mxu1 %v20332_v40  ;;  %v153_v39 = vld [vmem:[#allocation2 + $0x190] sm:$0xff] }
 0x4fb   :  { %v24476_v40 = vld [vmem:[#allocation7 + $0x600] ss:$16 sps:$4 sm:$0xff]  }
 0x4fc   :  { %16416 = vmatpush1.bf16.msra.mxu0 %v24398_v41  ;;  %17584 = vmatpush1.bf16.msra.mxu1 %v24401_v42  ;;  %v24479_v41 = vld [vmem:[#allocation7 + $0x608] ss:$16 sps:$4 sm:$0xff]   ;;  %v24484_v42 = vld [vmem:[#allocation7 + $0x624] ss:$16 sps:$4 sm:$0xff]  }
 0x4fd   :  { %16417 = vmatprep.subr.bf16.mxu0 %v24406_v43  ;;  %17585 = vmatprep.subr.bf16.mxu1 %v24409_v44  ;;  %v24487_v43 = vld [vmem:[#allocation7 + $0x62c] ss:$16 sps:$4 sm:$0xff]   ;;  %v20302_v44 = vcombine.high %v137_v38, %v153_v39 }
 0x4ff   :  { %16389 = vmatmul.mubr.bf16.gmra.mrb[8].mxu0 %v20331_v45  ;;  %17557 = vmatmul.mubr.bf16.gmra.mrb[8].mxu1 %v20331_v45  ;;  %v24482_v45 = vld [vmem:[#allocation7 + $0x620] ss:$16 sps:$4 sm:$0xff]  }
 0x500   :  { %16418 = vmatpush1.bf16.msra.mxu0 %v24404_v48  ;;  %17586 = vmatpush1.bf16.msra.mxu1 %v24407_v49  ;;  %v24493_v48 = vld [vmem:[#allocation7 + $0x64c] ss:$16 sps:$4 sm:$0xff]   ;;  %v20301_v49 = vcombine.low %v137_v38, %v153_v39  ;;  %v24551_v38 = vld [vmem:[#allocation7 + $0x788] ss:$16 sps:$4 sm:$0xff]   ;;  %v24556_v39 = vld [vmem:[#allocation7 + $0x7a4] ss:$16 sps:$4 sm:$0xff]  }
 0x501   :  { %16419 = vmatprep.subr.bf16.mxu0 %v24412_v50  ;;  %17587 = vmatprep.subr.bf16.mxu1 %v24415_v51  ;;  %v169_v50 = vld [vmem:[#allocation2 + $0x210] sm:$0xff] }
 0x502   :  { %16398 = vmatprep.mubr.bf16.mxu0 %v20364_v52  ;;  %17566 = vmatprep.mubr.bf16.mxu1 %v20364_v52  ;;  %v185_v51 = vld [vmem:[#allocation2 + $0x290] sm:$0xff] }
 0x503   :  { %v24488_v52 = vld [vmem:[#allocation7 + $0x640] ss:$16 sps:$4 sm:$0xff]  }
 0x504   :  { %16420 = vmatpush1.bf16.msra.mxu0 %v24410_v53  ;;  %17588 = vmatpush1.bf16.msra.mxu1 %v24413_v54  ;;  %v24491_v53 = vld [vmem:[#allocation7 + $0x648] ss:$16 sps:$4 sm:$0xff]   ;;  %v24496_v54 = vld [vmem:[#allocation7 + $0x664] ss:$16 sps:$4 sm:$0xff]  }
 0x505   :  { %16421 = vmatprep.subr.bf16.mxu0 %v24418_v55  ;;  %17589 = vmatprep.subr.bf16.mxu1 %v24421_v56  ;;  %v24499_v55 = vld [vmem:[#allocation7 + $0x66c] ss:$16 sps:$4 sm:$0xff]   ;;  %v20334_v56 = vcombine.high %v169_v50, %v185_v51 }
 0x507   :  { %16399 = vmatmul.mubr.bf16.gmra.mrb[12].mxu0 %v20363_v57  ;;  %17567 = vmatmul.mubr.bf16.gmra.mrb[12].mxu1 %v20363_v57  ;;  %v24494_v57 = vld [vmem:[#allocation7 + $0x660] ss:$16 sps:$4 sm:$0xff]  }
 0x508   :  { %16422 = vmatpush1.bf16.msra.mxu0 %v24416_v60  ;;  %17590 = vmatpush1.bf16.msra.mxu1 %v24419_v61  ;;  %v24505_v60 = vld [vmem:[#allocation7 + $0x68c] ss:$16 sps:$4 sm:$0xff]   ;;  %v20333_v61 = vcombine.low %v169_v50, %v185_v51  ;;  %v24569_v50 = vld [vmem:[#allocation7 + $0x7e8] ss:$16 sps:$4 sm:$0xff]   ;;  %v24574_v51 = vld [vmem:[#allocation7 + $0x804] ss:$16 sps:$4 sm:$0xff]  }
 0x509   :  { %16423 = vmatprep.subr.bf16.mxu0 %v24424_v62  ;;  %17591 = vmatprep.subr.bf16.mxu1 %v24427_v63  ;;  %v201_v62 = vld [vmem:[#allocation2 + $0x310] sm:$0xff] }
 0x50a   :  { %16441 = vmatprep.mubr.bf16.mxu0 %v20270_v0  ;;  %17609 = vmatprep.mubr.bf16.mxu1 %v20270_v0  ;;  %v217_v63 = vld [vmem:[#allocation2 + $0x390] sm:$0x33] }
 0x50b   :  { %v24500_v0 = vld [vmem:[#allocation7 + $0x680] ss:$16 sps:$4 sm:$0xff]  }
 0x50c   :  { %16424 = vmatpush1.bf16.msra.mxu0 %v24422_v1  ;;  %17592 = vmatpush1.bf16.msra.mxu1 %v24425_v2  ;;  %v24503_v1 = vld [vmem:[#allocation7 + $0x688] ss:$16 sps:$4 sm:$0xff]   ;;  %v24508_v2 = vld [vmem:[#allocation7 + $0x6a4] ss:$16 sps:$4 sm:$0xff]  }
 0x50d   :  { %16425 = vmatprep.subr.bf16.mxu0 %v24430_v3  ;;  %17593 = vmatprep.subr.bf16.mxu1 %v24433_v4  ;;  %v24511_v3 = vld [vmem:[#allocation7 + $0x6ac] ss:$16 sps:$4 sm:$0xff]   ;;  %v20366_v4 = vcombine.high %v201_v62, %v217_v63 }
 0x510   :  { %16426 = vmatpush1.bf16.msra.mxu0 %v24428_v5  ;;  %17594 = vmatpush1.bf16.msra.mxu1 %v24431_v6  ;;  %v24506_v5 = vld [vmem:[#allocation7 + $0x6a0] ss:$16 sps:$4 sm:$0xff]   ;;  %v24509_v6 = vld [vmem:[#allocation7 + $0x6a8] ss:$16 sps:$4 sm:$0xff]  }
 0x511   :  { %16427 = vmatprep.subr.bf16.mxu0 %v24436_v7  ;;  %17595 = vmatprep.subr.bf16.mxu1 %v24439_v8  ;;  %v24514_v7 = vld [vmem:[#allocation7 + $0x6c4] ss:$16 sps:$4 sm:$0xff]   ;;  %v24517_v8 = vld [vmem:[#allocation7 + $0x6cc] ss:$16 sps:$4 sm:$0xff]  }
 0x514   :  { %16428 = vmatpush1.bf16.msra.mxu0 %v24434_v9  ;;  %17596 = vmatpush1.bf16.msra.mxu1 %v24437_v10  ;;  %v20365_v9 = vcombine.low %v201_v62, %v217_v63  ;;  %v26204_v10 = vld [vmem:[#allocation2 + $0x18] sm:$0xff]  ;;  %v24586_v63 = vld [vmem:[#allocation7 + $0x844] ss:$16 sps:$4 sm:$0xff]  }
 0x515   :  { %16429 = vmatprep.subr.bf16.mxu0 %v24442_v11  ;;  %17597 = vmatprep.subr.bf16.mxu1 %v24445_v12  ;;  %v26206_v11 = vld [vmem:[#allocation2 + $0x98] sm:$0xff]  ;;  %v24512_v12 = vld [vmem:[#allocation7 + $0x6c0] ss:$16 sps:$4 sm:$0xff]  }
 0x516   :  { %v24581_v62 = vld [vmem:[#allocation7 + $0x828] ss:$16 sps:$4 sm:$0xff]  }
 0x518   :  { %16430 = vmatpush1.bf16.msra.mxu0 %v24440_v13  ;;  %17598 = vmatpush1.bf16.msra.mxu1 %v24443_v14  ;;  %v24515_v13 = vld [vmem:[#allocation7 + $0x6c8] ss:$16 sps:$4 sm:$0xff]   ;;  %v24520_v14 = vld [vmem:[#allocation7 + $0x6e4] ss:$16 sps:$4 sm:$0xff]  }
 0x519   :  { %16431 = vmatprep.subr.bf16.mxu0 %v24448_v15  ;;  %17599 = vmatprep.subr.bf16.mxu1 %v24451_v16  ;;  %v24523_v15 = vld [vmem:[#allocation7 + $0x6ec] ss:$16 sps:$4 sm:$0xff]   ;;  %v20272_v16 = vcombine.high %v26204_v10, %v26206_v11 }
 0x51c   :  { %16432 = vmatpush1.bf16.msra.mxu0 %v24446_v17  ;;  %17600 = vmatpush1.bf16.msra.mxu1 %v24449_v18  ;;  %v24518_v17 = vld [vmem:[#allocation7 + $0x6e0] ss:$16 sps:$4 sm:$0xff]   ;;  %v24521_v18 = vld [vmem:[#allocation7 + $0x6e8] ss:$16 sps:$4 sm:$0xff]  }
 0x51d   :  { %16433 = vmatprep.subr.bf16.mxu0 %v24454_v19  ;;  %17601 = vmatprep.subr.bf16.mxu1 %v24457_v20  ;;  %v24526_v19 = vld [vmem:[#allocation7 + $0x704] ss:$16 sps:$4 sm:$0xff]   ;;  %v24529_v20 = vld [vmem:[#allocation7 + $0x70c] ss:$16 sps:$4 sm:$0xff]  }
 0x520   :  { %16434 = vmatpush1.bf16.msra.mxu0 %v24452_v21  ;;  %17602 = vmatpush1.bf16.msra.mxu1 %v24455_v22  ;;  %v24524_v21 = vld [vmem:[#allocation7 + $0x700] ss:$16 sps:$4 sm:$0xff]   ;;  %v24527_v22 = vld [vmem:[#allocation7 + $0x708] ss:$16 sps:$4 sm:$0xff]  }
 0x521   :  { %16435 = vmatprep.subr.bf16.mxu0 %v24460_v23  ;;  %17603 = vmatprep.subr.bf16.mxu1 %v24463_v24  ;;  %v24532_v23 = vld [vmem:[#allocation7 + $0x724] ss:$16 sps:$4 sm:$0xff]   ;;  %v24535_v24 = vld [vmem:[#allocation7 + $0x72c] ss:$16 sps:$4 sm:$0xff]  }
 0x524   :  { %16436 = vmatpush1.bf16.msra.mxu0 %v24458_v25  ;;  %17604 = vmatpush1.bf16.msra.mxu1 %v24461_v26  ;;  %v24530_v25 = vld [vmem:[#allocation7 + $0x720] ss:$16 sps:$4 sm:$0xff]   ;;  %v24533_v26 = vld [vmem:[#allocation7 + $0x728] ss:$16 sps:$4 sm:$0xff]  }
 0x525   :  { %16437 = vmatprep.subr.bf16.mxu0 %v24466_v27  ;;  %17605 = vmatprep.subr.bf16.mxu1 %v24469_v28  ;;  %v24538_v27 = vld [vmem:[#allocation7 + $0x744] ss:$16 sps:$4 sm:$0xff]   ;;  %v24541_v28 = vld [vmem:[#allocation7 + $0x74c] ss:$16 sps:$4 sm:$0xff]  }
 0x528   :  { %16438 = vmatpush1.bf16.msra.mxu0 %v24464_v29  ;;  %17606 = vmatpush1.bf16.msra.mxu1 %v24467_v30  ;;  %v24536_v29 = vld [vmem:[#allocation7 + $0x740] ss:$16 sps:$4 sm:$0xff]   ;;  %v24539_v30 = vld [vmem:[#allocation7 + $0x748] ss:$16 sps:$4 sm:$0xff]  }
 0x529   :  { %16439 = vmatprep.subr.bf16.mxu0 %v24472_v31  ;;  %17607 = vmatprep.subr.bf16.mxu1 %v24475_v32  ;;  %v24544_v31 = vld [vmem:[#allocation7 + $0x764] ss:$16 sps:$4 sm:$0xff]   ;;  %v24547_v32 = vld [vmem:[#allocation7 + $0x76c] ss:$16 sps:$4 sm:$0xff]  }
 0x52c   :  { %16440 = vmatpush1.bf16.msra.mxu0 %v24470_v33  ;;  %17608 = vmatpush1.bf16.msra.mxu1 %v24473_v34  ;;  %v24542_v33 = vld [vmem:[#allocation7 + $0x760] ss:$16 sps:$4 sm:$0xff]   ;;  %v24545_v34 = vld [vmem:[#allocation7 + $0x768] ss:$16 sps:$4 sm:$0xff]  }
 0x52d   :  { %16482 = vmatprep.subr.bf16.mxu0 %v24478_v35  ;;  %17650 = vmatprep.subr.bf16.mxu1 %v24481_v36  ;;  %v24550_v35 = vld [vmem:[#allocation7 + $0x784] ss:$16 sps:$4 sm:$0xff]   ;;  %v24553_v36 = vld [vmem:[#allocation7 + $0x78c] ss:$16 sps:$4 sm:$0xff]  }
 0x52f   :  { %16442 = vmatmul.mubr.bf16.vlgmr.msra.gmra.mrb[0].mxu0 %v20269_v37  ;;  %17610 = vmatmul.mubr.bf16.vlgmr.msra.gmra.mrb[0].mxu1 %v20269_v37  ;;  %v24548_v37 = vld [vmem:[#allocation7 + $0x780] ss:$16 sps:$4 sm:$0xff]  }
 0x530   :  { %16483 = vmatpush1.bf16.msra.mxu0 %v24476_v40  ;;  %17651 = vmatpush1.bf16.msra.mxu1 %v24479_v41  ;;  %v24559_v40 = vld [vmem:[#allocation7 + $0x7ac] ss:$16 sps:$4 sm:$0xff]   ;;  %v24554_v41 = vld [vmem:[#allocation7 + $0x7a0] ss:$16 sps:$4 sm:$0xff]  }
 0x531   :  { %16484 = vmatprep.subr.bf16.mxu0 %v24484_v42  ;;  %17652 = vmatprep.subr.bf16.mxu1 %v24487_v43  ;;  %v24557_v42 = vld [vmem:[#allocation7 + $0x7a8] ss:$16 sps:$4 sm:$0xff]   ;;  %v24562_v43 = vld [vmem:[#allocation7 + $0x7c4] ss:$16 sps:$4 sm:$0xff]  }
 0x532   :  { %16451 = vmatprep.mubr.bf16.mxu0 %v20302_v44  ;;  %17619 = vmatprep.mubr.bf16.mxu1 %v20302_v44  ;;  %v24565_v44 = vld [vmem:[#allocation7 + $0x7cc] ss:$16 sps:$4 sm:$0xff]  }
 0x534   :  { %16485 = vmatpush1.bf16.msra.mxu0 %v24482_v45  ;;  %17653 = vmatpush1.bf16.msra.mxu1 %v24485_v46  ;;  %v24560_v45 = vld [vmem:[#allocation7 + $0x7c0] ss:$16 sps:$4 sm:$0xff]   ;;  %v24563_v46 = vld [vmem:[#allocation7 + $0x7c8] ss:$16 sps:$4 sm:$0xff]  }
 0x535   :  { %16486 = vmatprep.subr.bf16.mxu0 %v24490_v47  ;;  %17654 = vmatprep.subr.bf16.mxu1 %v24493_v48  ;;  %v24568_v47 = vld [vmem:[#allocation7 + $0x7e4] ss:$16 sps:$4 sm:$0xff]   ;;  %v24571_v48 = vld [vmem:[#allocation7 + $0x7ec] ss:$16 sps:$4 sm:$0xff]  }
 0x537   :  { %16452 = vmatmul.mubr.bf16.gmra.mrb[4].mxu0 %v20301_v49  ;;  %17620 = vmatmul.mubr.bf16.gmra.mrb[4].mxu1 %v20301_v49  ;;  %v24566_v49 = vld [vmem:[#allocation7 + $0x7e0] ss:$16 sps:$4 sm:$0xff]  }
 0x538   :  { %16487 = vmatpush1.bf16.msra.mxu0 %v24488_v52  ;;  %17655 = vmatpush1.bf16.msra.mxu1 %v24491_v53  ;;  %v24577_v52 = vld [vmem:[#allocation7 + $0x80c] ss:$16 sps:$4 sm:$0xff]   ;;  %v20271_v53 = vcombine.low %v26204_v10, %v26206_v11  ;;  %v24593_v10 = vld [vmem:[#allocation7 + $0x868] ss:$16 sps:$4 sm:$0xff]   ;;  %v24598_v11 = vld [vmem:[#allocation7 + $0x884] ss:$16 sps:$4 sm:$0xff]  }
 0x539   :  { %16488 = vmatprep.subr.bf16.mxu0 %v24496_v54  ;;  %17656 = vmatprep.subr.bf16.mxu1 %v24499_v55  ;;  %v138_v54 = vld [vmem:[#allocation2 + $0x118] sm:$0xff] }
 0x53a   :  { %16461 = vmatprep.mubr.bf16.mxu0 %v20334_v56  ;;  %17629 = vmatprep.mubr.bf16.mxu1 %v20334_v56  ;;  %v154_v55 = vld [vmem:[#allocation2 + $0x198] sm:$0xff]  ;;  %v24572_v56 = vld [vmem:[#allocation7 + $0x800] ss:$16 sps:$4 sm:$0xff]  }
 0x53c   :  { %16489 = vmatpush1.bf16.msra.mxu0 %v24494_v57  ;;  %17657 = vmatpush1.bf16.msra.mxu1 %v24497_v58  ;;  %v24575_v57 = vld [vmem:[#allocation7 + $0x808] ss:$16 sps:$4 sm:$0xff]   ;;  %v24580_v58 = vld [vmem:[#allocation7 + $0x824] ss:$16 sps:$4 sm:$0xff]  }
 0x53d   :  { %16490 = vmatprep.subr.bf16.mxu0 %v24502_v59  ;;  %17658 = vmatprep.subr.bf16.mxu1 %v24505_v60  ;;  %v24583_v59 = vld [vmem:[#allocation7 + $0x82c] ss:$16 sps:$4 sm:$0xff]   ;;  %v20304_v60 = vcombine.high %v138_v54, %v154_v55 }
 0x53f   :  { %16462 = vmatmul.mubr.bf16.gmra.mrb[8].mxu0 %v20333_v61  ;;  %17630 = vmatmul.mubr.bf16.gmra.mrb[8].mxu1 %v20333_v61  ;;  %v24578_v61 = vld [vmem:[#allocation7 + $0x820] ss:$16 sps:$4 sm:$0xff]  }
 0x540   :  { %16491 = vmatpush1.bf16.msra.mxu0 %v24500_v0  ;;  %17659 = vmatpush1.bf16.msra.mxu1 %v24503_v1  ;;  %v24589_v0 = vld [vmem:[#allocation7 + $0x84c] ss:$16 sps:$4 sm:$0xff]   ;;  %v20303_v1 = vcombine.low %v138_v54, %v154_v55  ;;  %v24647_v54 = vld [vmem:[#allocation7 + $0x988] ss:$16 sps:$4 sm:$0xff]   ;;  %v24652_v55 = vld [vmem:[#allocation7 + $0x9a4] ss:$16 sps:$4 sm:$0xff]  }
 0x541   :  { %16492 = vmatprep.subr.bf16.mxu0 %v24508_v2  ;;  %17660 = vmatprep.subr.bf16.mxu1 %v24511_v3  ;;  %v170_v2 = vld [vmem:[#allocation2 + $0x218] sm:$0xff] }
 0x542   :  { %16471 = vmatprep.mubr.bf16.mxu0 %v20366_v4  ;;  %17639 = vmatprep.mubr.bf16.mxu1 %v20366_v4  ;;  %v186_v3 = vld [vmem:[#allocation2 + $0x298] sm:$0xff]  ;;  %v24584_v4 = vld [vmem:[#allocation7 + $0x840] ss:$16 sps:$4 sm:$0xff]  }
 0x544   :  { %16493 = vmatpush1.bf16.msra.mxu0 %v24506_v5  ;;  %17661 = vmatpush1.bf16.msra.mxu1 %v24509_v6  ;;  %v24587_v5 = vld [vmem:[#allocation7 + $0x848] ss:$16 sps:$4 sm:$0xff]   ;;  %v24592_v6 = vld [vmem:[#allocation7 + $0x864] ss:$16 sps:$4 sm:$0xff]  }
 0x545   :  { %16494 = vmatprep.subr.bf16.mxu0 %v24514_v7  ;;  %17662 = vmatprep.subr.bf16.mxu1 %v24517_v8  ;;  %v24595_v7 = vld [vmem:[#allocation7 + $0x86c] ss:$16 sps:$4 sm:$0xff]   ;;  %v20336_v8 = vcombine.high %v170_v2, %v186_v3 }
 0x547   :  { %16472 = vmatmul.mubr.bf16.gmra.mrb[12].mxu0 %v20365_v9  ;;  %17640 = vmatmul.mubr.bf16.gmra.mrb[12].mxu1 %v20365_v9  ;;  %v24590_v9 = vld [vmem:[#allocation7 + $0x860] ss:$16 sps:$4 sm:$0xff]  }
 0x548   :  { %16495 = vmatpush1.bf16.msra.mxu0 %v24512_v12  ;;  %17663 = vmatpush1.bf16.msra.mxu1 %v24515_v13  ;;  %v24601_v12 = vld [vmem:[#allocation7 + $0x88c] ss:$16 sps:$4 sm:$0xff]   ;;  %v20335_v13 = vcombine.low %v170_v2, %v186_v3  ;;  %v24665_v2 = vld [vmem:[#allocation7 + $0x9e8] ss:$16 sps:$4 sm:$0xff]   ;;  %v24670_v3 = vld [vmem:[#allocation7 + $0xa04] ss:$16 sps:$4 sm:$0xff]  }
 0x549   :  { %16496 = vmatprep.subr.bf16.mxu0 %v24520_v14  ;;  %17664 = vmatprep.subr.bf16.mxu1 %v24523_v15  ;;  %v202_v14 = vld [vmem:[#allocation2 + $0x318] sm:$0xff] }
 0x54a   :  { %16514 = vmatprep.mubr.bf16.mxu0 %v20272_v16  ;;  %17682 = vmatprep.mubr.bf16.mxu1 %v20272_v16  ;;  %v218_v15 = vld [vmem:[#allocation2 + $0x398] sm:$0x33]  ;;  %v24596_v16 = vld [vmem:[#allocation7 + $0x880] ss:$16 sps:$4 sm:$0xff]  }
 0x54c   :  { %16497 = vmatpush1.bf16.msra.mxu0 %v24518_v17  ;;  %17665 = vmatpush1.bf16.msra.mxu1 %v24521_v18  ;;  %v24599_v17 = vld [vmem:[#allocation7 + $0x888] ss:$16 sps:$4 sm:$0xff]   ;;  %v24604_v18 = vld [vmem:[#allocation7 + $0x8a4] ss:$16 sps:$4 sm:$0xff]  }
 0x54d   :  { %16498 = vmatprep.subr.bf16.mxu0 %v24526_v19  ;;  %17666 = vmatprep.subr.bf16.mxu1 %v24529_v20  ;;  %v24607_v19 = vld [vmem:[#allocation7 + $0x8ac] ss:$16 sps:$4 sm:$0xff]   ;;  %v20368_v20 = vcombine.high %v202_v14, %v218_v15 }
 0x550   :  { %16499 = vmatpush1.bf16.msra.mxu0 %v24524_v21  ;;  %17667 = vmatpush1.bf16.msra.mxu1 %v24527_v22  ;;  %v24602_v21 = vld [vmem:[#allocation7 + $0x8a0] ss:$16 sps:$4 sm:$0xff]   ;;  %v24605_v22 = vld [vmem:[#allocation7 + $0x8a8] ss:$16 sps:$4 sm:$0xff]  }
 0x551   :  { %16500 = vmatprep.subr.bf16.mxu0 %v24532_v23  ;;  %17668 = vmatprep.subr.bf16.mxu1 %v24535_v24  ;;  %v24610_v23 = vld [vmem:[#allocation7 + $0x8c4] ss:$16 sps:$4 sm:$0xff]   ;;  %v24613_v24 = vld [vmem:[#allocation7 + $0x8cc] ss:$16 sps:$4 sm:$0xff]  }
 0x554   :  { %16501 = vmatpush1.bf16.msra.mxu0 %v24530_v25  ;;  %17669 = vmatpush1.bf16.msra.mxu1 %v24533_v26  ;;  %v20367_v25 = vcombine.low %v202_v14, %v218_v15  ;;  %v26212_v26 = vld [vmem:[#allocation2 + $0x20] sm:$0xff]  ;;  %v24677_v14 = vld [vmem:[#allocation7 + $0xa28] ss:$16 sps:$4 sm:$0xff]  }
 0x555   :  { %16502 = vmatprep.subr.bf16.mxu0 %v24538_v27  ;;  %17670 = vmatprep.subr.bf16.mxu1 %v24541_v28  ;;  %v26214_v27 = vld [vmem:[#allocation2 + $0xa0] sm:$0xff] }
 0x556   :  { %v24608_v28 = vld [vmem:[#allocation7 + $0x8c0] ss:$16 sps:$4 sm:$0xff]   ;;  %v24682_v15 = vld [vmem:[#allocation7 + $0xa44] ss:$16 sps:$4 sm:$0xff]  }
 0x558   :  { %16503 = vmatpush1.bf16.msra.mxu0 %v24536_v29  ;;  %17671 = vmatpush1.bf16.msra.mxu1 %v24539_v30  ;;  %v24611_v29 = vld [vmem:[#allocation7 + $0x8c8] ss:$16 sps:$4 sm:$0xff]   ;;  %v24616_v30 = vld [vmem:[#allocation7 + $0x8e4] ss:$16 sps:$4 sm:$0xff]  }
 0x559   :  { %16504 = vmatprep.subr.bf16.mxu0 %v24544_v31  ;;  %17672 = vmatprep.subr.bf16.mxu1 %v24547_v32  ;;  %v24619_v31 = vld [vmem:[#allocation7 + $0x8ec] ss:$16 sps:$4 sm:$0xff]   ;;  %v20274_v32 = vcombine.high %v26212_v26, %v26214_v27 }
 0x55c   :  { %16505 = vmatpush1.bf16.msra.mxu0 %v24542_v33  ;;  %17673 = vmatpush1.bf16.msra.mxu1 %v24545_v34  ;;  %v24614_v33 = vld [vmem:[#allocation7 + $0x8e0] ss:$16 sps:$4 sm:$0xff]   ;;  %v24617_v34 = vld [vmem:[#allocation7 + $0x8e8] ss:$16 sps:$4 sm:$0xff]  }
 0x55d   :  { %16506 = vmatprep.subr.bf16.mxu0 %v24550_v35  ;;  %17674 = vmatprep.subr.bf16.mxu1 %v24553_v36  ;;  %v24622_v35 = vld [vmem:[#allocation7 + $0x904] ss:$16 sps:$4 sm:$0xff]   ;;  %v24625_v36 = vld [vmem:[#allocation7 + $0x90c] ss:$16 sps:$4 sm:$0xff]  }
 0x560   :  { %16507 = vmatpush1.bf16.msra.mxu0 %v24548_v37  ;;  %17675 = vmatpush1.bf16.msra.mxu1 %v24551_v38  ;;  %v24620_v37 = vld [vmem:[#allocation7 + $0x900] ss:$16 sps:$4 sm:$0xff]   ;;  %v24623_v38 = vld [vmem:[#allocation7 + $0x908] ss:$16 sps:$4 sm:$0xff]  }
 0x561   :  { %16508 = vmatprep.subr.bf16.mxu0 %v24556_v39  ;;  %17676 = vmatprep.subr.bf16.mxu1 %v24559_v40  ;;  %v24628_v39 = vld [vmem:[#allocation7 + $0x924] ss:$16 sps:$4 sm:$0xff]   ;;  %v24631_v40 = vld [vmem:[#allocation7 + $0x92c] ss:$16 sps:$4 sm:$0xff]  }
 0x564   :  { %16509 = vmatpush1.bf16.msra.mxu0 %v24554_v41  ;;  %17677 = vmatpush1.bf16.msra.mxu1 %v24557_v42  ;;  %v24626_v41 = vld [vmem:[#allocation7 + $0x920] ss:$16 sps:$4 sm:$0xff]   ;;  %v24629_v42 = vld [vmem:[#allocation7 + $0x928] ss:$16 sps:$4 sm:$0xff]  }
 0x565   :  { %16510 = vmatprep.subr.bf16.mxu0 %v24562_v43  ;;  %17678 = vmatprep.subr.bf16.mxu1 %v24565_v44  ;;  %v24634_v43 = vld [vmem:[#allocation7 + $0x944] ss:$16 sps:$4 sm:$0xff]   ;;  %v24637_v44 = vld [vmem:[#allocation7 + $0x94c] ss:$16 sps:$4 sm:$0xff]  }
 0x568   :  { %16511 = vmatpush1.bf16.msra.mxu0 %v24560_v45  ;;  %17679 = vmatpush1.bf16.msra.mxu1 %v24563_v46  ;;  %v24632_v45 = vld [vmem:[#allocation7 + $0x940] ss:$16 sps:$4 sm:$0xff]   ;;  %v24635_v46 = vld [vmem:[#allocation7 + $0x948] ss:$16 sps:$4 sm:$0xff]  }
 0x569   :  { %16512 = vmatprep.subr.bf16.mxu0 %v24568_v47  ;;  %17680 = vmatprep.subr.bf16.mxu1 %v24571_v48  ;;  %v24640_v47 = vld [vmem:[#allocation7 + $0x964] ss:$16 sps:$4 sm:$0xff]   ;;  %v24643_v48 = vld [vmem:[#allocation7 + $0x96c] ss:$16 sps:$4 sm:$0xff]  }
 0x56c   :  { %16513 = vmatpush1.bf16.msra.mxu0 %v24566_v49  ;;  %17681 = vmatpush1.bf16.msra.mxu1 %v24569_v50  ;;  %v24638_v49 = vld [vmem:[#allocation7 + $0x960] ss:$16 sps:$4 sm:$0xff]   ;;  %v24641_v50 = vld [vmem:[#allocation7 + $0x968] ss:$16 sps:$4 sm:$0xff]  }
 0x56d   :  { %16555 = vmatprep.subr.bf16.mxu0 %v24574_v51  ;;  %17723 = vmatprep.subr.bf16.mxu1 %v24577_v52  ;;  %v24646_v51 = vld [vmem:[#allocation7 + $0x984] ss:$16 sps:$4 sm:$0xff]   ;;  %v24649_v52 = vld [vmem:[#allocation7 + $0x98c] ss:$16 sps:$4 sm:$0xff]  }
 0x56f   :  { %16515 = vmatmul.mubr.bf16.vlgmr.msra.gmra.mrb[0].mxu0 %v20271_v53  ;;  %17683 = vmatmul.mubr.bf16.vlgmr.msra.gmra.mrb[0].mxu1 %v20271_v53  ;;  %v24644_v53 = vld [vmem:[#allocation7 + $0x980] ss:$16 sps:$4 sm:$0xff]  }
 0x570   :  { %16556 = vmatpush1.bf16.msra.mxu0 %v24572_v56  ;;  %17724 = vmatpush1.bf16.msra.mxu1 %v24575_v57  ;;  %v24655_v56 = vld [vmem:[#allocation7 + $0x9ac] ss:$16 sps:$4 sm:$0xff]   ;;  %v24650_v57 = vld [vmem:[#allocation7 + $0x9a0] ss:$16 sps:$4 sm:$0xff]  }
 0x571   :  { %16557 = vmatprep.subr.bf16.mxu0 %v24580_v58  ;;  %17725 = vmatprep.subr.bf16.mxu1 %v24583_v59  ;;  %v24653_v58 = vld [vmem:[#allocation7 + $0x9a8] ss:$16 sps:$4 sm:$0xff]   ;;  %v24658_v59 = vld [vmem:[#allocation7 + $0x9c4] ss:$16 sps:$4 sm:$0xff]  }
 0x572   :  { %16524 = vmatprep.mubr.bf16.mxu0 %v20304_v60  ;;  %17692 = vmatprep.mubr.bf16.mxu1 %v20304_v60  ;;  %v24661_v60 = vld [vmem:[#allocation7 + $0x9cc] ss:$16 sps:$4 sm:$0xff]  }
 0x574   :  { %16558 = vmatpush1.bf16.msra.mxu0 %v24578_v61  ;;  %17726 = vmatpush1.bf16.msra.mxu1 %v24581_v62  ;;  %v24656_v61 = vld [vmem:[#allocation7 + $0x9c0] ss:$16 sps:$4 sm:$0xff]   ;;  %v24659_v62 = vld [vmem:[#allocation7 + $0x9c8] ss:$16 sps:$4 sm:$0xff]  }
 0x575   :  { %16559 = vmatprep.subr.bf16.mxu0 %v24586_v63  ;;  %17727 = vmatprep.subr.bf16.mxu1 %v24589_v0  ;;  %v24664_v63 = vld [vmem:[#allocation7 + $0x9e4] ss:$16 sps:$4 sm:$0xff]   ;;  %v24667_v0 = vld [vmem:[#allocation7 + $0x9ec] ss:$16 sps:$4 sm:$0xff]  }
 0x577   :  { %16525 = vmatmul.mubr.bf16.gmra.mrb[4].mxu0 %v20303_v1  ;;  %17693 = vmatmul.mubr.bf16.gmra.mrb[4].mxu1 %v20303_v1  ;;  %v24662_v1 = vld [vmem:[#allocation7 + $0x9e0] ss:$16 sps:$4 sm:$0xff]  }
 0x578   :  { %16560 = vmatpush1.bf16.msra.mxu0 %v24584_v4  ;;  %17728 = vmatpush1.bf16.msra.mxu1 %v24587_v5  ;;  %v24673_v4 = vld [vmem:[#allocation7 + $0xa0c] ss:$16 sps:$4 sm:$0xff]   ;;  %v20273_v5 = vcombine.low %v26212_v26, %v26214_v27  ;;  %v24689_v26 = vld [vmem:[#allocation7 + $0xa68] ss:$16 sps:$4 sm:$0xff]   ;;  %v24694_v27 = vld [vmem:[#allocation7 + $0xa84] ss:$16 sps:$4 sm:$0xff]  }
 0x579   :  { %16561 = vmatprep.subr.bf16.mxu0 %v24592_v6  ;;  %17729 = vmatprep.subr.bf16.mxu1 %v24595_v7  ;;  %v139_v6 = vld [vmem:[#allocation2 + $0x120] sm:$0xff] }
 0x57a   :  { %16534 = vmatprep.mubr.bf16.mxu0 %v20336_v8  ;;  %17702 = vmatprep.mubr.bf16.mxu1 %v20336_v8  ;;  %v155_v7 = vld [vmem:[#allocation2 + $0x1a0] sm:$0xff] }
 0x57b   :  { %v24668_v8 = vld [vmem:[#allocation7 + $0xa00] ss:$16 sps:$4 sm:$0xff]  }
 0x57c   :  { %16562 = vmatpush1.bf16.msra.mxu0 %v24590_v9  ;;  %17730 = vmatpush1.bf16.msra.mxu1 %v24593_v10  ;;  %v24671_v9 = vld [vmem:[#allocation7 + $0xa08] ss:$16 sps:$4 sm:$0xff]   ;;  %v24676_v10 = vld [vmem:[#allocation7 + $0xa24] ss:$16 sps:$4 sm:$0xff]  }
 0x57d   :  { %16563 = vmatprep.subr.bf16.mxu0 %v24598_v11  ;;  %17731 = vmatprep.subr.bf16.mxu1 %v24601_v12  ;;  %v24679_v11 = vld [vmem:[#allocation7 + $0xa2c] ss:$16 sps:$4 sm:$0xff]   ;;  %v20306_v12 = vcombine.high %v139_v6, %v155_v7 }
 0x57f   :  { %16535 = vmatmul.mubr.bf16.gmra.mrb[8].mxu0 %v20335_v13  ;;  %17703 = vmatmul.mubr.bf16.gmra.mrb[8].mxu1 %v20335_v13  ;;  %v24674_v13 = vld [vmem:[#allocation7 + $0xa20] ss:$16 sps:$4 sm:$0xff]  }
 0x580   :  { %16564 = vmatpush1.bf16.msra.mxu0 %v24596_v16  ;;  %17732 = vmatpush1.bf16.msra.mxu1 %v24599_v17  ;;  %v24685_v16 = vld [vmem:[#allocation7 + $0xa4c] ss:$16 sps:$4 sm:$0xff]   ;;  %v20305_v17 = vcombine.low %v139_v6, %v155_v7  ;;  %v24743_v6 = vld [vmem:[#allocation7 + $0xb88] ss:$16 sps:$4 sm:$0xff]   ;;  %v24748_v7 = vld [vmem:[#allocation7 + $0xba4] ss:$16 sps:$4 sm:$0xff]  }
 0x581   :  { %16565 = vmatprep.subr.bf16.mxu0 %v24604_v18  ;;  %17733 = vmatprep.subr.bf16.mxu1 %v24607_v19  ;;  %v171_v18 = vld [vmem:[#allocation2 + $0x220] sm:$0xff] }
 0x582   :  { %16544 = vmatprep.mubr.bf16.mxu0 %v20368_v20  ;;  %17712 = vmatprep.mubr.bf16.mxu1 %v20368_v20  ;;  %v187_v19 = vld [vmem:[#allocation2 + $0x2a0] sm:$0xff] }
 0x583   :  { %v24680_v20 = vld [vmem:[#allocation7 + $0xa40] ss:$16 sps:$4 sm:$0xff]  }
 0x584   :  { %16566 = vmatpush1.bf16.msra.mxu0 %v24602_v21  ;;  %17734 = vmatpush1.bf16.msra.mxu1 %v24605_v22  ;;  %v24683_v21 = vld [vmem:[#allocation7 + $0xa48] ss:$16 sps:$4 sm:$0xff]   ;;  %v24688_v22 = vld [vmem:[#allocation7 + $0xa64] ss:$16 sps:$4 sm:$0xff]  }
 0x585   :  { %16567 = vmatprep.subr.bf16.mxu0 %v24610_v23  ;;  %17735 = vmatprep.subr.bf16.mxu1 %v24613_v24  ;;  %v24691_v23 = vld [vmem:[#allocation7 + $0xa6c] ss:$16 sps:$4 sm:$0xff]   ;;  %v20338_v24 = vcombine.high %v171_v18, %v187_v19 }
 0x587   :  { %16545 = vmatmul.mubr.bf16.gmra.mrb[12].mxu0 %v20367_v25  ;;  %17713 = vmatmul.mubr.bf16.gmra.mrb[12].mxu1 %v20367_v25  ;;  %v24686_v25 = vld [vmem:[#allocation7 + $0xa60] ss:$16 sps:$4 sm:$0xff]  }
 0x588   :  { %16568 = vmatpush1.bf16.msra.mxu0 %v24608_v28  ;;  %17736 = vmatpush1.bf16.msra.mxu1 %v24611_v29  ;;  %v24697_v28 = vld [vmem:[#allocation7 + $0xa8c] ss:$16 sps:$4 sm:$0xff]   ;;  %v20337_v29 = vcombine.low %v171_v18, %v187_v19  ;;  %v24761_v18 = vld [vmem:[#allocation7 + $0xbe8] ss:$16 sps:$4 sm:$0xff]   ;;  %v24766_v19 = vld [vmem:[#allocation7 + $0xc04] ss:$16 sps:$4 sm:$0xff]  }
 0x589   :  { %16569 = vmatprep.subr.bf16.mxu0 %v24616_v30  ;;  %17737 = vmatprep.subr.bf16.mxu1 %v24619_v31  ;;  %v203_v30 = vld [vmem:[#allocation2 + $0x320] sm:$0xff] }
 0x58a   :  { %16587 = vmatprep.mubr.bf16.mxu0 %v20274_v32  ;;  %17755 = vmatprep.mubr.bf16.mxu1 %v20274_v32  ;;  %v219_v31 = vld [vmem:[#allocation2 + $0x3a0] sm:$0x33] }
 0x58b   :  { %v24692_v32 = vld [vmem:[#allocation7 + $0xa80] ss:$16 sps:$4 sm:$0xff]  }
 0x58c   :  { %16570 = vmatpush1.bf16.msra.mxu0 %v24614_v33  ;;  %17738 = vmatpush1.bf16.msra.mxu1 %v24617_v34  ;;  %v24695_v33 = vld [vmem:[#allocation7 + $0xa88] ss:$16 sps:$4 sm:$0xff]   ;;  %v24700_v34 = vld [vmem:[#allocation7 + $0xaa4] ss:$16 sps:$4 sm:$0xff]  }
 0x58d   :  { %16571 = vmatprep.subr.bf16.mxu0 %v24622_v35  ;;  %17739 = vmatprep.subr.bf16.mxu1 %v24625_v36  ;;  %v24703_v35 = vld [vmem:[#allocation7 + $0xaac] ss:$16 sps:$4 sm:$0xff]   ;;  %v20370_v36 = vcombine.high %v203_v30, %v219_v31 }
 0x590   :  { %16572 = vmatpush1.bf16.msra.mxu0 %v24620_v37  ;;  %17740 = vmatpush1.bf16.msra.mxu1 %v24623_v38  ;;  %v24698_v37 = vld [vmem:[#allocation7 + $0xaa0] ss:$16 sps:$4 sm:$0xff]   ;;  %v24701_v38 = vld [vmem:[#allocation7 + $0xaa8] ss:$16 sps:$4 sm:$0xff]  }
 0x591   :  { %16573 = vmatprep.subr.bf16.mxu0 %v24628_v39  ;;  %17741 = vmatprep.subr.bf16.mxu1 %v24631_v40  ;;  %v24706_v39 = vld [vmem:[#allocation7 + $0xac4] ss:$16 sps:$4 sm:$0xff]   ;;  %v24709_v40 = vld [vmem:[#allocation7 + $0xacc] ss:$16 sps:$4 sm:$0xff]  }
 0x594   :  { %16574 = vmatpush1.bf16.msra.mxu0 %v24626_v41  ;;  %17742 = vmatpush1.bf16.msra.mxu1 %v24629_v42  ;;  %v20369_v41 = vcombine.low %v203_v30, %v219_v31  ;;  %v26220_v42 = vld [vmem:[#allocation2 + $0x28] sm:$0xff]  ;;  %v24778_v31 = vld [vmem:[#allocation7 + $0xc44] ss:$16 sps:$4 sm:$0xff]  }
 0x595   :  { %16575 = vmatprep.subr.bf16.mxu0 %v24634_v43  ;;  %17743 = vmatprep.subr.bf16.mxu1 %v24637_v44  ;;  %v26222_v43 = vld [vmem:[#allocation2 + $0xa8] sm:$0xff]  ;;  %v24704_v44 = vld [vmem:[#allocation7 + $0xac0] ss:$16 sps:$4 sm:$0xff]  }
 0x596   :  { %v24773_v30 = vld [vmem:[#allocation7 + $0xc28] ss:$16 sps:$4 sm:$0xff]  }
 0x598   :  { %16576 = vmatpush1.bf16.msra.mxu0 %v24632_v45  ;;  %17744 = vmatpush1.bf16.msra.mxu1 %v24635_v46  ;;  %v24707_v45 = vld [vmem:[#allocation7 + $0xac8] ss:$16 sps:$4 sm:$0xff]   ;;  %v24712_v46 = vld [vmem:[#allocation7 + $0xae4] ss:$16 sps:$4 sm:$0xff]  }
 0x599   :  { %16577 = vmatprep.subr.bf16.mxu0 %v24640_v47  ;;  %17745 = vmatprep.subr.bf16.mxu1 %v24643_v48  ;;  %v24715_v47 = vld [vmem:[#allocation7 + $0xaec] ss:$16 sps:$4 sm:$0xff]   ;;  %v20276_v48 = vcombine.high %v26220_v42, %v26222_v43 }
 0x59c   :  { %16578 = vmatpush1.bf16.msra.mxu0 %v24638_v49  ;;  %17746 = vmatpush1.bf16.msra.mxu1 %v24641_v50  ;;  %v24710_v49 = vld [vmem:[#allocation7 + $0xae0] ss:$16 sps:$4 sm:$0xff]   ;;  %v24713_v50 = vld [vmem:[#allocation7 + $0xae8] ss:$16 sps:$4 sm:$0xff]  }
 0x59d   :  { %16579 = vmatprep.subr.bf16.mxu0 %v24646_v51  ;;  %17747 = vmatprep.subr.bf16.mxu1 %v24649_v52  ;;  %v24718_v51 = vld [vmem:[#allocation7 + $0xb04] ss:$16 sps:$4 sm:$0xff]   ;;  %v24721_v52 = vld [vmem:[#allocation7 + $0xb0c] ss:$16 sps:$4 sm:$0xff]  }
 0x5a0   :  { %16580 = vmatpush1.bf16.msra.mxu0 %v24644_v53  ;;  %17748 = vmatpush1.bf16.msra.mxu1 %v24647_v54  ;;  %v24716_v53 = vld [vmem:[#allocation7 + $0xb00] ss:$16 sps:$4 sm:$0xff]   ;;  %v24719_v54 = vld [vmem:[#allocation7 + $0xb08] ss:$16 sps:$4 sm:$0xff]  }
 0x5a1   :  { %16581 = vmatprep.subr.bf16.mxu0 %v24652_v55  ;;  %17749 = vmatprep.subr.bf16.mxu1 %v24655_v56  ;;  %v24724_v55 = vld [vmem:[#allocation7 + $0xb24] ss:$16 sps:$4 sm:$0xff]   ;;  %v24727_v56 = vld [vmem:[#allocation7 + $0xb2c] ss:$16 sps:$4 sm:$0xff]  }
 0x5a4   :  { %16582 = vmatpush1.bf16.msra.mxu0 %v24650_v57  ;;  %17750 = vmatpush1.bf16.msra.mxu1 %v24653_v58  ;;  %v24722_v57 = vld [vmem:[#allocation7 + $0xb20] ss:$16 sps:$4 sm:$0xff]   ;;  %v24725_v58 = vld [vmem:[#allocation7 + $0xb28] ss:$16 sps:$4 sm:$0xff]  }
 0x5a5   :  { %16583 = vmatprep.subr.bf16.mxu0 %v24658_v59  ;;  %17751 = vmatprep.subr.bf16.mxu1 %v24661_v60  ;;  %v24730_v59 = vld [vmem:[#allocation7 + $0xb44] ss:$16 sps:$4 sm:$0xff]   ;;  %v24733_v60 = vld [vmem:[#allocation7 + $0xb4c] ss:$16 sps:$4 sm:$0xff]  }
 0x5a8   :  { %16584 = vmatpush1.bf16.msra.mxu0 %v24656_v61  ;;  %17752 = vmatpush1.bf16.msra.mxu1 %v24659_v62  ;;  %v24728_v61 = vld [vmem:[#allocation7 + $0xb40] ss:$16 sps:$4 sm:$0xff]   ;;  %v24731_v62 = vld [vmem:[#allocation7 + $0xb48] ss:$16 sps:$4 sm:$0xff]  }
 0x5a9   :  { %16585 = vmatprep.subr.bf16.mxu0 %v24664_v63  ;;  %17753 = vmatprep.subr.bf16.mxu1 %v24667_v0  ;;  %v24736_v63 = vld [vmem:[#allocation7 + $0xb64] ss:$16 sps:$4 sm:$0xff]   ;;  %v24739_v0 = vld [vmem:[#allocation7 + $0xb6c] ss:$16 sps:$4 sm:$0xff]  }
 0x5ac   :  { %16586 = vmatpush1.bf16.msra.mxu0 %v24662_v1  ;;  %17754 = vmatpush1.bf16.msra.mxu1 %v24665_v2  ;;  %v24734_v1 = vld [vmem:[#allocation7 + $0xb60] ss:$16 sps:$4 sm:$0xff]   ;;  %v24737_v2 = vld [vmem:[#allocation7 + $0xb68] ss:$16 sps:$4 sm:$0xff]  }
 0x5ad   :  { %16628 = vmatprep.subr.bf16.mxu0 %v24670_v3  ;;  %17796 = vmatprep.subr.bf16.mxu1 %v24673_v4  ;;  %v24742_v3 = vld [vmem:[#allocation7 + $0xb84] ss:$16 sps:$4 sm:$0xff]   ;;  %v24745_v4 = vld [vmem:[#allocation7 + $0xb8c] ss:$16 sps:$4 sm:$0xff]  }
 0x5af   :  { %16588 = vmatmul.mubr.bf16.vlgmr.msra.gmra.mrb[0].mxu0 %v20273_v5  ;;  %17756 = vmatmul.mubr.bf16.vlgmr.msra.gmra.mrb[0].mxu1 %v20273_v5  ;;  %v24740_v5 = vld [vmem:[#allocation7 + $0xb80] ss:$16 sps:$4 sm:$0xff]  }
 0x5b0   :  { %16629 = vmatpush1.bf16.msra.mxu0 %v24668_v8  ;;  %17797 = vmatpush1.bf16.msra.mxu1 %v24671_v9  ;;  %v24751_v8 = vld [vmem:[#allocation7 + $0xbac] ss:$16 sps:$4 sm:$0xff]   ;;  %v24746_v9 = vld [vmem:[#allocation7 + $0xba0] ss:$16 sps:$4 sm:$0xff]  }
 0x5b1   :  { %16630 = vmatprep.subr.bf16.mxu0 %v24676_v10  ;;  %17798 = vmatprep.subr.bf16.mxu1 %v24679_v11  ;;  %v24749_v10 = vld [vmem:[#allocation7 + $0xba8] ss:$16 sps:$4 sm:$0xff]   ;;  %v24754_v11 = vld [vmem:[#allocation7 + $0xbc4] ss:$16 sps:$4 sm:$0xff]  }
 0x5b2   :  { %16597 = vmatprep.mubr.bf16.mxu0 %v20306_v12  ;;  %17765 = vmatprep.mubr.bf16.mxu1 %v20306_v12  ;;  %v24757_v12 = vld [vmem:[#allocation7 + $0xbcc] ss:$16 sps:$4 sm:$0xff]  }
 0x5b4   :  { %16631 = vmatpush1.bf16.msra.mxu0 %v24674_v13  ;;  %17799 = vmatpush1.bf16.msra.mxu1 %v24677_v14  ;;  %v24752_v13 = vld [vmem:[#allocation7 + $0xbc0] ss:$16 sps:$4 sm:$0xff]   ;;  %v24755_v14 = vld [vmem:[#allocation7 + $0xbc8] ss:$16 sps:$4 sm:$0xff]  }
 0x5b5   :  { %16632 = vmatprep.subr.bf16.mxu0 %v24682_v15  ;;  %17800 = vmatprep.subr.bf16.mxu1 %v24685_v16  ;;  %v24760_v15 = vld [vmem:[#allocation7 + $0xbe4] ss:$16 sps:$4 sm:$0xff]   ;;  %v24763_v16 = vld [vmem:[#allocation7 + $0xbec] ss:$16 sps:$4 sm:$0xff]  }
 0x5b7   :  { %16598 = vmatmul.mubr.bf16.gmra.mrb[4].mxu0 %v20305_v17  ;;  %17766 = vmatmul.mubr.bf16.gmra.mrb[4].mxu1 %v20305_v17  ;;  %v24758_v17 = vld [vmem:[#allocation7 + $0xbe0] ss:$16 sps:$4 sm:$0xff]  }
 0x5b8   :  { %16633 = vmatpush1.bf16.msra.mxu0 %v24680_v20  ;;  %17801 = vmatpush1.bf16.msra.mxu1 %v24683_v21  ;;  %v24769_v20 = vld [vmem:[#allocation7 + $0xc0c] ss:$16 sps:$4 sm:$0xff]   ;;  %v20275_v21 = vcombine.low %v26220_v42, %v26222_v43  ;;  %v24785_v42 = vld [vmem:[#allocation7 + $0xc68] ss:$16 sps:$4 sm:$0xff]   ;;  %v24790_v43 = vld [vmem:[#allocation7 + $0xc84] ss:$16 sps:$4 sm:$0xff]  }
 0x5b9   :  { %16634 = vmatprep.subr.bf16.mxu0 %v24688_v22  ;;  %17802 = vmatprep.subr.bf16.mxu1 %v24691_v23  ;;  %v140_v22 = vld [vmem:[#allocation2 + $0x128] sm:$0xff] }
 0x5ba   :  { %16607 = vmatprep.mubr.bf16.mxu0 %v20338_v24  ;;  %17775 = vmatprep.mubr.bf16.mxu1 %v20338_v24  ;;  %v156_v23 = vld [vmem:[#allocation2 + $0x1a8] sm:$0xff]  ;;  %v24764_v24 = vld [vmem:[#allocation7 + $0xc00] ss:$16 sps:$4 sm:$0xff]  }
 0x5bc   :  { %16635 = vmatpush1.bf16.msra.mxu0 %v24686_v25  ;;  %17803 = vmatpush1.bf16.msra.mxu1 %v24689_v26  ;;  %v24767_v25 = vld [vmem:[#allocation7 + $0xc08] ss:$16 sps:$4 sm:$0xff]   ;;  %v24772_v26 = vld [vmem:[#allocation7 + $0xc24] ss:$16 sps:$4 sm:$0xff]  }
 0x5bd   :  { %16636 = vmatprep.subr.bf16.mxu0 %v24694_v27  ;;  %17804 = vmatprep.subr.bf16.mxu1 %v24697_v28  ;;  %v24775_v27 = vld [vmem:[#allocation7 + $0xc2c] ss:$16 sps:$4 sm:$0xff]   ;;  %v20308_v28 = vcombine.high %v140_v22, %v156_v23 }
 0x5bf   :  { %16608 = vmatmul.mubr.bf16.gmra.mrb[8].mxu0 %v20337_v29  ;;  %17776 = vmatmul.mubr.bf16.gmra.mrb[8].mxu1 %v20337_v29  ;;  %v24770_v29 = vld [vmem:[#allocation7 + $0xc20] ss:$16 sps:$4 sm:$0xff]  }
 0x5c0   :  { %16637 = vmatpush1.bf16.msra.mxu0 %v24692_v32  ;;  %17805 = vmatpush1.bf16.msra.mxu1 %v24695_v33  ;;  %v24781_v32 = vld [vmem:[#allocation7 + $0xc4c] ss:$16 sps:$4 sm:$0xff]   ;;  %v20307_v33 = vcombine.low %v140_v22, %v156_v23  ;;  %v24839_v22 = vld [vmem:[#allocation7 + $0xd88] ss:$16 sps:$4 sm:$0xff]   ;;  %v24844_v23 = vld [vmem:[#allocation7 + $0xda4] ss:$16 sps:$4 sm:$0xff]  }
 0x5c1   :  { %16638 = vmatprep.subr.bf16.mxu0 %v24700_v34  ;;  %17806 = vmatprep.subr.bf16.mxu1 %v24703_v35  ;;  %v172_v34 = vld [vmem:[#allocation2 + $0x228] sm:$0xff] }
 0x5c2   :  { %16617 = vmatprep.mubr.bf16.mxu0 %v20370_v36  ;;  %17785 = vmatprep.mubr.bf16.mxu1 %v20370_v36  ;;  %v188_v35 = vld [vmem:[#allocation2 + $0x2a8] sm:$0xff]  ;;  %v24776_v36 = vld [vmem:[#allocation7 + $0xc40] ss:$16 sps:$4 sm:$0xff]  }
 0x5c4   :  { %16639 = vmatpush1.bf16.msra.mxu0 %v24698_v37  ;;  %17807 = vmatpush1.bf16.msra.mxu1 %v24701_v38  ;;  %v24779_v37 = vld [vmem:[#allocation7 + $0xc48] ss:$16 sps:$4 sm:$0xff]   ;;  %v24784_v38 = vld [vmem:[#allocation7 + $0xc64] ss:$16 sps:$4 sm:$0xff]  }
 0x5c5   :  { %16640 = vmatprep.subr.bf16.mxu0 %v24706_v39  ;;  %17808 = vmatprep.subr.bf16.mxu1 %v24709_v40  ;;  %v24787_v39 = vld [vmem:[#allocation7 + $0xc6c] ss:$16 sps:$4 sm:$0xff]   ;;  %v20340_v40 = vcombine.high %v172_v34, %v188_v35 }
 0x5c7   :  { %16618 = vmatmul.mubr.bf16.gmra.mrb[12].mxu0 %v20369_v41  ;;  %17786 = vmatmul.mubr.bf16.gmra.mrb[12].mxu1 %v20369_v41  ;;  %v24782_v41 = vld [vmem:[#allocation7 + $0xc60] ss:$16 sps:$4 sm:$0xff]  }
 0x5c8   :  { %16641 = vmatpush1.bf16.msra.mxu0 %v24704_v44  ;;  %17809 = vmatpush1.bf16.msra.mxu1 %v24707_v45  ;;  %v24793_v44 = vld [vmem:[#allocation7 + $0xc8c] ss:$16 sps:$4 sm:$0xff]   ;;  %v20339_v45 = vcombine.low %v172_v34, %v188_v35  ;;  %v24857_v34 = vld [vmem:[#allocation7 + $0xde8] ss:$16 sps:$4 sm:$0xff]   ;;  %v24862_v35 = vld [vmem:[#allocation7 + $0xe04] ss:$16 sps:$4 sm:$0xff]  }
 0x5c9   :  { %16642 = vmatprep.subr.bf16.mxu0 %v24712_v46  ;;  %17810 = vmatprep.subr.bf16.mxu1 %v24715_v47  ;;  %v204_v46 = vld [vmem:[#allocation2 + $0x328] sm:$0xff] }
 0x5ca   :  { %16660 = vmatprep.mubr.bf16.mxu0 %v20276_v48  ;;  %17828 = vmatprep.mubr.bf16.mxu1 %v20276_v48  ;;  %v220_v47 = vld [vmem:[#allocation2 + $0x3a8] sm:$0x33]  ;;  %v24788_v48 = vld [vmem:[#allocation7 + $0xc80] ss:$16 sps:$4 sm:$0xff]  }
 0x5cc   :  { %16643 = vmatpush1.bf16.msra.mxu0 %v24710_v49  ;;  %17811 = vmatpush1.bf16.msra.mxu1 %v24713_v50  ;;  %v24791_v49 = vld [vmem:[#allocation7 + $0xc88] ss:$16 sps:$4 sm:$0xff]   ;;  %v24796_v50 = vld [vmem:[#allocation7 + $0xca4] ss:$16 sps:$4 sm:$0xff]  }
 0x5cd   :  { %16644 = vmatprep.subr.bf16.mxu0 %v24718_v51  ;;  %17812 = vmatprep.subr.bf16.mxu1 %v24721_v52  ;;  %v24799_v51 = vld [vmem:[#allocation7 + $0xcac] ss:$16 sps:$4 sm:$0xff]   ;;  %v20372_v52 = vcombine.high %v204_v46, %v220_v47 }
 0x5d0   :  { %16645 = vmatpush1.bf16.msra.mxu0 %v24716_v53  ;;  %17813 = vmatpush1.bf16.msra.mxu1 %v24719_v54  ;;  %v24794_v53 = vld [vmem:[#allocation7 + $0xca0] ss:$16 sps:$4 sm:$0xff]   ;;  %v24797_v54 = vld [vmem:[#allocation7 + $0xca8] ss:$16 sps:$4 sm:$0xff]  }
 0x5d1   :  { %16646 = vmatprep.subr.bf16.mxu0 %v24724_v55  ;;  %17814 = vmatprep.subr.bf16.mxu1 %v24727_v56  ;;  %v24802_v55 = vld [vmem:[#allocation7 + $0xcc4] ss:$16 sps:$4 sm:$0xff]   ;;  %v24805_v56 = vld [vmem:[#allocation7 + $0xccc] ss:$16 sps:$4 sm:$0xff]  }
 0x5d4   :  { %16647 = vmatpush1.bf16.msra.mxu0 %v24722_v57  ;;  %17815 = vmatpush1.bf16.msra.mxu1 %v24725_v58  ;;  %v20371_v57 = vcombine.low %v204_v46, %v220_v47  ;;  %v26228_v58 = vld [vmem:[#allocation2 + $0x30] sm:$0xff]  ;;  %v24869_v46 = vld [vmem:[#allocation7 + $0xe28] ss:$16 sps:$4 sm:$0xff]  }
 0x5d5   :  { %16648 = vmatprep.subr.bf16.mxu0 %v24730_v59  ;;  %17816 = vmatprep.subr.bf16.mxu1 %v24733_v60  ;;  %v26230_v59 = vld [vmem:[#allocation2 + $0xb0] sm:$0xff] }
 0x5d6   :  { %v24800_v60 = vld [vmem:[#allocation7 + $0xcc0] ss:$16 sps:$4 sm:$0xff]   ;;  %v24874_v47 = vld [vmem:[#allocation7 + $0xe44] ss:$16 sps:$4 sm:$0xff]  }
 0x5d8   :  { %16649 = vmatpush1.bf16.msra.mxu0 %v24728_v61  ;;  %17817 = vmatpush1.bf16.msra.mxu1 %v24731_v62  ;;  %v24803_v61 = vld [vmem:[#allocation7 + $0xcc8] ss:$16 sps:$4 sm:$0xff]   ;;  %v24808_v62 = vld [vmem:[#allocation7 + $0xce4] ss:$16 sps:$4 sm:$0xff]  }
 0x5d9   :  { %16650 = vmatprep.subr.bf16.mxu0 %v24736_v63  ;;  %17818 = vmatprep.subr.bf16.mxu1 %v24739_v0  ;;  %v24811_v63 = vld [vmem:[#allocation7 + $0xcec] ss:$16 sps:$4 sm:$0xff]   ;;  %v20278_v0 = vcombine.high %v26228_v58, %v26230_v59 }
 0x5dc   :  { %16651 = vmatpush1.bf16.msra.mxu0 %v24734_v1  ;;  %17819 = vmatpush1.bf16.msra.mxu1 %v24737_v2  ;;  %v24806_v1 = vld [vmem:[#allocation7 + $0xce0] ss:$16 sps:$4 sm:$0xff]   ;;  %v24809_v2 = vld [vmem:[#allocation7 + $0xce8] ss:$16 sps:$4 sm:$0xff]  }
 0x5dd   :  { %16652 = vmatprep.subr.bf16.mxu0 %v24742_v3  ;;  %17820 = vmatprep.subr.bf16.mxu1 %v24745_v4  ;;  %v24814_v3 = vld [vmem:[#allocation7 + $0xd04] ss:$16 sps:$4 sm:$0xff]   ;;  %v24817_v4 = vld [vmem:[#allocation7 + $0xd0c] ss:$16 sps:$4 sm:$0xff]  }
 0x5e0   :  { %16653 = vmatpush1.bf16.msra.mxu0 %v24740_v5  ;;  %17821 = vmatpush1.bf16.msra.mxu1 %v24743_v6  ;;  %v24812_v5 = vld [vmem:[#allocation7 + $0xd00] ss:$16 sps:$4 sm:$0xff]   ;;  %v24815_v6 = vld [vmem:[#allocation7 + $0xd08] ss:$16 sps:$4 sm:$0xff]  }
 0x5e1   :  { %16654 = vmatprep.subr.bf16.mxu0 %v24748_v7  ;;  %17822 = vmatprep.subr.bf16.mxu1 %v24751_v8  ;;  %v24820_v7 = vld [vmem:[#allocation7 + $0xd24] ss:$16 sps:$4 sm:$0xff]   ;;  %v24823_v8 = vld [vmem:[#allocation7 + $0xd2c] ss:$16 sps:$4 sm:$0xff]  }
 0x5e4   :  { %16655 = vmatpush1.bf16.msra.mxu0 %v24746_v9  ;;  %17823 = vmatpush1.bf16.msra.mxu1 %v24749_v10  ;;  %v24818_v9 = vld [vmem:[#allocation7 + $0xd20] ss:$16 sps:$4 sm:$0xff]   ;;  %v24821_v10 = vld [vmem:[#allocation7 + $0xd28] ss:$16 sps:$4 sm:$0xff]  }
 0x5e5   :  { %16656 = vmatprep.subr.bf16.mxu0 %v24754_v11  ;;  %17824 = vmatprep.subr.bf16.mxu1 %v24757_v12  ;;  %v24826_v11 = vld [vmem:[#allocation7 + $0xd44] ss:$16 sps:$4 sm:$0xff]   ;;  %v24829_v12 = vld [vmem:[#allocation7 + $0xd4c] ss:$16 sps:$4 sm:$0xff]  }
 0x5e8   :  { %16657 = vmatpush1.bf16.msra.mxu0 %v24752_v13  ;;  %17825 = vmatpush1.bf16.msra.mxu1 %v24755_v14  ;;  %v24824_v13 = vld [vmem:[#allocation7 + $0xd40] ss:$16 sps:$4 sm:$0xff]   ;;  %v24827_v14 = vld [vmem:[#allocation7 + $0xd48] ss:$16 sps:$4 sm:$0xff]  }
 0x5e9   :  { %16658 = vmatprep.subr.bf16.mxu0 %v24760_v15  ;;  %17826 = vmatprep.subr.bf16.mxu1 %v24763_v16  ;;  %v24832_v15 = vld [vmem:[#allocation7 + $0xd64] ss:$16 sps:$4 sm:$0xff]   ;;  %v24835_v16 = vld [vmem:[#allocation7 + $0xd6c] ss:$16 sps:$4 sm:$0xff]  }
 0x5ec   :  { %16659 = vmatpush1.bf16.msra.mxu0 %v24758_v17  ;;  %17827 = vmatpush1.bf16.msra.mxu1 %v24761_v18  ;;  %v24830_v17 = vld [vmem:[#allocation7 + $0xd60] ss:$16 sps:$4 sm:$0xff]   ;;  %v24833_v18 = vld [vmem:[#allocation7 + $0xd68] ss:$16 sps:$4 sm:$0xff]  }
 0x5ed   :  { %16701 = vmatprep.subr.bf16.mxu0 %v24766_v19  ;;  %17869 = vmatprep.subr.bf16.mxu1 %v24769_v20  ;;  %v24838_v19 = vld [vmem:[#allocation7 + $0xd84] ss:$16 sps:$4 sm:$0xff]   ;;  %v24841_v20 = vld [vmem:[#allocation7 + $0xd8c] ss:$16 sps:$4 sm:$0xff]  }
 0x5ef   :  { %16661 = vmatmul.mubr.bf16.vlgmr.msra.gmra.mrb[0].mxu0 %v20275_v21  ;;  %17829 = vmatmul.mubr.bf16.vlgmr.msra.gmra.mrb[0].mxu1 %v20275_v21  ;;  %v24836_v21 = vld [vmem:[#allocation7 + $0xd80] ss:$16 sps:$4 sm:$0xff]  }
 0x5f0   :  { %16702 = vmatpush1.bf16.msra.mxu0 %v24764_v24  ;;  %17870 = vmatpush1.bf16.msra.mxu1 %v24767_v25  ;;  %v24847_v24 = vld [vmem:[#allocation7 + $0xdac] ss:$16 sps:$4 sm:$0xff]   ;;  %v24842_v25 = vld [vmem:[#allocation7 + $0xda0] ss:$16 sps:$4 sm:$0xff]  }
 0x5f1   :  { %16703 = vmatprep.subr.bf16.mxu0 %v24772_v26  ;;  %17871 = vmatprep.subr.bf16.mxu1 %v24775_v27  ;;  %v24845_v26 = vld [vmem:[#allocation7 + $0xda8] ss:$16 sps:$4 sm:$0xff]   ;;  %v24850_v27 = vld [vmem:[#allocation7 + $0xdc4] ss:$16 sps:$4 sm:$0xff]  }
 0x5f2   :  { %16670 = vmatprep.mubr.bf16.mxu0 %v20308_v28  ;;  %17838 = vmatprep.mubr.bf16.mxu1 %v20308_v28  ;;  %v24853_v28 = vld [vmem:[#allocation7 + $0xdcc] ss:$16 sps:$4 sm:$0xff]  }
 0x5f4   :  { %16704 = vmatpush1.bf16.msra.mxu0 %v24770_v29  ;;  %17872 = vmatpush1.bf16.msra.mxu1 %v24773_v30  ;;  %v24848_v29 = vld [vmem:[#allocation7 + $0xdc0] ss:$16 sps:$4 sm:$0xff]   ;;  %v24851_v30 = vld [vmem:[#allocation7 + $0xdc8] ss:$16 sps:$4 sm:$0xff]  }
 0x5f5   :  { %16705 = vmatprep.subr.bf16.mxu0 %v24778_v31  ;;  %17873 = vmatprep.subr.bf16.mxu1 %v24781_v32  ;;  %v24856_v31 = vld [vmem:[#allocation7 + $0xde4] ss:$16 sps:$4 sm:$0xff]   ;;  %v24859_v32 = vld [vmem:[#allocation7 + $0xdec] ss:$16 sps:$4 sm:$0xff]  }
 0x5f7   :  { %16671 = vmatmul.mubr.bf16.gmra.mrb[4].mxu0 %v20307_v33  ;;  %17839 = vmatmul.mubr.bf16.gmra.mrb[4].mxu1 %v20307_v33  ;;  %v24854_v33 = vld [vmem:[#allocation7 + $0xde0] ss:$16 sps:$4 sm:$0xff]  }
 0x5f8   :  { %16706 = vmatpush1.bf16.msra.mxu0 %v24776_v36  ;;  %17874 = vmatpush1.bf16.msra.mxu1 %v24779_v37  ;;  %v24865_v36 = vld [vmem:[#allocation7 + $0xe0c] ss:$16 sps:$4 sm:$0xff]   ;;  %v20277_v37 = vcombine.low %v26228_v58, %v26230_v59  ;;  %v24881_v58 = vld [vmem:[#allocation7 + $0xe68] ss:$16 sps:$4 sm:$0xff]   ;;  %v24886_v59 = vld [vmem:[#allocation7 + $0xe84] ss:$16 sps:$4 sm:$0xff]  }
 0x5f9   :  { %16707 = vmatprep.subr.bf16.mxu0 %v24784_v38  ;;  %17875 = vmatprep.subr.bf16.mxu1 %v24787_v39  ;;  %v141_v38 = vld [vmem:[#allocation2 + $0x130] sm:$0xff] }
 0x5fa   :  { %16680 = vmatprep.mubr.bf16.mxu0 %v20340_v40  ;;  %17848 = vmatprep.mubr.bf16.mxu1 %v20340_v40  ;;  %v157_v39 = vld [vmem:[#allocation2 + $0x1b0] sm:$0xff] }
 0x5fb   :  { %v24860_v40 = vld [vmem:[#allocation7 + $0xe00] ss:$16 sps:$4 sm:$0xff]  }
 0x5fc   :  { %16708 = vmatpush1.bf16.msra.mxu0 %v24782_v41  ;;  %17876 = vmatpush1.bf16.msra.mxu1 %v24785_v42  ;;  %v24863_v41 = vld [vmem:[#allocation7 + $0xe08] ss:$16 sps:$4 sm:$0xff]   ;;  %v24868_v42 = vld [vmem:[#allocation7 + $0xe24] ss:$16 sps:$4 sm:$0xff]  }
 0x5fd   :  { %16709 = vmatprep.subr.bf16.mxu0 %v24790_v43  ;;  %17877 = vmatprep.subr.bf16.mxu1 %v24793_v44  ;;  %v24871_v43 = vld [vmem:[#allocation7 + $0xe2c] ss:$16 sps:$4 sm:$0xff]   ;;  %v20310_v44 = vcombine.high %v141_v38, %v157_v39 }
 0x5ff   :  { %16681 = vmatmul.mubr.bf16.gmra.mrb[8].mxu0 %v20339_v45  ;;  %17849 = vmatmul.mubr.bf16.gmra.mrb[8].mxu1 %v20339_v45  ;;  %v24866_v45 = vld [vmem:[#allocation7 + $0xe20] ss:$16 sps:$4 sm:$0xff]  }
 0x600   :  { %16710 = vmatpush1.bf16.msra.mxu0 %v24788_v48  ;;  %17878 = vmatpush1.bf16.msra.mxu1 %v24791_v49  ;;  %v24877_v48 = vld [vmem:[#allocation7 + $0xe4c] ss:$16 sps:$4 sm:$0xff]   ;;  %v20309_v49 = vcombine.low %v141_v38, %v157_v39  ;;  %v24935_v38 = vld [vmem:[#allocation7 + $0xf88] ss:$16 sps:$4 sm:$0xff]   ;;  %v24940_v39 = vld [vmem:[#allocation7 + $0xfa4] ss:$16 sps:$4 sm:$0xff]  }
 0x601   :  { %16711 = vmatprep.subr.bf16.mxu0 %v24796_v50  ;;  %17879 = vmatprep.subr.bf16.mxu1 %v24799_v51  ;;  %v173_v50 = vld [vmem:[#allocation2 + $0x230] sm:$0xff] }
 0x602   :  { %16690 = vmatprep.mubr.bf16.mxu0 %v20372_v52  ;;  %17858 = vmatprep.mubr.bf16.mxu1 %v20372_v52  ;;  %v189_v51 = vld [vmem:[#allocation2 + $0x2b0] sm:$0xff] }
 0x603   :  { %v24872_v52 = vld [vmem:[#allocation7 + $0xe40] ss:$16 sps:$4 sm:$0xff]  }
 0x604   :  { %16712 = vmatpush1.bf16.msra.mxu0 %v24794_v53  ;;  %17880 = vmatpush1.bf16.msra.mxu1 %v24797_v54  ;;  %v24875_v53 = vld [vmem:[#allocation7 + $0xe48] ss:$16 sps:$4 sm:$0xff]   ;;  %v24880_v54 = vld [vmem:[#allocation7 + $0xe64] ss:$16 sps:$4 sm:$0xff]  }
 0x605   :  { %16713 = vmatprep.subr.bf16.mxu0 %v24802_v55  ;;  %17881 = vmatprep.subr.bf16.mxu1 %v24805_v56  ;;  %v24883_v55 = vld [vmem:[#allocation7 + $0xe6c] ss:$16 sps:$4 sm:$0xff]   ;;  %v20342_v56 = vcombine.high %v173_v50, %v189_v51 }
 0x607   :  { %16691 = vmatmul.mubr.bf16.gmra.mrb[12].mxu0 %v20371_v57  ;;  %17859 = vmatmul.mubr.bf16.gmra.mrb[12].mxu1 %v20371_v57  ;;  %v24878_v57 = vld [vmem:[#allocation7 + $0xe60] ss:$16 sps:$4 sm:$0xff]  }
 0x608   :  { %16714 = vmatpush1.bf16.msra.mxu0 %v24800_v60  ;;  %17882 = vmatpush1.bf16.msra.mxu1 %v24803_v61  ;;  %v24889_v60 = vld [vmem:[#allocation7 + $0xe8c] ss:$16 sps:$4 sm:$0xff]   ;;  %v20341_v61 = vcombine.low %v173_v50, %v189_v51  ;;  %v24953_v50 = vld [vmem:[#allocation7 + $0xfe8] ss:$16 sps:$4 sm:$0xff]   ;;  %v24958_v51 = vld [vmem:[#allocation7 + $0x1004] ss:$16 sps:$4 sm:$0xff]  }
 0x609   :  { %16715 = vmatprep.subr.bf16.mxu0 %v24808_v62  ;;  %17883 = vmatprep.subr.bf16.mxu1 %v24811_v63  ;;  %v205_v62 = vld [vmem:[#allocation2 + $0x330] sm:$0xff] }
 0x60a   :  { %16733 = vmatprep.mubr.bf16.mxu0 %v20278_v0  ;;  %17901 = vmatprep.mubr.bf16.mxu1 %v20278_v0  ;;  %v221_v63 = vld [vmem:[#allocation2 + $0x3b0] sm:$0x33] }
 0x60b   :  { %v24884_v0 = vld [vmem:[#allocation7 + $0xe80] ss:$16 sps:$4 sm:$0xff]  }
 0x60c   :  { %16716 = vmatpush1.bf16.msra.mxu0 %v24806_v1  ;;  %17884 = vmatpush1.bf16.msra.mxu1 %v24809_v2  ;;  %v24887_v1 = vld [vmem:[#allocation7 + $0xe88] ss:$16 sps:$4 sm:$0xff]   ;;  %v24892_v2 = vld [vmem:[#allocation7 + $0xea4] ss:$16 sps:$4 sm:$0xff]  }
 0x60d   :  { %16717 = vmatprep.subr.bf16.mxu0 %v24814_v3  ;;  %17885 = vmatprep.subr.bf16.mxu1 %v24817_v4  ;;  %v24895_v3 = vld [vmem:[#allocation7 + $0xeac] ss:$16 sps:$4 sm:$0xff]   ;;  %v20374_v4 = vcombine.high %v205_v62, %v221_v63 }
 0x610   :  { %16718 = vmatpush1.bf16.msra.mxu0 %v24812_v5  ;;  %17886 = vmatpush1.bf16.msra.mxu1 %v24815_v6  ;;  %v24890_v5 = vld [vmem:[#allocation7 + $0xea0] ss:$16 sps:$4 sm:$0xff]   ;;  %v24893_v6 = vld [vmem:[#allocation7 + $0xea8] ss:$16 sps:$4 sm:$0xff]  }
 0x611   :  { %16719 = vmatprep.subr.bf16.mxu0 %v24820_v7  ;;  %17887 = vmatprep.subr.bf16.mxu1 %v24823_v8  ;;  %v24898_v7 = vld [vmem:[#allocation7 + $0xec4] ss:$16 sps:$4 sm:$0xff]   ;;  %v24901_v8 = vld [vmem:[#allocation7 + $0xecc] ss:$16 sps:$4 sm:$0xff]  }
 0x614   :  { %16720 = vmatpush1.bf16.msra.mxu0 %v24818_v9  ;;  %17888 = vmatpush1.bf16.msra.mxu1 %v24821_v10  ;;  %v20373_v9 = vcombine.low %v205_v62, %v221_v63  ;;  %v26236_v10 = vld [vmem:[#allocation2 + $0x38] sm:$0xff]  ;;  %v24970_v63 = vld [vmem:[#allocation7 + $0x1044] ss:$16 sps:$4 sm:$0xff]  }
 0x615   :  { %16721 = vmatprep.subr.bf16.mxu0 %v24826_v11  ;;  %17889 = vmatprep.subr.bf16.mxu1 %v24829_v12  ;;  %v26238_v11 = vld [vmem:[#allocation2 + $0xb8] sm:$0xff]  ;;  %v24896_v12 = vld [vmem:[#allocation7 + $0xec0] ss:$16 sps:$4 sm:$0xff]  }
 0x616   :  { %v24965_v62 = vld [vmem:[#allocation7 + $0x1028] ss:$16 sps:$4 sm:$0xff]  }
 0x618   :  { %16722 = vmatpush1.bf16.msra.mxu0 %v24824_v13  ;;  %17890 = vmatpush1.bf16.msra.mxu1 %v24827_v14  ;;  %v24899_v13 = vld [vmem:[#allocation7 + $0xec8] ss:$16 sps:$4 sm:$0xff]   ;;  %v24904_v14 = vld [vmem:[#allocation7 + $0xee4] ss:$16 sps:$4 sm:$0xff]  }
 0x619   :  { %16723 = vmatprep.subr.bf16.mxu0 %v24832_v15  ;;  %17891 = vmatprep.subr.bf16.mxu1 %v24835_v16  ;;  %v24907_v15 = vld [vmem:[#allocation7 + $0xeec] ss:$16 sps:$4 sm:$0xff]   ;;  %v20280_v16 = vcombine.high %v26236_v10, %v26238_v11 }
 0x61c   :  { %16724 = vmatpush1.bf16.msra.mxu0 %v24830_v17  ;;  %17892 = vmatpush1.bf16.msra.mxu1 %v24833_v18  ;;  %v24902_v17 = vld [vmem:[#allocation7 + $0xee0] ss:$16 sps:$4 sm:$0xff]   ;;  %v24905_v18 = vld [vmem:[#allocation7 + $0xee8] ss:$16 sps:$4 sm:$0xff]  }
 0x61d   :  { %16725 = vmatprep.subr.bf16.mxu0 %v24838_v19  ;;  %17893 = vmatprep.subr.bf16.mxu1 %v24841_v20  ;;  %v24910_v19 = vld [vmem:[#allocation7 + $0xf04] ss:$16 sps:$4 sm:$0xff]   ;;  %v24913_v20 = vld [vmem:[#allocation7 + $0xf0c] ss:$16 sps:$4 sm:$0xff]  }
 0x620   :  { %16726 = vmatpush1.bf16.msra.mxu0 %v24836_v21  ;;  %17894 = vmatpush1.bf16.msra.mxu1 %v24839_v22  ;;  %v24908_v21 = vld [vmem:[#allocation7 + $0xf00] ss:$16 sps:$4 sm:$0xff]   ;;  %v24911_v22 = vld [vmem:[#allocation7 + $0xf08] ss:$16 sps:$4 sm:$0xff]  }
 0x621   :  { %16727 = vmatprep.subr.bf16.mxu0 %v24844_v23  ;;  %17895 = vmatprep.subr.bf16.mxu1 %v24847_v24  ;;  %v24916_v23 = vld [vmem:[#allocation7 + $0xf24] ss:$16 sps:$4 sm:$0xff]   ;;  %v24919_v24 = vld [vmem:[#allocation7 + $0xf2c] ss:$16 sps:$4 sm:$0xff]  }
 0x624   :  { %16728 = vmatpush1.bf16.msra.mxu0 %v24842_v25  ;;  %17896 = vmatpush1.bf16.msra.mxu1 %v24845_v26  ;;  %v24914_v25 = vld [vmem:[#allocation7 + $0xf20] ss:$16 sps:$4 sm:$0xff]   ;;  %v24917_v26 = vld [vmem:[#allocation7 + $0xf28] ss:$16 sps:$4 sm:$0xff]  }
 0x625   :  { %16729 = vmatprep.subr.bf16.mxu0 %v24850_v27  ;;  %17897 = vmatprep.subr.bf16.mxu1 %v24853_v28  ;;  %v24922_v27 = vld [vmem:[#allocation7 + $0xf44] ss:$16 sps:$4 sm:$0xff]   ;;  %v24925_v28 = vld [vmem:[#allocation7 + $0xf4c] ss:$16 sps:$4 sm:$0xff]  }
 0x628   :  { %16730 = vmatpush1.bf16.msra.mxu0 %v24848_v29  ;;  %17898 = vmatpush1.bf16.msra.mxu1 %v24851_v30  ;;  %v24920_v29 = vld [vmem:[#allocation7 + $0xf40] ss:$16 sps:$4 sm:$0xff]   ;;  %v24923_v30 = vld [vmem:[#allocation7 + $0xf48] ss:$16 sps:$4 sm:$0xff]  }
 0x629   :  { %16731 = vmatprep.subr.bf16.mxu0 %v24856_v31  ;;  %17899 = vmatprep.subr.bf16.mxu1 %v24859_v32  ;;  %v24928_v31 = vld [vmem:[#allocation7 + $0xf64] ss:$16 sps:$4 sm:$0xff]   ;;  %v24931_v32 = vld [vmem:[#allocation7 + $0xf6c] ss:$16 sps:$4 sm:$0xff]  }
 0x62c   :  { %16732 = vmatpush1.bf16.msra.mxu0 %v24854_v33  ;;  %17900 = vmatpush1.bf16.msra.mxu1 %v24857_v34  ;;  %v24926_v33 = vld [vmem:[#allocation7 + $0xf60] ss:$16 sps:$4 sm:$0xff]   ;;  %v24929_v34 = vld [vmem:[#allocation7 + $0xf68] ss:$16 sps:$4 sm:$0xff]  }
 0x62d   :  { %16774 = vmatprep.subr.bf16.mxu0 %v24862_v35  ;;  %17942 = vmatprep.subr.bf16.mxu1 %v24865_v36  ;;  %v24934_v35 = vld [vmem:[#allocation7 + $0xf84] ss:$16 sps:$4 sm:$0xff]   ;;  %v24937_v36 = vld [vmem:[#allocation7 + $0xf8c] ss:$16 sps:$4 sm:$0xff]  }
 0x62f   :  { %16734 = vmatmul.mubr.bf16.vlgmr.msra.gmra.mrb[0].mxu0 %v20277_v37  ;;  %17902 = vmatmul.mubr.bf16.vlgmr.msra.gmra.mrb[0].mxu1 %v20277_v37  ;;  %v24932_v37 = vld [vmem:[#allocation7 + $0xf80] ss:$16 sps:$4 sm:$0xff]  }
 0x630   :  { %16775 = vmatpush1.bf16.msra.mxu0 %v24860_v40  ;;  %17943 = vmatpush1.bf16.msra.mxu1 %v24863_v41  ;;  %v24943_v40 = vld [vmem:[#allocation7 + $0xfac] ss:$16 sps:$4 sm:$0xff]   ;;  %v24938_v41 = vld [vmem:[#allocation7 + $0xfa0] ss:$16 sps:$4 sm:$0xff]  }
 0x631   :  { %16776 = vmatprep.subr.bf16.mxu0 %v24868_v42  ;;  %17944 = vmatprep.subr.bf16.mxu1 %v24871_v43  ;;  %v24941_v42 = vld [vmem:[#allocation7 + $0xfa8] ss:$16 sps:$4 sm:$0xff]   ;;  %v24946_v43 = vld [vmem:[#allocation7 + $0xfc4] ss:$16 sps:$4 sm:$0xff]  }
 0x632   :  { %16743 = vmatprep.mubr.bf16.mxu0 %v20310_v44  ;;  %17911 = vmatprep.mubr.bf16.mxu1 %v20310_v44  ;;  %v24949_v44 = vld [vmem:[#allocation7 + $0xfcc] ss:$16 sps:$4 sm:$0xff]  }
 0x634   :  { %16777 = vmatpush1.bf16.msra.mxu0 %v24866_v45  ;;  %17945 = vmatpush1.bf16.msra.mxu1 %v24869_v46  ;;  %v24944_v45 = vld [vmem:[#allocation7 + $0xfc0] ss:$16 sps:$4 sm:$0xff]   ;;  %v24947_v46 = vld [vmem:[#allocation7 + $0xfc8] ss:$16 sps:$4 sm:$0xff]  }
 0x635   :  { %16778 = vmatprep.subr.bf16.mxu0 %v24874_v47  ;;  %17946 = vmatprep.subr.bf16.mxu1 %v24877_v48  ;;  %v24952_v47 = vld [vmem:[#allocation7 + $0xfe4] ss:$16 sps:$4 sm:$0xff]   ;;  %v24955_v48 = vld [vmem:[#allocation7 + $0xfec] ss:$16 sps:$4 sm:$0xff]  }
 0x637   :  { %16744 = vmatmul.mubr.bf16.gmra.mrb[4].mxu0 %v20309_v49  ;;  %17912 = vmatmul.mubr.bf16.gmra.mrb[4].mxu1 %v20309_v49  ;;  %v24950_v49 = vld [vmem:[#allocation7 + $0xfe0] ss:$16 sps:$4 sm:$0xff]  }
 0x638   :  { %16779 = vmatpush1.bf16.msra.mxu0 %v24872_v52  ;;  %17947 = vmatpush1.bf16.msra.mxu1 %v24875_v53  ;;  %v24961_v52 = vld [vmem:[#allocation7 + $0x100c] ss:$16 sps:$4 sm:$0xff]   ;;  %v20279_v53 = vcombine.low %v26236_v10, %v26238_v11  ;;  %v24977_v10 = vld [vmem:[#allocation7 + $0x1068] ss:$16 sps:$4 sm:$0xff]   ;;  %v24982_v11 = vld [vmem:[#allocation7 + $0x1084] ss:$16 sps:$4 sm:$0xff]  }
 0x639   :  { %16780 = vmatprep.subr.bf16.mxu0 %v24880_v54  ;;  %17948 = vmatprep.subr.bf16.mxu1 %v24883_v55  ;;  %v142_v54 = vld [vmem:[#allocation2 + $0x138] sm:$0xff] }
 0x63a   :  { %16753 = vmatprep.mubr.bf16.mxu0 %v20342_v56  ;;  %17921 = vmatprep.mubr.bf16.mxu1 %v20342_v56  ;;  %v158_v55 = vld [vmem:[#allocation2 + $0x1b8] sm:$0xff]  ;;  %v24956_v56 = vld [vmem:[#allocation7 + $0x1000] ss:$16 sps:$4 sm:$0xff]  }
 0x63c   :  { %16781 = vmatpush1.bf16.msra.mxu0 %v24878_v57  ;;  %17949 = vmatpush1.bf16.msra.mxu1 %v24881_v58  ;;  %v24959_v57 = vld [vmem:[#allocation7 + $0x1008] ss:$16 sps:$4 sm:$0xff]   ;;  %v24964_v58 = vld [vmem:[#allocation7 + $0x1024] ss:$16 sps:$4 sm:$0xff]  }
 0x63d   :  { %16782 = vmatprep.subr.bf16.mxu0 %v24886_v59  ;;  %17950 = vmatprep.subr.bf16.mxu1 %v24889_v60  ;;  %v24967_v59 = vld [vmem:[#allocation7 + $0x102c] ss:$16 sps:$4 sm:$0xff]   ;;  %v20312_v60 = vcombine.high %v142_v54, %v158_v55 }
 0x63f   :  { %16754 = vmatmul.mubr.bf16.gmra.mrb[8].mxu0 %v20341_v61  ;;  %17922 = vmatmul.mubr.bf16.gmra.mrb[8].mxu1 %v20341_v61  ;;  %v24962_v61 = vld [vmem:[#allocation7 + $0x1020] ss:$16 sps:$4 sm:$0xff]  }
 0x640   :  { %16783 = vmatpush1.bf16.msra.mxu0 %v24884_v0  ;;  %17951 = vmatpush1.bf16.msra.mxu1 %v24887_v1  ;;  %v24973_v0 = vld [vmem:[#allocation7 + $0x104c] ss:$16 sps:$4 sm:$0xff]   ;;  %v20311_v1 = vcombine.low %v142_v54, %v158_v55  ;;  %v25031_v54 = vld [vmem:[#allocation7 + $0x1188] ss:$16 sps:$4 sm:$0xff]   ;;  %v25036_v55 = vld [vmem:[#allocation7 + $0x11a4] ss:$16 sps:$4 sm:$0xff]  }
 0x641   :  { %16784 = vmatprep.subr.bf16.mxu0 %v24892_v2  ;;  %17952 = vmatprep.subr.bf16.mxu1 %v24895_v3  ;;  %v174_v2 = vld [vmem:[#allocation2 + $0x238] sm:$0xff] }
 0x642   :  { %16763 = vmatprep.mubr.bf16.mxu0 %v20374_v4  ;;  %17931 = vmatprep.mubr.bf16.mxu1 %v20374_v4  ;;  %v190_v3 = vld [vmem:[#allocation2 + $0x2b8] sm:$0xff]  ;;  %v24968_v4 = vld [vmem:[#allocation7 + $0x1040] ss:$16 sps:$4 sm:$0xff]  }
 0x644   :  { %16785 = vmatpush1.bf16.msra.mxu0 %v24890_v5  ;;  %17953 = vmatpush1.bf16.msra.mxu1 %v24893_v6  ;;  %v24971_v5 = vld [vmem:[#allocation7 + $0x1048] ss:$16 sps:$4 sm:$0xff]   ;;  %v24976_v6 = vld [vmem:[#allocation7 + $0x1064] ss:$16 sps:$4 sm:$0xff]  }
 0x645   :  { %16786 = vmatprep.subr.bf16.mxu0 %v24898_v7  ;;  %17954 = vmatprep.subr.bf16.mxu1 %v24901_v8  ;;  %v24979_v7 = vld [vmem:[#allocation7 + $0x106c] ss:$16 sps:$4 sm:$0xff]   ;;  %v20344_v8 = vcombine.high %v174_v2, %v190_v3 }
 0x647   :  { %16764 = vmatmul.mubr.bf16.gmra.mrb[12].mxu0 %v20373_v9  ;;  %17932 = vmatmul.mubr.bf16.gmra.mrb[12].mxu1 %v20373_v9  ;;  %v24974_v9 = vld [vmem:[#allocation7 + $0x1060] ss:$16 sps:$4 sm:$0xff]  }
 0x648   :  { %16787 = vmatpush1.bf16.msra.mxu0 %v24896_v12  ;;  %17955 = vmatpush1.bf16.msra.mxu1 %v24899_v13  ;;  %v24985_v12 = vld [vmem:[#allocation7 + $0x108c] ss:$16 sps:$4 sm:$0xff]   ;;  %v20343_v13 = vcombine.low %v174_v2, %v190_v3  ;;  %v25049_v2 = vld [vmem:[#allocation7 + $0x11e8] ss:$16 sps:$4 sm:$0xff]   ;;  %v25054_v3 = vld [vmem:[#allocation7 + $0x1204] ss:$16 sps:$4 sm:$0xff]  }
 0x649   :  { %16788 = vmatprep.subr.bf16.mxu0 %v24904_v14  ;;  %17956 = vmatprep.subr.bf16.mxu1 %v24907_v15  ;;  %v206_v14 = vld [vmem:[#allocation2 + $0x338] sm:$0xff] }
 0x64a   :  { %16806 = vmatprep.mubr.bf16.mxu0 %v20280_v16  ;;  %17974 = vmatprep.mubr.bf16.mxu1 %v20280_v16  ;;  %v222_v15 = vld [vmem:[#allocation2 + $0x3b8] sm:$0x33]  ;;  %v24980_v16 = vld [vmem:[#allocation7 + $0x1080] ss:$16 sps:$4 sm:$0xff]  }
 0x64c   :  { %16789 = vmatpush1.bf16.msra.mxu0 %v24902_v17  ;;  %17957 = vmatpush1.bf16.msra.mxu1 %v24905_v18  ;;  %v24983_v17 = vld [vmem:[#allocation7 + $0x1088] ss:$16 sps:$4 sm:$0xff]   ;;  %v24988_v18 = vld [vmem:[#allocation7 + $0x10a4] ss:$16 sps:$4 sm:$0xff]  }
 0x64d   :  { %16790 = vmatprep.subr.bf16.mxu0 %v24910_v19  ;;  %17958 = vmatprep.subr.bf16.mxu1 %v24913_v20  ;;  %v24991_v19 = vld [vmem:[#allocation7 + $0x10ac] ss:$16 sps:$4 sm:$0xff]   ;;  %v20376_v20 = vcombine.high %v206_v14, %v222_v15 }
 0x650   :  { %16791 = vmatpush1.bf16.msra.mxu0 %v24908_v21  ;;  %17959 = vmatpush1.bf16.msra.mxu1 %v24911_v22  ;;  %v24986_v21 = vld [vmem:[#allocation7 + $0x10a0] ss:$16 sps:$4 sm:$0xff]   ;;  %v24989_v22 = vld [vmem:[#allocation7 + $0x10a8] ss:$16 sps:$4 sm:$0xff]  }
 0x651   :  { %16792 = vmatprep.subr.bf16.mxu0 %v24916_v23  ;;  %17960 = vmatprep.subr.bf16.mxu1 %v24919_v24  ;;  %v24994_v23 = vld [vmem:[#allocation7 + $0x10c4] ss:$16 sps:$4 sm:$0xff]   ;;  %v24997_v24 = vld [vmem:[#allocation7 + $0x10cc] ss:$16 sps:$4 sm:$0xff]  }
 0x654   :  { %16793 = vmatpush1.bf16.msra.mxu0 %v24914_v25  ;;  %17961 = vmatpush1.bf16.msra.mxu1 %v24917_v26  ;;  %v20375_v25 = vcombine.low %v206_v14, %v222_v15  ;;  %v26244_v26 = vld [vmem:[#allocation2 + $0x40] sm:$0xff]  ;;  %v25061_v14 = vld [vmem:[#allocation7 + $0x1228] ss:$16 sps:$4 sm:$0xff]  }
 0x655   :  { %16794 = vmatprep.subr.bf16.mxu0 %v24922_v27  ;;  %17962 = vmatprep.subr.bf16.mxu1 %v24925_v28  ;;  %v26246_v27 = vld [vmem:[#allocation2 + $0xc0] sm:$0xff] }
 0x656   :  { %v24992_v28 = vld [vmem:[#allocation7 + $0x10c0] ss:$16 sps:$4 sm:$0xff]   ;;  %v25066_v15 = vld [vmem:[#allocation7 + $0x1244] ss:$16 sps:$4 sm:$0xff]  }
 0x658   :  { %16795 = vmatpush1.bf16.msra.mxu0 %v24920_v29  ;;  %17963 = vmatpush1.bf16.msra.mxu1 %v24923_v30  ;;  %v24995_v29 = vld [vmem:[#allocation7 + $0x10c8] ss:$16 sps:$4 sm:$0xff]   ;;  %v25000_v30 = vld [vmem:[#allocation7 + $0x10e4] ss:$16 sps:$4 sm:$0xff]  }
 0x659   :  { %16796 = vmatprep.subr.bf16.mxu0 %v24928_v31  ;;  %17964 = vmatprep.subr.bf16.mxu1 %v24931_v32  ;;  %v25003_v31 = vld [vmem:[#allocation7 + $0x10ec] ss:$16 sps:$4 sm:$0xff]   ;;  %v20282_v32 = vcombine.high %v26244_v26, %v26246_v27 }
 0x65c   :  { %16797 = vmatpush1.bf16.msra.mxu0 %v24926_v33  ;;  %17965 = vmatpush1.bf16.msra.mxu1 %v24929_v34  ;;  %v24998_v33 = vld [vmem:[#allocation7 + $0x10e0] ss:$16 sps:$4 sm:$0xff]   ;;  %v25001_v34 = vld [vmem:[#allocation7 + $0x10e8] ss:$16 sps:$4 sm:$0xff]  }
 0x65d   :  { %16798 = vmatprep.subr.bf16.mxu0 %v24934_v35  ;;  %17966 = vmatprep.subr.bf16.mxu1 %v24937_v36  ;;  %v25006_v35 = vld [vmem:[#allocation7 + $0x1104] ss:$16 sps:$4 sm:$0xff]   ;;  %v25009_v36 = vld [vmem:[#allocation7 + $0x110c] ss:$16 sps:$4 sm:$0xff]  }
 0x660   :  { %16799 = vmatpush1.bf16.msra.mxu0 %v24932_v37  ;;  %17967 = vmatpush1.bf16.msra.mxu1 %v24935_v38  ;;  %v25004_v37 = vld [vmem:[#allocation7 + $0x1100] ss:$16 sps:$4 sm:$0xff]   ;;  %v25007_v38 = vld [vmem:[#allocation7 + $0x1108] ss:$16 sps:$4 sm:$0xff]  }
 0x661   :  { %16800 = vmatprep.subr.bf16.mxu0 %v24940_v39  ;;  %17968 = vmatprep.subr.bf16.mxu1 %v24943_v40  ;;  %v25012_v39 = vld [vmem:[#allocation7 + $0x1124] ss:$16 sps:$4 sm:$0xff]   ;;  %v25015_v40 = vld [vmem:[#allocation7 + $0x112c] ss:$16 sps:$4 sm:$0xff]  }
 0x664   :  { %16801 = vmatpush1.bf16.msra.mxu0 %v24938_v41  ;;  %17969 = vmatpush1.bf16.msra.mxu1 %v24941_v42  ;;  %v25010_v41 = vld [vmem:[#allocation7 + $0x1120] ss:$16 sps:$4 sm:$0xff]   ;;  %v25013_v42 = vld [vmem:[#allocation7 + $0x1128] ss:$16 sps:$4 sm:$0xff]  }
 0x665   :  { %16802 = vmatprep.subr.bf16.mxu0 %v24946_v43  ;;  %17970 = vmatprep.subr.bf16.mxu1 %v24949_v44  ;;  %v25018_v43 = vld [vmem:[#allocation7 + $0x1144] ss:$16 sps:$4 sm:$0xff]   ;;  %v25021_v44 = vld [vmem:[#allocation7 + $0x114c] ss:$16 sps:$4 sm:$0xff]  }
 0x668   :  { %16803 = vmatpush1.bf16.msra.mxu0 %v24944_v45  ;;  %17971 = vmatpush1.bf16.msra.mxu1 %v24947_v46  ;;  %v25016_v45 = vld [vmem:[#allocation7 + $0x1140] ss:$16 sps:$4 sm:$0xff]   ;;  %v25019_v46 = vld [vmem:[#allocation7 + $0x1148] ss:$16 sps:$4 sm:$0xff]  }
 0x669   :  { %16804 = vmatprep.subr.bf16.mxu0 %v24952_v47  ;;  %17972 = vmatprep.subr.bf16.mxu1 %v24955_v48  ;;  %v25024_v47 = vld [vmem:[#allocation7 + $0x1164] ss:$16 sps:$4 sm:$0xff]   ;;  %v25027_v48 = vld [vmem:[#allocation7 + $0x116c] ss:$16 sps:$4 sm:$0xff]  }
 0x66c   :  { %16805 = vmatpush1.bf16.msra.mxu0 %v24950_v49  ;;  %17973 = vmatpush1.bf16.msra.mxu1 %v24953_v50  ;;  %v25022_v49 = vld [vmem:[#allocation7 + $0x1160] ss:$16 sps:$4 sm:$0xff]   ;;  %v25025_v50 = vld [vmem:[#allocation7 + $0x1168] ss:$16 sps:$4 sm:$0xff]  }
 0x66d   :  { %16847 = vmatprep.subr.bf16.mxu0 %v24958_v51  ;;  %18015 = vmatprep.subr.bf16.mxu1 %v24961_v52  ;;  %v25030_v51 = vld [vmem:[#allocation7 + $0x1184] ss:$16 sps:$4 sm:$0xff]   ;;  %v25033_v52 = vld [vmem:[#allocation7 + $0x118c] ss:$16 sps:$4 sm:$0xff]  }
 0x66f   :  { %16807 = vmatmul.mubr.bf16.vlgmr.msra.gmra.mrb[0].mxu0 %v20279_v53  ;;  %17975 = vmatmul.mubr.bf16.vlgmr.msra.gmra.mrb[0].mxu1 %v20279_v53  ;;  %v25028_v53 = vld [vmem:[#allocation7 + $0x1180] ss:$16 sps:$4 sm:$0xff]  }
 0x670   :  { %16848 = vmatpush1.bf16.msra.mxu0 %v24956_v56  ;;  %18016 = vmatpush1.bf16.msra.mxu1 %v24959_v57  ;;  %v25039_v56 = vld [vmem:[#allocation7 + $0x11ac] ss:$16 sps:$4 sm:$0xff]   ;;  %v25034_v57 = vld [vmem:[#allocation7 + $0x11a0] ss:$16 sps:$4 sm:$0xff]  }
 0x671   :  { %16849 = vmatprep.subr.bf16.mxu0 %v24964_v58  ;;  %18017 = vmatprep.subr.bf16.mxu1 %v24967_v59  ;;  %v25037_v58 = vld [vmem:[#allocation7 + $0x11a8] ss:$16 sps:$4 sm:$0xff]   ;;  %v25042_v59 = vld [vmem:[#allocation7 + $0x11c4] ss:$16 sps:$4 sm:$0xff]  }
 0x672   :  { %16816 = vmatprep.mubr.bf16.mxu0 %v20312_v60  ;;  %17984 = vmatprep.mubr.bf16.mxu1 %v20312_v60  ;;  %v25045_v60 = vld [vmem:[#allocation7 + $0x11cc] ss:$16 sps:$4 sm:$0xff]  }
 0x674   :  { %16850 = vmatpush1.bf16.msra.mxu0 %v24962_v61  ;;  %18018 = vmatpush1.bf16.msra.mxu1 %v24965_v62  ;;  %v25040_v61 = vld [vmem:[#allocation7 + $0x11c0] ss:$16 sps:$4 sm:$0xff]   ;;  %v25043_v62 = vld [vmem:[#allocation7 + $0x11c8] ss:$16 sps:$4 sm:$0xff]  }
 0x675   :  { %16851 = vmatprep.subr.bf16.mxu0 %v24970_v63  ;;  %18019 = vmatprep.subr.bf16.mxu1 %v24973_v0  ;;  %v25048_v63 = vld [vmem:[#allocation7 + $0x11e4] ss:$16 sps:$4 sm:$0xff]   ;;  %v25051_v0 = vld [vmem:[#allocation7 + $0x11ec] ss:$16 sps:$4 sm:$0xff]  }
 0x677   :  { %16817 = vmatmul.mubr.bf16.gmra.mrb[4].mxu0 %v20311_v1  ;;  %17985 = vmatmul.mubr.bf16.gmra.mrb[4].mxu1 %v20311_v1  ;;  %v25046_v1 = vld [vmem:[#allocation7 + $0x11e0] ss:$16 sps:$4 sm:$0xff]  }
 0x678   :  { %16852 = vmatpush1.bf16.msra.mxu0 %v24968_v4  ;;  %18020 = vmatpush1.bf16.msra.mxu1 %v24971_v5  ;;  %v25057_v4 = vld [vmem:[#allocation7 + $0x120c] ss:$16 sps:$4 sm:$0xff]   ;;  %v20281_v5 = vcombine.low %v26244_v26, %v26246_v27  ;;  %v25073_v26 = vld [vmem:[#allocation7 + $0x1268] ss:$16 sps:$4 sm:$0xff]   ;;  %v25078_v27 = vld [vmem:[#allocation7 + $0x1284] ss:$16 sps:$4 sm:$0xff]  }
 0x679   :  { %16853 = vmatprep.subr.bf16.mxu0 %v24976_v6  ;;  %18021 = vmatprep.subr.bf16.mxu1 %v24979_v7  ;;  %v143_v6 = vld [vmem:[#allocation2 + $0x140] sm:$0xff] }
 0x67a   :  { %16826 = vmatprep.mubr.bf16.mxu0 %v20344_v8  ;;  %17994 = vmatprep.mubr.bf16.mxu1 %v20344_v8  ;;  %v159_v7 = vld [vmem:[#allocation2 + $0x1c0] sm:$0xff] }
 0x67b   :  { %v25052_v8 = vld [vmem:[#allocation7 + $0x1200] ss:$16 sps:$4 sm:$0xff]  }
 0x67c   :  { %16854 = vmatpush1.bf16.msra.mxu0 %v24974_v9  ;;  %18022 = vmatpush1.bf16.msra.mxu1 %v24977_v10  ;;  %v25055_v9 = vld [vmem:[#allocation7 + $0x1208] ss:$16 sps:$4 sm:$0xff]   ;;  %v25060_v10 = vld [vmem:[#allocation7 + $0x1224] ss:$16 sps:$4 sm:$0xff]  }
 0x67d   :  { %16855 = vmatprep.subr.bf16.mxu0 %v24982_v11  ;;  %18023 = vmatprep.subr.bf16.mxu1 %v24985_v12  ;;  %v25063_v11 = vld [vmem:[#allocation7 + $0x122c] ss:$16 sps:$4 sm:$0xff]   ;;  %v20314_v12 = vcombine.high %v143_v6, %v159_v7 }
 0x67f   :  { %16827 = vmatmul.mubr.bf16.gmra.mrb[8].mxu0 %v20343_v13  ;;  %17995 = vmatmul.mubr.bf16.gmra.mrb[8].mxu1 %v20343_v13  ;;  %v25058_v13 = vld [vmem:[#allocation7 + $0x1220] ss:$16 sps:$4 sm:$0xff]  }
 0x680   :  { %16856 = vmatpush1.bf16.msra.mxu0 %v24980_v16  ;;  %18024 = vmatpush1.bf16.msra.mxu1 %v24983_v17  ;;  %v25069_v16 = vld [vmem:[#allocation7 + $0x124c] ss:$16 sps:$4 sm:$0xff]   ;;  %v20313_v17 = vcombine.low %v143_v6, %v159_v7  ;;  %v25127_v6 = vld [vmem:[#allocation7 + $0x1388] ss:$16 sps:$4 sm:$0xff]   ;;  %v25132_v7 = vld [vmem:[#allocation7 + $0x13a4] ss:$16 sps:$4 sm:$0xff]  }
 0x681   :  { %16857 = vmatprep.subr.bf16.mxu0 %v24988_v18  ;;  %18025 = vmatprep.subr.bf16.mxu1 %v24991_v19  ;;  %v175_v18 = vld [vmem:[#allocation2 + $0x240] sm:$0xff] }
 0x682   :  { %16836 = vmatprep.mubr.bf16.mxu0 %v20376_v20  ;;  %18004 = vmatprep.mubr.bf16.mxu1 %v20376_v20  ;;  %v191_v19 = vld [vmem:[#allocation2 + $0x2c0] sm:$0xff] }
 0x683   :  { %v25064_v20 = vld [vmem:[#allocation7 + $0x1240] ss:$16 sps:$4 sm:$0xff]  }
 0x684   :  { %16858 = vmatpush1.bf16.msra.mxu0 %v24986_v21  ;;  %18026 = vmatpush1.bf16.msra.mxu1 %v24989_v22  ;;  %v25067_v21 = vld [vmem:[#allocation7 + $0x1248] ss:$16 sps:$4 sm:$0xff]   ;;  %v25072_v22 = vld [vmem:[#allocation7 + $0x1264] ss:$16 sps:$4 sm:$0xff]  }
 0x685   :  { %16859 = vmatprep.subr.bf16.mxu0 %v24994_v23  ;;  %18027 = vmatprep.subr.bf16.mxu1 %v24997_v24  ;;  %v25075_v23 = vld [vmem:[#allocation7 + $0x126c] ss:$16 sps:$4 sm:$0xff]   ;;  %v20346_v24 = vcombine.high %v175_v18, %v191_v19 }
 0x687   :  { %16837 = vmatmul.mubr.bf16.gmra.mrb[12].mxu0 %v20375_v25  ;;  %18005 = vmatmul.mubr.bf16.gmra.mrb[12].mxu1 %v20375_v25  ;;  %v25070_v25 = vld [vmem:[#allocation7 + $0x1260] ss:$16 sps:$4 sm:$0xff]  }
 0x688   :  { %16860 = vmatpush1.bf16.msra.mxu0 %v24992_v28  ;;  %18028 = vmatpush1.bf16.msra.mxu1 %v24995_v29  ;;  %v25081_v28 = vld [vmem:[#allocation7 + $0x128c] ss:$16 sps:$4 sm:$0xff]   ;;  %v20345_v29 = vcombine.low %v175_v18, %v191_v19  ;;  %v25145_v18 = vld [vmem:[#allocation7 + $0x13e8] ss:$16 sps:$4 sm:$0xff]   ;;  %v25150_v19 = vld [vmem:[#allocation7 + $0x1404] ss:$16 sps:$4 sm:$0xff]  }
 0x689   :  { %16861 = vmatprep.subr.bf16.mxu0 %v25000_v30  ;;  %18029 = vmatprep.subr.bf16.mxu1 %v25003_v31  ;;  %v207_v30 = vld [vmem:[#allocation2 + $0x340] sm:$0xff] }
 0x68a   :  { %16879 = vmatprep.mubr.bf16.mxu0 %v20282_v32  ;;  %18047 = vmatprep.mubr.bf16.mxu1 %v20282_v32  ;;  %v223_v31 = vld [vmem:[#allocation2 + $0x3c0] sm:$0x33] }
 0x68b   :  { %v25076_v32 = vld [vmem:[#allocation7 + $0x1280] ss:$16 sps:$4 sm:$0xff]  }
 0x68c   :  { %16862 = vmatpush1.bf16.msra.mxu0 %v24998_v33  ;;  %18030 = vmatpush1.bf16.msra.mxu1 %v25001_v34  ;;  %v25079_v33 = vld [vmem:[#allocation7 + $0x1288] ss:$16 sps:$4 sm:$0xff]   ;;  %v25084_v34 = vld [vmem:[#allocation7 + $0x12a4] ss:$16 sps:$4 sm:$0xff]  }
 0x68d   :  { %16863 = vmatprep.subr.bf16.mxu0 %v25006_v35  ;;  %18031 = vmatprep.subr.bf16.mxu1 %v25009_v36  ;;  %v25087_v35 = vld [vmem:[#allocation7 + $0x12ac] ss:$16 sps:$4 sm:$0xff]   ;;  %v20378_v36 = vcombine.high %v207_v30, %v223_v31 }
 0x690   :  { %16864 = vmatpush1.bf16.msra.mxu0 %v25004_v37  ;;  %18032 = vmatpush1.bf16.msra.mxu1 %v25007_v38  ;;  %v25082_v37 = vld [vmem:[#allocation7 + $0x12a0] ss:$16 sps:$4 sm:$0xff]   ;;  %v25085_v38 = vld [vmem:[#allocation7 + $0x12a8] ss:$16 sps:$4 sm:$0xff]  }
 0x691   :  { %16865 = vmatprep.subr.bf16.mxu0 %v25012_v39  ;;  %18033 = vmatprep.subr.bf16.mxu1 %v25015_v40  ;;  %v25090_v39 = vld [vmem:[#allocation7 + $0x12c4] ss:$16 sps:$4 sm:$0xff]   ;;  %v25093_v40 = vld [vmem:[#allocation7 + $0x12cc] ss:$16 sps:$4 sm:$0xff]  }
 0x694   :  { %16866 = vmatpush1.bf16.msra.mxu0 %v25010_v41  ;;  %18034 = vmatpush1.bf16.msra.mxu1 %v25013_v42  ;;  %v20377_v41 = vcombine.low %v207_v30, %v223_v31  ;;  %v26252_v42 = vld [vmem:[#allocation2 + $0x48] sm:$0xff]  ;;  %v25162_v31 = vld [vmem:[#allocation7 + $0x1444] ss:$16 sps:$4 sm:$0xff]  }
 0x695   :  { %16867 = vmatprep.subr.bf16.mxu0 %v25018_v43  ;;  %18035 = vmatprep.subr.bf16.mxu1 %v25021_v44  ;;  %v26254_v43 = vld [vmem:[#allocation2 + $0xc8] sm:$0xff]  ;;  %v25088_v44 = vld [vmem:[#allocation7 + $0x12c0] ss:$16 sps:$4 sm:$0xff]  }
 0x696   :  { %v25157_v30 = vld [vmem:[#allocation7 + $0x1428] ss:$16 sps:$4 sm:$0xff]  }
 0x698   :  { %16868 = vmatpush1.bf16.msra.mxu0 %v25016_v45  ;;  %18036 = vmatpush1.bf16.msra.mxu1 %v25019_v46  ;;  %v25091_v45 = vld [vmem:[#allocation7 + $0x12c8] ss:$16 sps:$4 sm:$0xff]   ;;  %v25096_v46 = vld [vmem:[#allocation7 + $0x12e4] ss:$16 sps:$4 sm:$0xff]  }
 0x699   :  { %16869 = vmatprep.subr.bf16.mxu0 %v25024_v47  ;;  %18037 = vmatprep.subr.bf16.mxu1 %v25027_v48  ;;  %v25099_v47 = vld [vmem:[#allocation7 + $0x12ec] ss:$16 sps:$4 sm:$0xff]   ;;  %v20284_v48 = vcombine.high %v26252_v42, %v26254_v43 }
 0x69c   :  { %16870 = vmatpush1.bf16.msra.mxu0 %v25022_v49  ;;  %18038 = vmatpush1.bf16.msra.mxu1 %v25025_v50  ;;  %v25094_v49 = vld [vmem:[#allocation7 + $0x12e0] ss:$16 sps:$4 sm:$0xff]   ;;  %v25097_v50 = vld [vmem:[#allocation7 + $0x12e8] ss:$16 sps:$4 sm:$0xff]  }
 0x69d   :  { %16871 = vmatprep.subr.bf16.mxu0 %v25030_v51  ;;  %18039 = vmatprep.subr.bf16.mxu1 %v25033_v52  ;;  %v25102_v51 = vld [vmem:[#allocation7 + $0x1304] ss:$16 sps:$4 sm:$0xff]   ;;  %v25105_v52 = vld [vmem:[#allocation7 + $0x130c] ss:$16 sps:$4 sm:$0xff]  }
 0x6a0   :  { %16872 = vmatpush1.bf16.msra.mxu0 %v25028_v53  ;;  %18040 = vmatpush1.bf16.msra.mxu1 %v25031_v54  ;;  %v25100_v53 = vld [vmem:[#allocation7 + $0x1300] ss:$16 sps:$4 sm:$0xff]   ;;  %v25103_v54 = vld [vmem:[#allocation7 + $0x1308] ss:$16 sps:$4 sm:$0xff]  }
 0x6a1   :  { %16873 = vmatprep.subr.bf16.mxu0 %v25036_v55  ;;  %18041 = vmatprep.subr.bf16.mxu1 %v25039_v56  ;;  %v25108_v55 = vld [vmem:[#allocation7 + $0x1324] ss:$16 sps:$4 sm:$0xff]   ;;  %v25111_v56 = vld [vmem:[#allocation7 + $0x132c] ss:$16 sps:$4 sm:$0xff]  }
 0x6a4   :  { %16874 = vmatpush1.bf16.msra.mxu0 %v25034_v57  ;;  %18042 = vmatpush1.bf16.msra.mxu1 %v25037_v58  ;;  %v25106_v57 = vld [vmem:[#allocation7 + $0x1320] ss:$16 sps:$4 sm:$0xff]   ;;  %v25109_v58 = vld [vmem:[#allocation7 + $0x1328] ss:$16 sps:$4 sm:$0xff]  }
 0x6a5   :  { %16875 = vmatprep.subr.bf16.mxu0 %v25042_v59  ;;  %18043 = vmatprep.subr.bf16.mxu1 %v25045_v60  ;;  %v25114_v59 = vld [vmem:[#allocation7 + $0x1344] ss:$16 sps:$4 sm:$0xff]   ;;  %v25117_v60 = vld [vmem:[#allocation7 + $0x134c] ss:$16 sps:$4 sm:$0xff]  }
 0x6a8   :  { %16876 = vmatpush1.bf16.msra.mxu0 %v25040_v61  ;;  %18044 = vmatpush1.bf16.msra.mxu1 %v25043_v62  ;;  %v25112_v61 = vld [vmem:[#allocation7 + $0x1340] ss:$16 sps:$4 sm:$0xff]   ;;  %v25115_v62 = vld [vmem:[#allocation7 + $0x1348] ss:$16 sps:$4 sm:$0xff]  }
 0x6a9   :  { %16877 = vmatprep.subr.bf16.mxu0 %v25048_v63  ;;  %18045 = vmatprep.subr.bf16.mxu1 %v25051_v0  ;;  %v25120_v63 = vld [vmem:[#allocation7 + $0x1364] ss:$16 sps:$4 sm:$0xff]   ;;  %v25123_v0 = vld [vmem:[#allocation7 + $0x136c] ss:$16 sps:$4 sm:$0xff]  }
 0x6ac   :  { %16878 = vmatpush1.bf16.msra.mxu0 %v25046_v1  ;;  %18046 = vmatpush1.bf16.msra.mxu1 %v25049_v2  ;;  %v25118_v1 = vld [vmem:[#allocation7 + $0x1360] ss:$16 sps:$4 sm:$0xff]   ;;  %v25121_v2 = vld [vmem:[#allocation7 + $0x1368] ss:$16 sps:$4 sm:$0xff]  }
 0x6ad   :  { %16920 = vmatprep.subr.bf16.mxu0 %v25054_v3  ;;  %18088 = vmatprep.subr.bf16.mxu1 %v25057_v4  ;;  %v25126_v3 = vld [vmem:[#allocation7 + $0x1384] ss:$16 sps:$4 sm:$0xff]   ;;  %v25129_v4 = vld [vmem:[#allocation7 + $0x138c] ss:$16 sps:$4 sm:$0xff]  }
 0x6af   :  { %16880 = vmatmul.mubr.bf16.vlgmr.msra.gmra.mrb[0].mxu0 %v20281_v5  ;;  %18048 = vmatmul.mubr.bf16.vlgmr.msra.gmra.mrb[0].mxu1 %v20281_v5  ;;  %v25124_v5 = vld [vmem:[#allocation7 + $0x1380] ss:$16 sps:$4 sm:$0xff]  }
 0x6b0   :  { %16921 = vmatpush1.bf16.msra.mxu0 %v25052_v8  ;;  %18089 = vmatpush1.bf16.msra.mxu1 %v25055_v9  ;;  %v25135_v8 = vld [vmem:[#allocation7 + $0x13ac] ss:$16 sps:$4 sm:$0xff]   ;;  %v25130_v9 = vld [vmem:[#allocation7 + $0x13a0] ss:$16 sps:$4 sm:$0xff]  }
 0x6b1   :  { %16922 = vmatprep.subr.bf16.mxu0 %v25060_v10  ;;  %18090 = vmatprep.subr.bf16.mxu1 %v25063_v11  ;;  %v25133_v10 = vld [vmem:[#allocation7 + $0x13a8] ss:$16 sps:$4 sm:$0xff]   ;;  %v25138_v11 = vld [vmem:[#allocation7 + $0x13c4] ss:$16 sps:$4 sm:$0xff]  }
 0x6b2   :  { %16889 = vmatprep.mubr.bf16.mxu0 %v20314_v12  ;;  %18057 = vmatprep.mubr.bf16.mxu1 %v20314_v12  ;;  %v25141_v12 = vld [vmem:[#allocation7 + $0x13cc] ss:$16 sps:$4 sm:$0xff]  }
 0x6b4   :  { %16923 = vmatpush1.bf16.msra.mxu0 %v25058_v13  ;;  %18091 = vmatpush1.bf16.msra.mxu1 %v25061_v14  ;;  %v25136_v13 = vld [vmem:[#allocation7 + $0x13c0] ss:$16 sps:$4 sm:$0xff]   ;;  %v25139_v14 = vld [vmem:[#allocation7 + $0x13c8] ss:$16 sps:$4 sm:$0xff]  }
 0x6b5   :  { %16924 = vmatprep.subr.bf16.mxu0 %v25066_v15  ;;  %18092 = vmatprep.subr.bf16.mxu1 %v25069_v16  ;;  %v25144_v15 = vld [vmem:[#allocation7 + $0x13e4] ss:$16 sps:$4 sm:$0xff]   ;;  %v25147_v16 = vld [vmem:[#allocation7 + $0x13ec] ss:$16 sps:$4 sm:$0xff]  }
 0x6b7   :  { %16890 = vmatmul.mubr.bf16.gmra.mrb[4].mxu0 %v20313_v17  ;;  %18058 = vmatmul.mubr.bf16.gmra.mrb[4].mxu1 %v20313_v17  ;;  %v25142_v17 = vld [vmem:[#allocation7 + $0x13e0] ss:$16 sps:$4 sm:$0xff]  }
 0x6b8   :  { %16925 = vmatpush1.bf16.msra.mxu0 %v25064_v20  ;;  %18093 = vmatpush1.bf16.msra.mxu1 %v25067_v21  ;;  %v25153_v20 = vld [vmem:[#allocation7 + $0x140c] ss:$16 sps:$4 sm:$0xff]   ;;  %v20283_v21 = vcombine.low %v26252_v42, %v26254_v43  ;;  %v25169_v42 = vld [vmem:[#allocation7 + $0x1468] ss:$16 sps:$4 sm:$0xff]   ;;  %v25174_v43 = vld [vmem:[#allocation7 + $0x1484] ss:$16 sps:$4 sm:$0xff]  }
 0x6b9   :  { %16926 = vmatprep.subr.bf16.mxu0 %v25072_v22  ;;  %18094 = vmatprep.subr.bf16.mxu1 %v25075_v23  ;;  %v144_v22 = vld [vmem:[#allocation2 + $0x148] sm:$0xff] }
 0x6ba   :  { %16899 = vmatprep.mubr.bf16.mxu0 %v20346_v24  ;;  %18067 = vmatprep.mubr.bf16.mxu1 %v20346_v24  ;;  %v160_v23 = vld [vmem:[#allocation2 + $0x1c8] sm:$0xff]  ;;  %v25148_v24 = vld [vmem:[#allocation7 + $0x1400] ss:$16 sps:$4 sm:$0xff]  }
 0x6bc   :  { %16927 = vmatpush1.bf16.msra.mxu0 %v25070_v25  ;;  %18095 = vmatpush1.bf16.msra.mxu1 %v25073_v26  ;;  %v25151_v25 = vld [vmem:[#allocation7 + $0x1408] ss:$16 sps:$4 sm:$0xff]   ;;  %v25156_v26 = vld [vmem:[#allocation7 + $0x1424] ss:$16 sps:$4 sm:$0xff]  }
 0x6bd   :  { %16928 = vmatprep.subr.bf16.mxu0 %v25078_v27  ;;  %18096 = vmatprep.subr.bf16.mxu1 %v25081_v28  ;;  %v25159_v27 = vld [vmem:[#allocation7 + $0x142c] ss:$16 sps:$4 sm:$0xff]   ;;  %v20316_v28 = vcombine.high %v144_v22, %v160_v23 }
 0x6bf   :  { %16900 = vmatmul.mubr.bf16.gmra.mrb[8].mxu0 %v20345_v29  ;;  %18068 = vmatmul.mubr.bf16.gmra.mrb[8].mxu1 %v20345_v29  ;;  %v25154_v29 = vld [vmem:[#allocation7 + $0x1420] ss:$16 sps:$4 sm:$0xff]  }
 0x6c0   :  { %16929 = vmatpush1.bf16.msra.mxu0 %v25076_v32  ;;  %18097 = vmatpush1.bf16.msra.mxu1 %v25079_v33  ;;  %v25165_v32 = vld [vmem:[#allocation7 + $0x144c] ss:$16 sps:$4 sm:$0xff]   ;;  %v20315_v33 = vcombine.low %v144_v22, %v160_v23  ;;  %v25223_v22 = vld [vmem:[#allocation7 + $0x1588] ss:$16 sps:$4 sm:$0xff]   ;;  %v25228_v23 = vld [vmem:[#allocation7 + $0x15a4] ss:$16 sps:$4 sm:$0xff]  }
 0x6c1   :  { %16930 = vmatprep.subr.bf16.mxu0 %v25084_v34  ;;  %18098 = vmatprep.subr.bf16.mxu1 %v25087_v35  ;;  %v176_v34 = vld [vmem:[#allocation2 + $0x248] sm:$0xff] }
 0x6c2   :  { %16909 = vmatprep.mubr.bf16.mxu0 %v20378_v36  ;;  %18077 = vmatprep.mubr.bf16.mxu1 %v20378_v36  ;;  %v192_v35 = vld [vmem:[#allocation2 + $0x2c8] sm:$0xff]  ;;  %v25160_v36 = vld [vmem:[#allocation7 + $0x1440] ss:$16 sps:$4 sm:$0xff]  }
 0x6c4   :  { %16931 = vmatpush1.bf16.msra.mxu0 %v25082_v37  ;;  %18099 = vmatpush1.bf16.msra.mxu1 %v25085_v38  ;;  %v25163_v37 = vld [vmem:[#allocation7 + $0x1448] ss:$16 sps:$4 sm:$0xff]   ;;  %v25168_v38 = vld [vmem:[#allocation7 + $0x1464] ss:$16 sps:$4 sm:$0xff]  }
 0x6c5   :  { %16932 = vmatprep.subr.bf16.mxu0 %v25090_v39  ;;  %18100 = vmatprep.subr.bf16.mxu1 %v25093_v40  ;;  %v25171_v39 = vld [vmem:[#allocation7 + $0x146c] ss:$16 sps:$4 sm:$0xff]   ;;  %v20348_v40 = vcombine.high %v176_v34, %v192_v35 }
 0x6c7   :  { %16910 = vmatmul.mubr.bf16.gmra.mrb[12].mxu0 %v20377_v41  ;;  %18078 = vmatmul.mubr.bf16.gmra.mrb[12].mxu1 %v20377_v41  ;;  %v25166_v41 = vld [vmem:[#allocation7 + $0x1460] ss:$16 sps:$4 sm:$0xff]  }
 0x6c8   :  { %16933 = vmatpush1.bf16.msra.mxu0 %v25088_v44  ;;  %18101 = vmatpush1.bf16.msra.mxu1 %v25091_v45  ;;  %v25177_v44 = vld [vmem:[#allocation7 + $0x148c] ss:$16 sps:$4 sm:$0xff]   ;;  %v20347_v45 = vcombine.low %v176_v34, %v192_v35  ;;  %v25241_v34 = vld [vmem:[#allocation7 + $0x15e8] ss:$16 sps:$4 sm:$0xff]   ;;  %v25246_v35 = vld [vmem:[#allocation7 + $0x1604] ss:$16 sps:$4 sm:$0xff]  }
 0x6c9   :  { %16934 = vmatprep.subr.bf16.mxu0 %v25096_v46  ;;  %18102 = vmatprep.subr.bf16.mxu1 %v25099_v47  ;;  %v208_v46 = vld [vmem:[#allocation2 + $0x348] sm:$0xff] }
 0x6ca   :  { %16952 = vmatprep.mubr.bf16.mxu0 %v20284_v48  ;;  %18120 = vmatprep.mubr.bf16.mxu1 %v20284_v48  ;;  %v224_v47 = vld [vmem:[#allocation2 + $0x3c8] sm:$0x33]  ;;  %v25172_v48 = vld [vmem:[#allocation7 + $0x1480] ss:$16 sps:$4 sm:$0xff]  }
 0x6cc   :  { %16935 = vmatpush1.bf16.msra.mxu0 %v25094_v49  ;;  %18103 = vmatpush1.bf16.msra.mxu1 %v25097_v50  ;;  %v25175_v49 = vld [vmem:[#allocation7 + $0x1488] ss:$16 sps:$4 sm:$0xff]   ;;  %v25180_v50 = vld [vmem:[#allocation7 + $0x14a4] ss:$16 sps:$4 sm:$0xff]  }
 0x6cd   :  { %16936 = vmatprep.subr.bf16.mxu0 %v25102_v51  ;;  %18104 = vmatprep.subr.bf16.mxu1 %v25105_v52  ;;  %v25183_v51 = vld [vmem:[#allocation7 + $0x14ac] ss:$16 sps:$4 sm:$0xff]   ;;  %v20380_v52 = vcombine.high %v208_v46, %v224_v47 }
 0x6d0   :  { %16937 = vmatpush1.bf16.msra.mxu0 %v25100_v53  ;;  %18105 = vmatpush1.bf16.msra.mxu1 %v25103_v54  ;;  %v25178_v53 = vld [vmem:[#allocation7 + $0x14a0] ss:$16 sps:$4 sm:$0xff]   ;;  %v25181_v54 = vld [vmem:[#allocation7 + $0x14a8] ss:$16 sps:$4 sm:$0xff]  }
 0x6d1   :  { %16938 = vmatprep.subr.bf16.mxu0 %v25108_v55  ;;  %18106 = vmatprep.subr.bf16.mxu1 %v25111_v56  ;;  %v25186_v55 = vld [vmem:[#allocation7 + $0x14c4] ss:$16 sps:$4 sm:$0xff]   ;;  %v25189_v56 = vld [vmem:[#allocation7 + $0x14cc] ss:$16 sps:$4 sm:$0xff]  }
 0x6d4   :  { %16939 = vmatpush1.bf16.msra.mxu0 %v25106_v57  ;;  %18107 = vmatpush1.bf16.msra.mxu1 %v25109_v58  ;;  %v20379_v57 = vcombine.low %v208_v46, %v224_v47  ;;  %v26260_v58 = vld [vmem:[#allocation2 + $0x50] sm:$0xff]  ;;  %v25253_v46 = vld [vmem:[#allocation7 + $0x1628] ss:$16 sps:$4 sm:$0xff]  }
 0x6d5   :  { %16940 = vmatprep.subr.bf16.mxu0 %v25114_v59  ;;  %18108 = vmatprep.subr.bf16.mxu1 %v25117_v60  ;;  %v26262_v59 = vld [vmem:[#allocation2 + $0xd0] sm:$0xff] }
 0x6d6   :  { %v25184_v60 = vld [vmem:[#allocation7 + $0x14c0] ss:$16 sps:$4 sm:$0xff]   ;;  %v25258_v47 = vld [vmem:[#allocation7 + $0x1644] ss:$16 sps:$4 sm:$0xff]  }
 0x6d8   :  { %16941 = vmatpush1.bf16.msra.mxu0 %v25112_v61  ;;  %18109 = vmatpush1.bf16.msra.mxu1 %v25115_v62  ;;  %v25187_v61 = vld [vmem:[#allocation7 + $0x14c8] ss:$16 sps:$4 sm:$0xff]   ;;  %v25192_v62 = vld [vmem:[#allocation7 + $0x14e4] ss:$16 sps:$4 sm:$0xff]  }
 0x6d9   :  { %16942 = vmatprep.subr.bf16.mxu0 %v25120_v63  ;;  %18110 = vmatprep.subr.bf16.mxu1 %v25123_v0  ;;  %v25195_v63 = vld [vmem:[#allocation7 + $0x14ec] ss:$16 sps:$4 sm:$0xff]   ;;  %v20286_v0 = vcombine.high %v26260_v58, %v26262_v59 }
 0x6dc   :  { %16943 = vmatpush1.bf16.msra.mxu0 %v25118_v1  ;;  %18111 = vmatpush1.bf16.msra.mxu1 %v25121_v2  ;;  %v25190_v1 = vld [vmem:[#allocation7 + $0x14e0] ss:$16 sps:$4 sm:$0xff]   ;;  %v25193_v2 = vld [vmem:[#allocation7 + $0x14e8] ss:$16 sps:$4 sm:$0xff]  }
 0x6dd   :  { %16944 = vmatprep.subr.bf16.mxu0 %v25126_v3  ;;  %18112 = vmatprep.subr.bf16.mxu1 %v25129_v4  ;;  %v25198_v3 = vld [vmem:[#allocation7 + $0x1504] ss:$16 sps:$4 sm:$0xff]   ;;  %v25201_v4 = vld [vmem:[#allocation7 + $0x150c] ss:$16 sps:$4 sm:$0xff]  }
 0x6e0   :  { %16945 = vmatpush1.bf16.msra.mxu0 %v25124_v5  ;;  %18113 = vmatpush1.bf16.msra.mxu1 %v25127_v6  ;;  %v25196_v5 = vld [vmem:[#allocation7 + $0x1500] ss:$16 sps:$4 sm:$0xff]   ;;  %v25199_v6 = vld [vmem:[#allocation7 + $0x1508] ss:$16 sps:$4 sm:$0xff]  }
 0x6e1   :  { %16946 = vmatprep.subr.bf16.mxu0 %v25132_v7  ;;  %18114 = vmatprep.subr.bf16.mxu1 %v25135_v8  ;;  %v25204_v7 = vld [vmem:[#allocation7 + $0x1524] ss:$16 sps:$4 sm:$0xff]   ;;  %v25207_v8 = vld [vmem:[#allocation7 + $0x152c] ss:$16 sps:$4 sm:$0xff]  }
 0x6e4   :  { %16947 = vmatpush1.bf16.msra.mxu0 %v25130_v9  ;;  %18115 = vmatpush1.bf16.msra.mxu1 %v25133_v10  ;;  %v25202_v9 = vld [vmem:[#allocation7 + $0x1520] ss:$16 sps:$4 sm:$0xff]   ;;  %v25205_v10 = vld [vmem:[#allocation7 + $0x1528] ss:$16 sps:$4 sm:$0xff]  }
 0x6e5   :  { %16948 = vmatprep.subr.bf16.mxu0 %v25138_v11  ;;  %18116 = vmatprep.subr.bf16.mxu1 %v25141_v12  ;;  %v25210_v11 = vld [vmem:[#allocation7 + $0x1544] ss:$16 sps:$4 sm:$0xff]   ;;  %v25213_v12 = vld [vmem:[#allocation7 + $0x154c] ss:$16 sps:$4 sm:$0xff]  }
 0x6e8   :  { %16949 = vmatpush1.bf16.msra.mxu0 %v25136_v13  ;;  %18117 = vmatpush1.bf16.msra.mxu1 %v25139_v14  ;;  %v25208_v13 = vld [vmem:[#allocation7 + $0x1540] ss:$16 sps:$4 sm:$0xff]   ;;  %v25211_v14 = vld [vmem:[#allocation7 + $0x1548] ss:$16 sps:$4 sm:$0xff]  }
 0x6e9   :  { %16950 = vmatprep.subr.bf16.mxu0 %v25144_v15  ;;  %18118 = vmatprep.subr.bf16.mxu1 %v25147_v16  ;;  %v25216_v15 = vld [vmem:[#allocation7 + $0x1564] ss:$16 sps:$4 sm:$0xff]   ;;  %v25219_v16 = vld [vmem:[#allocation7 + $0x156c] ss:$16 sps:$4 sm:$0xff]  }
 0x6ec   :  { %16951 = vmatpush1.bf16.msra.mxu0 %v25142_v17  ;;  %18119 = vmatpush1.bf16.msra.mxu1 %v25145_v18  ;;  %v25214_v17 = vld [vmem:[#allocation7 + $0x1560] ss:$16 sps:$4 sm:$0xff]   ;;  %v25217_v18 = vld [vmem:[#allocation7 + $0x1568] ss:$16 sps:$4 sm:$0xff]  }
 0x6ed   :  { %16993 = vmatprep.subr.bf16.mxu0 %v25150_v19  ;;  %18161 = vmatprep.subr.bf16.mxu1 %v25153_v20  ;;  %v25222_v19 = vld [vmem:[#allocation7 + $0x1584] ss:$16 sps:$4 sm:$0xff]   ;;  %v25225_v20 = vld [vmem:[#allocation7 + $0x158c] ss:$16 sps:$4 sm:$0xff]  }
 0x6ef   :  { %16953 = vmatmul.mubr.bf16.vlgmr.msra.gmra.mrb[0].mxu0 %v20283_v21  ;;  %18121 = vmatmul.mubr.bf16.vlgmr.msra.gmra.mrb[0].mxu1 %v20283_v21  ;;  %v25220_v21 = vld [vmem:[#allocation7 + $0x1580] ss:$16 sps:$4 sm:$0xff]  }
 0x6f0   :  { %16994 = vmatpush1.bf16.msra.mxu0 %v25148_v24  ;;  %18162 = vmatpush1.bf16.msra.mxu1 %v25151_v25  ;;  %v25231_v24 = vld [vmem:[#allocation7 + $0x15ac] ss:$16 sps:$4 sm:$0xff]   ;;  %v25226_v25 = vld [vmem:[#allocation7 + $0x15a0] ss:$16 sps:$4 sm:$0xff]  }
 0x6f1   :  { %16995 = vmatprep.subr.bf16.mxu0 %v25156_v26  ;;  %18163 = vmatprep.subr.bf16.mxu1 %v25159_v27  ;;  %v25229_v26 = vld [vmem:[#allocation7 + $0x15a8] ss:$16 sps:$4 sm:$0xff]   ;;  %v25234_v27 = vld [vmem:[#allocation7 + $0x15c4] ss:$16 sps:$4 sm:$0xff]  }
 0x6f2   :  { %16962 = vmatprep.mubr.bf16.mxu0 %v20316_v28  ;;  %18130 = vmatprep.mubr.bf16.mxu1 %v20316_v28  ;;  %v25237_v28 = vld [vmem:[#allocation7 + $0x15cc] ss:$16 sps:$4 sm:$0xff]  }
 0x6f4   :  { %16996 = vmatpush1.bf16.msra.mxu0 %v25154_v29  ;;  %18164 = vmatpush1.bf16.msra.mxu1 %v25157_v30  ;;  %v25232_v29 = vld [vmem:[#allocation7 + $0x15c0] ss:$16 sps:$4 sm:$0xff]   ;;  %v25235_v30 = vld [vmem:[#allocation7 + $0x15c8] ss:$16 sps:$4 sm:$0xff]  }
 0x6f5   :  { %16997 = vmatprep.subr.bf16.mxu0 %v25162_v31  ;;  %18165 = vmatprep.subr.bf16.mxu1 %v25165_v32  ;;  %v25240_v31 = vld [vmem:[#allocation7 + $0x15e4] ss:$16 sps:$4 sm:$0xff]   ;;  %v25243_v32 = vld [vmem:[#allocation7 + $0x15ec] ss:$16 sps:$4 sm:$0xff]  }
 0x6f7   :  { %16963 = vmatmul.mubr.bf16.gmra.mrb[4].mxu0 %v20315_v33  ;;  %18131 = vmatmul.mubr.bf16.gmra.mrb[4].mxu1 %v20315_v33  ;;  %v25238_v33 = vld [vmem:[#allocation7 + $0x15e0] ss:$16 sps:$4 sm:$0xff]  }
 0x6f8   :  { %16998 = vmatpush1.bf16.msra.mxu0 %v25160_v36  ;;  %18166 = vmatpush1.bf16.msra.mxu1 %v25163_v37  ;;  %v25249_v36 = vld [vmem:[#allocation7 + $0x160c] ss:$16 sps:$4 sm:$0xff]   ;;  %v20285_v37 = vcombine.low %v26260_v58, %v26262_v59  ;;  %v25265_v58 = vld [vmem:[#allocation7 + $0x1668] ss:$16 sps:$4 sm:$0xff]   ;;  %v25270_v59 = vld [vmem:[#allocation7 + $0x1684] ss:$16 sps:$4 sm:$0xff]  }
 0x6f9   :  { %16999 = vmatprep.subr.bf16.mxu0 %v25168_v38  ;;  %18167 = vmatprep.subr.bf16.mxu1 %v25171_v39  ;;  %v145_v38 = vld [vmem:[#allocation2 + $0x150] sm:$0xff] }
 0x6fa   :  { %16972 = vmatprep.mubr.bf16.mxu0 %v20348_v40  ;;  %18140 = vmatprep.mubr.bf16.mxu1 %v20348_v40  ;;  %v161_v39 = vld [vmem:[#allocation2 + $0x1d0] sm:$0xff] }
 0x6fb   :  { %v25244_v40 = vld [vmem:[#allocation7 + $0x1600] ss:$16 sps:$4 sm:$0xff]  }
 0x6fc   :  { %17000 = vmatpush1.bf16.msra.mxu0 %v25166_v41  ;;  %18168 = vmatpush1.bf16.msra.mxu1 %v25169_v42  ;;  %v25247_v41 = vld [vmem:[#allocation7 + $0x1608] ss:$16 sps:$4 sm:$0xff]   ;;  %v25252_v42 = vld [vmem:[#allocation7 + $0x1624] ss:$16 sps:$4 sm:$0xff]  }
 0x6fd   :  { %17001 = vmatprep.subr.bf16.mxu0 %v25174_v43  ;;  %18169 = vmatprep.subr.bf16.mxu1 %v25177_v44  ;;  %v25255_v43 = vld [vmem:[#allocation7 + $0x162c] ss:$16 sps:$4 sm:$0xff]   ;;  %v20318_v44 = vcombine.high %v145_v38, %v161_v39 }
 0x6ff   :  { %16973 = vmatmul.mubr.bf16.gmra.mrb[8].mxu0 %v20347_v45  ;;  %18141 = vmatmul.mubr.bf16.gmra.mrb[8].mxu1 %v20347_v45  ;;  %v25250_v45 = vld [vmem:[#allocation7 + $0x1620] ss:$16 sps:$4 sm:$0xff]  }
 0x700   :  { %17002 = vmatpush1.bf16.msra.mxu0 %v25172_v48  ;;  %18170 = vmatpush1.bf16.msra.mxu1 %v25175_v49  ;;  %v25261_v48 = vld [vmem:[#allocation7 + $0x164c] ss:$16 sps:$4 sm:$0xff]   ;;  %v20317_v49 = vcombine.low %v145_v38, %v161_v39  ;;  %v25319_v38 = vld [vmem:[#allocation7 + $0x1788] ss:$16 sps:$4 sm:$0xff]   ;;  %v25324_v39 = vld [vmem:[#allocation7 + $0x17a4] ss:$16 sps:$4 sm:$0xff]  }
 0x701   :  { %17003 = vmatprep.subr.bf16.mxu0 %v25180_v50  ;;  %18171 = vmatprep.subr.bf16.mxu1 %v25183_v51  ;;  %v177_v50 = vld [vmem:[#allocation2 + $0x250] sm:$0xff] }
 0x702   :  { %16982 = vmatprep.mubr.bf16.mxu0 %v20380_v52  ;;  %18150 = vmatprep.mubr.bf16.mxu1 %v20380_v52  ;;  %v193_v51 = vld [vmem:[#allocation2 + $0x2d0] sm:$0xff] }
 0x703   :  { %v25256_v52 = vld [vmem:[#allocation7 + $0x1640] ss:$16 sps:$4 sm:$0xff]  }
 0x704   :  { %17004 = vmatpush1.bf16.msra.mxu0 %v25178_v53  ;;  %18172 = vmatpush1.bf16.msra.mxu1 %v25181_v54  ;;  %v25259_v53 = vld [vmem:[#allocation7 + $0x1648] ss:$16 sps:$4 sm:$0xff]   ;;  %v25264_v54 = vld [vmem:[#allocation7 + $0x1664] ss:$16 sps:$4 sm:$0xff]  }
 0x705   :  { %17005 = vmatprep.subr.bf16.mxu0 %v25186_v55  ;;  %18173 = vmatprep.subr.bf16.mxu1 %v25189_v56  ;;  %v25267_v55 = vld [vmem:[#allocation7 + $0x166c] ss:$16 sps:$4 sm:$0xff]   ;;  %v20350_v56 = vcombine.high %v177_v50, %v193_v51 }
 0x707   :  { %16983 = vmatmul.mubr.bf16.gmra.mrb[12].mxu0 %v20379_v57  ;;  %18151 = vmatmul.mubr.bf16.gmra.mrb[12].mxu1 %v20379_v57  ;;  %v25262_v57 = vld [vmem:[#allocation7 + $0x1660] ss:$16 sps:$4 sm:$0xff]  }
 0x708   :  { %17006 = vmatpush1.bf16.msra.mxu0 %v25184_v60  ;;  %18174 = vmatpush1.bf16.msra.mxu1 %v25187_v61  ;;  %v25273_v60 = vld [vmem:[#allocation7 + $0x168c] ss:$16 sps:$4 sm:$0xff]   ;;  %v20349_v61 = vcombine.low %v177_v50, %v193_v51  ;;  %v25337_v50 = vld [vmem:[#allocation7 + $0x17e8] ss:$16 sps:$4 sm:$0xff]   ;;  %v25342_v51 = vld [vmem:[#allocation7 + $0x1804] ss:$16 sps:$4 sm:$0xff]  }
 0x709   :  { %17007 = vmatprep.subr.bf16.mxu0 %v25192_v62  ;;  %18175 = vmatprep.subr.bf16.mxu1 %v25195_v63  ;;  %v209_v62 = vld [vmem:[#allocation2 + $0x350] sm:$0xff] }
 0x70a   :  { %17025 = vmatprep.mubr.bf16.mxu0 %v20286_v0  ;;  %18193 = vmatprep.mubr.bf16.mxu1 %v20286_v0  ;;  %v225_v63 = vld [vmem:[#allocation2 + $0x3d0] sm:$0x33] }
 0x70b   :  { %v25268_v0 = vld [vmem:[#allocation7 + $0x1680] ss:$16 sps:$4 sm:$0xff]  }
 0x70c   :  { %17008 = vmatpush1.bf16.msra.mxu0 %v25190_v1  ;;  %18176 = vmatpush1.bf16.msra.mxu1 %v25193_v2  ;;  %v25271_v1 = vld [vmem:[#allocation7 + $0x1688] ss:$16 sps:$4 sm:$0xff]   ;;  %v25276_v2 = vld [vmem:[#allocation7 + $0x16a4] ss:$16 sps:$4 sm:$0xff]  }
 0x70d   :  { %17009 = vmatprep.subr.bf16.mxu0 %v25198_v3  ;;  %18177 = vmatprep.subr.bf16.mxu1 %v25201_v4  ;;  %v25279_v3 = vld [vmem:[#allocation7 + $0x16ac] ss:$16 sps:$4 sm:$0xff]   ;;  %v20382_v4 = vcombine.high %v209_v62, %v225_v63 }
 0x710   :  { %17010 = vmatpush1.bf16.msra.mxu0 %v25196_v5  ;;  %18178 = vmatpush1.bf16.msra.mxu1 %v25199_v6  ;;  %v25274_v5 = vld [vmem:[#allocation7 + $0x16a0] ss:$16 sps:$4 sm:$0xff]   ;;  %v25277_v6 = vld [vmem:[#allocation7 + $0x16a8] ss:$16 sps:$4 sm:$0xff]  }
 0x711   :  { %17011 = vmatprep.subr.bf16.mxu0 %v25204_v7  ;;  %18179 = vmatprep.subr.bf16.mxu1 %v25207_v8  ;;  %v25282_v7 = vld [vmem:[#allocation7 + $0x16c4] ss:$16 sps:$4 sm:$0xff]   ;;  %v25285_v8 = vld [vmem:[#allocation7 + $0x16cc] ss:$16 sps:$4 sm:$0xff]  }
 0x714   :  { %17012 = vmatpush1.bf16.msra.mxu0 %v25202_v9  ;;  %18180 = vmatpush1.bf16.msra.mxu1 %v25205_v10  ;;  %v20381_v9 = vcombine.low %v209_v62, %v225_v63  ;;  %v26268_v10 = vld [vmem:[#allocation2 + $0x58] sm:$0xff]  ;;  %v25354_v63 = vld [vmem:[#allocation7 + $0x1844] ss:$16 sps:$4 sm:$0xff]  }
 0x715   :  { %17013 = vmatprep.subr.bf16.mxu0 %v25210_v11  ;;  %18181 = vmatprep.subr.bf16.mxu1 %v25213_v12  ;;  %v26270_v11 = vld [vmem:[#allocation2 + $0xd8] sm:$0xff]  ;;  %v25280_v12 = vld [vmem:[#allocation7 + $0x16c0] ss:$16 sps:$4 sm:$0xff]  }
 0x716   :  { %v25349_v62 = vld [vmem:[#allocation7 + $0x1828] ss:$16 sps:$4 sm:$0xff]  }
 0x718   :  { %17014 = vmatpush1.bf16.msra.mxu0 %v25208_v13  ;;  %18182 = vmatpush1.bf16.msra.mxu1 %v25211_v14  ;;  %v25283_v13 = vld [vmem:[#allocation7 + $0x16c8] ss:$16 sps:$4 sm:$0xff]   ;;  %v25288_v14 = vld [vmem:[#allocation7 + $0x16e4] ss:$16 sps:$4 sm:$0xff]  }
 0x719   :  { %17015 = vmatprep.subr.bf16.mxu0 %v25216_v15  ;;  %18183 = vmatprep.subr.bf16.mxu1 %v25219_v16  ;;  %v25291_v15 = vld [vmem:[#allocation7 + $0x16ec] ss:$16 sps:$4 sm:$0xff]   ;;  %v20288_v16 = vcombine.high %v26268_v10, %v26270_v11 }
 0x71c   :  { %17016 = vmatpush1.bf16.msra.mxu0 %v25214_v17  ;;  %18184 = vmatpush1.bf16.msra.mxu1 %v25217_v18  ;;  %v25286_v17 = vld [vmem:[#allocation7 + $0x16e0] ss:$16 sps:$4 sm:$0xff]   ;;  %v25289_v18 = vld [vmem:[#allocation7 + $0x16e8] ss:$16 sps:$4 sm:$0xff]  }
 0x71d   :  { %17017 = vmatprep.subr.bf16.mxu0 %v25222_v19  ;;  %18185 = vmatprep.subr.bf16.mxu1 %v25225_v20  ;;  %v25294_v19 = vld [vmem:[#allocation7 + $0x1704] ss:$16 sps:$4 sm:$0xff]   ;;  %v25297_v20 = vld [vmem:[#allocation7 + $0x170c] ss:$16 sps:$4 sm:$0xff]  }
 0x720   :  { %17018 = vmatpush1.bf16.msra.mxu0 %v25220_v21  ;;  %18186 = vmatpush1.bf16.msra.mxu1 %v25223_v22  ;;  %v25292_v21 = vld [vmem:[#allocation7 + $0x1700] ss:$16 sps:$4 sm:$0xff]   ;;  %v25295_v22 = vld [vmem:[#allocation7 + $0x1708] ss:$16 sps:$4 sm:$0xff]  }
 0x721   :  { %17019 = vmatprep.subr.bf16.mxu0 %v25228_v23  ;;  %18187 = vmatprep.subr.bf16.mxu1 %v25231_v24  ;;  %v25300_v23 = vld [vmem:[#allocation7 + $0x1724] ss:$16 sps:$4 sm:$0xff]   ;;  %v25303_v24 = vld [vmem:[#allocation7 + $0x172c] ss:$16 sps:$4 sm:$0xff]  }
 0x724   :  { %17020 = vmatpush1.bf16.msra.mxu0 %v25226_v25  ;;  %18188 = vmatpush1.bf16.msra.mxu1 %v25229_v26  ;;  %v25298_v25 = vld [vmem:[#allocation7 + $0x1720] ss:$16 sps:$4 sm:$0xff]   ;;  %v25301_v26 = vld [vmem:[#allocation7 + $0x1728] ss:$16 sps:$4 sm:$0xff]  }
 0x725   :  { %17021 = vmatprep.subr.bf16.mxu0 %v25234_v27  ;;  %18189 = vmatprep.subr.bf16.mxu1 %v25237_v28  ;;  %v25306_v27 = vld [vmem:[#allocation7 + $0x1744] ss:$16 sps:$4 sm:$0xff]   ;;  %v25309_v28 = vld [vmem:[#allocation7 + $0x174c] ss:$16 sps:$4 sm:$0xff]  }
 0x728   :  { %17022 = vmatpush1.bf16.msra.mxu0 %v25232_v29  ;;  %18190 = vmatpush1.bf16.msra.mxu1 %v25235_v30  ;;  %v25304_v29 = vld [vmem:[#allocation7 + $0x1740] ss:$16 sps:$4 sm:$0xff]   ;;  %v25307_v30 = vld [vmem:[#allocation7 + $0x1748] ss:$16 sps:$4 sm:$0xff]  }
 0x729   :  { %17023 = vmatprep.subr.bf16.mxu0 %v25240_v31  ;;  %18191 = vmatprep.subr.bf16.mxu1 %v25243_v32  ;;  %v25312_v31 = vld [vmem:[#allocation7 + $0x1764] ss:$16 sps:$4 sm:$0xff]   ;;  %v25315_v32 = vld [vmem:[#allocation7 + $0x176c] ss:$16 sps:$4 sm:$0xff]  }
 0x72c   :  { %17024 = vmatpush1.bf16.msra.mxu0 %v25238_v33  ;;  %18192 = vmatpush1.bf16.msra.mxu1 %v25241_v34  ;;  %v25310_v33 = vld [vmem:[#allocation7 + $0x1760] ss:$16 sps:$4 sm:$0xff]   ;;  %v25313_v34 = vld [vmem:[#allocation7 + $0x1768] ss:$16 sps:$4 sm:$0xff]  }
 0x72d   :  { %17066 = vmatprep.subr.bf16.mxu0 %v25246_v35  ;;  %18234 = vmatprep.subr.bf16.mxu1 %v25249_v36  ;;  %v25318_v35 = vld [vmem:[#allocation7 + $0x1784] ss:$16 sps:$4 sm:$0xff]   ;;  %v25321_v36 = vld [vmem:[#allocation7 + $0x178c] ss:$16 sps:$4 sm:$0xff]  }
 0x72f   :  { %17026 = vmatmul.mubr.bf16.vlgmr.msra.gmra.mrb[0].mxu0 %v20285_v37  ;;  %18194 = vmatmul.mubr.bf16.vlgmr.msra.gmra.mrb[0].mxu1 %v20285_v37  ;;  %v25316_v37 = vld [vmem:[#allocation7 + $0x1780] ss:$16 sps:$4 sm:$0xff]  }
 0x730   :  { %17067 = vmatpush1.bf16.msra.mxu0 %v25244_v40  ;;  %18235 = vmatpush1.bf16.msra.mxu1 %v25247_v41  ;;  %v25327_v40 = vld [vmem:[#allocation7 + $0x17ac] ss:$16 sps:$4 sm:$0xff]   ;;  %v25322_v41 = vld [vmem:[#allocation7 + $0x17a0] ss:$16 sps:$4 sm:$0xff]  }
 0x731   :  { %17068 = vmatprep.subr.bf16.mxu0 %v25252_v42  ;;  %18236 = vmatprep.subr.bf16.mxu1 %v25255_v43  ;;  %v25325_v42 = vld [vmem:[#allocation7 + $0x17a8] ss:$16 sps:$4 sm:$0xff]   ;;  %v25330_v43 = vld [vmem:[#allocation7 + $0x17c4] ss:$16 sps:$4 sm:$0xff]  }
 0x732   :  { %17035 = vmatprep.mubr.bf16.mxu0 %v20318_v44  ;;  %18203 = vmatprep.mubr.bf16.mxu1 %v20318_v44  ;;  %v25333_v44 = vld [vmem:[#allocation7 + $0x17cc] ss:$16 sps:$4 sm:$0xff]  }
 0x734   :  { %17069 = vmatpush1.bf16.msra.mxu0 %v25250_v45  ;;  %18237 = vmatpush1.bf16.msra.mxu1 %v25253_v46  ;;  %v25328_v45 = vld [vmem:[#allocation7 + $0x17c0] ss:$16 sps:$4 sm:$0xff]   ;;  %v25331_v46 = vld [vmem:[#allocation7 + $0x17c8] ss:$16 sps:$4 sm:$0xff]  }
 0x735   :  { %17070 = vmatprep.subr.bf16.mxu0 %v25258_v47  ;;  %18238 = vmatprep.subr.bf16.mxu1 %v25261_v48  ;;  %v25336_v47 = vld [vmem:[#allocation7 + $0x17e4] ss:$16 sps:$4 sm:$0xff]   ;;  %v25339_v48 = vld [vmem:[#allocation7 + $0x17ec] ss:$16 sps:$4 sm:$0xff]  }
 0x737   :  { %17036 = vmatmul.mubr.bf16.gmra.mrb[4].mxu0 %v20317_v49  ;;  %18204 = vmatmul.mubr.bf16.gmra.mrb[4].mxu1 %v20317_v49  ;;  %v25334_v49 = vld [vmem:[#allocation7 + $0x17e0] ss:$16 sps:$4 sm:$0xff]  }
 0x738   :  { %17071 = vmatpush1.bf16.msra.mxu0 %v25256_v52  ;;  %18239 = vmatpush1.bf16.msra.mxu1 %v25259_v53  ;;  %v25345_v52 = vld [vmem:[#allocation7 + $0x180c] ss:$16 sps:$4 sm:$0xff]   ;;  %v20287_v53 = vcombine.low %v26268_v10, %v26270_v11  ;;  %v25361_v10 = vld [vmem:[#allocation7 + $0x1868] ss:$16 sps:$4 sm:$0xff]   ;;  %v25366_v11 = vld [vmem:[#allocation7 + $0x1884] ss:$16 sps:$4 sm:$0xff]  }
 0x739   :  { %17072 = vmatprep.subr.bf16.mxu0 %v25264_v54  ;;  %18240 = vmatprep.subr.bf16.mxu1 %v25267_v55  ;;  %v146_v54 = vld [vmem:[#allocation2 + $0x158] sm:$0xff] }
 0x73a   :  { %17045 = vmatprep.mubr.bf16.mxu0 %v20350_v56  ;;  %18213 = vmatprep.mubr.bf16.mxu1 %v20350_v56  ;;  %v162_v55 = vld [vmem:[#allocation2 + $0x1d8] sm:$0xff]  ;;  %v25340_v56 = vld [vmem:[#allocation7 + $0x1800] ss:$16 sps:$4 sm:$0xff]  }
 0x73c   :  { %17073 = vmatpush1.bf16.msra.mxu0 %v25262_v57  ;;  %18241 = vmatpush1.bf16.msra.mxu1 %v25265_v58  ;;  %v25343_v57 = vld [vmem:[#allocation7 + $0x1808] ss:$16 sps:$4 sm:$0xff]   ;;  %v25348_v58 = vld [vmem:[#allocation7 + $0x1824] ss:$16 sps:$4 sm:$0xff]  }
 0x73d   :  { %17074 = vmatprep.subr.bf16.mxu0 %v25270_v59  ;;  %18242 = vmatprep.subr.bf16.mxu1 %v25273_v60  ;;  %v25351_v59 = vld [vmem:[#allocation7 + $0x182c] ss:$16 sps:$4 sm:$0xff]   ;;  %v20320_v60 = vcombine.high %v146_v54, %v162_v55 }
 0x73f   :  { %17046 = vmatmul.mubr.bf16.gmra.mrb[8].mxu0 %v20349_v61  ;;  %18214 = vmatmul.mubr.bf16.gmra.mrb[8].mxu1 %v20349_v61  ;;  %v25346_v61 = vld [vmem:[#allocation7 + $0x1820] ss:$16 sps:$4 sm:$0xff]  }
 0x740   :  { %17075 = vmatpush1.bf16.msra.mxu0 %v25268_v0  ;;  %18243 = vmatpush1.bf16.msra.mxu1 %v25271_v1  ;;  %v25357_v0 = vld [vmem:[#allocation7 + $0x184c] ss:$16 sps:$4 sm:$0xff]   ;;  %v20319_v1 = vcombine.low %v146_v54, %v162_v55  ;;  %v25415_v54 = vld [vmem:[#allocation7 + $0x1988] ss:$16 sps:$4 sm:$0xff]   ;;  %v25420_v55 = vld [vmem:[#allocation7 + $0x19a4] ss:$16 sps:$4 sm:$0xff]  }
 0x741   :  { %17076 = vmatprep.subr.bf16.mxu0 %v25276_v2  ;;  %18244 = vmatprep.subr.bf16.mxu1 %v25279_v3  ;;  %v178_v2 = vld [vmem:[#allocation2 + $0x258] sm:$0xff] }
 0x742   :  { %17055 = vmatprep.mubr.bf16.mxu0 %v20382_v4  ;;  %18223 = vmatprep.mubr.bf16.mxu1 %v20382_v4  ;;  %v194_v3 = vld [vmem:[#allocation2 + $0x2d8] sm:$0xff]  ;;  %v25352_v4 = vld [vmem:[#allocation7 + $0x1840] ss:$16 sps:$4 sm:$0xff]  }
 0x744   :  { %17077 = vmatpush1.bf16.msra.mxu0 %v25274_v5  ;;  %18245 = vmatpush1.bf16.msra.mxu1 %v25277_v6  ;;  %v25355_v5 = vld [vmem:[#allocation7 + $0x1848] ss:$16 sps:$4 sm:$0xff]   ;;  %v25360_v6 = vld [vmem:[#allocation7 + $0x1864] ss:$16 sps:$4 sm:$0xff]  }
 0x745   :  { %17078 = vmatprep.subr.bf16.mxu0 %v25282_v7  ;;  %18246 = vmatprep.subr.bf16.mxu1 %v25285_v8  ;;  %v25363_v7 = vld [vmem:[#allocation7 + $0x186c] ss:$16 sps:$4 sm:$0xff]   ;;  %v20352_v8 = vcombine.high %v178_v2, %v194_v3 }
 0x747   :  { %17056 = vmatmul.mubr.bf16.gmra.mrb[12].mxu0 %v20381_v9  ;;  %18224 = vmatmul.mubr.bf16.gmra.mrb[12].mxu1 %v20381_v9  ;;  %v25358_v9 = vld [vmem:[#allocation7 + $0x1860] ss:$16 sps:$4 sm:$0xff]  }
 0x748   :  { %17079 = vmatpush1.bf16.msra.mxu0 %v25280_v12  ;;  %18247 = vmatpush1.bf16.msra.mxu1 %v25283_v13  ;;  %v25369_v12 = vld [vmem:[#allocation7 + $0x188c] ss:$16 sps:$4 sm:$0xff]   ;;  %v20351_v13 = vcombine.low %v178_v2, %v194_v3  ;;  %v25433_v2 = vld [vmem:[#allocation7 + $0x19e8] ss:$16 sps:$4 sm:$0xff]   ;;  %v25438_v3 = vld [vmem:[#allocation7 + $0x1a04] ss:$16 sps:$4 sm:$0xff]  }
 0x749   :  { %17080 = vmatprep.subr.bf16.mxu0 %v25288_v14  ;;  %18248 = vmatprep.subr.bf16.mxu1 %v25291_v15  ;;  %v210_v14 = vld [vmem:[#allocation2 + $0x358] sm:$0xff] }
 0x74a   :  { %17098 = vmatprep.mubr.bf16.mxu0 %v20288_v16  ;;  %18266 = vmatprep.mubr.bf16.mxu1 %v20288_v16  ;;  %v226_v15 = vld [vmem:[#allocation2 + $0x3d8] sm:$0x33]  ;;  %v25364_v16 = vld [vmem:[#allocation7 + $0x1880] ss:$16 sps:$4 sm:$0xff]  }
 0x74c   :  { %17081 = vmatpush1.bf16.msra.mxu0 %v25286_v17  ;;  %18249 = vmatpush1.bf16.msra.mxu1 %v25289_v18  ;;  %v25367_v17 = vld [vmem:[#allocation7 + $0x1888] ss:$16 sps:$4 sm:$0xff]   ;;  %v25372_v18 = vld [vmem:[#allocation7 + $0x18a4] ss:$16 sps:$4 sm:$0xff]  }
 0x74d   :  { %17082 = vmatprep.subr.bf16.mxu0 %v25294_v19  ;;  %18250 = vmatprep.subr.bf16.mxu1 %v25297_v20  ;;  %v25375_v19 = vld [vmem:[#allocation7 + $0x18ac] ss:$16 sps:$4 sm:$0xff]   ;;  %v20384_v20 = vcombine.high %v210_v14, %v226_v15 }
 0x750   :  { %17083 = vmatpush1.bf16.msra.mxu0 %v25292_v21  ;;  %18251 = vmatpush1.bf16.msra.mxu1 %v25295_v22  ;;  %v25370_v21 = vld [vmem:[#allocation7 + $0x18a0] ss:$16 sps:$4 sm:$0xff]   ;;  %v25373_v22 = vld [vmem:[#allocation7 + $0x18a8] ss:$16 sps:$4 sm:$0xff]  }
 0x751   :  { %17084 = vmatprep.subr.bf16.mxu0 %v25300_v23  ;;  %18252 = vmatprep.subr.bf16.mxu1 %v25303_v24  ;;  %v25378_v23 = vld [vmem:[#allocation7 + $0x18c4] ss:$16 sps:$4 sm:$0xff]   ;;  %v25381_v24 = vld [vmem:[#allocation7 + $0x18cc] ss:$16 sps:$4 sm:$0xff]  }
 0x754   :  { %17085 = vmatpush1.bf16.msra.mxu0 %v25298_v25  ;;  %18253 = vmatpush1.bf16.msra.mxu1 %v25301_v26  ;;  %v20383_v25 = vcombine.low %v210_v14, %v226_v15  ;;  %v26276_v26 = vld [vmem:[#allocation2 + $0x60] sm:$0xff]  ;;  %v25445_v14 = vld [vmem:[#allocation7 + $0x1a28] ss:$16 sps:$4 sm:$0xff]  }
 0x755   :  { %17086 = vmatprep.subr.bf16.mxu0 %v25306_v27  ;;  %18254 = vmatprep.subr.bf16.mxu1 %v25309_v28  ;;  %v26278_v27 = vld [vmem:[#allocation2 + $0xe0] sm:$0xff] }
 0x756   :  { %v25376_v28 = vld [vmem:[#allocation7 + $0x18c0] ss:$16 sps:$4 sm:$0xff]   ;;  %v25450_v15 = vld [vmem:[#allocation7 + $0x1a44] ss:$16 sps:$4 sm:$0xff]  }
 0x758   :  { %17087 = vmatpush1.bf16.msra.mxu0 %v25304_v29  ;;  %18255 = vmatpush1.bf16.msra.mxu1 %v25307_v30  ;;  %v25379_v29 = vld [vmem:[#allocation7 + $0x18c8] ss:$16 sps:$4 sm:$0xff]   ;;  %v25384_v30 = vld [vmem:[#allocation7 + $0x18e4] ss:$16 sps:$4 sm:$0xff]  }
 0x759   :  { %17088 = vmatprep.subr.bf16.mxu0 %v25312_v31  ;;  %18256 = vmatprep.subr.bf16.mxu1 %v25315_v32  ;;  %v25387_v31 = vld [vmem:[#allocation7 + $0x18ec] ss:$16 sps:$4 sm:$0xff]   ;;  %v20290_v32 = vcombine.high %v26276_v26, %v26278_v27 }
 0x75c   :  { %17089 = vmatpush1.bf16.msra.mxu0 %v25310_v33  ;;  %18257 = vmatpush1.bf16.msra.mxu1 %v25313_v34  ;;  %v25382_v33 = vld [vmem:[#allocation7 + $0x18e0] ss:$16 sps:$4 sm:$0xff]   ;;  %v25385_v34 = vld [vmem:[#allocation7 + $0x18e8] ss:$16 sps:$4 sm:$0xff]  }
 0x75d   :  { %17090 = vmatprep.subr.bf16.mxu0 %v25318_v35  ;;  %18258 = vmatprep.subr.bf16.mxu1 %v25321_v36  ;;  %v25390_v35 = vld [vmem:[#allocation7 + $0x1904] ss:$16 sps:$4 sm:$0xff]   ;;  %v25393_v36 = vld [vmem:[#allocation7 + $0x190c] ss:$16 sps:$4 sm:$0xff]  }
 0x760   :  { %17091 = vmatpush1.bf16.msra.mxu0 %v25316_v37  ;;  %18259 = vmatpush1.bf16.msra.mxu1 %v25319_v38  ;;  %v25388_v37 = vld [vmem:[#allocation7 + $0x1900] ss:$16 sps:$4 sm:$0xff]   ;;  %v25391_v38 = vld [vmem:[#allocation7 + $0x1908] ss:$16 sps:$4 sm:$0xff]  }
 0x761   :  { %17092 = vmatprep.subr.bf16.mxu0 %v25324_v39  ;;  %18260 = vmatprep.subr.bf16.mxu1 %v25327_v40  ;;  %v25396_v39 = vld [vmem:[#allocation7 + $0x1924] ss:$16 sps:$4 sm:$0xff]   ;;  %v25399_v40 = vld [vmem:[#allocation7 + $0x192c] ss:$16 sps:$4 sm:$0xff]  }
 0x764   :  { %17093 = vmatpush1.bf16.msra.mxu0 %v25322_v41  ;;  %18261 = vmatpush1.bf16.msra.mxu1 %v25325_v42  ;;  %v25394_v41 = vld [vmem:[#allocation7 + $0x1920] ss:$16 sps:$4 sm:$0xff]   ;;  %v25397_v42 = vld [vmem:[#allocation7 + $0x1928] ss:$16 sps:$4 sm:$0xff]  }
 0x765   :  { %17094 = vmatprep.subr.bf16.mxu0 %v25330_v43  ;;  %18262 = vmatprep.subr.bf16.mxu1 %v25333_v44  ;;  %v25402_v43 = vld [vmem:[#allocation7 + $0x1944] ss:$16 sps:$4 sm:$0xff]   ;;  %v25405_v44 = vld [vmem:[#allocation7 + $0x194c] ss:$16 sps:$4 sm:$0xff]  }
 0x768   :  { %17095 = vmatpush1.bf16.msra.mxu0 %v25328_v45  ;;  %18263 = vmatpush1.bf16.msra.mxu1 %v25331_v46  ;;  %v25400_v45 = vld [vmem:[#allocation7 + $0x1940] ss:$16 sps:$4 sm:$0xff]   ;;  %v25403_v46 = vld [vmem:[#allocation7 + $0x1948] ss:$16 sps:$4 sm:$0xff]  }
 0x769   :  { %17096 = vmatprep.subr.bf16.mxu0 %v25336_v47  ;;  %18264 = vmatprep.subr.bf16.mxu1 %v25339_v48  ;;  %v25408_v47 = vld [vmem:[#allocation7 + $0x1964] ss:$16 sps:$4 sm:$0xff]   ;;  %v25411_v48 = vld [vmem:[#allocation7 + $0x196c] ss:$16 sps:$4 sm:$0xff]  }
 0x76c   :  { %17097 = vmatpush1.bf16.msra.mxu0 %v25334_v49  ;;  %18265 = vmatpush1.bf16.msra.mxu1 %v25337_v50  ;;  %v25406_v49 = vld [vmem:[#allocation7 + $0x1960] ss:$16 sps:$4 sm:$0xff]   ;;  %v25409_v50 = vld [vmem:[#allocation7 + $0x1968] ss:$16 sps:$4 sm:$0xff]  }
 0x76d   :  { %17139 = vmatprep.subr.bf16.mxu0 %v25342_v51  ;;  %18307 = vmatprep.subr.bf16.mxu1 %v25345_v52  ;;  %v25414_v51 = vld [vmem:[#allocation7 + $0x1984] ss:$16 sps:$4 sm:$0xff]   ;;  %v25417_v52 = vld [vmem:[#allocation7 + $0x198c] ss:$16 sps:$4 sm:$0xff]  }
 0x76f   :  { %17099 = vmatmul.mubr.bf16.vlgmr.msra.gmra.mrb[0].mxu0 %v20287_v53  ;;  %18267 = vmatmul.mubr.bf16.vlgmr.msra.gmra.mrb[0].mxu1 %v20287_v53  ;;  %v25412_v53 = vld [vmem:[#allocation7 + $0x1980] ss:$16 sps:$4 sm:$0xff]  }
 0x770   :  { %17140 = vmatpush1.bf16.msra.mxu0 %v25340_v56  ;;  %18308 = vmatpush1.bf16.msra.mxu1 %v25343_v57  ;;  %v25423_v56 = vld [vmem:[#allocation7 + $0x19ac] ss:$16 sps:$4 sm:$0xff]   ;;  %v25418_v57 = vld [vmem:[#allocation7 + $0x19a0] ss:$16 sps:$4 sm:$0xff]  }
 0x771   :  { %17141 = vmatprep.subr.bf16.mxu0 %v25348_v58  ;;  %18309 = vmatprep.subr.bf16.mxu1 %v25351_v59  ;;  %v25421_v58 = vld [vmem:[#allocation7 + $0x19a8] ss:$16 sps:$4 sm:$0xff]   ;;  %v25426_v59 = vld [vmem:[#allocation7 + $0x19c4] ss:$16 sps:$4 sm:$0xff]  }
 0x772   :  { %17108 = vmatprep.mubr.bf16.mxu0 %v20320_v60  ;;  %18276 = vmatprep.mubr.bf16.mxu1 %v20320_v60  ;;  %v25429_v60 = vld [vmem:[#allocation7 + $0x19cc] ss:$16 sps:$4 sm:$0xff]  }
 0x774   :  { %17142 = vmatpush1.bf16.msra.mxu0 %v25346_v61  ;;  %18310 = vmatpush1.bf16.msra.mxu1 %v25349_v62  ;;  %v25424_v61 = vld [vmem:[#allocation7 + $0x19c0] ss:$16 sps:$4 sm:$0xff]   ;;  %v25427_v62 = vld [vmem:[#allocation7 + $0x19c8] ss:$16 sps:$4 sm:$0xff]  }
 0x775   :  { %17143 = vmatprep.subr.bf16.mxu0 %v25354_v63  ;;  %18311 = vmatprep.subr.bf16.mxu1 %v25357_v0  ;;  %v25432_v63 = vld [vmem:[#allocation7 + $0x19e4] ss:$16 sps:$4 sm:$0xff]   ;;  %v25435_v0 = vld [vmem:[#allocation7 + $0x19ec] ss:$16 sps:$4 sm:$0xff]  }
 0x777   :  { %17109 = vmatmul.mubr.bf16.gmra.mrb[4].mxu0 %v20319_v1  ;;  %18277 = vmatmul.mubr.bf16.gmra.mrb[4].mxu1 %v20319_v1  ;;  %v25430_v1 = vld [vmem:[#allocation7 + $0x19e0] ss:$16 sps:$4 sm:$0xff]  }
 0x778   :  { %17144 = vmatpush1.bf16.msra.mxu0 %v25352_v4  ;;  %18312 = vmatpush1.bf16.msra.mxu1 %v25355_v5  ;;  %v25441_v4 = vld [vmem:[#allocation7 + $0x1a0c] ss:$16 sps:$4 sm:$0xff]   ;;  %v20289_v5 = vcombine.low %v26276_v26, %v26278_v27  ;;  %v25457_v26 = vld [vmem:[#allocation7 + $0x1a68] ss:$16 sps:$4 sm:$0xff]   ;;  %v25462_v27 = vld [vmem:[#allocation7 + $0x1a84] ss:$16 sps:$4 sm:$0xff]  }
 0x779   :  { %17145 = vmatprep.subr.bf16.mxu0 %v25360_v6  ;;  %18313 = vmatprep.subr.bf16.mxu1 %v25363_v7  ;;  %v147_v6 = vld [vmem:[#allocation2 + $0x160] sm:$0xff] }
 0x77a   :  { %17118 = vmatprep.mubr.bf16.mxu0 %v20352_v8  ;;  %18286 = vmatprep.mubr.bf16.mxu1 %v20352_v8  ;;  %v163_v7 = vld [vmem:[#allocation2 + $0x1e0] sm:$0xff] }
 0x77b   :  { %v25436_v8 = vld [vmem:[#allocation7 + $0x1a00] ss:$16 sps:$4 sm:$0xff]  }
 0x77c   :  { %17146 = vmatpush1.bf16.msra.mxu0 %v25358_v9  ;;  %18314 = vmatpush1.bf16.msra.mxu1 %v25361_v10  ;;  %v25439_v9 = vld [vmem:[#allocation7 + $0x1a08] ss:$16 sps:$4 sm:$0xff]   ;;  %v25444_v10 = vld [vmem:[#allocation7 + $0x1a24] ss:$16 sps:$4 sm:$0xff]  }
 0x77d   :  { %17147 = vmatprep.subr.bf16.mxu0 %v25366_v11  ;;  %18315 = vmatprep.subr.bf16.mxu1 %v25369_v12  ;;  %v25447_v11 = vld [vmem:[#allocation7 + $0x1a2c] ss:$16 sps:$4 sm:$0xff]   ;;  %v20322_v12 = vcombine.high %v147_v6, %v163_v7 }
 0x77f   :  { %17119 = vmatmul.mubr.bf16.gmra.mrb[8].mxu0 %v20351_v13  ;;  %18287 = vmatmul.mubr.bf16.gmra.mrb[8].mxu1 %v20351_v13  ;;  %v25442_v13 = vld [vmem:[#allocation7 + $0x1a20] ss:$16 sps:$4 sm:$0xff]  }
 0x780   :  { %17148 = vmatpush1.bf16.msra.mxu0 %v25364_v16  ;;  %18316 = vmatpush1.bf16.msra.mxu1 %v25367_v17  ;;  %v25453_v16 = vld [vmem:[#allocation7 + $0x1a4c] ss:$16 sps:$4 sm:$0xff]   ;;  %v20321_v17 = vcombine.low %v147_v6, %v163_v7  ;;  %v25511_v6 = vld [vmem:[#allocation7 + $0x1b88] ss:$16 sps:$4 sm:$0xff]   ;;  %v25516_v7 = vld [vmem:[#allocation7 + $0x1ba4] ss:$16 sps:$4 sm:$0xff]  }
 0x781   :  { %17149 = vmatprep.subr.bf16.mxu0 %v25372_v18  ;;  %18317 = vmatprep.subr.bf16.mxu1 %v25375_v19  ;;  %v179_v18 = vld [vmem:[#allocation2 + $0x260] sm:$0xff] }
 0x782   :  { %17128 = vmatprep.mubr.bf16.mxu0 %v20384_v20  ;;  %18296 = vmatprep.mubr.bf16.mxu1 %v20384_v20  ;;  %v195_v19 = vld [vmem:[#allocation2 + $0x2e0] sm:$0xff] }
 0x783   :  { %v25448_v20 = vld [vmem:[#allocation7 + $0x1a40] ss:$16 sps:$4 sm:$0xff]  }
 0x784   :  { %17150 = vmatpush1.bf16.msra.mxu0 %v25370_v21  ;;  %18318 = vmatpush1.bf16.msra.mxu1 %v25373_v22  ;;  %v25451_v21 = vld [vmem:[#allocation7 + $0x1a48] ss:$16 sps:$4 sm:$0xff]   ;;  %v25456_v22 = vld [vmem:[#allocation7 + $0x1a64] ss:$16 sps:$4 sm:$0xff]  }
 0x785   :  { %17151 = vmatprep.subr.bf16.mxu0 %v25378_v23  ;;  %18319 = vmatprep.subr.bf16.mxu1 %v25381_v24  ;;  %v25459_v23 = vld [vmem:[#allocation7 + $0x1a6c] ss:$16 sps:$4 sm:$0xff]   ;;  %v20354_v24 = vcombine.high %v179_v18, %v195_v19 }
 0x787   :  { %17129 = vmatmul.mubr.bf16.gmra.mrb[12].mxu0 %v20383_v25  ;;  %18297 = vmatmul.mubr.bf16.gmra.mrb[12].mxu1 %v20383_v25  ;;  %v25454_v25 = vld [vmem:[#allocation7 + $0x1a60] ss:$16 sps:$4 sm:$0xff]  }
 0x788   :  { %17152 = vmatpush1.bf16.msra.mxu0 %v25376_v28  ;;  %18320 = vmatpush1.bf16.msra.mxu1 %v25379_v29  ;;  %v25465_v28 = vld [vmem:[#allocation7 + $0x1a8c] ss:$16 sps:$4 sm:$0xff]   ;;  %v20353_v29 = vcombine.low %v179_v18, %v195_v19  ;;  %v25529_v18 = vld [vmem:[#allocation7 + $0x1be8] ss:$16 sps:$4 sm:$0xff]   ;;  %v25534_v19 = vld [vmem:[#allocation7 + $0x1c04] ss:$16 sps:$4 sm:$0xff]  }
 0x789   :  { %17153 = vmatprep.subr.bf16.mxu0 %v25384_v30  ;;  %18321 = vmatprep.subr.bf16.mxu1 %v25387_v31  ;;  %v211_v30 = vld [vmem:[#allocation2 + $0x360] sm:$0xff] }
 0x78a   :  { %17171 = vmatprep.mubr.bf16.mxu0 %v20290_v32  ;;  %18339 = vmatprep.mubr.bf16.mxu1 %v20290_v32  ;;  %v227_v31 = vld [vmem:[#allocation2 + $0x3e0] sm:$0x33] }
 0x78b   :  { %v25460_v32 = vld [vmem:[#allocation7 + $0x1a80] ss:$16 sps:$4 sm:$0xff]  }
 0x78c   :  { %17154 = vmatpush1.bf16.msra.mxu0 %v25382_v33  ;;  %18322 = vmatpush1.bf16.msra.mxu1 %v25385_v34  ;;  %v25463_v33 = vld [vmem:[#allocation7 + $0x1a88] ss:$16 sps:$4 sm:$0xff]   ;;  %v25468_v34 = vld [vmem:[#allocation7 + $0x1aa4] ss:$16 sps:$4 sm:$0xff]  }
 0x78d   :  { %17155 = vmatprep.subr.bf16.mxu0 %v25390_v35  ;;  %18323 = vmatprep.subr.bf16.mxu1 %v25393_v36  ;;  %v25471_v35 = vld [vmem:[#allocation7 + $0x1aac] ss:$16 sps:$4 sm:$0xff]   ;;  %v20386_v36 = vcombine.high %v211_v30, %v227_v31 }
 0x790   :  { %17156 = vmatpush1.bf16.msra.mxu0 %v25388_v37  ;;  %18324 = vmatpush1.bf16.msra.mxu1 %v25391_v38  ;;  %v25466_v37 = vld [vmem:[#allocation7 + $0x1aa0] ss:$16 sps:$4 sm:$0xff]   ;;  %v25469_v38 = vld [vmem:[#allocation7 + $0x1aa8] ss:$16 sps:$4 sm:$0xff]  }
 0x791   :  { %17157 = vmatprep.subr.bf16.mxu0 %v25396_v39  ;;  %18325 = vmatprep.subr.bf16.mxu1 %v25399_v40  ;;  %v25474_v39 = vld [vmem:[#allocation7 + $0x1ac4] ss:$16 sps:$4 sm:$0xff]   ;;  %v25477_v40 = vld [vmem:[#allocation7 + $0x1acc] ss:$16 sps:$4 sm:$0xff]  }
 0x794   :  { %17158 = vmatpush1.bf16.msra.mxu0 %v25394_v41  ;;  %18326 = vmatpush1.bf16.msra.mxu1 %v25397_v42  ;;  %v20385_v41 = vcombine.low %v211_v30, %v227_v31  ;;  %v26284_v42 = vld [vmem:[#allocation2 + $0x68] sm:$0xff]  ;;  %v25546_v31 = vld [vmem:[#allocation7 + $0x1c44] ss:$16 sps:$4 sm:$0xff]  }
 0x795   :  { %17159 = vmatprep.subr.bf16.mxu0 %v25402_v43  ;;  %18327 = vmatprep.subr.bf16.mxu1 %v25405_v44  ;;  %v26286_v43 = vld [vmem:[#allocation2 + $0xe8] sm:$0xff]  ;;  %v25472_v44 = vld [vmem:[#allocation7 + $0x1ac0] ss:$16 sps:$4 sm:$0xff]  }
 0x796   :  { %v25541_v30 = vld [vmem:[#allocation7 + $0x1c28] ss:$16 sps:$4 sm:$0xff]  }
 0x798   :  { %17160 = vmatpush1.bf16.msra.mxu0 %v25400_v45  ;;  %18328 = vmatpush1.bf16.msra.mxu1 %v25403_v46  ;;  %v25475_v45 = vld [vmem:[#allocation7 + $0x1ac8] ss:$16 sps:$4 sm:$0xff]   ;;  %v25480_v46 = vld [vmem:[#allocation7 + $0x1ae4] ss:$16 sps:$4 sm:$0xff]  }
 0x799   :  { %17161 = vmatprep.subr.bf16.mxu0 %v25408_v47  ;;  %18329 = vmatprep.subr.bf16.mxu1 %v25411_v48  ;;  %v25483_v47 = vld [vmem:[#allocation7 + $0x1aec] ss:$16 sps:$4 sm:$0xff]   ;;  %v20292_v48 = vcombine.high %v26284_v42, %v26286_v43 }
 0x79c   :  { %17162 = vmatpush1.bf16.msra.mxu0 %v25406_v49  ;;  %18330 = vmatpush1.bf16.msra.mxu1 %v25409_v50  ;;  %v25478_v49 = vld [vmem:[#allocation7 + $0x1ae0] ss:$16 sps:$4 sm:$0xff]   ;;  %v25481_v50 = vld [vmem:[#allocation7 + $0x1ae8] ss:$16 sps:$4 sm:$0xff]  }
 0x79d   :  { %17163 = vmatprep.subr.bf16.mxu0 %v25414_v51  ;;  %18331 = vmatprep.subr.bf16.mxu1 %v25417_v52  ;;  %v25486_v51 = vld [vmem:[#allocation7 + $0x1b04] ss:$16 sps:$4 sm:$0xff]   ;;  %v25489_v52 = vld [vmem:[#allocation7 + $0x1b0c] ss:$16 sps:$4 sm:$0xff]  }
 0x7a0   :  { %17164 = vmatpush1.bf16.msra.mxu0 %v25412_v53  ;;  %18332 = vmatpush1.bf16.msra.mxu1 %v25415_v54  ;;  %v25484_v53 = vld [vmem:[#allocation7 + $0x1b00] ss:$16 sps:$4 sm:$0xff]   ;;  %v25487_v54 = vld [vmem:[#allocation7 + $0x1b08] ss:$16 sps:$4 sm:$0xff]  }
 0x7a1   :  { %17165 = vmatprep.subr.bf16.mxu0 %v25420_v55  ;;  %18333 = vmatprep.subr.bf16.mxu1 %v25423_v56  ;;  %v25492_v55 = vld [vmem:[#allocation7 + $0x1b24] ss:$16 sps:$4 sm:$0xff]   ;;  %v25495_v56 = vld [vmem:[#allocation7 + $0x1b2c] ss:$16 sps:$4 sm:$0xff]  }
 0x7a4   :  { %17166 = vmatpush1.bf16.msra.mxu0 %v25418_v57  ;;  %18334 = vmatpush1.bf16.msra.mxu1 %v25421_v58  ;;  %v25490_v57 = vld [vmem:[#allocation7 + $0x1b20] ss:$16 sps:$4 sm:$0xff]   ;;  %v25493_v58 = vld [vmem:[#allocation7 + $0x1b28] ss:$16 sps:$4 sm:$0xff]  }
 0x7a5   :  { %17167 = vmatprep.subr.bf16.mxu0 %v25426_v59  ;;  %18335 = vmatprep.subr.bf16.mxu1 %v25429_v60  ;;  %v25498_v59 = vld [vmem:[#allocation7 + $0x1b44] ss:$16 sps:$4 sm:$0xff]   ;;  %v25501_v60 = vld [vmem:[#allocation7 + $0x1b4c] ss:$16 sps:$4 sm:$0xff]  }
 0x7a8   :  { %17168 = vmatpush1.bf16.msra.mxu0 %v25424_v61  ;;  %18336 = vmatpush1.bf16.msra.mxu1 %v25427_v62  ;;  %v25496_v61 = vld [vmem:[#allocation7 + $0x1b40] ss:$16 sps:$4 sm:$0xff]   ;;  %v25499_v62 = vld [vmem:[#allocation7 + $0x1b48] ss:$16 sps:$4 sm:$0xff]  }
 0x7a9   :  { %17169 = vmatprep.subr.bf16.mxu0 %v25432_v63  ;;  %18337 = vmatprep.subr.bf16.mxu1 %v25435_v0  ;;  %v25504_v63 = vld [vmem:[#allocation7 + $0x1b64] ss:$16 sps:$4 sm:$0xff]   ;;  %v25507_v0 = vld [vmem:[#allocation7 + $0x1b6c] ss:$16 sps:$4 sm:$0xff]  }
 0x7ac   :  { %17170 = vmatpush1.bf16.msra.mxu0 %v25430_v1  ;;  %18338 = vmatpush1.bf16.msra.mxu1 %v25433_v2  ;;  %v25502_v1 = vld [vmem:[#allocation7 + $0x1b60] ss:$16 sps:$4 sm:$0xff]   ;;  %v25505_v2 = vld [vmem:[#allocation7 + $0x1b68] ss:$16 sps:$4 sm:$0xff]  }
 0x7ad   :  { %17212 = vmatprep.subr.bf16.mxu0 %v25438_v3  ;;  %18380 = vmatprep.subr.bf16.mxu1 %v25441_v4  ;;  %v25510_v3 = vld [vmem:[#allocation7 + $0x1b84] ss:$16 sps:$4 sm:$0xff]   ;;  %v25513_v4 = vld [vmem:[#allocation7 + $0x1b8c] ss:$16 sps:$4 sm:$0xff]  }
 0x7af   :  { %17172 = vmatmul.mubr.bf16.vlgmr.msra.gmra.mrb[0].mxu0 %v20289_v5  ;;  %18340 = vmatmul.mubr.bf16.vlgmr.msra.gmra.mrb[0].mxu1 %v20289_v5  ;;  %v25508_v5 = vld [vmem:[#allocation7 + $0x1b80] ss:$16 sps:$4 sm:$0xff]  }
 0x7b0   :  { %17213 = vmatpush1.bf16.msra.mxu0 %v25436_v8  ;;  %18381 = vmatpush1.bf16.msra.mxu1 %v25439_v9  ;;  %v25519_v8 = vld [vmem:[#allocation7 + $0x1bac] ss:$16 sps:$4 sm:$0xff]   ;;  %v25514_v9 = vld [vmem:[#allocation7 + $0x1ba0] ss:$16 sps:$4 sm:$0xff]  }
 0x7b1   :  { %17214 = vmatprep.subr.bf16.mxu0 %v25444_v10  ;;  %18382 = vmatprep.subr.bf16.mxu1 %v25447_v11  ;;  %v25517_v10 = vld [vmem:[#allocation7 + $0x1ba8] ss:$16 sps:$4 sm:$0xff]   ;;  %v25522_v11 = vld [vmem:[#allocation7 + $0x1bc4] ss:$16 sps:$4 sm:$0xff]  }
 0x7b2   :  { %17181 = vmatprep.mubr.bf16.mxu0 %v20322_v12  ;;  %18349 = vmatprep.mubr.bf16.mxu1 %v20322_v12  ;;  %v25525_v12 = vld [vmem:[#allocation7 + $0x1bcc] ss:$16 sps:$4 sm:$0xff]  }
 0x7b4   :  { %17215 = vmatpush1.bf16.msra.mxu0 %v25442_v13  ;;  %18383 = vmatpush1.bf16.msra.mxu1 %v25445_v14  ;;  %v25520_v13 = vld [vmem:[#allocation7 + $0x1bc0] ss:$16 sps:$4 sm:$0xff]   ;;  %v25523_v14 = vld [vmem:[#allocation7 + $0x1bc8] ss:$16 sps:$4 sm:$0xff]  }
 0x7b5   :  { %17216 = vmatprep.subr.bf16.mxu0 %v25450_v15  ;;  %18384 = vmatprep.subr.bf16.mxu1 %v25453_v16  ;;  %v25528_v15 = vld [vmem:[#allocation7 + $0x1be4] ss:$16 sps:$4 sm:$0xff]   ;;  %v25531_v16 = vld [vmem:[#allocation7 + $0x1bec] ss:$16 sps:$4 sm:$0xff]  }
 0x7b7   :  { %17182 = vmatmul.mubr.bf16.gmra.mrb[4].mxu0 %v20321_v17  ;;  %18350 = vmatmul.mubr.bf16.gmra.mrb[4].mxu1 %v20321_v17  ;;  %v25526_v17 = vld [vmem:[#allocation7 + $0x1be0] ss:$16 sps:$4 sm:$0xff]  }
 0x7b8   :  { %17217 = vmatpush1.bf16.msra.mxu0 %v25448_v20  ;;  %18385 = vmatpush1.bf16.msra.mxu1 %v25451_v21  ;;  %v25537_v20 = vld [vmem:[#allocation7 + $0x1c0c] ss:$16 sps:$4 sm:$0xff]   ;;  %v20291_v21 = vcombine.low %v26284_v42, %v26286_v43  ;;  %v25553_v42 = vld [vmem:[#allocation7 + $0x1c68] ss:$16 sps:$4 sm:$0xff]   ;;  %v25558_v43 = vld [vmem:[#allocation7 + $0x1c84] ss:$16 sps:$4 sm:$0xff]  }
 0x7b9   :  { %17218 = vmatprep.subr.bf16.mxu0 %v25456_v22  ;;  %18386 = vmatprep.subr.bf16.mxu1 %v25459_v23  ;;  %v148_v22 = vld [vmem:[#allocation2 + $0x168] sm:$0xff] }
 0x7ba   :  { %17191 = vmatprep.mubr.bf16.mxu0 %v20354_v24  ;;  %18359 = vmatprep.mubr.bf16.mxu1 %v20354_v24  ;;  %v164_v23 = vld [vmem:[#allocation2 + $0x1e8] sm:$0xff]  ;;  %v25532_v24 = vld [vmem:[#allocation7 + $0x1c00] ss:$16 sps:$4 sm:$0xff]  }
 0x7bc   :  { %17219 = vmatpush1.bf16.msra.mxu0 %v25454_v25  ;;  %18387 = vmatpush1.bf16.msra.mxu1 %v25457_v26  ;;  %v25535_v25 = vld [vmem:[#allocation7 + $0x1c08] ss:$16 sps:$4 sm:$0xff]   ;;  %v25540_v26 = vld [vmem:[#allocation7 + $0x1c24] ss:$16 sps:$4 sm:$0xff]  }
 0x7bd   :  { %17220 = vmatprep.subr.bf16.mxu0 %v25462_v27  ;;  %18388 = vmatprep.subr.bf16.mxu1 %v25465_v28  ;;  %v25543_v27 = vld [vmem:[#allocation7 + $0x1c2c] ss:$16 sps:$4 sm:$0xff]   ;;  %v20324_v28 = vcombine.high %v148_v22, %v164_v23 }
 0x7bf   :  { %17192 = vmatmul.mubr.bf16.gmra.mrb[8].mxu0 %v20353_v29  ;;  %18360 = vmatmul.mubr.bf16.gmra.mrb[8].mxu1 %v20353_v29  ;;  %v25538_v29 = vld [vmem:[#allocation7 + $0x1c20] ss:$16 sps:$4 sm:$0xff]  }
 0x7c0   :  { %17221 = vmatpush1.bf16.msra.mxu0 %v25460_v32  ;;  %18389 = vmatpush1.bf16.msra.mxu1 %v25463_v33  ;;  %v25549_v32 = vld [vmem:[#allocation7 + $0x1c4c] ss:$16 sps:$4 sm:$0xff]   ;;  %v20323_v33 = vcombine.low %v148_v22, %v164_v23  ;;  %v25607_v22 = vld [vmem:[#allocation7 + $0x1d88] ss:$16 sps:$4 sm:$0xff]   ;;  %v25612_v23 = vld [vmem:[#allocation7 + $0x1da4] ss:$16 sps:$4 sm:$0xff]  }
 0x7c1   :  { %17222 = vmatprep.subr.bf16.mxu0 %v25468_v34  ;;  %18390 = vmatprep.subr.bf16.mxu1 %v25471_v35  ;;  %v180_v34 = vld [vmem:[#allocation2 + $0x268] sm:$0xff] }
 0x7c2   :  { %17201 = vmatprep.mubr.bf16.mxu0 %v20386_v36  ;;  %18369 = vmatprep.mubr.bf16.mxu1 %v20386_v36  ;;  %v196_v35 = vld [vmem:[#allocation2 + $0x2e8] sm:$0xff]  ;;  %v25544_v36 = vld [vmem:[#allocation7 + $0x1c40] ss:$16 sps:$4 sm:$0xff]  }
 0x7c4   :  { %17223 = vmatpush1.bf16.msra.mxu0 %v25466_v37  ;;  %18391 = vmatpush1.bf16.msra.mxu1 %v25469_v38  ;;  %v25547_v37 = vld [vmem:[#allocation7 + $0x1c48] ss:$16 sps:$4 sm:$0xff]   ;;  %v25552_v38 = vld [vmem:[#allocation7 + $0x1c64] ss:$16 sps:$4 sm:$0xff]  }
 0x7c5   :  { %17224 = vmatprep.subr.bf16.mxu0 %v25474_v39  ;;  %18392 = vmatprep.subr.bf16.mxu1 %v25477_v40  ;;  %v25555_v39 = vld [vmem:[#allocation7 + $0x1c6c] ss:$16 sps:$4 sm:$0xff]   ;;  %v20356_v40 = vcombine.high %v180_v34, %v196_v35 }
 0x7c7   :  { %17202 = vmatmul.mubr.bf16.gmra.mrb[12].mxu0 %v20385_v41  ;;  %18370 = vmatmul.mubr.bf16.gmra.mrb[12].mxu1 %v20385_v41  ;;  %v25550_v41 = vld [vmem:[#allocation7 + $0x1c60] ss:$16 sps:$4 sm:$0xff]  }
 0x7c8   :  { %17225 = vmatpush1.bf16.msra.mxu0 %v25472_v44  ;;  %18393 = vmatpush1.bf16.msra.mxu1 %v25475_v45  ;;  %v25561_v44 = vld [vmem:[#allocation7 + $0x1c8c] ss:$16 sps:$4 sm:$0xff]   ;;  %v20355_v45 = vcombine.low %v180_v34, %v196_v35  ;;  %v25625_v34 = vld [vmem:[#allocation7 + $0x1de8] ss:$16 sps:$4 sm:$0xff]   ;;  %v25630_v35 = vld [vmem:[#allocation7 + $0x1e04] ss:$16 sps:$4 sm:$0xff]  }
 0x7c9   :  { %17226 = vmatprep.subr.bf16.mxu0 %v25480_v46  ;;  %18394 = vmatprep.subr.bf16.mxu1 %v25483_v47  ;;  %v212_v46 = vld [vmem:[#allocation2 + $0x368] sm:$0xff] }
 0x7ca   :  { %17244 = vmatprep.mubr.bf16.mxu0 %v20292_v48  ;;  %18412 = vmatprep.mubr.bf16.mxu1 %v20292_v48  ;;  %v228_v47 = vld [vmem:[#allocation2 + $0x3e8] sm:$0x33]  ;;  %v25556_v48 = vld [vmem:[#allocation7 + $0x1c80] ss:$16 sps:$4 sm:$0xff]  }
 0x7cc   :  { %17227 = vmatpush1.bf16.msra.mxu0 %v25478_v49  ;;  %18395 = vmatpush1.bf16.msra.mxu1 %v25481_v50  ;;  %v25559_v49 = vld [vmem:[#allocation7 + $0x1c88] ss:$16 sps:$4 sm:$0xff]   ;;  %v25564_v50 = vld [vmem:[#allocation7 + $0x1ca4] ss:$16 sps:$4 sm:$0xff]  }
 0x7cd   :  { %17228 = vmatprep.subr.bf16.mxu0 %v25486_v51  ;;  %18396 = vmatprep.subr.bf16.mxu1 %v25489_v52  ;;  %v25567_v51 = vld [vmem:[#allocation7 + $0x1cac] ss:$16 sps:$4 sm:$0xff]   ;;  %v20388_v52 = vcombine.high %v212_v46, %v228_v47 }
 0x7d0   :  { %17229 = vmatpush1.bf16.msra.mxu0 %v25484_v53  ;;  %18397 = vmatpush1.bf16.msra.mxu1 %v25487_v54  ;;  %v25562_v53 = vld [vmem:[#allocation7 + $0x1ca0] ss:$16 sps:$4 sm:$0xff]   ;;  %v25565_v54 = vld [vmem:[#allocation7 + $0x1ca8] ss:$16 sps:$4 sm:$0xff]  }
 0x7d1   :  { %17230 = vmatprep.subr.bf16.mxu0 %v25492_v55  ;;  %18398 = vmatprep.subr.bf16.mxu1 %v25495_v56  ;;  %v25570_v55 = vld [vmem:[#allocation7 + $0x1cc4] ss:$16 sps:$4 sm:$0xff]   ;;  %v25573_v56 = vld [vmem:[#allocation7 + $0x1ccc] ss:$16 sps:$4 sm:$0xff]  }
 0x7d4   :  { %17231 = vmatpush1.bf16.msra.mxu0 %v25490_v57  ;;  %18399 = vmatpush1.bf16.msra.mxu1 %v25493_v58  ;;  %v20387_v57 = vcombine.low %v212_v46, %v228_v47  ;;  %v26292_v58 = vld [vmem:[#allocation2 + $0x70] sm:$0xff]  ;;  %v25637_v46 = vld [vmem:[#allocation7 + $0x1e28] ss:$16 sps:$4 sm:$0xff]  }
 0x7d5   :  { %17232 = vmatprep.subr.bf16.mxu0 %v25498_v59  ;;  %18400 = vmatprep.subr.bf16.mxu1 %v25501_v60  ;;  %v26294_v59 = vld [vmem:[#allocation2 + $0xf0] sm:$0xff] }
 0x7d6   :  { %v25568_v60 = vld [vmem:[#allocation7 + $0x1cc0] ss:$16 sps:$4 sm:$0xff]   ;;  %v25642_v47 = vld [vmem:[#allocation7 + $0x1e44] ss:$16 sps:$4 sm:$0xff]  }
 0x7d8   :  { %17233 = vmatpush1.bf16.msra.mxu0 %v25496_v61  ;;  %18401 = vmatpush1.bf16.msra.mxu1 %v25499_v62  ;;  %v25571_v61 = vld [vmem:[#allocation7 + $0x1cc8] ss:$16 sps:$4 sm:$0xff]   ;;  %v25576_v62 = vld [vmem:[#allocation7 + $0x1ce4] ss:$16 sps:$4 sm:$0xff]  }
 0x7d9   :  { %17234 = vmatprep.subr.bf16.mxu0 %v25504_v63  ;;  %18402 = vmatprep.subr.bf16.mxu1 %v25507_v0  ;;  %v25579_v63 = vld [vmem:[#allocation7 + $0x1cec] ss:$16 sps:$4 sm:$0xff]   ;;  %v20294_v0 = vcombine.high %v26292_v58, %v26294_v59 }
 0x7dc   :  { %17235 = vmatpush1.bf16.msra.mxu0 %v25502_v1  ;;  %18403 = vmatpush1.bf16.msra.mxu1 %v25505_v2  ;;  %v25574_v1 = vld [vmem:[#allocation7 + $0x1ce0] ss:$16 sps:$4 sm:$0xff]   ;;  %v25577_v2 = vld [vmem:[#allocation7 + $0x1ce8] ss:$16 sps:$4 sm:$0xff]  }
 0x7dd   :  { %17236 = vmatprep.subr.bf16.mxu0 %v25510_v3  ;;  %18404 = vmatprep.subr.bf16.mxu1 %v25513_v4  ;;  %v25582_v3 = vld [vmem:[#allocation7 + $0x1d04] ss:$16 sps:$4 sm:$0xff]   ;;  %v25585_v4 = vld [vmem:[#allocation7 + $0x1d0c] ss:$16 sps:$4 sm:$0xff]  }
 0x7e0   :  { %17237 = vmatpush1.bf16.msra.mxu0 %v25508_v5  ;;  %18405 = vmatpush1.bf16.msra.mxu1 %v25511_v6  ;;  %v25580_v5 = vld [vmem:[#allocation7 + $0x1d00] ss:$16 sps:$4 sm:$0xff]   ;;  %v25583_v6 = vld [vmem:[#allocation7 + $0x1d08] ss:$16 sps:$4 sm:$0xff]  }
 0x7e1   :  { %17238 = vmatprep.subr.bf16.mxu0 %v25516_v7  ;;  %18406 = vmatprep.subr.bf16.mxu1 %v25519_v8  ;;  %v25588_v7 = vld [vmem:[#allocation7 + $0x1d24] ss:$16 sps:$4 sm:$0xff]   ;;  %v25591_v8 = vld [vmem:[#allocation7 + $0x1d2c] ss:$16 sps:$4 sm:$0xff]  }
 0x7e4   :  { %17239 = vmatpush1.bf16.msra.mxu0 %v25514_v9  ;;  %18407 = vmatpush1.bf16.msra.mxu1 %v25517_v10  ;;  %v25586_v9 = vld [vmem:[#allocation7 + $0x1d20] ss:$16 sps:$4 sm:$0xff]   ;;  %v25589_v10 = vld [vmem:[#allocation7 + $0x1d28] ss:$16 sps:$4 sm:$0xff]  }
 0x7e5   :  { %17240 = vmatprep.subr.bf16.mxu0 %v25522_v11  ;;  %18408 = vmatprep.subr.bf16.mxu1 %v25525_v12  ;;  %v25594_v11 = vld [vmem:[#allocation7 + $0x1d44] ss:$16 sps:$4 sm:$0xff]   ;;  %v25597_v12 = vld [vmem:[#allocation7 + $0x1d4c] ss:$16 sps:$4 sm:$0xff]  }
 0x7e8   :  { %17241 = vmatpush1.bf16.msra.mxu0 %v25520_v13  ;;  %18409 = vmatpush1.bf16.msra.mxu1 %v25523_v14  ;;  %v25592_v13 = vld [vmem:[#allocation7 + $0x1d40] ss:$16 sps:$4 sm:$0xff]   ;;  %v25595_v14 = vld [vmem:[#allocation7 + $0x1d48] ss:$16 sps:$4 sm:$0xff]  }
 0x7e9   :  { %17242 = vmatprep.subr.bf16.mxu0 %v25528_v15  ;;  %18410 = vmatprep.subr.bf16.mxu1 %v25531_v16  ;;  %v25600_v15 = vld [vmem:[#allocation7 + $0x1d64] ss:$16 sps:$4 sm:$0xff]   ;;  %v25603_v16 = vld [vmem:[#allocation7 + $0x1d6c] ss:$16 sps:$4 sm:$0xff]  }
 0x7ec   :  { %17243 = vmatpush1.bf16.msra.mxu0 %v25526_v17  ;;  %18411 = vmatpush1.bf16.msra.mxu1 %v25529_v18  ;;  %v25598_v17 = vld [vmem:[#allocation7 + $0x1d60] ss:$16 sps:$4 sm:$0xff]   ;;  %v25601_v18 = vld [vmem:[#allocation7 + $0x1d68] ss:$16 sps:$4 sm:$0xff]  }
 0x7ed   :  { %17285 = vmatprep.subr.bf16.mxu0 %v25534_v19  ;;  %18453 = vmatprep.subr.bf16.mxu1 %v25537_v20  ;;  %v25606_v19 = vld [vmem:[#allocation7 + $0x1d84] ss:$16 sps:$4 sm:$0xff]   ;;  %v25609_v20 = vld [vmem:[#allocation7 + $0x1d8c] ss:$16 sps:$4 sm:$0xff]  }
 0x7ef   :  { %17245 = vmatmul.mubr.bf16.vlgmr.msra.gmra.mrb[0].mxu0 %v20291_v21  ;;  %18413 = vmatmul.mubr.bf16.vlgmr.msra.gmra.mrb[0].mxu1 %v20291_v21  ;;  %v25604_v21 = vld [vmem:[#allocation7 + $0x1d80] ss:$16 sps:$4 sm:$0xff]  }
 0x7f0   :  { %17286 = vmatpush1.bf16.msra.mxu0 %v25532_v24  ;;  %18454 = vmatpush1.bf16.msra.mxu1 %v25535_v25  ;;  %v25615_v24 = vld [vmem:[#allocation7 + $0x1dac] ss:$16 sps:$4 sm:$0xff]   ;;  %v25610_v25 = vld [vmem:[#allocation7 + $0x1da0] ss:$16 sps:$4 sm:$0xff]  }
 0x7f1   :  { %17287 = vmatprep.subr.bf16.mxu0 %v25540_v26  ;;  %18455 = vmatprep.subr.bf16.mxu1 %v25543_v27  ;;  %v25613_v26 = vld [vmem:[#allocation7 + $0x1da8] ss:$16 sps:$4 sm:$0xff]   ;;  %v25618_v27 = vld [vmem:[#allocation7 + $0x1dc4] ss:$16 sps:$4 sm:$0xff]  }
 0x7f2   :  { %17254 = vmatprep.mubr.bf16.mxu0 %v20324_v28  ;;  %18422 = vmatprep.mubr.bf16.mxu1 %v20324_v28  ;;  %v25621_v28 = vld [vmem:[#allocation7 + $0x1dcc] ss:$16 sps:$4 sm:$0xff]  }
 0x7f4   :  { %17288 = vmatpush1.bf16.msra.mxu0 %v25538_v29  ;;  %18456 = vmatpush1.bf16.msra.mxu1 %v25541_v30  ;;  %v25616_v29 = vld [vmem:[#allocation7 + $0x1dc0] ss:$16 sps:$4 sm:$0xff]   ;;  %v25619_v30 = vld [vmem:[#allocation7 + $0x1dc8] ss:$16 sps:$4 sm:$0xff]  }
 0x7f5   :  { %17289 = vmatprep.subr.bf16.mxu0 %v25546_v31  ;;  %18457 = vmatprep.subr.bf16.mxu1 %v25549_v32  ;;  %v25624_v31 = vld [vmem:[#allocation7 + $0x1de4] ss:$16 sps:$4 sm:$0xff]   ;;  %v25627_v32 = vld [vmem:[#allocation7 + $0x1dec] ss:$16 sps:$4 sm:$0xff]  }
 0x7f7   :  { %17255 = vmatmul.mubr.bf16.gmra.mrb[4].mxu0 %v20323_v33  ;;  %18423 = vmatmul.mubr.bf16.gmra.mrb[4].mxu1 %v20323_v33  ;;  %v25622_v33 = vld [vmem:[#allocation7 + $0x1de0] ss:$16 sps:$4 sm:$0xff]  }
 0x7f8   :  { %17290 = vmatpush1.bf16.msra.mxu0 %v25544_v36  ;;  %18458 = vmatpush1.bf16.msra.mxu1 %v25547_v37  ;;  %v25633_v36 = vld [vmem:[#allocation7 + $0x1e0c] ss:$16 sps:$4 sm:$0xff]   ;;  %v20293_v37 = vcombine.low %v26292_v58, %v26294_v59  ;;  %v25649_v58 = vld [vmem:[#allocation7 + $0x1e68] ss:$16 sps:$4 sm:$0xff]   ;;  %v25654_v59 = vld [vmem:[#allocation7 + $0x1e84] ss:$16 sps:$4 sm:$0xff]  }
 0x7f9   :  { %17291 = vmatprep.subr.bf16.mxu0 %v25552_v38  ;;  %18459 = vmatprep.subr.bf16.mxu1 %v25555_v39  ;;  %v149_v38 = vld [vmem:[#allocation2 + $0x170] sm:$0xff] }
 0x7fa   :  { %17264 = vmatprep.mubr.bf16.mxu0 %v20356_v40  ;;  %18432 = vmatprep.mubr.bf16.mxu1 %v20356_v40  ;;  %v165_v39 = vld [vmem:[#allocation2 + $0x1f0] sm:$0xff] }
 0x7fb   :  { %v25628_v40 = vld [vmem:[#allocation7 + $0x1e00] ss:$16 sps:$4 sm:$0xff]  }
 0x7fc   :  { %17292 = vmatpush1.bf16.msra.mxu0 %v25550_v41  ;;  %18460 = vmatpush1.bf16.msra.mxu1 %v25553_v42  ;;  %v25631_v41 = vld [vmem:[#allocation7 + $0x1e08] ss:$16 sps:$4 sm:$0xff]   ;;  %v25636_v42 = vld [vmem:[#allocation7 + $0x1e24] ss:$16 sps:$4 sm:$0xff]  }
 0x7fd   :  { %17293 = vmatprep.subr.bf16.mxu0 %v25558_v43  ;;  %18461 = vmatprep.subr.bf16.mxu1 %v25561_v44  ;;  %v25639_v43 = vld [vmem:[#allocation7 + $0x1e2c] ss:$16 sps:$4 sm:$0xff]   ;;  %v20326_v44 = vcombine.high %v149_v38, %v165_v39 }
 0x7ff   :  { %17265 = vmatmul.mubr.bf16.gmra.mrb[8].mxu0 %v20355_v45  ;;  %18433 = vmatmul.mubr.bf16.gmra.mrb[8].mxu1 %v20355_v45  ;;  %v25634_v45 = vld [vmem:[#allocation7 + $0x1e20] ss:$16 sps:$4 sm:$0xff]  }
 0x800   :  { %17294 = vmatpush1.bf16.msra.mxu0 %v25556_v48  ;;  %18462 = vmatpush1.bf16.msra.mxu1 %v25559_v49  ;;  %v25645_v48 = vld [vmem:[#allocation7 + $0x1e4c] ss:$16 sps:$4 sm:$0xff]   ;;  %v20325_v49 = vcombine.low %v149_v38, %v165_v39  ;;  %v25703_v38 = vld [vmem:[#allocation7 + $0x1f88] ss:$16 sps:$4 sm:$0xff]   ;;  %v25708_v39 = vld [vmem:[#allocation7 + $0x1fa4] ss:$16 sps:$4 sm:$0xff]  }
 0x801   :  { %17295 = vmatprep.subr.bf16.mxu0 %v25564_v50  ;;  %18463 = vmatprep.subr.bf16.mxu1 %v25567_v51  ;;  %v181_v50 = vld [vmem:[#allocation2 + $0x270] sm:$0xff] }
 0x802   :  { %17274 = vmatprep.mubr.bf16.mxu0 %v20388_v52  ;;  %18442 = vmatprep.mubr.bf16.mxu1 %v20388_v52  ;;  %v197_v51 = vld [vmem:[#allocation2 + $0x2f0] sm:$0xff] }
 0x803   :  { %v25640_v52 = vld [vmem:[#allocation7 + $0x1e40] ss:$16 sps:$4 sm:$0xff]  }
 0x804   :  { %17296 = vmatpush1.bf16.msra.mxu0 %v25562_v53  ;;  %18464 = vmatpush1.bf16.msra.mxu1 %v25565_v54  ;;  %v25643_v53 = vld [vmem:[#allocation7 + $0x1e48] ss:$16 sps:$4 sm:$0xff]   ;;  %v25648_v54 = vld [vmem:[#allocation7 + $0x1e64] ss:$16 sps:$4 sm:$0xff]  }
 0x805   :  { %17297 = vmatprep.subr.bf16.mxu0 %v25570_v55  ;;  %18465 = vmatprep.subr.bf16.mxu1 %v25573_v56  ;;  %v25651_v55 = vld [vmem:[#allocation7 + $0x1e6c] ss:$16 sps:$4 sm:$0xff]   ;;  %v20358_v56 = vcombine.high %v181_v50, %v197_v51 }
 0x807   :  { %17275 = vmatmul.mubr.bf16.gmra.mrb[12].mxu0 %v20387_v57  ;;  %18443 = vmatmul.mubr.bf16.gmra.mrb[12].mxu1 %v20387_v57  ;;  %v25646_v57 = vld [vmem:[#allocation7 + $0x1e60] ss:$16 sps:$4 sm:$0xff]  }
 0x808   :  { %17298 = vmatpush1.bf16.msra.mxu0 %v25568_v60  ;;  %18466 = vmatpush1.bf16.msra.mxu1 %v25571_v61  ;;  %v25657_v60 = vld [vmem:[#allocation7 + $0x1e8c] ss:$16 sps:$4 sm:$0xff]   ;;  %v20357_v61 = vcombine.low %v181_v50, %v197_v51  ;;  %v18733_v51 = vld [vmem:[%s26570_s4 + $0x180] sm:$0xff] }
 0x809   :  { %17299 = vmatprep.subr.bf16.mxu0 %v25576_v62  ;;  %18467 = vmatprep.subr.bf16.mxu1 %v25579_v63  ;;  %v213_v62 = vld [vmem:[#allocation2 + $0x370] sm:$0xff]  ;;  %v18702_v50 = vld [vmem:[%s26570_s4 + $0x88] sm:$0xff] }
 0x80a   :  { %17317 = vmatprep.mubr.bf16.mxu0 %v20294_v0  ;;  %18485 = vmatprep.mubr.bf16.mxu1 %v20294_v0  ;;  %v229_v63 = vld [vmem:[#allocation2 + $0x3f0] sm:$0x33] }
 0x80b   :  { %v25652_v0 = vld [vmem:[#allocation7 + $0x1e80] ss:$16 sps:$4 sm:$0xff]  }
 0x80c   :  { %17300 = vmatpush1.bf16.msra.mxu0 %v25574_v1  ;;  %18468 = vmatpush1.bf16.msra.mxu1 %v25577_v2  ;;  %v25655_v1 = vld [vmem:[#allocation7 + $0x1e88] ss:$16 sps:$4 sm:$0xff]   ;;  %v25660_v2 = vld [vmem:[#allocation7 + $0x1ea4] ss:$16 sps:$4 sm:$0xff]  }
 0x80d   :  { %17301 = vmatprep.subr.bf16.mxu0 %v25582_v3  ;;  %18469 = vmatprep.subr.bf16.mxu1 %v25585_v4  ;;  %v25663_v3 = vld [vmem:[#allocation7 + $0x1eac] ss:$16 sps:$4 sm:$0xff]   ;;  %v20390_v4 = vcombine.high %v213_v62, %v229_v63 }
 0x810   :  { %17302 = vmatpush1.bf16.msra.mxu0 %v25580_v5  ;;  %18470 = vmatpush1.bf16.msra.mxu1 %v25583_v6  ;;  %v25658_v5 = vld [vmem:[#allocation7 + $0x1ea0] ss:$16 sps:$4 sm:$0xff]   ;;  %v25661_v6 = vld [vmem:[#allocation7 + $0x1ea8] ss:$16 sps:$4 sm:$0xff]  }
 0x811   :  { %17303 = vmatprep.subr.bf16.mxu0 %v25588_v7  ;;  %18471 = vmatprep.subr.bf16.mxu1 %v25591_v8  ;;  %v25666_v7 = vld [vmem:[#allocation7 + $0x1ec4] ss:$16 sps:$4 sm:$0xff]   ;;  %v25669_v8 = vld [vmem:[#allocation7 + $0x1ecc] ss:$16 sps:$4 sm:$0xff]  }
 0x814   :  { %17304 = vmatpush1.bf16.msra.mxu0 %v25586_v9  ;;  %18472 = vmatpush1.bf16.msra.mxu1 %v25589_v10  ;;  %v20389_v9 = vcombine.low %v213_v62, %v229_v63  ;;  %v26300_v10 = vld [vmem:[#allocation2 + $0x78] sm:$0xff]  ;;  %v18718_v62 = vld [vmem:[%s26570_s4 + $0x108] sm:$0xff]  ;;  %v18703_v63 = vld [vmem:[%s26570_s4 + $0x90] sm:$0xff] }
 0x815   :  { %17305 = vmatprep.subr.bf16.mxu0 %v25594_v11  ;;  %18473 = vmatprep.subr.bf16.mxu1 %v25597_v12  ;;  %v26302_v11 = vld [vmem:[#allocation2 + $0xf8] sm:$0xff]  ;;  %v25664_v12 = vld [vmem:[#allocation7 + $0x1ec0] ss:$16 sps:$4 sm:$0xff]  }
 0x818   :  { %17306 = vmatpush1.bf16.msra.mxu0 %v25592_v13  ;;  %18474 = vmatpush1.bf16.msra.mxu1 %v25595_v14  ;;  %v25667_v13 = vld [vmem:[#allocation7 + $0x1ec8] ss:$16 sps:$4 sm:$0xff]   ;;  %v25672_v14 = vld [vmem:[#allocation7 + $0x1ee4] ss:$16 sps:$4 sm:$0xff]  }
 0x819   :  { %17307 = vmatprep.subr.bf16.mxu0 %v25600_v15  ;;  %18475 = vmatprep.subr.bf16.mxu1 %v25603_v16  ;;  %v25675_v15 = vld [vmem:[#allocation7 + $0x1eec] ss:$16 sps:$4 sm:$0xff]   ;;  %v20296_v16 = vcombine.high %v26300_v10, %v26302_v11 }
 0x81c   :  { %17308 = vmatpush1.bf16.msra.mxu0 %v25598_v17  ;;  %18476 = vmatpush1.bf16.msra.mxu1 %v25601_v18  ;;  %v25670_v17 = vld [vmem:[#allocation7 + $0x1ee0] ss:$16 sps:$4 sm:$0xff]   ;;  %v25673_v18 = vld [vmem:[#allocation7 + $0x1ee8] ss:$16 sps:$4 sm:$0xff]  }
 0x81d   :  { %17309 = vmatprep.subr.bf16.mxu0 %v25606_v19  ;;  %18477 = vmatprep.subr.bf16.mxu1 %v25609_v20  ;;  %v25678_v19 = vld [vmem:[#allocation7 + $0x1f04] ss:$16 sps:$4 sm:$0xff]   ;;  %v25681_v20 = vld [vmem:[#allocation7 + $0x1f0c] ss:$16 sps:$4 sm:$0xff]  }
 0x820   :  { %17310 = vmatpush1.bf16.msra.mxu0 %v25604_v21  ;;  %18478 = vmatpush1.bf16.msra.mxu1 %v25607_v22  ;;  %v25676_v21 = vld [vmem:[#allocation7 + $0x1f00] ss:$16 sps:$4 sm:$0xff]   ;;  %v25679_v22 = vld [vmem:[#allocation7 + $0x1f08] ss:$16 sps:$4 sm:$0xff]  }
 0x821   :  { %17311 = vmatprep.subr.bf16.mxu0 %v25612_v23  ;;  %18479 = vmatprep.subr.bf16.mxu1 %v25615_v24  ;;  %v25684_v23 = vld [vmem:[#allocation7 + $0x1f24] ss:$16 sps:$4 sm:$0xff]   ;;  %v25687_v24 = vld [vmem:[#allocation7 + $0x1f2c] ss:$16 sps:$4 sm:$0xff]  }
 0x824   :  { %17312 = vmatpush1.bf16.msra.mxu0 %v25610_v25  ;;  %18480 = vmatpush1.bf16.msra.mxu1 %v25613_v26  ;;  %v25682_v25 = vld [vmem:[#allocation7 + $0x1f20] ss:$16 sps:$4 sm:$0xff]   ;;  %v25685_v26 = vld [vmem:[#allocation7 + $0x1f28] ss:$16 sps:$4 sm:$0xff]  }
 0x825   :  { %17313 = vmatprep.subr.bf16.mxu0 %v25618_v27  ;;  %18481 = vmatprep.subr.bf16.mxu1 %v25621_v28  ;;  %v25690_v27 = vld [vmem:[#allocation7 + $0x1f44] ss:$16 sps:$4 sm:$0xff]   ;;  %v25693_v28 = vld [vmem:[#allocation7 + $0x1f4c] ss:$16 sps:$4 sm:$0xff]  }
 0x828   :  { %17314 = vmatpush1.bf16.msra.mxu0 %v25616_v29  ;;  %18482 = vmatpush1.bf16.msra.mxu1 %v25619_v30  ;;  %v25688_v29 = vld [vmem:[#allocation7 + $0x1f40] ss:$16 sps:$4 sm:$0xff]   ;;  %v25691_v30 = vld [vmem:[#allocation7 + $0x1f48] ss:$16 sps:$4 sm:$0xff]  }
 0x829   :  { %17315 = vmatprep.subr.bf16.mxu0 %v25624_v31  ;;  %18483 = vmatprep.subr.bf16.mxu1 %v25627_v32  ;;  %v25696_v31 = vld [vmem:[#allocation7 + $0x1f64] ss:$16 sps:$4 sm:$0xff]   ;;  %v25699_v32 = vld [vmem:[#allocation7 + $0x1f6c] ss:$16 sps:$4 sm:$0xff]  }
 0x82c   :  { %17316 = vmatpush1.bf16.msra.mxu0 %v25622_v33  ;;  %18484 = vmatpush1.bf16.msra.mxu1 %v25625_v34  ;;  %v25694_v33 = vld [vmem:[#allocation7 + $0x1f60] ss:$16 sps:$4 sm:$0xff]   ;;  %v25697_v34 = vld [vmem:[#allocation7 + $0x1f68] ss:$16 sps:$4 sm:$0xff]  }
 0x82d   :  { %17358 = vmatprep.subr.bf16.mxu0 %v25630_v35  ;;  %18526 = vmatprep.subr.bf16.mxu1 %v25633_v36  ;;  %v25702_v35 = vld [vmem:[#allocation7 + $0x1f84] ss:$16 sps:$4 sm:$0xff]   ;;  %v25705_v36 = vld [vmem:[#allocation7 + $0x1f8c] ss:$16 sps:$4 sm:$0xff]  }
 0x82f   :  { %17318 = vmatmul.mubr.bf16.vlgmr.msra.gmra.mrb[0].mxu0 %v20293_v37  ;;  %18486 = vmatmul.mubr.bf16.vlgmr.msra.gmra.mrb[0].mxu1 %v20293_v37  ;;  %v25700_v37 = vld [vmem:[#allocation7 + $0x1f80] ss:$16 sps:$4 sm:$0xff]  }
 0x830   :  { %17359 = vmatpush1.bf16.msra.mxu0 %v25628_v40  ;;  %18527 = vmatpush1.bf16.msra.mxu1 %v25631_v41  ;;  %v25711_v40 = vld [vmem:[#allocation7 + $0x1fac] ss:$16 sps:$4 sm:$0xff]   ;;  %v25706_v41 = vld [vmem:[#allocation7 + $0x1fa0] ss:$16 sps:$4 sm:$0xff]  }
 0x831   :  { %17360 = vmatprep.subr.bf16.mxu0 %v25636_v42  ;;  %18528 = vmatprep.subr.bf16.mxu1 %v25639_v43  ;;  %v25709_v42 = vld [vmem:[#allocation7 + $0x1fa8] ss:$16 sps:$4 sm:$0xff]   ;;  %v25714_v43 = vld [vmem:[#allocation7 + $0x1fc4] ss:$16 sps:$4 sm:$0xff]  }
 0x832   :  { %17327 = vmatprep.mubr.bf16.mxu0 %v20326_v44  ;;  %18495 = vmatprep.mubr.bf16.mxu1 %v20326_v44  ;;  %v25717_v44 = vld [vmem:[#allocation7 + $0x1fcc] ss:$16 sps:$4 sm:$0xff]  }
 0x834   :  { %17361 = vmatpush1.bf16.msra.mxu0 %v25634_v45  ;;  %18529 = vmatpush1.bf16.msra.mxu1 %v25637_v46  ;;  %v25712_v45 = vld [vmem:[#allocation7 + $0x1fc0] ss:$16 sps:$4 sm:$0xff]   ;;  %v25715_v46 = vld [vmem:[#allocation7 + $0x1fc8] ss:$16 sps:$4 sm:$0xff]  }
 0x835   :  { %17362 = vmatprep.subr.bf16.mxu0 %v25642_v47  ;;  %18530 = vmatprep.subr.bf16.mxu1 %v25645_v48  ;;  %v25720_v47 = vld [vmem:[#allocation7 + $0x1fe4] ss:$16 sps:$4 sm:$0xff]   ;;  %v25723_v48 = vld [vmem:[#allocation7 + $0x1fec] ss:$16 sps:$4 sm:$0xff]  }
 0x837   :  { %17328 = vmatmul.mubr.bf16.gmra.mrb[4].mxu0 %v20325_v49  ;;  %18496 = vmatmul.mubr.bf16.gmra.mrb[4].mxu1 %v20325_v49  ;;  %v18701_v49 = vld [vmem:[%s26570_s4 + $0x80] sm:$0xff] }
 0x838   :  { %17363 = vmatpush1.bf16.msra.mxu0 %v25640_v52  ;;  %18531 = vmatpush1.bf16.msra.mxu1 %v25643_v53  ;;  %v18734_v52 = vld [vmem:[%s26570_s4 + $0x188] sm:$0xff]  ;;  %v25718_v53 = vld [vmem:[#allocation7 + $0x1fe0] ss:$16 sps:$4 sm:$0xff]  }
 0x839   :  { %17364 = vmatprep.subr.bf16.mxu0 %v25648_v54  ;;  %18532 = vmatprep.subr.bf16.mxu1 %v25651_v55  ;;  %v25721_v54 = vld [vmem:[#allocation7 + $0x1fe8] ss:$16 sps:$4 sm:$0xff]  }
 0x83a   :  { %17337 = vmatprep.mubr.bf16.mxu0 %v20358_v56  ;;  %18505 = vmatprep.mubr.bf16.mxu1 %v20358_v56  ;;  %v150_v55 = vld [vmem:[#allocation2 + $0x178] sm:$0xff] }
 0x83b   :  { %v166_v56 = vld [vmem:[#allocation2 + $0x1f8] sm:$0xff] }
 0x83c   :  { %17365 = vmatpush1.bf16.msra.mxu0 %v25646_v57  ;;  %18533 = vmatpush1.bf16.msra.mxu1 %v25649_v58  ;;  %v21568_v57 = vpack.c.bf16 %v18702_v50, %v18701_v49  ;;  %v21600_v58 = vpack.c.bf16 %v18734_v52, %v18733_v51  ;;  %v18693_v49 = vld [vmem:[%s26570_s4 + $0x40] sm:$0xff]  ;;  %v18694_v50 = vld [vmem:[%s26570_s4 + $0x48] sm:$0xff] }
 0x83d   :  { %17366 = vmatprep.subr.bf16.mxu0 %v25654_v59  ;;  %18534 = vmatprep.subr.bf16.mxu1 %v25657_v60  ;;  %v18685_v59 = vld [vmem:[%s26570_s4] sm:$0xff]  ;;  %v18686_v60 = vld [vmem:[%s26570_s4 + $0x8] sm:$0xff] }
 0x83f   :  { %17338 = vmatmul.mubr.bf16.gmra.mrb[8].mxu0 %v20357_v61  ;;  %18506 = vmatmul.mubr.bf16.gmra.mrb[8].mxu1 %v20357_v61  ;;  %v18717_v61 = vld [vmem:[%s26570_s4 + $0x100] sm:$0xff] }
 0x840   :  { %17367 = vmatpush1.bf16.msra.mxu0 %v25652_v0  ;;  %18535 = vmatpush1.bf16.msra.mxu1 %v25655_v1  ;;  %v20295_v0 = vcombine.low %v26300_v10, %v26302_v11  ;;  %v18704_v1 = vld [vmem:[%s26570_s4 + $0x98] sm:$0xff]  ;;  %v18719_v11 = vld [vmem:[%s26570_s4 + $0x110] sm:$0xff] }
 0x841   :  { %17368 = vmatprep.subr.bf16.mxu0 %v25660_v2  ;;  %18536 = vmatprep.subr.bf16.mxu1 %v25663_v3  ;;  %v18735_v2 = vld [vmem:[%s26570_s4 + $0x190] sm:$0xff]  ;;  %v18736_v3 = vld [vmem:[%s26570_s4 + $0x198] sm:$0xff] }
 0x842   :  { %17347 = vmatprep.mubr.bf16.mxu0 %v20390_v4  ;;  %18515 = vmatprep.mubr.bf16.mxu1 %v20390_v4  ;;  %v20328_v4 = vcombine.high %v150_v55, %v166_v56  ;;  %v21604_v10 = vpack.c.bf16 %v18736_v3, %v18735_v2  ;;  %v18727_v3 = vld [vmem:[%s26570_s4 + $0x150] sm:$0xff] }
 0x844   :  { %17369 = vmatpush1.bf16.msra.mxu0 %v25658_v5  ;;  %18537 = vmatpush1.bf16.msra.mxu1 %v25661_v6  ;;  %v21570_v5 = vpack.c.bf16 %v18686_v60, %v18685_v59  ;;  %v21602_v6 = vpack.c.bf16 %v18718_v62, %v18717_v61  ;;  %v18744_v59 = vld [vmem:[%s26570_s4 + $0x1d8] sm:$0xff]  ;;  %v21586_v61 = vpack.c.bf16 %v18694_v50, %v18693_v49 }
 0x845   :  { %17370 = vmatprep.subr.bf16.mxu0 %v25666_v7  ;;  %18538 = vmatprep.subr.bf16.mxu1 %v25669_v8  ;;  %v18687_v7 = vld [vmem:[%s26570_s4 + $0x10] sm:$0xff]  ;;  %v18688_v8 = vld [vmem:[%s26570_s4 + $0x18] sm:$0xff] }
 0x847   :  { %17348 = vmatmul.mubr.bf16.gmra.mrb[12].mxu0 %v20389_v9  ;;  %18516 = vmatmul.mubr.bf16.gmra.mrb[12].mxu1 %v20389_v9  ;;  %v21572_v9 = vpack.c.bf16 %v18704_v1, %v18703_v63  ;;  %v18695_v63 = vld [vmem:[%s26570_s4 + $0x50] sm:$0xff] }
 0x848   :  { %17371 = vmatpush1.bf16.msra.mxu0 %v25664_v12  ;;  %18539 = vmatpush1.bf16.msra.mxu1 %v25667_v13  ;;  %v18720_v12 = vld [vmem:[%s26570_s4 + $0x118] sm:$0xff]  ;;  %v18705_v13 = vld [vmem:[%s26570_s4 + $0xa0] sm:$0xff] }
 0x849   :  { %17372 = vmatprep.subr.bf16.mxu0 %v25672_v14  ;;  %18540 = vmatprep.subr.bf16.mxu1 %v25675_v15  ;;  %v18706_v14 = vld [vmem:[%s26570_s4 + $0xa8] sm:$0xff]  ;;  %v18737_v15 = vld [vmem:[%s26570_s4 + $0x1a0] sm:$0xff] }
 0x84a   :  { %17390 = vmatprep.mubr.bf16.mxu0 %v20296_v16  ;;  %18558 = vmatprep.mubr.bf16.mxu1 %v20296_v16  ;;  %v18738_v16 = vld [vmem:[%s26570_s4 + $0x1a8] sm:$0xff] }
 0x84c   :  { %17373 = vmatpush1.bf16.msra.mxu0 %v25670_v17  ;;  %18541 = vmatpush1.bf16.msra.mxu1 %v25673_v18  ;;  %v182_v17 = vld [vmem:[#allocation2 + $0x278] sm:$0xff] }
 0x84d   :  { %17374 = vmatprep.subr.bf16.mxu0 %v25678_v19  ;;  %18542 = vmatprep.subr.bf16.mxu1 %v25681_v20  ;;  %v198_v18 = vld [vmem:[#allocation2 + $0x2f8] sm:$0xff]  ;;  %v21574_v19 = vpack.c.bf16 %v18688_v8, %v18687_v7  ;;  %v21606_v20 = vpack.c.bf16 %v18720_v12, %v18719_v11  ;;  %v18745_v7 = vld [vmem:[%s26570_s4 + $0x1e0] sm:$0xff]  ;;  %v18746_v8 = vld [vmem:[%s26570_s4 + $0x1e8] sm:$0xff] }
 0x84e   :  { %v21624_v12 = vpack.c.bf16 %v18746_v8, %v18745_v7 }
 0x850   :  { %17375 = vmatpush1.bf16.msra.mxu0 %v25676_v21  ;;  %18543 = vmatpush1.bf16.msra.mxu1 %v25679_v22  ;;  %v18689_v21 = vld [vmem:[%s26570_s4 + $0x20] sm:$0xff]  ;;  %v18690_v22 = vld [vmem:[%s26570_s4 + $0x28] sm:$0xff] }
 0x851   :  { %17376 = vmatprep.subr.bf16.mxu0 %v25684_v23  ;;  %18544 = vmatprep.subr.bf16.mxu1 %v25687_v24  ;;  %v21576_v23 = vpack.c.bf16 %v18706_v14, %v18705_v13  ;;  %v21608_v24 = vpack.c.bf16 %v18738_v16, %v18737_v15  ;;  %v18697_v14 = vld [vmem:[%s26570_s4 + $0x60] sm:$0xff]  ;;  %v18698_v15 = vld [vmem:[%s26570_s4 + $0x68] sm:$0xff] }
 0x852   :  { %v18729_v16 = vld [vmem:[%s26570_s4 + $0x160] sm:$0xff] }
 0x854   :  { %17377 = vmatpush1.bf16.msra.mxu0 %v25682_v25  ;;  %18545 = vmatpush1.bf16.msra.mxu1 %v25685_v26  ;;  %v18721_v25 = vld [vmem:[%s26570_s4 + $0x120] sm:$0xff]  ;;  %v18722_v26 = vld [vmem:[%s26570_s4 + $0x128] sm:$0xff] }
 0x855   :  { %17378 = vmatprep.subr.bf16.mxu0 %v25690_v27  ;;  %18546 = vmatprep.subr.bf16.mxu1 %v25693_v28  ;;  %v18707_v27 = vld [vmem:[%s26570_s4 + $0xb0] sm:$0xff]  ;;  %v20327_v28 = vcombine.low %v150_v55, %v166_v56  ;;  %v20359_v56 = vcombine.low %v182_v17, %v198_v18 }
 0x856   :  { %v18711_v55 = vld [vmem:[%s26570_s4 + $0xd0] sm:$0xff] }
 0x858   :  { %17379 = vmatpush1.bf16.msra.mxu0 %v25688_v29  ;;  %18547 = vmatpush1.bf16.msra.mxu1 %v25691_v30  ;;  %v18708_v29 = vld [vmem:[%s26570_s4 + $0xb8] sm:$0xff]  ;;  %v18739_v30 = vld [vmem:[%s26570_s4 + $0x1b0] sm:$0xff] }
 0x859   :  { %17380 = vmatprep.subr.bf16.mxu0 %v25696_v31  ;;  %18548 = vmatprep.subr.bf16.mxu1 %v25699_v32  ;;  %v18740_v31 = vld [vmem:[%s26570_s4 + $0x1b8] sm:$0xff]  ;;  %v20360_v32 = vcombine.high %v182_v17, %v198_v18  ;;  %v21594_v17 = vpack.c.bf16 %v18698_v15, %v18697_v14  ;;  %v18730_v18 = vld [vmem:[%s26570_s4 + $0x168] sm:$0xff] }
 0x85c   :  { %17381 = vmatpush1.bf16.msra.mxu0 %v25694_v33  ;;  %18549 = vmatpush1.bf16.msra.mxu1 %v25697_v34  ;;  %v21578_v33 = vpack.c.bf16 %v18690_v22, %v18689_v21  ;;  %v21610_v34 = vpack.c.bf16 %v18722_v26, %v18721_v25  ;;  %v18716_v21 = vld [vmem:[%s26570_s4 + $0xf8] sm:$0xff]  ;;  %v18747_v22 = vld [vmem:[%s26570_s4 + $0x1f0] sm:$0xff] }
 0x85d   :  { %17382 = vmatprep.subr.bf16.mxu0 %v25702_v35  ;;  %18550 = vmatprep.subr.bf16.mxu1 %v25705_v36  ;;  %v18691_v35 = vld [vmem:[%s26570_s4 + $0x30] sm:$0xff]  ;;  %v18692_v36 = vld [vmem:[%s26570_s4 + $0x38] sm:$0xff] }
 0x85e   :  { %v18699_v25 = vld [vmem:[%s26570_s4 + $0x70] sm:$0xff]  ;;  %v18700_v26 = vld [vmem:[%s26570_s4 + $0x78] sm:$0xff] }
 0x860   :  { %17383 = vmatpush1.bf16.msra.mxu0 %v25700_v37  ;;  %18551 = vmatpush1.bf16.msra.mxu1 %v25703_v38  ;;  %v21580_v37 = vpack.c.bf16 %v18708_v29, %v18707_v27  ;;  %v21612_v38 = vpack.c.bf16 %v18740_v31, %v18739_v30  ;;  %v18731_v29 = vld [vmem:[%s26570_s4 + $0x170] sm:$0xff]  ;;  %v18732_v30 = vld [vmem:[%s26570_s4 + $0x178] sm:$0xff] }
 0x861   :  { %17384 = vmatprep.subr.bf16.mxu0 %v25708_v39  ;;  %18552 = vmatprep.subr.bf16.mxu1 %v25711_v40  ;;  %v18723_v39 = vld [vmem:[%s26570_s4 + $0x130] sm:$0xff]  ;;  %v18724_v40 = vld [vmem:[%s26570_s4 + $0x138] sm:$0xff]  ;;  %v21630_v31 = vpack.c.bf16 %v18732_v30, %v18731_v29 }
 0x864   :  { %17385 = vmatpush1.bf16.msra.mxu0 %v25706_v41  ;;  %18553 = vmatpush1.bf16.msra.mxu1 %v25709_v42  ;;  %v18709_v41 = vld [vmem:[%s26570_s4 + $0xc0] sm:$0xff]  ;;  %v18710_v42 = vld [vmem:[%s26570_s4 + $0xc8] sm:$0xff] }
 0x865   :  { %17386 = vmatprep.subr.bf16.mxu0 %v25714_v43  ;;  %18554 = vmatprep.subr.bf16.mxu1 %v25717_v44  ;;  %v18741_v43 = vld [vmem:[%s26570_s4 + $0x1c0] sm:$0xff]  ;;  %v18742_v44 = vld [vmem:[%s26570_s4 + $0x1c8] sm:$0xff]  ;;  %v21584_v51 = vpack.c.bf16 %v18710_v42, %v18709_v41 }
 0x866   :  { %v21616_v52 = vpack.c.bf16 %v18742_v44, %v18741_v43 }
 0x868   :  { %17387 = vmatpush1.bf16.msra.mxu0 %v25712_v45  ;;  %18555 = vmatpush1.bf16.msra.mxu1 %v25715_v46  ;;  %v214_v45 = vld [vmem:[#allocation2 + $0x378] sm:$0xff] }
 0x869   :  { %17388 = vmatprep.subr.bf16.mxu0 %v25720_v47  ;;  %18556 = vmatprep.subr.bf16.mxu1 %v25723_v48  ;;  %v230_v46 = vld [vmem:[#allocation2 + $0x3f8] sm:$0x33]  ;;  %v21582_v47 = vpack.c.bf16 %v18692_v36, %v18691_v35  ;;  %v21614_v48 = vpack.c.bf16 %v18724_v40, %v18723_v39  ;;  %v18599_v36 = vld [vmem:[#allocation8] sm:$0xf] }
 0x86a   :  { %v20392_v60 = vcombine.high %v214_v45, %v230_v46  ;;  %v20391_v13 = vcombine.low %v214_v45, %v230_v46 }
 0x86c   :  { %17389 = vmatpush1.bf16.msra.mxu0 %v25718_v53  ;;  %18557 = vmatpush1.bf16.msra.mxu1 %v25721_v54  ;;  %v18725_v53 = vld [vmem:[%s26570_s4 + $0x140] sm:$0xff]  ;;  %v18726_v54 = vld [vmem:[%s26570_s4 + $0x148] sm:$0xff] }
 0x86d   :  { %21569 = vmatprep.subr.bf16.mxu0 %v21568_v57  ;;  %21601 = vmatprep.subr.bf16.mxu1 %v21600_v58  ;;  %v18712_v57 = vld [vmem:[%s26570_s4 + $0xd8] sm:$0xff]  ;;  %v18743_v58 = vld [vmem:[%s26570_s4 + $0x1d0] sm:$0xff]  ;;  %v21618_v62 = vpack.c.bf16 %v18726_v54, %v18725_v53 }
 0x86e   :  { %v21588_v1 = vpack.c.bf16 %v18712_v57, %v18711_v55  ;;  %v21620_v2 = vpack.c.bf16 %v18744_v59, %v18743_v58 }
 0x86f   :  { %17391 = vmatmul.mubr.bf16.vlgmr.msra.gmra.mrb[0].mxu0 %v20295_v0  ;;  %18559 = vmatmul.mubr.bf16.vlgmr.msra.gmra.mrb[0].mxu1 %v20295_v0  ;;  %v18696_v0 = vld [vmem:[%s26570_s4 + $0x58] sm:$0xff] }
 0x870   :  { %17400 = vmatprep.mubr.bf16.mxu0 %v20328_v4  ;;  %18568 = vmatprep.mubr.bf16.mxu1 %v20328_v4  ;;  %v18728_v4 = vld [vmem:[%s26570_s4 + $0x158] sm:$0xff] }
 0x871   :  { %21571 = vmatpush3.bf16.msra.mxu0 %v21570_v5  ;;  %21603 = vmatpush3.bf16.msra.mxu1 %v21602_v6  ;;  %v18713_v5 = vld [vmem:[%s26570_s4 + $0xe0] sm:$0xff]  ;;  %v18714_v6 = vld [vmem:[%s26570_s4 + $0xe8] sm:$0xff] }
 0x872   :  { %21573 = vmatprep.subr.bf16.mxu0 %v21572_v9  ;;  %21605 = vmatprep.subr.bf16.mxu1 %v21604_v10  ;;  %v21590_v9 = vpack.c.bf16 %v18696_v0, %v18695_v63  ;;  %v21622_v10 = vpack.c.bf16 %v18728_v4, %v18727_v3  ;;  %v21592_v11 = vpack.c.bf16 %v18714_v6, %v18713_v5 }
 0x875   :  { %21575 = vmatpush3.bf16.msra.mxu0 %v21574_v19  ;;  %21607 = vmatpush3.bf16.msra.mxu1 %v21606_v20  ;;  %v21626_v19 = vpack.c.bf16 %v18730_v18, %v18729_v16  ;;  %v18715_v20 = vld [vmem:[%s26570_s4 + $0xf0] sm:$0xff] }
 0x876   :  { %21577 = vmatprep.subr.bf16.mxu0 %v21576_v23  ;;  %21609 = vmatprep.subr.bf16.mxu1 %v21608_v24  ;;  %v21596_v23 = vpack.c.bf16 %v18716_v21, %v18715_v20  ;;  %v18748_v24 = vld [vmem:[%s26570_s4 + $0x1f8] sm:$0xff]  ;;  %s25934_s4 = smov [#allocation13]  }
 0x877   :  { %17401 = vmatmul.mubr.bf16.gmra.mrb[4].mxu0 %v20327_v28  ;;  %18569 = vmatmul.mubr.bf16.gmra.mrb[4].mxu1 %v20327_v28  ;;  %v21628_v27 = vpack.c.bf16 %v18748_v24, %v18747_v22  ;;  %v21598_v28 = vpack.c.bf16 %v18700_v26, %v18699_v25  ;;  %s19101_s15 = sshll.u32 %s25934_s4, 4  ;;  %s19102_s15 = int_to_ptr.vmem [resolvable:$true] %s19101_s15 }
 0x878   :  { %17410 = vmatprep.mubr.bf16.mxu0 %v20360_v32  ;;  %18578 = vmatprep.mubr.bf16.mxu1 %v20360_v32  ;;  %v18601_v32 = vlaneseq  ;;  %s25888_s16 = scalar_lea.vmem %s19102_s15, 64  ;;  %p25893_p7 = scmp.lt.s32.totalorder %s19102_s15, %s19102_s15 }
 0x879   :  { %21579 = vmatpush3.bf16.msra.mxu0 %v21578_v33  ;;  %21611 = vmatpush3.bf16.msra.mxu1 %v21610_v34  ;;  %p25889_p6 = scmp.ne.s32.totalorder %s19102_s15, %s25888_s16  ;;  %p25894_p8 = scmp.lt.s32.totalorder %s25888_s16, %s25888_s16 }
 0x87a   :  { %21581 = vmatprep.subr.bf16.mxu0 %v21580_v37  ;;  %21613 = vmatprep.subr.bf16.mxu1 %v21612_v38  ;;  %v18602_v33 = vshrl.u32 %v18601_v32, 7 }
 0x87b   :  { %p25895_p9 = por %p25894_p8, %p25893_p7 }
 0x87c   :  { %v18603_v34 = vsub.s32 0, %v18602_v33  ;;  %v18611_v35 = vsub.s32 2, %v18602_v33  ;;  %v18607_v37 = vsub.s32 1, %v18602_v33  ;;  %v18615_v38 = vsub.s32 3, %v18602_v33 }
 0x87d   :  { %21583 = vmatpush3.bf16.msra.mxu0 %v21582_v47  ;;  %21615 = vmatpush3.bf16.msra.mxu1 %v21614_v48  ;;  %p25896_p10 = pnand %p25895_p9, %p25889_p6 }
 0x87e   :  { %21585 = vmatprep.subr.bf16.mxu0 %v21584_v51  ;;  %21617 = vmatprep.subr.bf16.mxu1 %v21616_v52  ;;  %v26500_v39 = vrot.slane %v18599_v36, %v18603_v34  ;;  %v26502_v40 = vrot.slane %v18599_v36, %v18611_v35  ;;  %v26504_v41 = vrot.slane %v18599_v36, %v18607_v37 }
 0x87f   :  { %17411 = vmatmul.mubr.bf16.gmra.mrb[8].mxu0 %v20359_v56  ;;  %18579 = vmatmul.mubr.bf16.gmra.mrb[8].mxu1 %v20359_v56  ;;  %v26506_v42 = vrot.slane %v18599_v36, %v18615_v38 }
 0x880   :  { %17420 = vmatprep.mubr.bf16.mxu0 %v20392_v60  ;;  %18588 = vmatprep.mubr.bf16.mxu1 %v20392_v60 }
 0x881   :  { %21587 = vmatpush3.bf16.msra.mxu0 %v21586_v61  ;;  %21619 = vmatpush3.bf16.msra.mxu1 %v21618_v62 }
 0x882   :  { %21589 = vmatprep.subr.bf16.mxu0 %v21588_v1  ;;  %21621 = vmatprep.subr.bf16.mxu1 %v21620_v2 }
 0x885   :  { %21591 = vmatpush3.bf16.msra.mxu0 %v21590_v9  ;;  %21623 = vmatpush3.bf16.msra.mxu1 %v21622_v10 }
 0x886   :  { %21593 = vmatprep.subr.bf16.mxu0 %v21592_v11  ;;  %21625 = vmatprep.subr.bf16.mxu1 %v21624_v12 }
 0x887   :  { %17421 = vmatmul.mubr.bf16.gmra.mrb[12].mxu0 %v20391_v13  ;;  %18589 = vmatmul.mubr.bf16.gmra.mrb[12].mxu1 %v20391_v13 }
 0x889   :  { %21595 = vmatpush3.bf16.msra.mxu0 %v21594_v17  ;;  %21627 = vmatpush3.bf16.msra.mxu1 %v21626_v19 }
 0x88a   :  { %21597 = vmatprep.subr.bf16.mxu0 %v21596_v23  ;;  %21629 = vmatprep.subr.bf16.mxu1 %v21628_v27 }
 0x88d   :  { %21599 = vmatpush3.bf16.msra.mxu0 %v21598_v28  ;;  %21631 = vmatpush3.bf16.msra.mxu1 %v21630_v31 }
 0x942   :  { %v17392_v43 = vpop.f32.mrb[0].mxu0  ;;  %v18560_v44 = vpop.f32.mrb[0].mxu1 }
 0x943   :  { %v18621_v45 = vadd.f32 %v26500_v39, %v17392_v43  ;;  %v18623_v46 = vadd.f32 %v26502_v40, %v18560_v44  ;;  %v17394_v47 = vpop.f32.mrb[1].mxu0  ;;  %v18562_v48 = vpop.f32.mrb[1].mxu1 }
 0x944   :  { %v18622_v49 = vadd.f32 %v26504_v41, %v17394_v47  ;;  %v18624_v50 = vadd.f32 %v26506_v42, %v18562_v48  ;;  %v17396_v51 = vpop.f32.mrb[2].mxu0  ;;  %v18564_v52 = vpop.f32.mrb[2].mxu1 }
 0x945   :  { %v17398_v53 = vpop.f32.mrb[3].mxu0  ;;  %v18566_v54 = vpop.f32.mrb[3].mxu1  ;;  %v18653_v59 = vmax.f32 %v18621_v45, 0.0  ;;  %v18655_v60 = vmax.f32 %v18623_v46, 0.0  ;;  %v18625_v61 = vadd.f32 %v26500_v39, %v17396_v51  ;;  %v18627_v62 = vadd.f32 %v26502_v40, %v18564_v52 }
 0x946   :  { %v18654_v55 = vmax.f32 %v18622_v49, 0.0  ;;  %v18656_v56 = vmax.f32 %v18624_v50, 0.0  ;;  %v18626_v57 = vadd.f32 %v26504_v41, %v17398_v53  ;;  %v18628_v58 = vadd.f32 %v26506_v42, %v18566_v54 }
 0x947   :  { %v18657_v3 = vmax.f32 %v18625_v61, 0.0  ;;  %v18659_v4 = vmax.f32 %v18627_v62, 0.0 }
 0x948   :  { %v18658_v63 = vmax.f32 %v18626_v57, 0.0  ;;  %v18660_v0 = vmax.f32 %v18628_v58, 0.0  ;;  %18820 = vmatprep.mubr.f32.mxu0 %v18654_v55  ;;  %18925 = vmatprep.mubr.f32.mxu1 %v18656_v56 }
 0x949   :  { %18821 = vmatmul.mubr.f32.vlgmr.msra.gmra.mrb[16].mxu0 %v18653_v59  ;;  %18926 = vmatmul.mubr.f32.vlgmr.msra.gmra.mrb[16].mxu1 %v18655_v60 }
 0x94a   :  { %v17402_v1 = vpop.f32.mrb[4].mxu0  ;;  %v18570_v2 = vpop.f32.mrb[4].mxu1  ;;  %18825 = vmatprep.mubr.f32.mxu0 %v18658_v63  ;;  %18930 = vmatprep.mubr.f32.mxu1 %v18660_v0 }
 0x94b   :  { %v18629_v5 = vadd.f32 %v26500_v39, %v17402_v1  ;;  %v18631_v6 = vadd.f32 %v26502_v40, %v18570_v2  ;;  %v17404_v7 = vpop.f32.mrb[5].mxu0  ;;  %v18572_v8 = vpop.f32.mrb[5].mxu1 }
 0x94c   :  { %v18630_v9 = vadd.f32 %v26504_v41, %v17404_v7  ;;  %v18632_v10 = vadd.f32 %v26506_v42, %v18572_v8  ;;  %v17406_v11 = vpop.f32.mrb[6].mxu0  ;;  %v18574_v12 = vpop.f32.mrb[6].mxu1 }
 0x94d   :  { %v17408_v13 = vpop.f32.mrb[7].mxu0  ;;  %v18576_v14 = vpop.f32.mrb[7].mxu1  ;;  %18826 = vmatmul.mubr.f32.gmra.mrb[18].mxu0 %v18657_v3  ;;  %18931 = vmatmul.mubr.f32.gmra.mrb[18].mxu1 %v18659_v4  ;;  %v18661_v19 = vmax.f32 %v18629_v5, 0.0  ;;  %v18663_v20 = vmax.f32 %v18631_v6, 0.0  ;;  %v18633_v21 = vadd.f32 %v26500_v39, %v17406_v11  ;;  %v18635_v22 = vadd.f32 %v26502_v40, %v18574_v12 }
 0x94e   :  { %v18662_v15 = vmax.f32 %v18630_v9, 0.0  ;;  %v18664_v16 = vmax.f32 %v18632_v10, 0.0  ;;  %v18634_v17 = vadd.f32 %v26504_v41, %v17408_v13  ;;  %v18636_v18 = vadd.f32 %v26506_v42, %v18576_v14 }
 0x94f   :  { %v18665_v27 = vmax.f32 %v18633_v21, 0.0  ;;  %v18667_v28 = vmax.f32 %v18635_v22, 0.0 }
 0x950   :  { %v18666_v23 = vmax.f32 %v18634_v17, 0.0  ;;  %v18668_v24 = vmax.f32 %v18636_v18, 0.0  ;;  %18830 = vmatprep.mubr.f32.mxu0 %v18662_v15  ;;  %18935 = vmatprep.mubr.f32.mxu1 %v18664_v16  ;;  %v26541_v15 = vld [vmem:[#allocation10] ss:$0 sm:$0xff] }
 0x951   :  { %18831 = vmatmul.mubr.f32.gmra.mrb[20].mxu0 %v18661_v19  ;;  %18936 = vmatmul.mubr.f32.gmra.mrb[20].mxu1 %v18663_v20 }
 0x952   :  { %v17412_v25 = vpop.f32.mrb[8].mxu0  ;;  %v18580_v26 = vpop.f32.mrb[8].mxu1  ;;  %18835 = vmatprep.mubr.f32.mxu0 %v18666_v23  ;;  %18940 = vmatprep.mubr.f32.mxu1 %v18668_v24 }
 0x953   :  { %v18637_v29 = vadd.f32 %v26500_v39, %v17412_v25  ;;  %v18639_v30 = vadd.f32 %v26502_v40, %v18580_v26  ;;  %v17414_v31 = vpop.f32.mrb[9].mxu0  ;;  %v18582_v32 = vpop.f32.mrb[9].mxu1 }
 0x954   :  { %v18638_v33 = vadd.f32 %v26504_v41, %v17414_v31  ;;  %v18640_v34 = vadd.f32 %v26506_v42, %v18582_v32  ;;  %v17416_v35 = vpop.f32.mrb[10].mxu0  ;;  %v18584_v36 = vpop.f32.mrb[10].mxu1 }
 0x955   :  { %v17418_v37 = vpop.f32.mrb[11].mxu0  ;;  %v18586_v38 = vpop.f32.mrb[11].mxu1  ;;  %18836 = vmatmul.mubr.f32.gmra.mrb[22].mxu0 %v18665_v27  ;;  %18941 = vmatmul.mubr.f32.gmra.mrb[22].mxu1 %v18667_v28  ;;  %v18669_v47 = vmax.f32 %v18637_v29, 0.0  ;;  %v18671_v48 = vmax.f32 %v18639_v30, 0.0  ;;  %v18641_v49 = vadd.f32 %v26500_v39, %v17416_v35  ;;  %v18643_v50 = vadd.f32 %v26502_v40, %v18584_v36 }
 0x956   :  { %v18670_v43 = vmax.f32 %v18638_v33, 0.0  ;;  %v18672_v44 = vmax.f32 %v18640_v34, 0.0  ;;  %v18642_v45 = vadd.f32 %v26504_v41, %v17418_v37  ;;  %v18644_v46 = vadd.f32 %v26506_v42, %v18586_v38 }
 0x957   :  { %v18673_v55 = vmax.f32 %v18641_v49, 0.0  ;;  %v18675_v56 = vmax.f32 %v18643_v50, 0.0 }
 0x958   :  { %v18674_v51 = vmax.f32 %v18642_v45, 0.0  ;;  %v18676_v52 = vmax.f32 %v18644_v46, 0.0  ;;  %18840 = vmatprep.mubr.f32.mxu0 %v18670_v43  ;;  %18945 = vmatprep.mubr.f32.mxu1 %v18672_v44 }
 0x959   :  { %18841 = vmatmul.mubr.f32.gmra.mrb[24].mxu0 %v18669_v47  ;;  %18946 = vmatmul.mubr.f32.gmra.mrb[24].mxu1 %v18671_v48 }
 0x95a   :  { %v17422_v53 = vpop.f32.mrb[12].mxu0  ;;  %v18590_v54 = vpop.f32.mrb[12].mxu1  ;;  %18845 = vmatprep.mubr.f32.mxu0 %v18674_v51  ;;  %18950 = vmatprep.mubr.f32.mxu1 %v18676_v52 }
 0x95b   :  { %v18645_v57 = vadd.f32 %v26500_v39, %v17422_v53  ;;  %v18647_v58 = vadd.f32 %v26502_v40, %v18590_v54  ;;  %v17424_v59 = vpop.f32.mrb[13].mxu0  ;;  %v18592_v60 = vpop.f32.mrb[13].mxu1 }
 0x95c   :  { %v18646_v61 = vadd.f32 %v26504_v41, %v17424_v59  ;;  %v18648_v62 = vadd.f32 %v26506_v42, %v18592_v60  ;;  %v17426_v63 = vpop.f32.mrb[14].mxu0  ;;  %v18594_v0 = vpop.f32.mrb[14].mxu1 }
 0x95d   :  { %v17428_v1 = vpop.f32.mrb[15].mxu0  ;;  %v18596_v2 = vpop.f32.mrb[15].mxu1  ;;  %18846 = vmatmul.mubr.f32.gmra.mrb[26].mxu0 %v18673_v55  ;;  %18951 = vmatmul.mubr.f32.gmra.mrb[26].mxu1 %v18675_v56  ;;  %v18677_v7 = vmax.f32 %v18645_v57, 0.0  ;;  %v18679_v8 = vmax.f32 %v18647_v58, 0.0  ;;  %v18649_v9 = vadd.f32 %v26500_v39, %v17426_v63  ;;  %v18651_v10 = vadd.f32 %v26502_v40, %v18594_v0 }
 0x95e   :  { %v18678_v3 = vmax.f32 %v18646_v61, 0.0  ;;  %v18680_v4 = vmax.f32 %v18648_v62, 0.0  ;;  %v18650_v5 = vadd.f32 %v26504_v41, %v17428_v1  ;;  %v18652_v6 = vadd.f32 %v26506_v42, %v18596_v2 }
 0x95f   :  { %v18681_v13 = vmax.f32 %v18649_v9, 0.0  ;;  %v18683_v14 = vmax.f32 %v18651_v10, 0.0  ;;  %v25930_v41 = vmov 0.0|0.0   ;;  %v25932_v42 = vmov 0.0  }
 0x960   :  { %v18682_v11 = vmax.f32 %v18650_v5, 0.0  ;;  %v18684_v12 = vmax.f32 %v18652_v6, 0.0  ;;  %18850 = vmatprep.mubr.f32.mxu0 %v18678_v3  ;;  %18955 = vmatprep.mubr.f32.mxu1 %v18680_v4 }
 0x961   :  { %18851 = vmatmul.mubr.f32.gmra.mrb[28].mxu0 %v18677_v7  ;;  %18956 = vmatmul.mubr.f32.gmra.mrb[28].mxu1 %v18679_v8 }
 0x962   :  { %18855 = vmatprep.mubr.f32.mxu0 %v18682_v11  ;;  %18960 = vmatprep.mubr.f32.mxu1 %v18684_v12 }
 0x963   :  { %21632 = vmatprep.subr.bf16.mxu0 %v25930_v41 }
 0x965   :  { %18856 = vmatmul.mubr.f32.gmra.mrb[30].mxu0 %v18681_v13  ;;  %18961 = vmatmul.mubr.f32.gmra.mrb[30].mxu1 %v18683_v14 }
 0x966   :  { %21565 = vmatprep.mubr.msk.f32.mxu0 %vm25931_vm0, %v25932_v42 }
 0xa1c   :  { %v21460_v39 = vpop.f32.mrb[16].mxu0  ;;  %v21516_v40 = vpop.f32.mrb[16].mxu1 }
 0xa1d   :  { %v21461_v16 = vpop.f32.mrb[17].mxu0  ;;  %v21517_v17 = vpop.f32.mrb[17].mxu1 }
 0xa1e   :  { %v21462_v18 = vadd.f32 %v21461_v16, %v21460_v39  ;;  %v21518_v19 = vadd.f32 %v21517_v17, %v21516_v40 }
 0xa20   :  { %v18823_v20 = vadd.f32 %v21462_v18, %v26541_v15  ;;  %v21463_v21 = vpop.f32.mrb[18].mxu0  ;;  %v21519_v22 = vpop.f32.mrb[18].mxu1 }
 0xa21   :  { %v21464_v23 = vpop.f32.mrb[19].mxu0  ;;  %v21520_v24 = vpop.f32.mrb[19].mxu1 }
 0xa22   :  { %v18928_v25 = vadd.f32 %v21518_v19, %v18823_v20  ;;  %v21465_v26 = vadd.f32 %v21464_v23, %v21463_v21  ;;  %v21521_v27 = vadd.f32 %v21520_v24, %v21519_v22 }
 0xa24   :  { %v21418_v28 = vmul.f32 -1.442695, %v18928_v25  ;;  %v18828_v29 = vadd.f32 %v21465_v26, %v26541_v15  ;;  %v21466_v30 = vpop.f32.mrb[20].mxu0  ;;  %v21522_v31 = vpop.f32.mrb[20].mxu1 }
 0xa25   :  { %v21467_v32 = vpop.f32.mrb[21].mxu0  ;;  %v21523_v33 = vpop.f32.mrb[21].mxu1 }
 0xa26   :  { %25724 = vpow2.f32 %v21418_v28  ;;  %v18933_v34 = vadd.f32 %v21521_v27, %v18828_v29  ;;  %v21468_v35 = vadd.f32 %v21467_v32, %v21466_v30  ;;  %v21524_v36 = vadd.f32 %v21523_v33, %v21522_v31 }
 0xa28   :  { %v21419_v37 = vmul.f32 -1.442695, %v18933_v34  ;;  %v18833_v38 = vadd.f32 %v21468_v35, %v26541_v15  ;;  %v21469_v43 = vpop.f32.mrb[22].mxu0  ;;  %v21525_v44 = vpop.f32.mrb[22].mxu1 }
 0xa29   :  { %v21470_v45 = vpop.f32.mrb[23].mxu0  ;;  %v21526_v46 = vpop.f32.mrb[23].mxu1 }
 0xa2a   :  { %25726 = vpow2.f32 %v21419_v37  ;;  %v18938_v47 = vadd.f32 %v21524_v36, %v18833_v38  ;;  %v21471_v48 = vadd.f32 %v21470_v45, %v21469_v43  ;;  %v21527_v49 = vadd.f32 %v21526_v46, %v21525_v44 }
 0xa2c   :  { %v21420_v50 = vmul.f32 -1.442695, %v18938_v47  ;;  %v18838_v51 = vadd.f32 %v21471_v48, %v26541_v15  ;;  %v21472_v52 = vpop.f32.mrb[24].mxu0  ;;  %v21528_v53 = vpop.f32.mrb[24].mxu1 }
 0xa2d   :  { %v21473_v54 = vpop.f32.mrb[25].mxu0  ;;  %v21529_v55 = vpop.f32.mrb[25].mxu1 }
 0xa2e   :  { %25728 = vpow2.f32 %v21420_v50  ;;  %v18943_v56 = vadd.f32 %v21527_v49, %v18838_v51  ;;  %v21474_v57 = vadd.f32 %v21473_v54, %v21472_v52  ;;  %v21530_v58 = vadd.f32 %v21529_v55, %v21528_v53  ;;  %v19014_v55 = vld [vmem:[#allocation11] sm:$0xf] }
 0xa30   :  { %v25725_v59 = vpop.eup %25724  ;;  %v21421_v60 = vmul.f32 -1.442695, %v18943_v56  ;;  %v18843_v61 = vadd.f32 %v21474_v57, %v26541_v15  ;;  %v21475_v62 = vpop.f32.mrb[26].mxu0 }
 0xa31   :  { %v21531_v63 = vpop.f32.mrb[26].mxu1  ;;  %v18990_v0 = vadd.f32 1.0, %v25725_v59  ;;  %v21476_v1 = vpop.f32.mrb[27].mxu0 }
 0xa32   :  { %v21532_v2 = vpop.f32.mrb[27].mxu1  ;;  %25730 = vpow2.f32 %v21421_v60  ;;  %v18948_v3 = vadd.f32 %v21530_v58, %v18843_v61  ;;  %v21477_v4 = vadd.f32 %v21476_v1, %v21475_v62 }
 0xa33   :  { %v21533_v5 = vadd.f32 %v21532_v2, %v21531_v63  ;;  %25732 = vrcp.f32 %v18990_v0 }
 0xa34   :  { %v25727_v6 = vpop.eup %25726  ;;  %v21422_v7 = vmul.f32 -1.442695, %v18948_v3  ;;  %v18848_v8 = vadd.f32 %v21477_v4, %v26541_v15  ;;  %v21478_v9 = vpop.f32.mrb[28].mxu0 }
 0xa35   :  { %v21534_v10 = vpop.f32.mrb[28].mxu1  ;;  %v18991_v11 = vadd.f32 1.0, %v25727_v6  ;;  %v21479_v12 = vpop.f32.mrb[29].mxu0 }
 0xa36   :  { %v21535_v13 = vpop.f32.mrb[29].mxu1  ;;  %25734 = vpow2.f32 %v21422_v7  ;;  %v18953_v14 = vadd.f32 %v21533_v5, %v18848_v8  ;;  %v21480_v42 = vadd.f32 %v21479_v12, %v21478_v9 }
 0xa37   :  { %v21536_v39 = vadd.f32 %v21535_v13, %v21534_v10  ;;  %25736 = vrcp.f32 %v18991_v11 }
 0xa38   :  { %v25729_v40 = vpop.eup %25728  ;;  %v21423_v16 = vmul.f32 -1.442695, %v18953_v14  ;;  %v18853_v17 = vadd.f32 %v21480_v42, %v26541_v15  ;;  %v21481_v18 = vpop.f32.mrb[30].mxu0 }
 0xa39   :  { %v21537_v19 = vpop.f32.mrb[30].mxu1  ;;  %v18992_v20 = vadd.f32 1.0, %v25729_v40  ;;  %v21482_v21 = vpop.f32.mrb[31].mxu0 }
 0xa3a   :  { %v21538_v22 = vpop.f32.mrb[31].mxu1  ;;  %25738 = vpow2.f32 %v21423_v16  ;;  %v18958_v23 = vadd.f32 %v21536_v39, %v18853_v17  ;;  %v21483_v24 = vadd.f32 %v21482_v21, %v21481_v18 }
 0xa3b   :  { %v21539_v25 = vadd.f32 %v21538_v22, %v21537_v19  ;;  %25740 = vrcp.f32 %v18992_v20 }
 0xa3c   :  { %v25731_v26 = vpop.eup %25730  ;;  %v21424_v27 = vmul.f32 -1.442695, %v18958_v23  ;;  %v18858_v28 = vadd.f32 %v21483_v24, %v26541_v15 }
 0xa3d   :  { %v18993_v29 = vadd.f32 1.0, %v25731_v26  ;;  %v25733_v31 = vpop.eup %25732 }
 0xa3e   :  { %25742 = vpow2.f32 %v21424_v27  ;;  %v18963_v30 = vadd.f32 %v21539_v25, %v18858_v28 }
 0xa3f   :  { %25744 = vrcp.f32 %v18993_v29 }
 0xa40   :  { %v25735_v32 = vpop.eup %25734  ;;  %v21425_v33 = vmul.f32 -1.442695, %v18963_v30 }
 0xa41   :  { %v25737_v34 = vpop.eup %25736  ;;  %v18994_v35 = vadd.f32 1.0, %v25735_v32 }
 0xa42   :  { %25746 = vpow2.f32 %v21425_v33  ;;  %v21633_v36 = vpack.c.bf16 %v25737_v34, %v25733_v31 }
 0xa43   :  { %25748 = vrcp.f32 %v18994_v35 }
 0xa44   :  { %v25739_v37 = vpop.eup %25738  ;;  %21634 = vmatpush3.bf16.msra.mxu0 %v21633_v36 }
 0xa45   :  { %v18995_v38 = vadd.f32 1.0, %v25739_v37  ;;  %21635 = vmatprep.subr.bf16.mxu0 %v25930_v41  ;;  %v25741_v43 = vpop.eup %25740 }
 0xa47   :  { %25750 = vrcp.f32 %v18995_v38 }
 0xa48   :  { %v25743_v15 = vpop.eup %25742 }
 0xa49   :  { %v25745_v44 = vpop.eup %25744  ;;  %v18996_v45 = vadd.f32 1.0, %v25743_v15 }
 0xa4a   :  { %v21636_v46 = vpack.c.bf16 %v25745_v44, %v25741_v43 }
 0xa4b   :  { %25752 = vrcp.f32 %v18996_v45 }
 0xa4c   :  { %v25747_v47 = vpop.eup %25746  ;;  %21637 = vmatpush3.bf16.msra.mxu0 %v21636_v46 }
 0xa4d   :  { %v18997_v48 = vadd.f32 1.0, %v25747_v47  ;;  %21638 = vmatprep.subr.bf16.mxu0 %v25930_v41  ;;  %v25749_v49 = vpop.eup %25748 }
 0xa4f   :  { %25754 = vrcp.f32 %v18997_v48 }
 0xa51   :  { %v25751_v50 = vpop.eup %25750 }
 0xa52   :  { %v21639_v51 = vpack.c.bf16 %v25751_v50, %v25749_v49 }
 0xa54   :  { %21640 = vmatpush3.bf16.msra.mxu0 %v21639_v51 }
 0xa55   :  { %21641 = vmatprep.subr.bf16.mxu0 %v25930_v41  ;;  %v25753_v52 = vpop.eup %25752 }
 0xa59   :  { %v25755_v53 = vpop.eup %25754 }
 0xa5a   :  { %v21642_v54 = vpack.c.bf16 %v25755_v53, %v25753_v52 }
 0xa5c   :  { %21644 = vmatpush3.bf16.msk.msra.mxu0 %vm21643_vm3, %v21642_v54 }
 0xa5f   :  { %21566 = vmatmul.mubr.msk.f32.vlgmr.msra.gmra.mrb[32].mxu0 %vm19015_vm4, %v19014_v55 }
 0xb32   :  { %v19089_v56 = vpop.f32.mrb[32].mxu0 }
 0xb33   :  { %v21567_v57 = vpop.f32.mrb[33].mxu0  ;;  %19094 = vst.msk [vmem:[#allocation13] sm:$0xf] %vm19093_vm5, %v19089_v56 }
 0xb34   :  { %25899 = shalt.err (!%p25896_p10)
}
 0xb35   :  { %s25900_s30 = scalar_lea.hbm %s26573_s7, 64 }
 0xb36   :  { %p25901_p11 = scmp.ne.s32.totalorder %s26573_s7, %s25900_s30  ;;  %p25904_p12 = scmp.lt.u32.totalorder %s25900_s30, %s26573_s7 }
 0xb38   :  { %p25906_p13 = pnand %p25904_p12, %p25901_p11 }
 0xb3a   :  { %25909 = shalt.err (!%p25906_p13)
}
 0xb3b   :  { %19104 = dma.vmem_to_hbm [thread:$0]  %s19102_s15, 64, %s26573_s7, [#allocation4]  }
 0xb3c   :  { %25918 = dma.done.wait [#allocation4], 64  }
 0xb3d   :  { %25919 = vsyncadd [#allocation4], 4294967232 }
 0xb3e   :  { %19108 = vsyncpa [#allocation3], 1 }
 0xb3f   :  { %19109 = vsyncpa [#allocation6], 1 }
 0xb40   :  { %19110 = vsyncpa [#allocation9], 1 }
 0xb41   :  { %19111 = vsyncpa [#allocation12], 1 }
 0xb42   :  { %19112 = vsyncpa [#allocation4], 1 }

</bundles_post_ra>
